<compile_context>
chip_gen: v5e
topology: v5e:2x2
jax: 0.10.0
libtpu: 0.0.40
codegen_flags: <defaults>
</compile_context>

<pallas_src>
import functools

import jax
import jax.numpy as jnp
from jax import lax
from jax.experimental import pallas as pl
from jax.experimental.pallas import tpu as pltpu


# ---------------------------------------------------------------------------
# One fused kernel per batch tile: conv3x3(pad=1)+bias+ReLU+maxpool2x2 (twice),
# then fc1+ReLU+fc2.  Everything in between stays in VMEM / vregs.
# ---------------------------------------------------------------------------
def fused_cnn_kernel(x_ref, w1_ref, b1_ref, w2_ref, b2_ref,
                     fc1w_ref, fc1b_ref, fc2w_ref, fc2b_ref,
                     o_ref, pad1_ref, pad2_ref, *, H, W, C0, C1, C2):
    TB = x_ref.shape[0]

    def conv3x3_relu_pool(pad_ref, x, w_ref, b_ref, h, w, cin, cout):
        # pad=1 halo in VMEM scratch: zero it, store the interior once.
        # (Re-zeroed every step so megacore grid sharding stays correct.)
        pad_ref[...] = jnp.zeros(pad_ref.shape, pad_ref.dtype)
        pad_ref[:, 1:h + 1, 1:w + 1, :] = x
        # 3x3 conv as nine accumulated dots -- no im2col buffer materialized.
        acc = jnp.zeros((TB * h * w, cout), jnp.float32)
        for t in range(9):
            dh, dw = divmod(t, 3)
            tap = pad_ref[:, dh:dh + h, dw:dw + w, :].reshape(TB * h * w, cin)
            acc = acc + jnp.dot(tap, w_ref[t], preferred_element_type=jnp.float32)
        act = jnp.maximum(acc + b_ref[...], 0.0)                     # bias + ReLU
        # 2x2 max pool, stride 2.  H via a size-2 leading axis (cheap), then W
        # via a small sublane-pair reduction (minor dim never changes).
        act = act.reshape(TB, h // 2, 2, w, cout)
        act = jnp.maximum(act[:, :, 0], act[:, :, 1])                # (TB, h/2, w, cout)
        act = act.reshape(TB, h // 2, w // 2, 2, cout)
        return jnp.max(act, axis=3)                                  # (TB, h/2, w/2, cout)

    a1 = conv3x3_relu_pool(pad1_ref, x_ref[...], w1_ref, b1_ref, H, W, C0, C1)
    a2 = conv3x3_relu_pool(pad2_ref, a1, w2_ref, b2_ref, H // 2, W // 2, C1, C2)

    # fc1 over the NHWC feature map WITHOUT materializing the flatten: one
    # accumulated (TB, C2) @ (C2, 512) dot per spatial position, using the
    # pre-reshaped (h4*w4, C2, 512) weight.  Intermediate never leaves VMEM.
    h4, w4 = H // 4, W // 4
    D1 = fc1b_ref.shape[1]
    acc1 = jnp.zeros((TB, D1), jnp.float32)
    for hh in range(h4):
        for ww in range(w4):
            acc1 = acc1 + jnp.dot(a2[:, hh, ww, :], fc1w_ref[hh * w4 + ww],
                                  preferred_element_type=jnp.float32)
    hid = jnp.maximum(acc1 + fc1b_ref[...], 0.0)

    out = jnp.dot(hid, fc2w_ref[...], preferred_element_type=jnp.float32) + fc2b_ref[...]
    o_ref[...] = out.astype(o_ref.dtype)                             # lane-dense (TB, 128)


def _pick_batch_tile(B):
    # >= 2 grid steps whenever B >= 2 (v7x has 2 TensorCores); TB capped at 4
    # to keep per-step VMEM modest on v5e's 16 MiB scoped default.
    for tb in (4, 2, 1):
        if B % tb == 0 and B // tb >= 2:
            return tb
    return 1


def cnn_forward(x_nchw, prep, num_classes):
    B, C0, H, W = x_nchw.shape
    assert H % 4 == 0 and W % 4 == 0, "two 2x2 pools assume spatial dims % 4 == 0"
    C1 = prep["w1"].shape[2]
    C2 = prep["w2"].shape[2]
    D1 = prep["fc1_b"].shape[1]
    NCP = prep["fc2_w"].shape[1]
    assert prep["fc1_w"].shape == ((H // 4) * (W // 4), C2, D1)

    x = jnp.transpose(x_nchw, (0, 2, 3, 1))                          # NCHW -> NHWC once
    TB = _pick_batch_tile(B)
    G = B // TB

    flops = 2 * B * (H * W * 9 * C0 * C1
                     + (H // 2) * (W // 2) * 9 * C1 * C2
                     + (H // 4) * (W // 4) * C2 * D1
                     + D1 * NCP)
    bytes_accessed = 4 * (x.size + prep["w1"].size + prep["w2"].size
                          + prep["fc1_w"].size + prep["fc2_w"].size + B * NCP)

    kern = functools.partial(fused_cnn_kernel, H=H, W=W, C0=C0, C1=C1, C2=C2)
    out = pl.pallas_call(
        kern,
        out_shape=jax.ShapeDtypeStruct((G, TB, NCP), jnp.float32),
        grid=(G,),
        in_specs=[
            pl.BlockSpec((TB, H, W, C0), lambda b: (b, 0, 0, 0)),          # x tile
            pl.BlockSpec((9, C0, C1), lambda b: (0, 0, 0)),                # conv1 w
            pl.BlockSpec((1, C1), lambda b: (0, 0)),                       # conv1 b
            pl.BlockSpec((9, C1, C2), lambda b: (0, 0, 0)),                # conv2 w
            pl.BlockSpec((1, C2), lambda b: (0, 0)),                       # conv2 b
            pl.BlockSpec(((H // 4) * (W // 4), C2, D1), lambda b: (0, 0, 0)),  # fc1 w
            pl.BlockSpec((1, D1), lambda b: (0, 0)),                       # fc1 b
            pl.BlockSpec((D1, NCP), lambda b: (0, 0)),                     # fc2 w (padded)
            pl.BlockSpec((1, NCP), lambda b: (0, 0)),                      # fc2 b (padded)
        ],
        out_specs=pl.BlockSpec((None, TB, NCP), lambda b: (b, 0, 0)),
        scratch_shapes=[
            pltpu.VMEM((TB, H + 2, W + 2, C0), jnp.float32),               # conv1 halo
            pltpu.VMEM((TB, H // 2 + 2, W // 2 + 2, C1), jnp.float32),     # conv2 halo
        ],
        compiler_params=pltpu.CompilerParams(dimension_semantics=("parallel",)),
        cost_estimate=pl.CostEstimate(flops=flops, transcendentals=0,
                                      bytes_accessed=bytes_accessed),
    )(x, prep["w1"], prep["b1"], prep["w2"], prep["b2"],
      prep["fc1_w"], prep["fc1_b"], prep["fc2_w"], prep["fc2_b"])
    return out.reshape(B, NCP)[:, :num_classes]                      # drop lane padding


# ---------------------------------------------------------------------------
# Parameter preparation (done once, outside the hot path):
#  * conv weights HWIO -> (9, Cin, Cout) matching the 9-tap accumulation order
#  * fc1_w rearranged from NCHW-flatten rows to a (h4*w4, C2, 512) per-pixel form
#  * fc2 padded to a multiple of 128 output columns (lane-dense store)
# ---------------------------------------------------------------------------
def prepare_params(params, H, W, num_classes):
    h4, w4 = H // 4, W // 4
    c2 = params["w2"].shape[3]
    d1 = params["fc1_w"].shape[1]
    ncp = ((num_classes + 127) // 128) * 128
    fc1_w = params["fc1_w"]                                          # (c2*h4*w4, d1) NCHW rows
    fc1_w_px = (fc1_w.reshape(c2, h4, w4, d1)
                .transpose(1, 2, 0, 3)
                .reshape(h4 * w4, c2, d1))
    return {
        "w1": params["w1"].reshape(9, params["w1"].shape[2], params["w1"].shape[3]),
        "b1": params["b1"].reshape(1, -1),
        "w2": params["w2"].reshape(9, params["w2"].shape[2], params["w2"].shape[3]),
        "b2": params["b2"].reshape(1, -1),
        "fc1_w": fc1_w_px,
        "fc1_b": params["fc1_b"].reshape(1, -1),
        "fc2_w": jnp.pad(params["fc2_w"], ((0, 0), (0, ncp - num_classes))),
        "fc2_b": jnp.pad(params["fc2_b"], (0, ncp - num_classes)).reshape(1, ncp),
    }


# ---------------------------------------------------------------------------
# Pure-JAX reference for correctness checking (mirrors the PyTorch forward).
# ---------------------------------------------------------------------------
def cnn_reference(x_nchw, params):
    def conv_block(x, w, b):
        y = lax.conv_general_dilated(
            x, w, window_strides=(1, 1), padding=((1, 1), (1, 1)),
            dimension_numbers=("NCHW", "HWIO", "NCHW"))
        y = jnp.maximum(y + b[None, :, None, None], 0.0)
        return lax.reduce_window(y, -jnp.inf, lax.max,
                                 (1, 1, 2, 2), (1, 1, 2, 2), "VALID")
    x = conv_block(x_nchw, params["w1"], params["b1"])
    x = conv_block(x, params["w2"], params["b2"])
    x = x.reshape(x.shape[0], -1)
    x = jnp.maximum(x @ params["fc1_w"] + params["fc1_b"], 0.0)
    return x @ params["fc2_w"] + params["fc2_b"]


def init_params(key, num_classes, H, W):
    ks = jax.random.split(key, 8)
    flat = 64 * (H // 4) * (W // 4)   # channels after conv2 = 64, spatial /4
    s = 0.05
    return {
        "w1": s * jax.random.normal(ks[0], (3, 3, 64, 32), jnp.float32),
        "b1": s * jax.random.normal(ks[1], (32,), jnp.float32),
        "w2": s * jax.random.normal(ks[2], (3, 3, 32, 64), jnp.float32),
        "b2": s * jax.random.normal(ks[3], (64,), jnp.float32),
        "fc1_w": s * jax.random.normal(ks[4], (flat, 512), jnp.float32),
        "fc1_b": s * jax.random.normal(ks[5], (512,), jnp.float32),
        "fc2_w": s * jax.random.normal(ks[6], (512, num_classes), jnp.float32),
        "fc2_b": s * jax.random.normal(ks[7], (num_classes,), jnp.float32),
    }


if __name__ == "__main__":
    B, C, H, W = 2, 64, 16, 16      # conv1 expects 64 input channels
    num_classes = 10

    key = jax.random.PRNGKey(0)
    kx, kp = jax.random.split(key)
    x = jax.random.normal(kx, (B, C, H, W), jnp.float32)
    params = init_params(kp, num_classes, H, W)
    prep = prepare_params(params, H, W, num_classes)          # once, off hot path

    out = jax.block_until_ready(cnn_forward(x, prep, num_classes))
    ref = jax.block_until_ready(cnn_reference(x, params))

    assert out.shape == (B, num_classes), out.shape
    assert jnp.allclose(out, ref, atol=1e-3, rtol=1e-3), \
        float(jnp.max(jnp.abs(out - ref)))

    print("KERNEL_OK")
</pallas_src>

<mosaic_0001>
module attributes {stable_mosaic.version = 11 : i64} {
  func.func @fused_cnn_kernel(%arg0: i32, %arg1: memref<1x16x16x64xf32, #tpu.memory_space<vmem>>, %arg2: memref<9x64x32xf32, #tpu.memory_space<vmem>>, %arg3: memref<1x32xf32, #tpu.memory_space<vmem>>, %arg4: memref<9x32x64xf32, #tpu.memory_space<vmem>>, %arg5: memref<1x64xf32, #tpu.memory_space<vmem>>, %arg6: memref<16x64x512xf32, #tpu.memory_space<vmem>>, %arg7: memref<1x512xf32, #tpu.memory_space<vmem>>, %arg8: memref<512x128xf32, #tpu.memory_space<vmem>>, %arg9: memref<1x128xf32, #tpu.memory_space<vmem>>, %arg10: memref<1x1x128xf32, #tpu.memory_space<vmem>>, %arg11: memref<1x18x18x64xf32, #tpu.memory_space<vmem>>, %arg12: memref<1x10x10x32xf32, #tpu.memory_space<vmem>>) attributes {dimension_semantics = [#tpu.dimension_semantics<parallel>], iteration_bounds = array<i64: 2>, scalar_prefetch = 0 : i64, scratch_operands = 2 : i64, tpu.core_type = #tpu.core_type<tc>, window_params = [{transform_indices = @transform_0, window_bounds = array<i64: 1, 16, 16, 64>}, {pipeline_mode = #tpu.pipeline_mode<synchronous>, transform_indices = @transform_1, window_bounds = array<i64: 9, 64, 32>}, {pipeline_mode = #tpu.pipeline_mode<synchronous>, transform_indices = @transform_2, window_bounds = array<i64: 1, 32>}, {pipeline_mode = #tpu.pipeline_mode<synchronous>, transform_indices = @transform_3, window_bounds = array<i64: 9, 32, 64>}, {pipeline_mode = #tpu.pipeline_mode<synchronous>, transform_indices = @transform_4, window_bounds = array<i64: 1, 64>}, {pipeline_mode = #tpu.pipeline_mode<synchronous>, transform_indices = @transform_5, window_bounds = array<i64: 16, 64, 512>}, {pipeline_mode = #tpu.pipeline_mode<synchronous>, transform_indices = @transform_6, window_bounds = array<i64: 1, 512>}, {pipeline_mode = #tpu.pipeline_mode<synchronous>, transform_indices = @transform_7, window_bounds = array<i64: 512, 128>}, {pipeline_mode = #tpu.pipeline_mode<synchronous>, transform_indices = @transform_8, window_bounds = array<i64: 1, 128>}, {transform_indices = @transform_9, window_bounds = array<i64: 1, 1, 128>}]} {
    %c0 = arith.constant 0 : index
    %c0_0 = arith.constant 0 : index
    %c0_1 = arith.constant 0 : index
    %c0_2 = arith.constant 0 : index
    %0 = vector.load %arg1[%c0, %c0_0, %c0_1, %c0_2] : memref<1x16x16x64xf32, #tpu.memory_space<vmem>>, vector<1x16x16x64xf32>
    %cst = arith.constant 0.000000e+00 : f32
    %1 = vector.broadcast %cst : f32 to vector<1x18x18x64xf32>
    %c0_3 = arith.constant 0 : index
    %c0_4 = arith.constant 0 : index
    %c0_5 = arith.constant 0 : index
    %c0_6 = arith.constant 0 : index
    %2 = vector.load %arg11[%c0_3, %c0_4, %c0_5, %c0_6] : memref<1x18x18x64xf32, #tpu.memory_space<vmem>>, vector<1x18x18x64xf32>
    tpu.vector_store %arg11[%c0_3, %c0_4, %c0_5, %c0_6], %1 {strides = array<i32>} : memref<1x18x18x64xf32, #tpu.memory_space<vmem>>, vector<1x18x18x64xf32>,
    %c0_7 = arith.constant 0 : index
    %c1 = arith.constant 1 : index
    %c1_8 = arith.constant 1 : index
    %c0_9 = arith.constant 0 : index
    %3 = vector.load %arg11[%c0_7, %c1, %c1_8, %c0_9] : memref<1x18x18x64xf32, #tpu.memory_space<vmem>>, vector<1x16x16x64xf32>
    tpu.vector_store %arg11[%c0_7, %c1, %c1_8, %c0_9], %0 {strides = array<i32>} : memref<1x18x18x64xf32, #tpu.memory_space<vmem>>, vector<1x16x16x64xf32>,
    %cst_10 = arith.constant 0.000000e+00 : f32
    %4 = vector.broadcast %cst_10 : f32 to vector<256x32xf32>
    %c0_11 = arith.constant 0 : index
    %c0_12 = arith.constant 0 : index
    %c0_13 = arith.constant 0 : index
    %c0_14 = arith.constant 0 : index
    %5 = vector.load %arg11[%c0_11, %c0_12, %c0_13, %c0_14] : memref<1x18x18x64xf32, #tpu.memory_space<vmem>>, vector<1x16x16x64xf32>
    %6 = vector.shape_cast %5 : vector<1x16x16x64xf32> to vector<256x64xf32>
    %c0_15 = arith.constant 0 : index
    %c0_16 = arith.constant 0 : index
    %c0_17 = arith.constant 0 : index
    %7 = vector.load %arg2[%c0_15, %c0_16, %c0_17] : memref<9x64x32xf32, #tpu.memory_space<vmem>>, vector<1x64x32xf32>
    %8 = vector.shape_cast %7 : vector<1x64x32xf32> to vector<64x32xf32>
    %cst_18 = arith.constant dense<0.000000e+00> : vector<256x32xf32>
    %9 = tpu.matmul %6, %8, %cst_18 {dimension_numbers = #tpu.dot_dimension_numbers<[1], [0], [0], [1], [0, 0, 1, 1], [], []>} : vector<256x64xf32>, vector<64x32xf32>, vector<256x32xf32> -> vector<256x32xf32>
    %10 = arith.addf %4, %9 : vector<256x32xf32>
    %c0_19 = arith.constant 0 : index
    %c0_20 = arith.constant 0 : index
    %c1_21 = arith.constant 1 : index
    %c0_22 = arith.constant 0 : index
    %11 = vector.load %arg11[%c0_19, %c0_20, %c1_21, %c0_22] : memref<1x18x18x64xf32, #tpu.memory_space<vmem>>, vector<1x16x16x64xf32>
    %12 = vector.shape_cast %11 : vector<1x16x16x64xf32> to vector<256x64xf32>
    %c1_23 = arith.constant 1 : index
    %c0_24 = arith.constant 0 : index
    %c0_25 = arith.constant 0 : index
    %13 = vector.load %arg2[%c1_23, %c0_24, %c0_25] : memref<9x64x32xf32, #tpu.memory_space<vmem>>, vector<1x64x32xf32>
    %14 = vector.shape_cast %13 : vector<1x64x32xf32> to vector<64x32xf32>
    %cst_26 = arith.constant dense<0.000000e+00> : vector<256x32xf32>
    %15 = tpu.matmul %12, %14, %cst_26 {dimension_numbers = #tpu.dot_dimension_numbers<[1], [0], [0], [1], [0, 0, 1, 1], [], []>} : vector<256x64xf32>, vector<64x32xf32>, vector<256x32xf32> -> vector<256x32xf32>
    %16 = arith.addf %10, %15 : vector<256x32xf32>
    %c0_27 = arith.constant 0 : index
    %c0_28 = arith.constant 0 : index
    %c2 = arith.constant 2 : index
    %c0_29 = arith.constant 0 : index
    %17 = vector.load %arg11[%c0_27, %c0_28, %c2, %c0_29] : memref<1x18x18x64xf32, #tpu.memory_space<vmem>>, vector<1x16x16x64xf32>
    %18 = vector.shape_cast %17 : vector<1x16x16x64xf32> to vector<256x64xf32>
    %c2_30 = arith.constant 2 : index
    %c0_31 = arith.constant 0 : index
    %c0_32 = arith.constant 0 : index
    %19 = vector.load %arg2[%c2_30, %c0_31, %c0_32] : memref<9x64x32xf32, #tpu.memory_space<vmem>>, vector<1x64x32xf32>
    %20 = vector.shape_cast %19 : vector<1x64x32xf32> to vector<64x32xf32>
    %cst_33 = arith.constant dense<0.000000e+00> : vector<256x32xf32>
    %21 = tpu.matmul %18, %20, %cst_33 {dimension_numbers = #tpu.dot_dimension_numbers<[1], [0], [0], [1], [0, 0, 1, 1], [], []>} : vector<256x64xf32>, vector<64x32xf32>, vector<256x32xf32> -> vector<256x32xf32>
    %22 = arith.addf %16, %21 : vector<256x32xf32>
    %c0_34 = arith.constant 0 : index
    %c1_35 = arith.constant 1 : index
    %c0_36 = arith.constant 0 : index
    %c0_37 = arith.constant 0 : index
    %23 = vector.load %arg11[%c0_34, %c1_35, %c0_36, %c0_37] : memref<1x18x18x64xf32, #tpu.memory_space<vmem>>, vector<1x16x16x64xf32>
    %24 = vector.shape_cast %23 : vector<1x16x16x64xf32> to vector<256x64xf32>
    %c3 = arith.constant 3 : index
    %c0_38 = arith.constant 0 : index
    %c0_39 = arith.constant 0 : index
    %25 = vector.load %arg2[%c3, %c0_38, %c0_39] : memref<9x64x32xf32, #tpu.memory_space<vmem>>, vector<1x64x32xf32>
    %26 = vector.shape_cast %25 : vector<1x64x32xf32> to vector<64x32xf32>
    %cst_40 = arith.constant dense<0.000000e+00> : vector<256x32xf32>
    %27 = tpu.matmul %24, %26, %cst_40 {dimension_numbers = #tpu.dot_dimension_numbers<[1], [0], [0], [1], [0, 0, 1, 1], [], []>} : vector<256x64xf32>, vector<64x32xf32>, vector<256x32xf32> -> vector<256x32xf32>
    %28 = arith.addf %22, %27 : vector<256x32xf32>
    %c0_41 = arith.constant 0 : index
    %c1_42 = arith.constant 1 : index
    %c1_43 = arith.constant 1 : index
    %c0_44 = arith.constant 0 : index
    %29 = vector.load %arg11[%c0_41, %c1_42, %c1_43, %c0_44] : memref<1x18x18x64xf32, #tpu.memory_space<vmem>>, vector<1x16x16x64xf32>
    %30 = vector.shape_cast %29 : vector<1x16x16x64xf32> to vector<256x64xf32>
    %c4 = arith.constant 4 : index
    %c0_45 = arith.constant 0 : index
    %c0_46 = arith.constant 0 : index
    %31 = vector.load %arg2[%c4, %c0_45, %c0_46] : memref<9x64x32xf32, #tpu.memory_space<vmem>>, vector<1x64x32xf32>
    %32 = vector.shape_cast %31 : vector<1x64x32xf32> to vector<64x32xf32>
    %cst_47 = arith.constant dense<0.000000e+00> : vector<256x32xf32>
    %33 = tpu.matmul %30, %32, %cst_47 {dimension_numbers = #tpu.dot_dimension_numbers<[1], [0], [0], [1], [0, 0, 1, 1], [], []>} : vector<256x64xf32>, vector<64x32xf32>, vector<256x32xf32> -> vector<256x32xf32>
    %34 = arith.addf %28, %33 : vector<256x32xf32>
    %c0_48 = arith.constant 0 : index
    %c1_49 = arith.constant 1 : index
    %c2_50 = arith.constant 2 : index
    %c0_51 = arith.constant 0 : index
    %35 = vector.load %arg11[%c0_48, %c1_49, %c2_50, %c0_51] : memref<1x18x18x64xf32, #tpu.memory_space<vmem>>, vector<1x16x16x64xf32>
    %36 = vector.shape_cast %35 : vector<1x16x16x64xf32> to vector<256x64xf32>
    %c5 = arith.constant 5 : index
    %c0_52 = arith.constant 0 : index
    %c0_53 = arith.constant 0 : index
    %37 = vector.load %arg2[%c5, %c0_52, %c0_53] : memref<9x64x32xf32, #tpu.memory_space<vmem>>, vector<1x64x32xf32>
    %38 = vector.shape_cast %37 : vector<1x64x32xf32> to vector<64x32xf32>
    %cst_54 = arith.constant dense<0.000000e+00> : vector<256x32xf32>
    %39 = tpu.matmul %36, %38, %cst_54 {dimension_numbers = #tpu.dot_dimension_numbers<[1], [0], [0], [1], [0, 0, 1, 1], [], []>} : vector<256x64xf32>, vector<64x32xf32>, vector<256x32xf32> -> vector<256x32xf32>
    %40 = arith.addf %34, %39 : vector<256x32xf32>
    %c0_55 = arith.constant 0 : index
    %c2_56 = arith.constant 2 : index
    %c0_57 = arith.constant 0 : index
    %c0_58 = arith.constant 0 : index
    %41 = vector.load %arg11[%c0_55, %c2_56, %c0_57, %c0_58] : memref<1x18x18x64xf32, #tpu.memory_space<vmem>>, vector<1x16x16x64xf32>
    %42 = vector.shape_cast %41 : vector<1x16x16x64xf32> to vector<256x64xf32>
    %c6 = arith.constant 6 : index
    %c0_59 = arith.constant 0 : index
    %c0_60 = arith.constant 0 : index
    %43 = vector.load %arg2[%c6, %c0_59, %c0_60] : memref<9x64x32xf32, #tpu.memory_space<vmem>>, vector<1x64x32xf32>
    %44 = vector.shape_cast %43 : vector<1x64x32xf32> to vector<64x32xf32>
    %cst_61 = arith.constant dense<0.000000e+00> : vector<256x32xf32>
    %45 = tpu.matmul %42, %44, %cst_61 {dimension_numbers = #tpu.dot_dimension_numbers<[1], [0], [0], [1], [0, 0, 1, 1], [], []>} : vector<256x64xf32>, vector<64x32xf32>, vector<256x32xf32> -> vector<256x32xf32>
    %46 = arith.addf %40, %45 : vector<256x32xf32>
    %c0_62 = arith.constant 0 : index
    %c2_63 = arith.constant 2 : index
    %c1_64 = arith.constant 1 : index
    %c0_65 = arith.constant 0 : index
    %47 = vector.load %arg11[%c0_62, %c2_63, %c1_64, %c0_65] : memref<1x18x18x64xf32, #tpu.memory_space<vmem>>, vector<1x16x16x64xf32>
    %48 = vector.shape_cast %47 : vector<1x16x16x64xf32> to vector<256x64xf32>
    %c7 = arith.constant 7 : index
    %c0_66 = arith.constant 0 : index
    %c0_67 = arith.constant 0 : index
    %49 = vector.load %arg2[%c7, %c0_66, %c0_67] : memref<9x64x32xf32, #tpu.memory_space<vmem>>, vector<1x64x32xf32>
    %50 = vector.shape_cast %49 : vector<1x64x32xf32> to vector<64x32xf32>
    %cst_68 = arith.constant dense<0.000000e+00> : vector<256x32xf32>
    %51 = tpu.matmul %48, %50, %cst_68 {dimension_numbers = #tpu.dot_dimension_numbers<[1], [0], [0], [1], [0, 0, 1, 1], [], []>} : vector<256x64xf32>, vector<64x32xf32>, vector<256x32xf32> -> vector<256x32xf32>
    %52 = arith.addf %46, %51 : vector<256x32xf32>
    %c0_69 = arith.constant 0 : index
    %c2_70 = arith.constant 2 : index
    %c2_71 = arith.constant 2 : index
    %c0_72 = arith.constant 0 : index
    %53 = vector.load %arg11[%c0_69, %c2_70, %c2_71, %c0_72] : memref<1x18x18x64xf32, #tpu.memory_space<vmem>>, vector<1x16x16x64xf32>
    %54 = vector.shape_cast %53 : vector<1x16x16x64xf32> to vector<256x64xf32>
    %c8 = arith.constant 8 : index
    %c0_73 = arith.constant 0 : index
    %c0_74 = arith.constant 0 : index
    %55 = vector.load %arg2[%c8, %c0_73, %c0_74] : memref<9x64x32xf32, #tpu.memory_space<vmem>>, vector<1x64x32xf32>
    %56 = vector.shape_cast %55 : vector<1x64x32xf32> to vector<64x32xf32>
    %cst_75 = arith.constant dense<0.000000e+00> : vector<256x32xf32>
    %57 = tpu.matmul %54, %56, %cst_75 {dimension_numbers = #tpu.dot_dimension_numbers<[1], [0], [0], [1], [0, 0, 1, 1], [], []>} : vector<256x64xf32>, vector<64x32xf32>, vector<256x32xf32> -> vector<256x32xf32>
    %58 = arith.addf %52, %57 : vector<256x32xf32>
    %c0_76 = arith.constant 0 : index
    %c0_77 = arith.constant 0 : index
    %59 = vector.load %arg3[%c0_76, %c0_77] : memref<1x32xf32, #tpu.memory_space<vmem>>, vector<1x32xf32>
    %60 = vector.broadcast %59 : vector<1x32xf32> to vector<256x32xf32>
    %61 = arith.addf %58, %60 : vector<256x32xf32>
    %cst_78 = arith.constant 0.000000e+00 : f32
    %62 = vector.broadcast %cst_78 : f32 to vector<256x32xf32>
    %63 = arith.maximumf %61, %62 : vector<256x32xf32>
    %64 = vector.shape_cast %63 : vector<256x32xf32> to vector<1x8x2x16x32xf32>
    %65 = vector.extract_strided_slice %64 {offsets = [0, 0, 0, 0, 0], sizes = [1, 8, 1, 16, 32], strides = [1, 1, 1, 1, 1]} : vector<1x8x2x16x32xf32> to vector<1x8x1x16x32xf32>
    %66 = vector.shape_cast %65 : vector<1x8x1x16x32xf32> to vector<1x8x16x32xf32>
    %67 = vector.extract_strided_slice %64 {offsets = [0, 0, 1, 0, 0], sizes = [1, 8, 1, 16, 32], strides = [1, 1, 1, 1, 1]} : vector<1x8x2x16x32xf32> to vector<1x8x1x16x32xf32>
    %68 = vector.shape_cast %67 : vector<1x8x1x16x32xf32> to vector<1x8x16x32xf32>
    %69 = arith.maximumf %66, %68 : vector<1x8x16x32xf32>
    %70 = vector.shape_cast %69 : vector<1x8x16x32xf32> to vector<1x8x8x2x32xf32>
    %cst_79 = arith.constant dense<0xFF800000> : vector<1x8x8x32xf32>
    %71 = vector.multi_reduction <maximumf>, %70, %cst_79 [3] : vector<1x8x8x2x32xf32> to vector<1x8x8x32xf32>
    %cst_80 = arith.constant 0.000000e+00 : f32
    %72 = vector.broadcast %cst_80 : f32 to vector<1x10x10x32xf32>
    %c0_81 = arith.constant 0 : index
    %c0_82 = arith.constant 0 : index
    %c0_83 = arith.constant 0 : index
    %c0_84 = arith.constant 0 : index
    %73 = vector.load %arg12[%c0_81, %c0_82, %c0_83, %c0_84] : memref<1x10x10x32xf32, #tpu.memory_space<vmem>>, vector<1x10x10x32xf32>
    tpu.vector_store %arg12[%c0_81, %c0_82, %c0_83, %c0_84], %72 {strides = array<i32>} : memref<1x10x10x32xf32, #tpu.memory_space<vmem>>, vector<1x10x10x32xf32>,
    %c0_85 = arith.constant 0 : index
    %c1_86 = arith.constant 1 : index
    %c1_87 = arith.constant 1 : index
    %c0_88 = arith.constant 0 : index
    %74 = vector.load %arg12[%c0_85, %c1_86, %c1_87, %c0_88] : memref<1x10x10x32xf32, #tpu.memory_space<vmem>>, vector<1x8x8x32xf32>
    tpu.vector_store %arg12[%c0_85, %c1_86, %c1_87, %c0_88], %71 {strides = array<i32>} : memref<1x10x10x32xf32, #tpu.memory_space<vmem>>, vector<1x8x8x32xf32>,
    %cst_89 = arith.constant 0.000000e+00 : f32
    %75 = vector.broadcast %cst_89 : f32 to vector<64x64xf32>
    %c0_90 = arith.constant 0 : index
    %c0_91 = arith.constant 0 : index
    %c0_92 = arith.constant 0 : index
    %c0_93 = arith.constant 0 : index
    %76 = vector.load %arg12[%c0_90, %c0_91, %c0_92, %c0_93] : memref<1x10x10x32xf32, #tpu.memory_space<vmem>>, vector<1x8x8x32xf32>
    %77 = vector.shape_cast %76 : vector<1x8x8x32xf32> to vector<64x32xf32>
    %c0_94 = arith.constant 0 : index
    %c0_95 = arith.constant 0 : index
    %c0_96 = arith.constant 0 : index
    %78 = vector.load %arg4[%c0_94, %c0_95, %c0_96] : memref<9x32x64xf32, #tpu.memory_space<vmem>>, vector<1x32x64xf32>
    %79 = vector.shape_cast %78 : vector<1x32x64xf32> to vector<32x64xf32>
    %cst_97 = arith.constant dense<0.000000e+00> : vector<64x64xf32>
    %80 = tpu.matmul %77, %79, %cst_97 {dimension_numbers = #tpu.dot_dimension_numbers<[1], [0], [0], [1], [0, 0, 1, 1], [], []>} : vector<64x32xf32>, vector<32x64xf32>, vector<64x64xf32> -> vector<64x64xf32>
    %81 = arith.addf %75, %80 : vector<64x64xf32>
    %c0_98 = arith.constant 0 : index
    %c0_99 = arith.constant 0 : index
    %c1_100 = arith.constant 1 : index
    %c0_101 = arith.constant 0 : index
    %82 = vector.load %arg12[%c0_98, %c0_99, %c1_100, %c0_101] : memref<1x10x10x32xf32, #tpu.memory_space<vmem>>, vector<1x8x8x32xf32>
    %83 = vector.shape_cast %82 : vector<1x8x8x32xf32> to vector<64x32xf32>
    %c1_102 = arith.constant 1 : index
    %c0_103 = arith.constant 0 : index
    %c0_104 = arith.constant 0 : index
    %84 = vector.load %arg4[%c1_102, %c0_103, %c0_104] : memref<9x32x64xf32, #tpu.memory_space<vmem>>, vector<1x32x64xf32>
    %85 = vector.shape_cast %84 : vector<1x32x64xf32> to vector<32x64xf32>
    %cst_105 = arith.constant dense<0.000000e+00> : vector<64x64xf32>
    %86 = tpu.matmul %83, %85, %cst_105 {dimension_numbers = #tpu.dot_dimension_numbers<[1], [0], [0], [1], [0, 0, 1, 1], [], []>} : vector<64x32xf32>, vector<32x64xf32>, vector<64x64xf32> -> vector<64x64xf32>
    %87 = arith.addf %81, %86 : vector<64x64xf32>
    %c0_106 = arith.constant 0 : index
    %c0_107 = arith.constant 0 : index
    %c2_108 = arith.constant 2 : index
    %c0_109 = arith.constant 0 : index
    %88 = vector.load %arg12[%c0_106, %c0_107, %c2_108, %c0_109] : memref<1x10x10x32xf32, #tpu.memory_space<vmem>>, vector<1x8x8x32xf32>
    %89 = vector.shape_cast %88 : vector<1x8x8x32xf32> to vector<64x32xf32>
    %c2_110 = arith.constant 2 : index
    %c0_111 = arith.constant 0 : index
    %c0_112 = arith.constant 0 : index
    %90 = vector.load %arg4[%c2_110, %c0_111, %c0_112] : memref<9x32x64xf32, #tpu.memory_space<vmem>>, vector<1x32x64xf32>
    %91 = vector.shape_cast %90 : vector<1x32x64xf32> to vector<32x64xf32>
    %cst_113 = arith.constant dense<0.000000e+00> : vector<64x64xf32>
    %92 = tpu.matmul %89, %91, %cst_113 {dimension_numbers = #tpu.dot_dimension_numbers<[1], [0], [0], [1], [0, 0, 1, 1], [], []>} : vector<64x32xf32>, vector<32x64xf32>, vector<64x64xf32> -> vector<64x64xf32>
    %93 = arith.addf %87, %92 : vector<64x64xf32>
    %c0_114 = arith.constant 0 : index
    %c1_115 = arith.constant 1 : index
    %c0_116 = arith.constant 0 : index
    %c0_117 = arith.constant 0 : index
    %94 = vector.load %arg12[%c0_114, %c1_115, %c0_116, %c0_117] : memref<1x10x10x32xf32, #tpu.memory_space<vmem>>, vector<1x8x8x32xf32>
    %95 = vector.shape_cast %94 : vector<1x8x8x32xf32> to vector<64x32xf32>
    %c3_118 = arith.constant 3 : index
    %c0_119 = arith.constant 0 : index
    %c0_120 = arith.constant 0 : index
    %96 = vector.load %arg4[%c3_118, %c0_119, %c0_120] : memref<9x32x64xf32, #tpu.memory_space<vmem>>, vector<1x32x64xf32>
    %97 = vector.shape_cast %96 : vector<1x32x64xf32> to vector<32x64xf32>
    %cst_121 = arith.constant dense<0.000000e+00> : vector<64x64xf32>
    %98 = tpu.matmul %95, %97, %cst_121 {dimension_numbers = #tpu.dot_dimension_numbers<[1], [0], [0], [1], [0, 0, 1, 1], [], []>} : vector<64x32xf32>, vector<32x64xf32>, vector<64x64xf32> -> vector<64x64xf32>
    %99 = arith.addf %93, %98 : vector<64x64xf32>
    %c0_122 = arith.constant 0 : index
    %c1_123 = arith.constant 1 : index
    %c1_124 = arith.constant 1 : index
    %c0_125 = arith.constant 0 : index
    %100 = vector.load %arg12[%c0_122, %c1_123, %c1_124, %c0_125] : memref<1x10x10x32xf32, #tpu.memory_space<vmem>>, vector<1x8x8x32xf32>
    %101 = vector.shape_cast %100 : vector<1x8x8x32xf32> to vector<64x32xf32>
    %c4_126 = arith.constant 4 : index
    %c0_127 = arith.constant 0 : index
    %c0_128 = arith.constant 0 : index
    %102 = vector.load %arg4[%c4_126, %c0_127, %c0_128] : memref<9x32x64xf32, #tpu.memory_space<vmem>>, vector<1x32x64xf32>
    %103 = vector.shape_cast %102 : vector<1x32x64xf32> to vector<32x64xf32>
    %cst_129 = arith.constant dense<0.000000e+00> : vector<64x64xf32>
    %104 = tpu.matmul %101, %103, %cst_129 {dimension_numbers = #tpu.dot_dimension_numbers<[1], [0], [0], [1], [0, 0, 1, 1], [], []>} : vector<64x32xf32>, vector<32x64xf32>, vector<64x64xf32> -> vector<64x64xf32>
    %105 = arith.addf %99, %104 : vector<64x64xf32>
    %c0_130 = arith.constant 0 : index
    %c1_131 = arith.constant 1 : index
    %c2_132 = arith.constant 2 : index
    %c0_133 = arith.constant 0 : index
    %106 = vector.load %arg12[%c0_130, %c1_131, %c2_132, %c0_133] : memref<1x10x10x32xf32, #tpu.memory_space<vmem>>, vector<1x8x8x32xf32>
    %107 = vector.shape_cast %106 : vector<1x8x8x32xf32> to vector<64x32xf32>
    %c5_134 = arith.constant 5 : index
    %c0_135 = arith.constant 0 : index
    %c0_136 = arith.constant 0 : index
    %108 = vector.load %arg4[%c5_134, %c0_135, %c0_136] : memref<9x32x64xf32, #tpu.memory_space<vmem>>, vector<1x32x64xf32>
    %109 = vector.shape_cast %108 : vector<1x32x64xf32> to vector<32x64xf32>
    %cst_137 = arith.constant dense<0.000000e+00> : vector<64x64xf32>
    %110 = tpu.matmul %107, %109, %cst_137 {dimension_numbers = #tpu.dot_dimension_numbers<[1], [0], [0], [1], [0, 0, 1, 1], [], []>} : vector<64x32xf32>, vector<32x64xf32>, vector<64x64xf32> -> vector<64x64xf32>
    %111 = arith.addf %105, %110 : vector<64x64xf32>
    %c0_138 = arith.constant 0 : index
    %c2_139 = arith.constant 2 : index
    %c0_140 = arith.constant 0 : index
    %c0_141 = arith.constant 0 : index
    %112 = vector.load %arg12[%c0_138, %c2_139, %c0_140, %c0_141] : memref<1x10x10x32xf32, #tpu.memory_space<vmem>>, vector<1x8x8x32xf32>
    %113 = vector.shape_cast %112 : vector<1x8x8x32xf32> to vector<64x32xf32>
    %c6_142 = arith.constant 6 : index
    %c0_143 = arith.constant 0 : index
    %c0_144 = arith.constant 0 : index
    %114 = vector.load %arg4[%c6_142, %c0_143, %c0_144] : memref<9x32x64xf32, #tpu.memory_space<vmem>>, vector<1x32x64xf32>
    %115 = vector.shape_cast %114 : vector<1x32x64xf32> to vector<32x64xf32>
    %cst_145 = arith.constant dense<0.000000e+00> : vector<64x64xf32>
    %116 = tpu.matmul %113, %115, %cst_145 {dimension_numbers = #tpu.dot_dimension_numbers<[1], [0], [0], [1], [0, 0, 1, 1], [], []>} : vector<64x32xf32>, vector<32x64xf32>, vector<64x64xf32> -> vector<64x64xf32>
    %117 = arith.addf %111, %116 : vector<64x64xf32>
    %c0_146 = arith.constant 0 : index
    %c2_147 = arith.constant 2 : index
    %c1_148 = arith.constant 1 : index
    %c0_149 = arith.constant 0 : index
    %118 = vector.load %arg12[%c0_146, %c2_147, %c1_148, %c0_149] : memref<1x10x10x32xf32, #tpu.memory_space<vmem>>, vector<1x8x8x32xf32>
    %119 = vector.shape_cast %118 : vector<1x8x8x32xf32> to vector<64x32xf32>
    %c7_150 = arith.constant 7 : index
    %c0_151 = arith.constant 0 : index
    %c0_152 = arith.constant 0 : index
    %120 = vector.load %arg4[%c7_150, %c0_151, %c0_152] : memref<9x32x64xf32, #tpu.memory_space<vmem>>, vector<1x32x64xf32>
    %121 = vector.shape_cast %120 : vector<1x32x64xf32> to vector<32x64xf32>
    %cst_153 = arith.constant dense<0.000000e+00> : vector<64x64xf32>
    %122 = tpu.matmul %119, %121, %cst_153 {dimension_numbers = #tpu.dot_dimension_numbers<[1], [0], [0], [1], [0, 0, 1, 1], [], []>} : vector<64x32xf32>, vector<32x64xf32>, vector<64x64xf32> -> vector<64x64xf32>
    %123 = arith.addf %117, %122 : vector<64x64xf32>
    %c0_154 = arith.constant 0 : index
    %c2_155 = arith.constant 2 : index
    %c2_156 = arith.constant 2 : index
    %c0_157 = arith.constant 0 : index
    %124 = vector.load %arg12[%c0_154, %c2_155, %c2_156, %c0_157] : memref<1x10x10x32xf32, #tpu.memory_space<vmem>>, vector<1x8x8x32xf32>
    %125 = vector.shape_cast %124 : vector<1x8x8x32xf32> to vector<64x32xf32>
    %c8_158 = arith.constant 8 : index
    %c0_159 = arith.constant 0 : index
    %c0_160 = arith.constant 0 : index
    %126 = vector.load %arg4[%c8_158, %c0_159, %c0_160] : memref<9x32x64xf32, #tpu.memory_space<vmem>>, vector<1x32x64xf32>
    %127 = vector.shape_cast %126 : vector<1x32x64xf32> to vector<32x64xf32>
    %cst_161 = arith.constant dense<0.000000e+00> : vector<64x64xf32>
    %128 = tpu.matmul %125, %127, %cst_161 {dimension_numbers = #tpu.dot_dimension_numbers<[1], [0], [0], [1], [0, 0, 1, 1], [], []>} : vector<64x32xf32>, vector<32x64xf32>, vector<64x64xf32> -> vector<64x64xf32>
    %129 = arith.addf %123, %128 : vector<64x64xf32>
    %c0_162 = arith.constant 0 : index
    %c0_163 = arith.constant 0 : index
    %130 = vector.load %arg5[%c0_162, %c0_163] : memref<1x64xf32, #tpu.memory_space<vmem>>, vector<1x64xf32>
    %131 = vector.broadcast %130 : vector<1x64xf32> to vector<64x64xf32>
    %132 = arith.addf %129, %131 : vector<64x64xf32>
    %cst_164 = arith.constant 0.000000e+00 : f32
    %133 = vector.broadcast %cst_164 : f32 to vector<64x64xf32>
    %134 = arith.maximumf %132, %133 : vector<64x64xf32>
    %135 = vector.shape_cast %134 : vector<64x64xf32> to vector<1x4x2x8x64xf32>
    %136 = vector.extract_strided_slice %135 {offsets = [0, 0, 0, 0, 0], sizes = [1, 4, 1, 8, 64], strides = [1, 1, 1, 1, 1]} : vector<1x4x2x8x64xf32> to vector<1x4x1x8x64xf32>
    %137 = vector.shape_cast %136 : vector<1x4x1x8x64xf32> to vector<1x4x8x64xf32>
    %138 = vector.extract_strided_slice %135 {offsets = [0, 0, 1, 0, 0], sizes = [1, 4, 1, 8, 64], strides = [1, 1, 1, 1, 1]} : vector<1x4x2x8x64xf32> to vector<1x4x1x8x64xf32>
    %139 = vector.shape_cast %138 : vector<1x4x1x8x64xf32> to vector<1x4x8x64xf32>
    %140 = arith.maximumf %137, %139 : vector<1x4x8x64xf32>
    %141 = vector.shape_cast %140 : vector<1x4x8x64xf32> to vector<1x4x4x2x64xf32>
    %cst_165 = arith.constant dense<0xFF800000> : vector<1x4x4x64xf32>
    %142 = vector.multi_reduction <maximumf>, %141, %cst_165 [3] : vector<1x4x4x2x64xf32> to vector<1x4x4x64xf32>
    %cst_166 = arith.constant 0.000000e+00 : f32
    %143 = vector.broadcast %cst_166 : f32 to vector<1x512xf32>
    %144 = vector.extract_strided_slice %142 {offsets = [0, 0, 0, 0], sizes = [1, 1, 1, 64], strides = [1, 1, 1, 1]} : vector<1x4x4x64xf32> to vector<1x1x1x64xf32>
    %145 = vector.shape_cast %144 : vector<1x1x1x64xf32> to vector<1x64xf32>
    %c0_167 = arith.constant 0 : index
    %c0_168 = arith.constant 0 : index
    %c0_169 = arith.constant 0 : index
    %146 = vector.load %arg6[%c0_167, %c0_168, %c0_169] : memref<16x64x512xf32, #tpu.memory_space<vmem>>, vector<1x64x512xf32>
    %147 = vector.shape_cast %146 : vector<1x64x512xf32> to vector<64x512xf32>
    %cst_170 = arith.constant dense<0.000000e+00> : vector<1x512xf32>
    %148 = tpu.matmul %145, %147, %cst_170 {dimension_numbers = #tpu.dot_dimension_numbers<[1], [0], [0], [1], [0, 0, 1, 1], [], []>} : vector<1x64xf32>, vector<64x512xf32>, vector<1x512xf32> -> vector<1x512xf32>
    %149 = arith.addf %143, %148 : vector<1x512xf32>
    %150 = vector.extract_strided_slice %142 {offsets = [0, 0, 1, 0], sizes = [1, 1, 1, 64], strides = [1, 1, 1, 1]} : vector<1x4x4x64xf32> to vector<1x1x1x64xf32>
    %151 = vector.shape_cast %150 : vector<1x1x1x64xf32> to vector<1x64xf32>
    %c1_171 = arith.constant 1 : index
    %c0_172 = arith.constant 0 : index
    %c0_173 = arith.constant 0 : index
    %152 = vector.load %arg6[%c1_171, %c0_172, %c0_173] : memref<16x64x512xf32, #tpu.memory_space<vmem>>, vector<1x64x512xf32>
    %153 = vector.shape_cast %152 : vector<1x64x512xf32> to vector<64x512xf32>
    %cst_174 = arith.constant dense<0.000000e+00> : vector<1x512xf32>
    %154 = tpu.matmul %151, %153, %cst_174 {dimension_numbers = #tpu.dot_dimension_numbers<[1], [0], [0], [1], [0, 0, 1, 1], [], []>} : vector<1x64xf32>, vector<64x512xf32>, vector<1x512xf32> -> vector<1x512xf32>
    %155 = arith.addf %149, %154 : vector<1x512xf32>
    %156 = vector.extract_strided_slice %142 {offsets = [0, 0, 2, 0], sizes = [1, 1, 1, 64], strides = [1, 1, 1, 1]} : vector<1x4x4x64xf32> to vector<1x1x1x64xf32>
    %157 = vector.shape_cast %156 : vector<1x1x1x64xf32> to vector<1x64xf32>
    %c2_175 = arith.constant 2 : index
    %c0_176 = arith.constant 0 : index
    %c0_177 = arith.constant 0 : index
    %158 = vector.load %arg6[%c2_175, %c0_176, %c0_177] : memref<16x64x512xf32, #tpu.memory_space<vmem>>, vector<1x64x512xf32>
    %159 = vector.shape_cast %158 : vector<1x64x512xf32> to vector<64x512xf32>
    %cst_178 = arith.constant dense<0.000000e+00> : vector<1x512xf32>
    %160 = tpu.matmul %157, %159, %cst_178 {dimension_numbers = #tpu.dot_dimension_numbers<[1], [0], [0], [1], [0, 0, 1, 1], [], []>} : vector<1x64xf32>, vector<64x512xf32>, vector<1x512xf32> -> vector<1x512xf32>
    %161 = arith.addf %155, %160 : vector<1x512xf32>
    %162 = vector.extract_strided_slice %142 {offsets = [0, 0, 3, 0], sizes = [1, 1, 1, 64], strides = [1, 1, 1, 1]} : vector<1x4x4x64xf32> to vector<1x1x1x64xf32>
    %163 = vector.shape_cast %162 : vector<1x1x1x64xf32> to vector<1x64xf32>
    %c3_179 = arith.constant 3 : index
    %c0_180 = arith.constant 0 : index
    %c0_181 = arith.constant 0 : index
    %164 = vector.load %arg6[%c3_179, %c0_180, %c0_181] : memref<16x64x512xf32, #tpu.memory_space<vmem>>, vector<1x64x512xf32>
    %165 = vector.shape_cast %164 : vector<1x64x512xf32> to vector<64x512xf32>
    %cst_182 = arith.constant dense<0.000000e+00> : vector<1x512xf32>
    %166 = tpu.matmul %163, %165, %cst_182 {dimension_numbers = #tpu.dot_dimension_numbers<[1], [0], [0], [1], [0, 0, 1, 1], [], []>} : vector<1x64xf32>, vector<64x512xf32>, vector<1x512xf32> -> vector<1x512xf32>
    %167 = arith.addf %161, %166 : vector<1x512xf32>
    %168 = vector.extract_strided_slice %142 {offsets = [0, 1, 0, 0], sizes = [1, 1, 1, 64], strides = [1, 1, 1, 1]} : vector<1x4x4x64xf32> to vector<1x1x1x64xf32>
    %169 = vector.shape_cast %168 : vector<1x1x1x64xf32> to vector<1x64xf32>
    %c4_183 = arith.constant 4 : index
    %c0_184 = arith.constant 0 : index
    %c0_185 = arith.constant 0 : index
    %170 = vector.load %arg6[%c4_183, %c0_184, %c0_185] : memref<16x64x512xf32, #tpu.memory_space<vmem>>, vector<1x64x512xf32>
    %171 = vector.shape_cast %170 : vector<1x64x512xf32> to vector<64x512xf32>
    %cst_186 = arith.constant dense<0.000000e+00> : vector<1x512xf32>
    %172 = tpu.matmul %169, %171, %cst_186 {dimension_numbers = #tpu.dot_dimension_numbers<[1], [0], [0], [1], [0, 0, 1, 1], [], []>} : vector<1x64xf32>, vector<64x512xf32>, vector<1x512xf32> -> vector<1x512xf32>
    %173 = arith.addf %167, %172 : vector<1x512xf32>
    %174 = vector.extract_strided_slice %142 {offsets = [0, 1, 1, 0], sizes = [1, 1, 1, 64], strides = [1, 1, 1, 1]} : vector<1x4x4x64xf32> to vector<1x1x1x64xf32>
    %175 = vector.shape_cast %174 : vector<1x1x1x64xf32> to vector<1x64xf32>
    %c5_187 = arith.constant 5 : index
    %c0_188 = arith.constant 0 : index
    %c0_189 = arith.constant 0 : index
    %176 = vector.load %arg6[%c5_187, %c0_188, %c0_189] : memref<16x64x512xf32, #tpu.memory_space<vmem>>, vector<1x64x512xf32>
    %177 = vector.shape_cast %176 : vector<1x64x512xf32> to vector<64x512xf32>
    %cst_190 = arith.constant dense<0.000000e+00> : vector<1x512xf32>
    %178 = tpu.matmul %175, %177, %cst_190 {dimension_numbers = #tpu.dot_dimension_numbers<[1], [0], [0], [1], [0, 0, 1, 1], [], []>} : vector<1x64xf32>, vector<64x512xf32>, vector<1x512xf32> -> vector<1x512xf32>
    %179 = arith.addf %173, %178 : vector<1x512xf32>
    %180 = vector.extract_strided_slice %142 {offsets = [0, 1, 2, 0], sizes = [1, 1, 1, 64], strides = [1, 1, 1, 1]} : vector<1x4x4x64xf32> to vector<1x1x1x64xf32>
    %181 = vector.shape_cast %180 : vector<1x1x1x64xf32> to vector<1x64xf32>
    %c6_191 = arith.constant 6 : index
    %c0_192 = arith.constant 0 : index
    %c0_193 = arith.constant 0 : index
    %182 = vector.load %arg6[%c6_191, %c0_192, %c0_193] : memref<16x64x512xf32, #tpu.memory_space<vmem>>, vector<1x64x512xf32>
    %183 = vector.shape_cast %182 : vector<1x64x512xf32> to vector<64x512xf32>
    %cst_194 = arith.constant dense<0.000000e+00> : vector<1x512xf32>
    %184 = tpu.matmul %181, %183, %cst_194 {dimension_numbers = #tpu.dot_dimension_numbers<[1], [0], [0], [1], [0, 0, 1, 1], [], []>} : vector<1x64xf32>, vector<64x512xf32>, vector<1x512xf32> -> vector<1x512xf32>
    %185 = arith.addf %179, %184 : vector<1x512xf32>
    %186 = vector.extract_strided_slice %142 {offsets = [0, 1, 3, 0], sizes = [1, 1, 1, 64], strides = [1, 1, 1, 1]} : vector<1x4x4x64xf32> to vector<1x1x1x64xf32>
    %187 = vector.shape_cast %186 : vector<1x1x1x64xf32> to vector<1x64xf32>
    %c7_195 = arith.constant 7 : index
    %c0_196 = arith.constant 0 : index
    %c0_197 = arith.constant 0 : index
    %188 = vector.load %arg6[%c7_195, %c0_196, %c0_197] : memref<16x64x512xf32, #tpu.memory_space<vmem>>, vector<1x64x512xf32>
    %189 = vector.shape_cast %188 : vector<1x64x512xf32> to vector<64x512xf32>
    %cst_198 = arith.constant dense<0.000000e+00> : vector<1x512xf32>
    %190 = tpu.matmul %187, %189, %cst_198 {dimension_numbers = #tpu.dot_dimension_numbers<[1], [0], [0], [1], [0, 0, 1, 1], [], []>} : vector<1x64xf32>, vector<64x512xf32>, vector<1x512xf32> -> vector<1x512xf32>
    %191 = arith.addf %185, %190 : vector<1x512xf32>
    %192 = vector.extract_strided_slice %142 {offsets = [0, 2, 0, 0], sizes = [1, 1, 1, 64], strides = [1, 1, 1, 1]} : vector<1x4x4x64xf32> to vector<1x1x1x64xf32>
    %193 = vector.shape_cast %192 : vector<1x1x1x64xf32> to vector<1x64xf32>
    %c8_199 = arith.constant 8 : index
    %c0_200 = arith.constant 0 : index
    %c0_201 = arith.constant 0 : index
    %194 = vector.load %arg6[%c8_199, %c0_200, %c0_201] : memref<16x64x512xf32, #tpu.memory_space<vmem>>, vector<1x64x512xf32>
    %195 = vector.shape_cast %194 : vector<1x64x512xf32> to vector<64x512xf32>
    %cst_202 = arith.constant dense<0.000000e+00> : vector<1x512xf32>
    %196 = tpu.matmul %193, %195, %cst_202 {dimension_numbers = #tpu.dot_dimension_numbers<[1], [0], [0], [1], [0, 0, 1, 1], [], []>} : vector<1x64xf32>, vector<64x512xf32>, vector<1x512xf32> -> vector<1x512xf32>
    %197 = arith.addf %191, %196 : vector<1x512xf32>
    %198 = vector.extract_strided_slice %142 {offsets = [0, 2, 1, 0], sizes = [1, 1, 1, 64], strides = [1, 1, 1, 1]} : vector<1x4x4x64xf32> to vector<1x1x1x64xf32>
    %199 = vector.shape_cast %198 : vector<1x1x1x64xf32> to vector<1x64xf32>
    %c9 = arith.constant 9 : index
    %c0_203 = arith.constant 0 : index
    %c0_204 = arith.constant 0 : index
    %200 = vector.load %arg6[%c9, %c0_203, %c0_204] : memref<16x64x512xf32, #tpu.memory_space<vmem>>, vector<1x64x512xf32>
    %201 = vector.shape_cast %200 : vector<1x64x512xf32> to vector<64x512xf32>
    %cst_205 = arith.constant dense<0.000000e+00> : vector<1x512xf32>
    %202 = tpu.matmul %199, %201, %cst_205 {dimension_numbers = #tpu.dot_dimension_numbers<[1], [0], [0], [1], [0, 0, 1, 1], [], []>} : vector<1x64xf32>, vector<64x512xf32>, vector<1x512xf32> -> vector<1x512xf32>
    %203 = arith.addf %197, %202 : vector<1x512xf32>
    %204 = vector.extract_strided_slice %142 {offsets = [0, 2, 2, 0], sizes = [1, 1, 1, 64], strides = [1, 1, 1, 1]} : vector<1x4x4x64xf32> to vector<1x1x1x64xf32>
    %205 = vector.shape_cast %204 : vector<1x1x1x64xf32> to vector<1x64xf32>
    %c10 = arith.constant 10 : index
    %c0_206 = arith.constant 0 : index
    %c0_207 = arith.constant 0 : index
    %206 = vector.load %arg6[%c10, %c0_206, %c0_207] : memref<16x64x512xf32, #tpu.memory_space<vmem>>, vector<1x64x512xf32>
    %207 = vector.shape_cast %206 : vector<1x64x512xf32> to vector<64x512xf32>
    %cst_208 = arith.constant dense<0.000000e+00> : vector<1x512xf32>
    %208 = tpu.matmul %205, %207, %cst_208 {dimension_numbers = #tpu.dot_dimension_numbers<[1], [0], [0], [1], [0, 0, 1, 1], [], []>} : vector<1x64xf32>, vector<64x512xf32>, vector<1x512xf32> -> vector<1x512xf32>
    %209 = arith.addf %203, %208 : vector<1x512xf32>
    %210 = vector.extract_strided_slice %142 {offsets = [0, 2, 3, 0], sizes = [1, 1, 1, 64], strides = [1, 1, 1, 1]} : vector<1x4x4x64xf32> to vector<1x1x1x64xf32>
    %211 = vector.shape_cast %210 : vector<1x1x1x64xf32> to vector<1x64xf32>
    %c11 = arith.constant 11 : index
    %c0_209 = arith.constant 0 : index
    %c0_210 = arith.constant 0 : index
    %212 = vector.load %arg6[%c11, %c0_209, %c0_210] : memref<16x64x512xf32, #tpu.memory_space<vmem>>, vector<1x64x512xf32>
    %213 = vector.shape_cast %212 : vector<1x64x512xf32> to vector<64x512xf32>
    %cst_211 = arith.constant dense<0.000000e+00> : vector<1x512xf32>
    %214 = tpu.matmul %211, %213, %cst_211 {dimension_numbers = #tpu.dot_dimension_numbers<[1], [0], [0], [1], [0, 0, 1, 1], [], []>} : vector<1x64xf32>, vector<64x512xf32>, vector<1x512xf32> -> vector<1x512xf32>
    %215 = arith.addf %209, %214 : vector<1x512xf32>
    %216 = vector.extract_strided_slice %142 {offsets = [0, 3, 0, 0], sizes = [1, 1, 1, 64], strides = [1, 1, 1, 1]} : vector<1x4x4x64xf32> to vector<1x1x1x64xf32>
    %217 = vector.shape_cast %216 : vector<1x1x1x64xf32> to vector<1x64xf32>
    %c12 = arith.constant 12 : index
    %c0_212 = arith.constant 0 : index
    %c0_213 = arith.constant 0 : index
    %218 = vector.load %arg6[%c12, %c0_212, %c0_213] : memref<16x64x512xf32, #tpu.memory_space<vmem>>, vector<1x64x512xf32>
    %219 = vector.shape_cast %218 : vector<1x64x512xf32> to vector<64x512xf32>
    %cst_214 = arith.constant dense<0.000000e+00> : vector<1x512xf32>
    %220 = tpu.matmul %217, %219, %cst_214 {dimension_numbers = #tpu.dot_dimension_numbers<[1], [0], [0], [1], [0, 0, 1, 1], [], []>} : vector<1x64xf32>, vector<64x512xf32>, vector<1x512xf32> -> vector<1x512xf32>
    %221 = arith.addf %215, %220 : vector<1x512xf32>
    %222 = vector.extract_strided_slice %142 {offsets = [0, 3, 1, 0], sizes = [1, 1, 1, 64], strides = [1, 1, 1, 1]} : vector<1x4x4x64xf32> to vector<1x1x1x64xf32>
    %223 = vector.shape_cast %222 : vector<1x1x1x64xf32> to vector<1x64xf32>
    %c13 = arith.constant 13 : index
    %c0_215 = arith.constant 0 : index
    %c0_216 = arith.constant 0 : index
    %224 = vector.load %arg6[%c13, %c0_215, %c0_216] : memref<16x64x512xf32, #tpu.memory_space<vmem>>, vector<1x64x512xf32>
    %225 = vector.shape_cast %224 : vector<1x64x512xf32> to vector<64x512xf32>
    %cst_217 = arith.constant dense<0.000000e+00> : vector<1x512xf32>
    %226 = tpu.matmul %223, %225, %cst_217 {dimension_numbers = #tpu.dot_dimension_numbers<[1], [0], [0], [1], [0, 0, 1, 1], [], []>} : vector<1x64xf32>, vector<64x512xf32>, vector<1x512xf32> -> vector<1x512xf32>
    %227 = arith.addf %221, %226 : vector<1x512xf32>
    %228 = vector.extract_strided_slice %142 {offsets = [0, 3, 2, 0], sizes = [1, 1, 1, 64], strides = [1, 1, 1, 1]} : vector<1x4x4x64xf32> to vector<1x1x1x64xf32>
    %229 = vector.shape_cast %228 : vector<1x1x1x64xf32> to vector<1x64xf32>
    %c14 = arith.constant 14 : index
    %c0_218 = arith.constant 0 : index
    %c0_219 = arith.constant 0 : index
    %230 = vector.load %arg6[%c14, %c0_218, %c0_219] : memref<16x64x512xf32, #tpu.memory_space<vmem>>, vector<1x64x512xf32>
    %231 = vector.shape_cast %230 : vector<1x64x512xf32> to vector<64x512xf32>
    %cst_220 = arith.constant dense<0.000000e+00> : vector<1x512xf32>
    %232 = tpu.matmul %229, %231, %cst_220 {dimension_numbers = #tpu.dot_dimension_numbers<[1], [0], [0], [1], [0, 0, 1, 1], [], []>} : vector<1x64xf32>, vector<64x512xf32>, vector<1x512xf32> -> vector<1x512xf32>
    %233 = arith.addf %227, %232 : vector<1x512xf32>
    %234 = vector.extract_strided_slice %142 {offsets = [0, 3, 3, 0], sizes = [1, 1, 1, 64], strides = [1, 1, 1, 1]} : vector<1x4x4x64xf32> to vector<1x1x1x64xf32>
    %235 = vector.shape_cast %234 : vector<1x1x1x64xf32> to vector<1x64xf32>
    %c15 = arith.constant 15 : index
    %c0_221 = arith.constant 0 : index
    %c0_222 = arith.constant 0 : index
    %236 = vector.load %arg6[%c15, %c0_221, %c0_222] : memref<16x64x512xf32, #tpu.memory_space<vmem>>, vector<1x64x512xf32>
    %237 = vector.shape_cast %236 : vector<1x64x512xf32> to vector<64x512xf32>
    %cst_223 = arith.constant dense<0.000000e+00> : vector<1x512xf32>
    %238 = tpu.matmul %235, %237, %cst_223 {dimension_numbers = #tpu.dot_dimension_numbers<[1], [0], [0], [1], [0, 0, 1, 1], [], []>} : vector<1x64xf32>, vector<64x512xf32>, vector<1x512xf32> -> vector<1x512xf32>
    %239 = arith.addf %233, %238 : vector<1x512xf32>
    %c0_224 = arith.constant 0 : index
    %c0_225 = arith.constant 0 : index
    %240 = vector.load %arg7[%c0_224, %c0_225] : memref<1x512xf32, #tpu.memory_space<vmem>>, vector<1x512xf32>
    %241 = arith.addf %239, %240 : vector<1x512xf32>
    %cst_226 = arith.constant 0.000000e+00 : f32
    %242 = vector.broadcast %cst_226 : f32 to vector<1x512xf32>
    %243 = arith.maximumf %241, %242 : vector<1x512xf32>
    %c0_227 = arith.constant 0 : index
    %c0_228 = arith.constant 0 : index
    %244 = vector.load %arg8[%c0_227, %c0_228] : memref<512x128xf32, #tpu.memory_space<vmem>>, vector<512x128xf32>
    %cst_229 = arith.constant dense<0.000000e+00> : vector<1x128xf32>
    %245 = tpu.matmul %243, %244, %cst_229 {dimension_numbers = #tpu.dot_dimension_numbers<[1], [0], [0], [1], [0, 0, 1, 1], [], []>} : vector<1x512xf32>, vector<512x128xf32>, vector<1x128xf32> -> vector<1x128xf32>
    %c0_230 = arith.constant 0 : index
    %c0_231 = arith.constant 0 : index
    %246 = vector.load %arg9[%c0_230, %c0_231] : memref<1x128xf32, #tpu.memory_space<vmem>>, vector<1x128xf32>
    %247 = arith.addf %245, %246 : vector<1x128xf32>
    %c0_232 = arith.constant 0 : index
    %c0_233 = arith.constant 0 : index
    %c0_234 = arith.constant 0 : index
    %248 = vector.load %arg10[%c0_232, %c0_233, %c0_234] : memref<1x1x128xf32, #tpu.memory_space<vmem>>, vector<1x1x128xf32>
    %249 = vector.shape_cast %248 : vector<1x1x128xf32> to vector<1x128xf32>
    %250 = vector.shape_cast %247 : vector<1x128xf32> to vector<1x1x128xf32>
    tpu.vector_store %arg10[%c0_232, %c0_233, %c0_234], %250 {strides = array<i32>} : memref<1x1x128xf32, #tpu.memory_space<vmem>>, vector<1x1x128xf32>,
    return
  }
  func.func @transform_0(%arg0: i32) -> (i32, i32, i32, i32) {
    %c0_i32 = arith.constant 0 : i32
    %c0_i32_0 = arith.constant 0 : i32
    %c0_i32_1 = arith.constant 0 : i32
    %c0_i32_2 = arith.constant 0 : i32
    return %arg0, %c0_i32, %c0_i32_0, %c0_i32_1 : i32, i32, i32, i32
  }
  func.func @transform_1(%arg0: i32) -> (i32, i32, i32) {
    %c0_i32 = arith.constant 0 : i32
    %c0_i32_0 = arith.constant 0 : i32
    %c0_i32_1 = arith.constant 0 : i32
    %c0_i32_2 = arith.constant 0 : i32
    return %c0_i32, %c0_i32_0, %c0_i32_1 : i32, i32, i32
  }
  func.func @transform_2(%arg0: i32) -> (i32, i32) {
    %c0_i32 = arith.constant 0 : i32
    %c0_i32_0 = arith.constant 0 : i32
    %c0_i32_1 = arith.constant 0 : i32
    return %c0_i32, %c0_i32_0 : i32, i32
  }
  func.func @transform_3(%arg0: i32) -> (i32, i32, i32) {
    %c0_i32 = arith.constant 0 : i32
    %c0_i32_0 = arith.constant 0 : i32
    %c0_i32_1 = arith.constant 0 : i32
    %c0_i32_2 = arith.constant 0 : i32
    return %c0_i32, %c0_i32_0, %c0_i32_1 : i32, i32, i32
  }
  func.func @transform_4(%arg0: i32) -> (i32, i32) {
    %c0_i32 = arith.constant 0 : i32
    %c0_i32_0 = arith.constant 0 : i32
    %c0_i32_1 = arith.constant 0 : i32
    return %c0_i32, %c0_i32_0 : i32, i32
  }
  func.func @transform_5(%arg0: i32) -> (i32, i32, i32) {
    %c0_i32 = arith.constant 0 : i32
    %c0_i32_0 = arith.constant 0 : i32
    %c0_i32_1 = arith.constant 0 : i32
    %c0_i32_2 = arith.constant 0 : i32
    return %c0_i32, %c0_i32_0, %c0_i32_1 : i32, i32, i32
  }
  func.func @transform_6(%arg0: i32) -> (i32, i32) {
    %c0_i32 = arith.constant 0 : i32
    %c0_i32_0 = arith.constant 0 : i32
    %c0_i32_1 = arith.constant 0 : i32
    return %c0_i32, %c0_i32_0 : i32, i32
  }
  func.func @transform_7(%arg0: i32) -> (i32, i32) {
    %c0_i32 = arith.constant 0 : i32
    %c0_i32_0 = arith.constant 0 : i32
    %c0_i32_1 = arith.constant 0 : i32
    return %c0_i32, %c0_i32_0 : i32, i32
  }
  func.func @transform_8(%arg0: i32) -> (i32, i32) {
    %c0_i32 = arith.constant 0 : i32
    %c0_i32_0 = arith.constant 0 : i32
    %c0_i32_1 = arith.constant 0 : i32
    return %c0_i32, %c0_i32_0 : i32, i32
  }
  func.func @transform_9(%arg0: i32) -> (i32, i32, i32) {
    %c0_i32 = arith.constant 0 : i32
    %c0_i32_0 = arith.constant 0 : i32
    %c0_i32_1 = arith.constant 0 : i32
    return %arg0, %c0_i32, %c0_i32_0 : i32, i32, i32
  }
}

</mosaic_0001>

<bundles_post_ra>
// kernel: tpu_custom_call.1
= control target key start
LH: loop header
LB: loop body
LE: loop exit
PB: predicated region body
PF: predicated region fallthrough
CT: control target
= control target key end

     0   :  { %s10380_s0 = inlined_call_operand.hbm [shape: f32[2,16,16,64], index: 0, kind: input, shape index: {}]   ;;  %s10381_s1 = inlined_call_operand.vmem [shape: f32[9,64,32], index: 1, kind: input, shape index: {}]   ;;  %s10382_s2 = inlined_call_operand.hbm [shape: f32[1,32], index: 2, kind: input, shape index: {}]   ;;  %s10383_s3 = inlined_call_operand.hbm [shape: f32[9,32,64], index: 3, kind: input, shape index: {}]   ;;  %s10384_s4 = inlined_call_operand.hbm [shape: f32[1,64], index: 4, kind: input, shape index: {}]   ;;  %s10385_s5 = inlined_call_operand.hbm [shape: f32[16,64,512], index: 5, kind: input, shape index: {}]   ;;  %s10386_s6 = inlined_call_operand.hbm [shape: f32[1,512], index: 6, kind: input, shape index: {}]   ;;  %s10387_s7 = inlined_call_operand.hbm [shape: f32[512,128], index: 7, kind: input, shape index: {}]   ;;  %s10388_s8 = inlined_call_operand.hbm [shape: f32[1,128], index: 8, kind: input, shape index: {}]   ;;  %s10389_s9 = inlined_call_operand.hbm [shape: f32[2,1,128], index: 9, kind: output, shape index: {}]  }
   0x1   :  { %10399 = sst [smem:[#allocation60_spill]] %s10382_s2 }
   0x2   :  { %10400 = sst [smem:[#allocation61_spill]] %s10383_s3 }
   0x3   :  { %10401 = sst [smem:[#allocation62_spill]] %s10384_s4 }
   0x4   :  { %14 = vsyncpa [#allocation5], 0 }
   0x5   :  { %16 = vsyncpa [#allocation5 + $0x1], 0 }
   0x6   :  { %17 = vsyncpa [#allocation8], 0 }
   0x7   :  { %18 = vsyncpa [#allocation11], 0 }
   0x8   :  { %19 = vsyncpa [#allocation14], 0 }
   0x9   :  { %20 = vsyncpa [#allocation17], 0 }
   0xa   :  { %21 = vsyncpa [#allocation6], 0 }
   0xb   :  { %23 = vsyncpa [#allocation6 + $0x1], 0  ;;  %s8039_s30 = smov 0   ;;  %s8041_s10 = smov 0  }
   0xc   :  { %s8043_s11 = smov 0   ;;  %s8045_s12 = smov 0  }
   0xd LB: > { %s10402_s2 = sld [smem:[#allocation60_spill]]  ;;  %s8063_s16 = sadd.s32 4294967295, %s7975_s12   ;;  %s7975_s12 = sphi %s8045_s12, %s10500_s12   ;;  %s7971_s11 = sphi %s8043_s11, %s10499_s11   ;;  %s7967_s10 = sphi %s8041_s10, %s10498_s10   ;;  %s7963_s30 = sphi %s8039_s30, %s10497_s30  }
   0xe   : > { %p7009_p0 = scmp.ge.s32.totalorder %s7975_s12, 1  ;;  %p50_p1 = scmp.eq.s32.totalorder %s8063_s16, 0 }
   0xf   : > { %p254_p2 = scmp.lt.s32.totalorder %s7975_s12, 3  ;;  %s7977_s18 = smov [#allocation7]  }
  0x10   : > { %s271_s19 = sshll.u32 %s7977_s18, 4  ;;  %s10404_s4 = sld [smem:[#allocation62_spill]]  ;;  %s272_s19 = int_to_ptr.vmem [resolvable:$true] %s271_s19 }
  0x11   : > { %p8068_p3 = pnand %p7009_p0, %p254_p2  ;;  %s7978_s24 = smov [#allocation10]  }
  0x12   : > { %s297_s25 = sshll.u32 %s7978_s24, 4  ;;  %s321_s28 = sshll.u32 %s10386_s6, 4  ;;  %s298_s25 = int_to_ptr.vmem [resolvable:$true] %s297_s25  ;;  %s322_s28 = int_to_ptr.hbm [resolvable:$true] %s321_s28 }
  0x13   : > { %s269_s15 = sshll.u32 %s10402_s2, 4  ;;  %p7553_p5 = pneg %p8068_p3  ;;  %s270_s15 = int_to_ptr.hbm [resolvable:$true] %s269_s15 }
  0x14   : > { %s10406_s3 = sld [smem:[#allocation61_spill]]  ;;  %s7979_s18 = smov [#allocation13]  }
  0x15   : > { %p8080_p6 = pnand %p7553_p5, %p50_p1  ;;  %s323_s20 = sshll.u32 %s7979_s18, 4  ;;  %s324_s20 = int_to_ptr.vmem [resolvable:$true] %s323_s20 }
  0x16   : > { %s295_s22 = sshll.u32 %s10404_s4, 4  ;;  %s7980_s21 = smov [#allocation9]   ;;  %s296_s22 = int_to_ptr.hbm [resolvable:$true] %s295_s22 }
  0x17   : > { %7556 = dma.hbm_to_vmem [thread:$0]  (!%p8080_p6), %s270_s15, 16, %s272_s19, [#allocation8]  }
  0x18   : > { %7562 = dma.hbm_to_vmem [thread:$0]  (!%p8080_p6), %s296_s22, 16, %s298_s25, [#allocation11]  }
  0x19   : > { %7568 = dma.hbm_to_vmem [thread:$0]  (!%p8080_p6), %s322_s28, 64, %s324_s20, [#allocation14]  }
  0x1a   : > { %s280_s14 = sshll.u32 %s10406_s3, 4  ;;  %s282_s24 = sshll.u32 %s7980_s21, 4  ;;  %s281_s14 = int_to_ptr.hbm [resolvable:$true] %s280_s14  ;;  %s283_s24 = int_to_ptr.vmem [resolvable:$true] %s282_s24 }
  0x1b   : > { %s10390_s26 = smov 128   ;;  %s10391_s27 = smov 8  }
  0x1c   : > { %7559 = dma.hbm_to_vmem [thread:$0]  (!%p8080_p6), %s281_s14, 4608, %s283_s24, [#allocation8], %s10390_s26, %s10390_s26, %s10391_s27  }
  0x1d   : > { %s306_s22 = sshll.u32 %s10385_s5, 4  ;;  %s7983_s25 = smov [#allocation12]   ;;  %s307_s22 = int_to_ptr.hbm [resolvable:$true] %s306_s22 }
  0x1e   : > { %s308_s29 = sshll.u32 %s7983_s25, 4  ;;  %s332_s18 = sshll.u32 %s10387_s7, 4  ;;  %s309_s29 = int_to_ptr.vmem [resolvable:$true] %s308_s29  ;;  %s333_s18 = int_to_ptr.hbm [resolvable:$true] %s332_s18 }
  0x1f   : > { %s7984_s20 = smov 512   ;;  %s7985_s21 = smov 32  }
  0x20   : > { %7565 = dma.hbm_to_vmem [thread:$0]  (!%p8080_p6), %s307_s22, 65536, %s309_s29, [#allocation11], %s7984_s20, %s7984_s20, %s7985_s21  }
  0x21   : > { %s7986_s14 = smov [#allocation15]   ;;  %s347_s25 = sshll.u32 %s10388_s8, 4  ;;  %s348_s25 = int_to_ptr.hbm [resolvable:$true] %s347_s25 }
  0x22   : > { %s334_s24 = sshll.u32 %s7986_s14, 4  ;;  %s7987_s22 = smov [#allocation16]   ;;  %s335_s24 = int_to_ptr.vmem [resolvable:$true] %s334_s24 }
  0x23   : > { %7571 = dma.hbm_to_vmem [thread:$0]  (!%p8080_p6), %s333_s18, 8192, %s335_s24, [#allocation14], %s10390_s26, %s10390_s26, %s10391_s27  }
  0x24   : > { %s349_s29 = sshll.u32 %s7987_s22, 4  ;;  %s7008_s28 = sadd.s32 4294967294, %s7975_s12   ;;  %s350_s29 = int_to_ptr.vmem [resolvable:$true] %s349_s29 }
  0x25   : > { %7574 = dma.hbm_to_vmem [thread:$0]  (!%p8080_p6), %s348_s25, 16, %s350_s29, [#allocation17]  }
  0x26   : > { %s8121_s13 = sadd.s32 1, %s7975_s12   ;;  %s36_s20 = sadd.s32 1, %s7971_s11 }
  0x27   : > { %s33_s21 = ssub.s32 %s7975_s12, %s8121_s13  ;;  %p43_p7 = scmp.ne.s32.totalorder %s7971_s11, %s7967_s10 }
  0x28   : > { %p34_p8 = scmp.eq.s32.totalorder %s33_s21, 0  ;;  %p44_p9 = scmp.eq.s32.totalorder %s7975_s12, 0 }
  0x29   : > { %p49_p10 = scmp.ne.s32.totalorder %s7967_s10, %s7963_s30  ;;  %p241_p11 = scmp.eq.s32.totalorder %s8063_s16, 1 }
  0x2a   : > { %s8133_s18 = scalar_select %p34_p8, %s7971_s11, %s36_s20  }
  0x2b   : > { %p8137_p12 = por %p50_p1, %p49_p10  ;;  %p8141_p13 = por %p241_p11, %p43_p7 }
  0x2c   : > { %p247_p0 = scmp.eq.s32.totalorder %s7008_s28, 1  ;;  %p45_p2 = por %p44_p9, %p43_p7 }
  0x2d   : > { %s360_s24 = sand.u32 1, %s7971_s11   ;;  %p7590_p6 = scmp.lt.s32.totalorder %s7975_s12, 2 }
  0x2e   : > { %p8146_p5 = por %p247_p0, %p49_p10  ;;  %s7018_s19 = sshll.u32 %s360_s24, 8 }
  0x2f   : > { %s7520_s25 = sshll.u32 %s7975_s12, 8  ;;  %s364_s26 = scalar_lea.vmem [#allocation4], %s7018_s19 }
  0x30   : > { %s369_s20 = scalar_lea.hbm %s10380_s0, %s7520_s25  ;;  %s372_s27 = sshll.u32 %s364_s26, 4  ;;  %s373_s27 = int_to_ptr.vmem [resolvable:$true] %s372_s27 }
  0x31   : > { %s370_s21 = sshll.u32 %s369_s20, 4  ;;  %p8155_p8 = pnand %p7590_p6, %p45_p2  ;;  %s371_s21 = int_to_ptr.hbm [resolvable:$true] %s370_s21 }
  0x32   : > { %s361_s2 = scalar_lea.sflag [#allocation5], %s360_s24  ;;  %s7863_s3 = sshra.s32 %s371_s21, 4  ;;  %s7864_s3 = int_to_ptr.hbm [resolvable:$true] %s7863_s3 }
  0x33   : > { %s7865_s4 = scalar_lea.hbm %s7864_s3, 256  ;;  %p7867_p9 = pneg %p8155_p8 }
  0x34   : > { %p7866_p7 = scmp.ne.s32.totalorder %s7864_s3, %s7865_s4  ;;  %s7870_s26 = scalar_lea.hbm %s10380_s0, 512 }
  0x35   : > { %p7871_p0 = scmp.lt.s32.totalorder %s7864_s3, %s10380_s0  ;;  %p7872_p2 = scmp.lt.s32.totalorder %s7870_s26, %s7865_s4 }
  0x36   : > { %p7868_p10 = pnand %p7867_p9, %p7866_p7 }
  0x37   : > { %p7873_p6 = por %p7872_p2, %p7871_p0 }
  0x38   : > { %p7869_p11 = pneg %p7868_p10 }
  0x3a   : > { %p7874_p4 = pnand %p7873_p6, %p7869_p11 }
  0x3c   : > { %7877 = shalt.err (!%p7874_p4)
}
  0x3d   : > { %s10411_s24 = smov 8   ;;  %s10412_s20 = smov 128  }
  0x3e   : > { %7578 = dma.hbm_to_vmem [thread:$0]  (!%p8155_p8), %s371_s21, 4096, %s373_s27, %s361_s2, %s10412_s20, %s10412_s20, %s10411_s24  }
  0x3f   : > { %384 = sbr.rel (%p8068_p3) target bundleno = 1795 (0x703), region = 56 }
  0x44   : > { %s8175_s25 = sand.u32 1, %s7967_s10  }
  0x45   : > { %s7022_s3 = sshll.u32 %s8175_s25, 8  ;;  %s387_s4 = scalar_lea.sflag [#allocation5], %s8175_s25 }
  0x46   : > { %s8179_s22 = scalar_lea.vmem [#allocation4], %s7022_s3 }
  0x47   : > { %7938 = dma.done.wait (%p8137_p12), %s387_s4, 4096  }
  0x48   : > { %7940 = vsyncadd (%p8137_p12), %s387_s4, 4294963200 }
  0x49   : > { %7942 = dma.done.wait (%p50_p1), [#allocation8], 4624  }
  0x4a   : > { %7944 = vsyncadd (%p50_p1), [#allocation8], 4294962672 }
  0x4b   : > { %7946 = dma.done.wait (%p50_p1), [#allocation11], 65552  }
  0x4c   : > { %7948 = vsyncadd (%p50_p1), [#allocation11], 4294901744 }
  0x4d   : > { %7950 = dma.done.wait (%p50_p1), [#allocation14], 8256  }
  0x4e   : > { %7952 = vsyncadd (%p50_p1), [#allocation14], 4294959040 }
  0x4f   : > { %7954 = dma.done.wait (%p50_p1), [#allocation17], 16  }
  0x50   : > { %7956 = vsyncadd (%p50_p1), [#allocation17], 4294967280  ;;  %vm492_vm0 = vcmask 523264   ;;  %v10392_v0 = vmov 0.0   ;;  %v7037_v1 = vld [vmem:[%s10381_s1 + $0x78] sm:$0xff]  ;;  %v7036_v4 = vld [vmem:[%s10381_s1 + $0x70] sm:$0xff]  ;;  %s6871_s3 = scalar_lea.hbm %s10389_s9, %s8063_s16 }
  0x51   : > { %493 = vst.msk [vmem:[#allocation2] sm:$0xff] %vm492_vm0, %v10392_v0  ;;  %v620_v2 = vld [vmem:[%s10381_s1 + $0x38] sm:$0xff]  ;;  %766 = vmatpush.msra.mxu0 %v7037_v1  ;;  %v619_v5 = vld [vmem:[%s10381_s1 + $0x30] sm:$0xff]  ;;  %v7035_v8 = vld [vmem:[%s10381_s1 + $0x68] sm:$0xff]  ;;  %vm495_vm1 = vcmask 517120   ;;  %vm3251_vm2 = vcmask 254976  }
  0x52   : > { %494 = vst.msk [vmem:[#allocation2 + $0x8] sm:$0xff] %vm492_vm0, %v10392_v0  ;;  %v7109_v3 = vld [vmem:[%s10381_s1 + $0xb8] sm:$0xff]  ;;  %975 = vmatpush.msra.mxu1 %v620_v2  ;;  %v7108_v6 = vld [vmem:[%s10381_s1 + $0xb0] sm:$0xff]  ;;  %v618_v9 = vld [vmem:[%s10381_s1 + $0x28] sm:$0xff]  ;;  %vm3700_vm3 = vcmask 261120   ;;  %vm3785_vm4 = vcmask 1041409  }
  0x53   : > { %497 = vst.msk [vmem:[#allocation2 + $0x18] sm:$0xff] %vm492_vm0, %v10392_v0  ;;  %1225 = vmatpush.msra.mxu2 %v7109_v3  ;;  %v7149_v7 = vld [vmem:[%s10381_s1 + $0xf8] sm:$0xff]  ;;  %767 = vmatpush.msra.mxu0 %v7036_v4  ;;  %v7107_v10 = vld [vmem:[%s10381_s1 + $0xa8] sm:$0xff]  ;;  %v7148_v11 = vld [vmem:[%s10381_s1 + $0xf0] sm:$0xff]  ;;  %vm3787_vm5 = vcmask 1042434   ;;  %vm3789_vm6 = vcmask 1043459  }
  0x54   : > { %498 = vst.msk [vmem:[#allocation2 + $0x20] sm:$0xff] %vm492_vm0, %v10392_v0  ;;  %976 = vmatpush.msra.mxu1 %v619_v5  ;;  %1507 = vmatpush.msra.mxu3 %v7149_v7  ;;  %v7034_v12 = vld [vmem:[%s10381_s1 + $0x60] sm:$0xff]  ;;  %v7147_v15 = vld [vmem:[%s10381_s1 + $0xe8] sm:$0xff]  ;;  %v7033_v16 = vld [vmem:[%s10381_s1 + $0x58] sm:$0xff]  ;;  %vm3791_vm7 = vcmask 1044484   ;;  %vm3793_vm8 = vcmask 1045509  }
  0x55   : > { %500 = vst.msk [vmem:[#allocation2 + $0x30] sm:$0xff] %vm492_vm0, %v10392_v0  ;;  %1226 = vmatpush.msra.mxu2 %v7108_v6  ;;  %v617_v13 = vld [vmem:[%s10381_s1 + $0x20] sm:$0xff]  ;;  %768 = vmatpush.msra.mxu0 %v7035_v8  ;;  %v616_v17 = vld [vmem:[%s10381_s1 + $0x18] sm:$0xff]  ;;  %v7032_v20 = vld [vmem:[%s10381_s1 + $0x50] sm:$0xff]  ;;  %vm3795_vm9 = vcmask 1046534   ;;  %vm3797_vm10 = vcmask 1047559  }
  0x56   : > { %501 = vst.msk [vmem:[#allocation2 + $0x38] sm:$0xff] %vm492_vm0, %v10392_v0  ;;  %977 = vmatpush.msra.mxu1 %v618_v9  ;;  %v7106_v14 = vld [vmem:[%s10381_s1 + $0xa0] sm:$0xff]  ;;  %1508 = vmatpush.msra.mxu3 %v7148_v11  ;;  %v7105_v18 = vld [vmem:[%s10381_s1 + $0x98] sm:$0xff]  ;;  %v615_v21 = vld [vmem:[%s10381_s1 + $0x10] sm:$0xff]  ;;  %s459_s4 = scalar_lea.vmem [#allocation18], %s8175_s25  ;;  %s6875_s17 = sshll.u32 %s6871_s3, 4  ;;  %s6876_s17 = int_to_ptr.hbm [resolvable:$true] %s6875_s17 }
  0x57   : > { %503 = vst.msk [vmem:[#allocation2 + $0x48] sm:$0xff] %vm492_vm0, %v10392_v0  ;;  %1227 = vmatpush.msra.mxu2 %v7107_v10  ;;  %769 = vmatpush.msra.mxu0 %v7034_v12  ;;  %v7146_v19 = vld [vmem:[%s10381_s1 + $0xe0] sm:$0xff]  ;;  %v7104_v22 = vld [vmem:[%s10381_s1 + $0x90] sm:$0xff]  ;;  %v7145_v23 = vld [vmem:[%s10381_s1 + $0xd8] sm:$0xff]  ;;  %s6873_s2 = sshll.u32 %s459_s4, 4  ;;  %s6863_s27 = scalar_lea.sflag [#allocation6], %s8175_s25  ;;  %s6874_s2 = int_to_ptr.vmem [resolvable:$true] %s6873_s2 }
  0x58   : > { %504 = vst.msk [vmem:[#allocation2 + $0x50] sm:$0xff] %vm492_vm0, %v10392_v0  ;;  %978 = vmatpush.msra.mxu1 %v617_v13  ;;  %1509 = vmatpush.msra.mxu3 %v7147_v15  ;;  %v7031_v24 = vld [vmem:[%s10381_s1 + $0x48] sm:$0xff]  ;;  %v7144_v27 = vld [vmem:[%s10381_s1 + $0xd0] sm:$0xff]  ;;  %v7030_v28 = vld [vmem:[%s10381_s1 + $0x40] sm:$0xff]  ;;  %s7907_s23 = sshra.s32 %s6876_s17, 4  ;;  %s7913_s28 = scalar_lea.hbm %s10389_s9, 2  ;;  %s7908_s23 = int_to_ptr.hbm [resolvable:$true] %s7907_s23 }
  0x59   : > { %506 = vst.msk [vmem:[#allocation2 + $0x60] sm:$0xff] %vm492_vm0, %v10392_v0  ;;  %1228 = vmatpush.msra.mxu2 %v7106_v14  ;;  %770 = vmatpush.msra.mxu0 %v7033_v16  ;;  %v614_v25 = vld [vmem:[%s10381_s1 + $0x8] sm:$0xff]  ;;  %v613_v29 = vld [vmem:[%s10381_s1] sm:$0xff]  ;;  %v460_v37 = vld [vmem:[%s8179_s22] sm:$0xff]  ;;  %p7914_p12 = scmp.lt.s32.totalorder %s7908_s23, %s10389_s9 }
  0x5a   : > { %507 = vst.msk [vmem:[#allocation2 + $0x68] sm:$0xff] %vm492_vm0, %v10392_v0  ;;  %979 = vmatpush.msra.mxu1 %v616_v17  ;;  %1510 = vmatpush.msra.mxu3 %v7146_v19  ;;  %v7103_v26 = vld [vmem:[%s10381_s1 + $0x88] sm:$0xff]  ;;  %v7102_v30 = vld [vmem:[%s10381_s1 + $0x80] sm:$0xff]  ;;  %v461_v42 = vld [vmem:[%s8179_s22 + $0x8] sm:$0xff] }
  0x5b   : > { %509 = vst.msk [vmem:[#allocation2 + $0x78] sm:$0xff] %vm492_vm0, %v10392_v0  ;;  %1229 = vmatpush.msra.mxu2 %v7105_v18  ;;  %771 = vmatpush.msra.mxu0 %v7032_v20  ;;  %v7143_v31 = vld [vmem:[%s10381_s1 + $0xc8] sm:$0xff]  ;;  %v581_v33 = vld [vmem:[#allocation2] sm:$0xff]  ;;  %v464_v45 = vld [vmem:[%s8179_s22 + $0x20] sm:$0xff] }
  0x5c   : > { %510 = vst.msk [vmem:[#allocation2 + $0x80] sm:$0xff] %vm492_vm0, %v10392_v0  ;;  %980 = vmatpush.msra.mxu1 %v615_v21  ;;  %1511 = vmatpush.msra.mxu3 %v7145_v23  ;;  %v621_v32 = vld [vmem:[#allocation2 + $0x1] sm:$0xff]  ;;  %v465_v46 = vld [vmem:[%s8179_s22 + $0x28] sm:$0xff]  ;;  %v468_v58 = vld [vmem:[%s8179_s22 + $0x40] sm:$0xff] }
  0x5d   : > { %512 = vst.msk [vmem:[#allocation2 + $0x90] sm:$0xff] %vm492_vm0, %v10392_v0  ;;  %1230 = vmatpush.msra.mxu2 %v7104_v22  ;;  %772 = vmatpush.msra.mxu0 %v7031_v24  ;;  %v1080_v34 = vld [vmem:[#allocation2 + $0x2] sm:$0xff]  ;;  %v469_v62 = vld [vmem:[%s8179_s22 + $0x48] sm:$0xff]  ;;  %v472_v11 = vld [vmem:[%s8179_s22 + $0x60] sm:$0xff] }
  0x5e   : > { %513 = vst.msk [vmem:[#allocation2 + $0x98] sm:$0xff] %vm492_vm0, %v10392_v0  ;;  %981 = vmatpush.msra.mxu1 %v614_v25  ;;  %1512 = vmatpush.msra.mxu3 %v7144_v27  ;;  %v7142_v35 = vld [vmem:[%s10381_s1 + $0xc0] sm:$0xff]  ;;  %v582_v36 = vld [vmem:[#allocation2 + $0x8] sm:$0xff]  ;;  %v7189_v12 = vld [vmem:[%s10381_s1 + $0x138] sm:$0xff] }
  0x5f   : > { %515 = vst.msk [vmem:[#allocation2 + $0xa8] sm:$0xff] %vm492_vm0, %v10392_v0  ;;  %1231 = vmatpush.msra.mxu2 %v7103_v26  ;;  %773 = vmatpush.msra.mxu0 %v7030_v28  ;;  %v462_v43 = vld [vmem:[%s8179_s22 + $0x10] sm:$0xff]  ;;  %v463_v44 = vld [vmem:[%s8179_s22 + $0x18] sm:$0xff]  ;;  %v473_v16 = vld [vmem:[%s8179_s22 + $0x68] sm:$0xff] }
  0x60   : > { %516 = vst.msk [vmem:[#allocation2 + $0xb0] sm:$0xff] %vm492_vm0, %v10392_v0  ;;  %982 = vmatpush.msra.mxu1 %v613_v29  ;;  %1513 = vmatpush.msra.mxu3 %v7143_v31  ;;  %v466_v50 = vld [vmem:[%s8179_s22 + $0x30] sm:$0xff]  ;;  %v467_v54 = vld [vmem:[%s8179_s22 + $0x38] sm:$0xff]  ;;  %v476_v28 = vld [vmem:[%s8179_s22 + $0x80] sm:$0xff] }
  0x61   : > { %518 = vst.msk [vmem:[#allocation2 + $0xc0] sm:$0xff] %vm492_vm0, %v10392_v0  ;;  %1232 = vmatpush.msra.mxu2 %v7102_v30  ;;  %7038 = vmatmul.msk.f32.vlgmr.msra.gmra.mxu0 %vm492_vm0, %v621_v32  ;;  %v470_v3 = vld [vmem:[%s8179_s22 + $0x50] sm:$0xff]  ;;  %v471_v7 = vld [vmem:[%s8179_s22 + $0x58] sm:$0xff]  ;;  %v7188_v29 = vld [vmem:[%s10381_s1 + $0x130] sm:$0xff] }
  0x62   : > { %519 = vst.msk [vmem:[#allocation2 + $0xc8] sm:$0xff] %vm492_vm0, %v10392_v0  ;;  %7070 = vmatmul.msk.f32.vlgmr.msra.gmra.mxu1 %vm492_vm0, %v581_v33  ;;  %7110 = vmatmul.msk.f32.vlgmr.msra.gmra.mxu2 %vm492_vm0, %v1080_v34  ;;  %v474_v20 = vld [vmem:[%s8179_s22 + $0x70] sm:$0xff]  ;;  %v475_v24 = vld [vmem:[%s8179_s22 + $0x78] sm:$0xff]  ;;  %v477_v33 = vld [vmem:[%s8179_s22 + $0x88] sm:$0xff] }
  0x63   : > { %521 = vst.msk [vmem:[#allocation2 + $0xd8] sm:$0xff] %vm492_vm0, %v10392_v0  ;;  %1514 = vmatpush.msra.mxu3 %v7142_v35  ;;  %1789 = vmatpush.msrb.mxu0 %v7189_v12 }
  0x64   : > { %522 = vst.msk [vmem:[#allocation2 + $0xe0] sm:$0xff] %vm492_vm0, %v10392_v0 }
  0x65   : > { %524 = vst.msk [vmem:[#allocation2 + $0xf0] sm:$0xff] %vm492_vm0, %v10392_v0  ;;  %1790 = vmatpush.msrb.mxu0 %v7188_v29  ;;  %v482_v29 = vld [vmem:[%s8179_s22 + $0xb0] sm:$0xff] }
  0x66   : > { %525 = vst.msk [vmem:[#allocation2 + $0xf8] sm:$0xff] %vm492_vm0, %v10392_v0 }
  0x67   : > { %527 = vst.msk [vmem:[#allocation2 + $0x108] sm:$0xff] %vm492_vm0, %v10392_v0 }
  0x68   : > { %528 = vst.msk [vmem:[#allocation2 + $0x110] sm:$0xff] %vm492_vm0, %v10392_v0 }
  0x69   : > { %530 = vst.msk [vmem:[#allocation2 + $0x120] sm:$0xff] %vm492_vm0, %v10392_v0 }
  0x6a   : > { %531 = vst.msk [vmem:[#allocation2 + $0x128] sm:$0xff] %vm492_vm0, %v10392_v0  ;;  %7071 = vmatmul.msk.f32.gmra.mxu1 %vm492_vm0, %v582_v36 }
  0x6b   : > { %533 = vst.msk [vmem:[#allocation2 + $0x138] sm:$0xff] %vm492_vm0, %v10392_v0 }
  0x6c   : > { %534 = vst.msk [vmem:[#allocation2 + $0x140] sm:$0xff] %vm492_vm0, %v10392_v0 }
  0x6d   : > { %536 = vst.msk [vmem:[#allocation2 + $0x150] sm:$0xff] %vm492_vm0, %v10392_v0 }
  0x6e   : > { %537 = vst.msk [vmem:[#allocation2 + $0x158] sm:$0xff] %vm492_vm0, %v10392_v0 }
  0x6f   : > { %539 = vst.msk [vmem:[#allocation2 + $0x168] sm:$0xff] %vm492_vm0, %v10392_v0 }
  0x70   : > { %540 = vst.msk [vmem:[#allocation2 + $0x170] sm:$0xff] %vm492_vm0, %v10392_v0 }
  0x71   : > { %542 = vst.msk [vmem:[#allocation2 + $0x180] sm:$0xff] %vm492_vm0, %v10392_v0 }
  0x72   : > { %543 = vst.msk [vmem:[#allocation2 + $0x188] sm:$0xff] %vm492_vm0, %v10392_v0 }
  0x73   : > { %545 = vst.msk [vmem:[#allocation2 + $0x198] sm:$0xff] %vm492_vm0, %v10392_v0 }
  0x74   : > { %546 = vst.msk [vmem:[#allocation2 + $0x1a0] sm:$0xff] %vm492_vm0, %v10392_v0 }
  0x75   : > { %549 = vst.msk [vmem:[#allocation2 + $0x19] sm:$0xff] %vm492_vm0, %v460_v37  ;;  %v478_v37 = vld [vmem:[%s8179_s22 + $0x90] sm:$0xff] }
  0x76   : > { %496 = vst.msk [vmem:[#allocation2 + $0x10] sm:$0x3] %vm495_vm1, %v10392_v0 }
  0x77   : > { %499 = vst.msk [vmem:[#allocation2 + $0x28] sm:$0x3] %vm495_vm1, %v10392_v0 }
  0x78   : > { %502 = vst.msk [vmem:[#allocation2 + $0x40] sm:$0x3] %vm495_vm1, %v10392_v0 }
  0x79   : > { %505 = vst.msk [vmem:[#allocation2 + $0x58] sm:$0x3] %vm495_vm1, %v10392_v0 }
  0x7a   : > { %508 = vst.msk [vmem:[#allocation2 + $0x70] sm:$0x3] %vm495_vm1, %v10392_v0 }
  0x7b   : > { %511 = vst.msk [vmem:[#allocation2 + $0x88] sm:$0x3] %vm495_vm1, %v10392_v0 }
  0x7c   : > { %v1362_v38 = vld [vmem:[#allocation2 + $0x18] sm:$0xff]  ;;  %514 = vst.msk [vmem:[#allocation2 + $0xa0] sm:$0x3] %vm495_vm1, %v10392_v0 }
  0x7d   : > { %7150 = vmatmul.msk.f32.vlgmr.msra.gmra.mxu3 %vm492_vm0, %v1362_v38  ;;  %v622_v39 = vld [vmem:[#allocation2 + $0x9] sm:$0xff]  ;;  %517 = vst.msk [vmem:[#allocation2 + $0xb8] sm:$0x3] %vm495_vm1, %v10392_v0  ;;  %7072 = vmatmul.msk.f32.gmra.mxu1 %vm492_vm0, %v1362_v38  ;;  %v8407_v41 = vld [vmem:[#allocation2 + $0x19] sm:$0xff] }
  0x7e   : > { %v1081_v40 = vld [vmem:[#allocation2 + $0xa] sm:$0xff]  ;;  %7039 = vmatmul.msk.f32.gmra.mxu0 %vm492_vm0, %v622_v39  ;;  %520 = vst.msk [vmem:[#allocation2 + $0xd0] sm:$0x3] %vm495_vm1, %v10392_v0 }
  0x7f   : > { %7111 = vmatmul.msk.f32.gmra.mxu2 %vm492_vm0, %v1081_v40  ;;  %523 = vst.msk [vmem:[#allocation2 + $0xe8] sm:$0x3] %vm495_vm1, %v10392_v0 }
  0x80   : > { %526 = vst.msk [vmem:[#allocation2 + $0x100] sm:$0x3] %vm495_vm1, %v10392_v0 }
  0x81   : > { %529 = vst.msk [vmem:[#allocation2 + $0x118] sm:$0x3] %vm495_vm1, %v10392_v0 }
  0x82   : > { %532 = vst.msk [vmem:[#allocation2 + $0x130] sm:$0x3] %vm495_vm1, %v10392_v0 }
  0x83   : > { %535 = vst.msk [vmem:[#allocation2 + $0x148] sm:$0x3] %vm495_vm1, %v10392_v0 }
  0x84   : > { %538 = vst.msk [vmem:[#allocation2 + $0x160] sm:$0x3] %vm495_vm1, %v10392_v0 }
  0x85   : > { %541 = vst.msk [vmem:[#allocation2 + $0x178] sm:$0x3] %vm495_vm1, %v10392_v0 }
  0x86   : > { %544 = vst.msk [vmem:[#allocation2 + $0x190] sm:$0x3] %vm495_vm1, %v10392_v0  ;;  %7040 = vmatmul.msk.f32.gmra.mxu0 %vm492_vm0, %v8407_v41 }
  0x87   : > { %547 = vst.msk [vmem:[#allocation2 + $0x1a8] sm:$0x3] %vm495_vm1, %v10392_v0 }
  0x88   : > { %550 = vst.msk [vmem:[#allocation2 + $0x21] sm:$0xff] %vm492_vm0, %v461_v42 }
  0x89   : > { %551 = vst.msk [vmem:[#allocation2 + $0x31] sm:$0xff] %vm492_vm0, %v462_v43 }
  0x8a   : > { %552 = vst.msk [vmem:[#allocation2 + $0x39] sm:$0xff] %vm492_vm0, %v463_v44  ;;  %v479_v44 = vld [vmem:[%s8179_s22 + $0x98] sm:$0xff] }
  0x8b   : > { %553 = vst.msk [vmem:[#allocation2 + $0x49] sm:$0xff] %vm492_vm0, %v464_v45 }
  0x8c   : > { %554 = vst.msk [vmem:[#allocation2 + $0x51] sm:$0xff] %vm492_vm0, %v465_v46 }
  0x8d   : > { %555 = vst.msk [vmem:[#allocation2 + $0x61] sm:$0xff] %vm492_vm0, %v466_v50 }
  0x8e   : > { %556 = vst.msk [vmem:[#allocation2 + $0x69] sm:$0xff] %vm492_vm0, %v467_v54 }
  0x8f   : > { %v1363_v47 = vld [vmem:[#allocation2 + $0x20] sm:$0xff]  ;;  %557 = vst.msk [vmem:[#allocation2 + $0x79] sm:$0xff] %vm492_vm0, %v468_v58 }
  0x90   : > { %v8429_v48 = vld [vmem:[#allocation2 + $0x1a] sm:$0xff]  ;;  %7151 = vmatmul.msk.f32.gmra.mxu3 %vm492_vm0, %v1363_v47  ;;  %7073 = vmatmul.msk.f32.gmra.mxu1 %vm492_vm0, %v1363_v47  ;;  %v8441_v51 = vld [vmem:[#allocation2 + $0x30] sm:$0xff]  ;;  %v8443_v52 = vld [vmem:[#allocation2 + $0x22] sm:$0xff]  ;;  %558 = vst.msk [vmem:[#allocation2 + $0x81] sm:$0xff] %vm492_vm0, %v469_v62 }
  0x91   : > { %v8431_v49 = vld [vmem:[#allocation2 + $0x21] sm:$0xff]  ;;  %7112 = vmatmul.msk.f32.gmra.mxu2 %vm492_vm0, %v8429_v48  ;;  %v8445_v53 = vld [vmem:[#allocation2 + $0x31] sm:$0xff]  ;;  %v8461_v57 = vld [vmem:[#allocation2 + $0x39] sm:$0xff]  ;;  %559 = vst.msk [vmem:[#allocation2 + $0x91] sm:$0xff] %vm492_vm0, %v470_v3 }
  0x92   : > { %7041 = vmatmul.msk.f32.gmra.mxu0 %vm492_vm0, %v8431_v49  ;;  %v8457_v55 = vld [vmem:[#allocation2 + $0x38] sm:$0xff]  ;;  %v8473_v59 = vld [vmem:[#allocation2 + $0x48] sm:$0xff]  ;;  %560 = vst.msk [vmem:[#allocation2 + $0x99] sm:$0xff] %vm492_vm0, %v471_v7  ;;  %v480_v62 = vld [vmem:[%s8179_s22 + $0xa0] sm:$0xff] }
  0x93   : > { %v8459_v56 = vld [vmem:[#allocation2 + $0x32] sm:$0xff]  ;;  %v8475_v60 = vld [vmem:[#allocation2 + $0x3a] sm:$0xff]  ;;  %v8477_v61 = vld [vmem:[#allocation2 + $0x49] sm:$0xff]  ;;  %561 = vst.msk [vmem:[#allocation2 + $0xa9] sm:$0xff] %vm492_vm0, %v472_v11 }
  0x94   : > { %v8489_v63 = vld [vmem:[#allocation2 + $0x50] sm:$0xff]  ;;  %v8505_v4 = vld [vmem:[#allocation2 + $0x60] sm:$0xff]  ;;  %562 = vst.msk [vmem:[#allocation2 + $0xb1] sm:$0xff] %vm492_vm0, %v473_v16  ;;  %v7187_v11 = vld [vmem:[%s10381_s1 + $0x128] sm:$0xff] }
  0x95   : > { %v8491_v1 = vld [vmem:[#allocation2 + $0x4a] sm:$0xff]  ;;  %v8507_v5 = vld [vmem:[#allocation2 + $0x52] sm:$0xff]  ;;  %v8509_v6 = vld [vmem:[#allocation2 + $0x61] sm:$0xff]  ;;  %563 = vst.msk [vmem:[#allocation2 + $0xc1] sm:$0xff] %vm492_vm0, %v474_v20  ;;  %1791 = vmatpush.msrb.mxu0 %v7187_v11 }
  0x96   : > { %v8493_v2 = vld [vmem:[#allocation2 + $0x51] sm:$0xff]  ;;  %v8521_v8 = vld [vmem:[#allocation2 + $0x68] sm:$0xff]  ;;  %v8542_v15 = vld [vmem:[#allocation2 + $0x79] sm:$0xff]  ;;  %564 = vst.msk [vmem:[#allocation2 + $0xc9] sm:$0xff] %vm492_vm0, %v475_v24 }
  0x97   : > { %v8523_v9 = vld [vmem:[#allocation2 + $0x62] sm:$0xff]  ;;  %v8540_v13 = vld [vmem:[#allocation2 + $0x78] sm:$0xff]  ;;  %v1089_v14 = vld [vmem:[#allocation2 + $0x6a] sm:$0xff]  ;;  %565 = vst.msk [vmem:[#allocation2 + $0xd9] sm:$0xff] %vm492_vm0, %v476_v28 }
  0x98   : > { %7152 = vmatmul.msk.f32.gmra.mxu3 %vm492_vm0, %v8441_v51  ;;  %7074 = vmatmul.msk.f32.gmra.mxu1 %vm492_vm0, %v8441_v51  ;;  %v8525_v10 = vld [vmem:[#allocation2 + $0x69] sm:$0xff]  ;;  %v8553_v17 = vld [vmem:[#allocation2 + $0x80] sm:$0xff]  ;;  %v8566_v23 = vld [vmem:[#allocation2 + $0x91] sm:$0xff]  ;;  %566 = vst.msk [vmem:[#allocation2 + $0xe1] sm:$0xff] %vm492_vm0, %v477_v33 }
  0x99   : > { %7113 = vmatmul.msk.f32.gmra.mxu2 %vm492_vm0, %v8443_v52  ;;  %v1090_v18 = vld [vmem:[#allocation2 + $0x7a] sm:$0xff]  ;;  %v1372_v21 = vld [vmem:[#allocation2 + $0x90] sm:$0xff]  ;;  %v1091_v22 = vld [vmem:[#allocation2 + $0x82] sm:$0xff]  ;;  %567 = vst.msk [vmem:[#allocation2 + $0xf1] sm:$0xff] %vm492_vm0, %v478_v37 }
  0x9a   : > { %7042 = vmatmul.msk.f32.gmra.mxu0 %vm492_vm0, %v8445_v53  ;;  %v8555_v19 = vld [vmem:[#allocation2 + $0x81] sm:$0xff]  ;;  %v1373_v25 = vld [vmem:[#allocation2 + $0x98] sm:$0xff]  ;;  %v635_v32 = vld [vmem:[#allocation2 + $0xa9] sm:$0xff]  ;;  %568 = vst.msk [vmem:[#allocation2 + $0xf9] sm:$0xff] %vm492_vm0, %v479_v44 }
  0x9b   : > { %v1092_v26 = vld [vmem:[#allocation2 + $0x92] sm:$0xff]  ;;  %v1374_v30 = vld [vmem:[#allocation2 + $0xa8] sm:$0xff]  ;;  %v1093_v31 = vld [vmem:[#allocation2 + $0x9a] sm:$0xff]  ;;  %569 = vst.msk [vmem:[#allocation2 + $0x109] sm:$0xff] %vm492_vm0, %v480_v62 }
  0x9c   : > { %v8575_v27 = vld [vmem:[#allocation2 + $0x99] sm:$0xff]  ;;  %v1375_v34 = vld [vmem:[#allocation2 + $0xb0] sm:$0xff]  ;;  %v637_v43 = vld [vmem:[#allocation2 + $0xc1] sm:$0xff]  ;;  %571 = vst.msk [vmem:[#allocation2 + $0x121] sm:$0xff] %vm492_vm0, %v482_v29 }
  0x9d   : > { %v1094_v35 = vld [vmem:[#allocation2 + $0xaa] sm:$0xff]  ;;  %v1376_v40 = vld [vmem:[#allocation2 + $0xc0] sm:$0xff]  ;;  %v1095_v42 = vld [vmem:[#allocation2 + $0xb2] sm:$0xff] }
  0x9e   : > { %v636_v36 = vld [vmem:[#allocation2 + $0xb1] sm:$0xff]  ;;  %v1377_v47 = vld [vmem:[#allocation2 + $0xc8] sm:$0xff]  ;;  %v639_v16 = vld [vmem:[#allocation2 + $0xd9] sm:$0xff] }
  0x9f   : > { %v1096_v50 = vld [vmem:[#allocation2 + $0xc2] sm:$0xff]  ;;  %v1378_v12 = vld [vmem:[#allocation2 + $0xd8] sm:$0xff] }
  0xa0   : > { %7153 = vmatmul.msk.f32.gmra.mxu3 %vm492_vm0, %v8457_v55  ;;  %7075 = vmatmul.msk.f32.gmra.mxu1 %vm492_vm0, %v8457_v55  ;;  %v638_v54 = vld [vmem:[#allocation2 + $0xc9] sm:$0xff]  ;;  %v1098_v24 = vld [vmem:[#allocation2 + $0xda] sm:$0xff]  ;;  %v641_v37 = vld [vmem:[#allocation2 + $0xf1] sm:$0xff] }
  0xa1   : > { %7114 = vmatmul.msk.f32.gmra.mxu2 %vm492_vm0, %v8459_v56  ;;  %v640_v28 = vld [vmem:[#allocation2 + $0xe1] sm:$0xff]  ;;  %v8650_v11 = vld [vmem:[#allocation2 + $0xf9] sm:$0xff] }
  0xa2   : > { %7043 = vmatmul.msk.f32.gmra.mxu0 %vm492_vm0, %v8461_v57  ;;  %v1099_v33 = vld [vmem:[#allocation2 + $0xe2] sm:$0xff] }
  0xa8   : > { %7154 = vmatmul.msk.f32.gmra.mxu3 %vm492_vm0, %v8473_v59  ;;  %7076 = vmatmul.msk.f32.gmra.mxu1 %vm492_vm0, %v8473_v59 }
  0xa9   : > { %7115 = vmatmul.msk.f32.gmra.mxu2 %vm492_vm0, %v8475_v60 }
  0xaa   : > { %7044 = vmatmul.msk.f32.gmra.mxu0 %vm492_vm0, %v8477_v61 }
  0xb0   : > { %7155 = vmatmul.msk.f32.gmra.mxu3 %vm492_vm0, %v8489_v63  ;;  %7077 = vmatmul.msk.f32.gmra.mxu1 %vm492_vm0, %v8489_v63 }
  0xb1   : > { %7116 = vmatmul.msk.f32.gmra.mxu2 %vm492_vm0, %v8491_v1 }
  0xb2   : > { %7045 = vmatmul.msk.f32.gmra.mxu0 %vm492_vm0, %v8493_v2 }
  0xb8   : > { %7156 = vmatmul.msk.f32.gmra.mxu3 %vm492_vm0, %v8505_v4  ;;  %7078 = vmatmul.msk.f32.gmra.mxu1 %vm492_vm0, %v8505_v4 }
  0xb9   : > { %7117 = vmatmul.msk.f32.gmra.mxu2 %vm492_vm0, %v8507_v5 }
  0xba   : > { %7046 = vmatmul.msk.f32.gmra.mxu0 %vm492_vm0, %v8509_v6 }
  0xc0   : > { %7157 = vmatmul.msk.f32.gmra.mxu3 %vm492_vm0, %v8521_v8  ;;  %7079 = vmatmul.msk.f32.gmra.mxu1 %vm492_vm0, %v8521_v8 }
  0xc1   : > { %7118 = vmatmul.msk.f32.gmra.mxu2 %vm492_vm0, %v8523_v9 }
  0xc2   : > { %7047 = vmatmul.msk.f32.gmra.mxu0 %vm492_vm0, %v8525_v10 }
  0xc8   : > { %7158 = vmatmul.msk.f32.gmra.mxu3 %vm492_vm0, %v8540_v13  ;;  %7080 = vmatmul.msk.f32.gmra.mxu1 %vm492_vm0, %v8540_v13 }
  0xc9   : > { %7119 = vmatmul.msk.f32.gmra.mxu2 %vm492_vm0, %v1089_v14  ;;  %v1097_v14 = vld [vmem:[#allocation2 + $0xca] sm:$0xff] }
  0xca   : > { %7048 = vmatmul.msk.f32.gmra.mxu0 %vm492_vm0, %v8542_v15 }
  0xd0   : > { %7159 = vmatmul.msk.f32.gmra.mxu3 %vm492_vm0, %v8553_v17  ;;  %7081 = vmatmul.msk.f32.gmra.mxu1 %vm492_vm0, %v8553_v17 }
  0xd1   : > { %7120 = vmatmul.msk.f32.gmra.mxu2 %vm492_vm0, %v1090_v18  ;;  %v481_v18 = vld [vmem:[%s8179_s22 + $0xa8] sm:$0xff] }
  0xd2   : > { %7049 = vmatmul.msk.f32.gmra.mxu0 %vm492_vm0, %v8555_v19  ;;  %570 = vst.msk [vmem:[#allocation2 + $0x111] sm:$0xff] %vm492_vm0, %v481_v18 }
  0xd8   : > { %7160 = vmatmul.msk.f32.gmra.mxu3 %vm492_vm0, %v1372_v21  ;;  %7082 = vmatmul.msk.f32.gmra.mxu1 %vm492_vm0, %v1372_v21 }
  0xd9   : > { %7121 = vmatmul.msk.f32.gmra.mxu2 %vm492_vm0, %v1091_v22  ;;  %v1379_v22 = vld [vmem:[#allocation2 + $0xe0] sm:$0xff] }
  0xda   : > { %7050 = vmatmul.msk.f32.gmra.mxu0 %vm492_vm0, %v8566_v23 }
  0xde   : > { %v8601_v39 = vpop.f32.mrf.mxu0 }
  0xdf   : > { %v8596_v38 = vpop.f32.mrf.mxu1 }
  0xe0   : > { %7161 = vmatmul.msk.f32.gmra.mxu3 %vm492_vm0, %v1373_v25  ;;  %7083 = vmatmul.msk.f32.gmra.mxu1 %vm492_vm0, %v1373_v25 }
  0xe1   : > { %7122 = vmatmul.msk.f32.gmra.mxu2 %vm492_vm0, %v1092_v26 }
  0xe2   : > { %7051 = vmatmul.msk.f32.gmra.mxu0 %vm492_vm0, %v8575_v27 }
  0xe5   : > { %v8613_v58 = vpop.f32.mrf.mxu2 }
  0xe7   : > { %v8609_v45 = vpop.f32.mrf.mxu1 }
  0xe8   : > { %7162 = vmatmul.msk.f32.gmra.mxu3 %vm492_vm0, %v1374_v30  ;;  %7084 = vmatmul.msk.f32.gmra.mxu1 %vm492_vm0, %v1374_v30 }
  0xe9   : > { %7123 = vmatmul.msk.f32.gmra.mxu2 %vm492_vm0, %v1093_v31 }
  0xea   : > { %7052 = vmatmul.msk.f32.gmra.mxu0 %vm492_vm0, %v635_v32  ;;  %v1380_v32 = vld [vmem:[#allocation2 + $0xf0] sm:$0xff] }
  0xf0   : > { %7163 = vmatmul.msk.f32.gmra.mxu3 %vm492_vm0, %v1375_v34  ;;  %7085 = vmatmul.msk.f32.gmra.mxu1 %vm492_vm0, %v1375_v34 }
  0xf1   : > { %7124 = vmatmul.msk.f32.gmra.mxu2 %vm492_vm0, %v1094_v35 }
  0xf2   : > { %7053 = vmatmul.msk.f32.gmra.mxu0 %vm492_vm0, %v636_v36 }
  0xf8   : > { %7164 = vmatmul.msk.f32.gmra.mxu3 %vm492_vm0, %v1376_v40  ;;  %7086 = vmatmul.msk.f32.gmra.mxu1 %vm492_vm0, %v1376_v40  ;;  %v483_v40 = vld [vmem:[%s8179_s22 + $0xb8] sm:$0xff] }
  0xf9   : > { %7125 = vmatmul.msk.f32.gmra.mxu2 %vm492_vm0, %v1095_v42  ;;  %572 = vst.msk [vmem:[#allocation2 + $0x129] sm:$0xff] %vm492_vm0, %v483_v40  ;;  %v1383_v40 = vld [vmem:[#allocation2 + $0x110] sm:$0xff] }
  0xfa   : > { %7054 = vmatmul.msk.f32.gmra.mxu0 %vm492_vm0, %v637_v43  ;;  %v990_v7 = vpop.f32.mrf.mxu1 }
  0xfb   : > { %v8611_v46 = vpop.f32.mrf.mxu0 }
 0x100   : > { %7165 = vmatmul.msk.f32.gmra.mxu3 %vm492_vm0, %v1377_v47  ;;  %7087 = vmatmul.msk.f32.gmra.mxu1 %vm492_vm0, %v1377_v47  ;;  %v8628_v20 = vpop.f32.mrf.mxu3 }
 0x101   : > { %7126 = vmatmul.msk.f32.gmra.mxu2 %vm492_vm0, %v1096_v50  ;;  %v1381_v50 = vld [vmem:[#allocation2 + $0xf8] sm:$0xff] }
 0x102   : > { %7055 = vmatmul.msk.f32.gmra.mxu0 %vm492_vm0, %v638_v54  ;;  %v8630_v21 = vpop.f32.mrf.mxu2  ;;  %v1100_v54 = vld [vmem:[#allocation2 + $0xf2] sm:$0xff] }
 0x103   : > { %v781_v3 = vpop.f32.mrf.mxu0 }
 0x104   : > { %v991_v34 = vadd.f32 %v990_v7, %v781_v3 }
 0x108   : > { %7166 = vmatmul.msk.f32.gmra.mxu3 %vm492_vm0, %v1378_v12  ;;  %7088 = vmatmul.msk.f32.gmra.mxu1 %vm492_vm0, %v1378_v12  ;;  %v484_v12 = vld [vmem:[%s8179_s22 + $0xc0] sm:$0xff] }
 0x109   : > { %7127 = vmatmul.msk.f32.gmra.mxu2 %vm492_vm0, %v1097_v14  ;;  %573 = vst.msk [vmem:[#allocation2 + $0x139] sm:$0xff] %vm492_vm0, %v484_v12 }
 0x10a   : > { %7056 = vmatmul.msk.f32.gmra.mxu0 %vm492_vm0, %v639_v16 }
 0x10d   : > { %v993_v26 = vpop.f32.mrf.mxu1 }
 0x10f   : > { %v784_v25 = vpop.f32.mrf.mxu0 }
 0x110   : > { %7167 = vmatmul.msk.f32.gmra.mxu3 %vm492_vm0, %v1379_v22  ;;  %7089 = vmatmul.msk.f32.gmra.mxu1 %vm492_vm0, %v1379_v22  ;;  %v994_v62 = vadd.f32 %v993_v26, %v784_v25  ;;  %v1382_v25 = vld [vmem:[#allocation2 + $0x108] sm:$0xff]  ;;  %v1101_v26 = vld [vmem:[#allocation2 + $0xfa] sm:$0xff] }
 0x111   : > { %7128 = vmatmul.msk.f32.gmra.mxu2 %vm492_vm0, %v1098_v24  ;;  %v7186_v24 = vld [vmem:[%s10381_s1 + $0x120] sm:$0xff] }
 0x112   : > { %7057 = vmatmul.msk.f32.gmra.mxu0 %vm492_vm0, %v640_v28 }
 0x113   : > { %v8640_v30 = vpop.f32.mrf.mxu3  ;;  %1792 = vmatpush.msrb.mxu0 %v7186_v24 }
 0x114   : > { %v1240_v31 = vpop.f32.mrf.mxu2 }
 0x115   : > { %v996_v36 = vpop.f32.mrf.mxu1  ;;  %v1332_v42 = vadd.f32 %v1240_v31, %v991_v34 }
 0x117   : > { %v787_v35 = vpop.f32.mrf.mxu0 }
 0x118   : > { %7168 = vmatmul.msk.f32.gmra.mxu3 %vm492_vm0, %v1380_v32  ;;  %7090 = vmatmul.msk.f32.gmra.mxu1 %vm492_vm0, %v1380_v32  ;;  %v997_v28 = vadd.f32 %v996_v36, %v787_v35  ;;  %v8664_v32 = vld [vmem:[#allocation2 + $0x109] sm:$0xff] }
 0x119   : > { %7129 = vmatmul.msk.f32.gmra.mxu2 %vm492_vm0, %v1099_v33  ;;  %v485_v33 = vld [vmem:[%s8179_s22 + $0xc8] sm:$0xff] }
 0x11a   : > { %7058 = vmatmul.msk.f32.gmra.mxu0 %vm492_vm0, %v641_v37  ;;  %574 = vst.msk [vmem:[#allocation2 + $0x141] sm:$0xff] %vm492_vm0, %v485_v33  ;;  %v487_v33 = vld [vmem:[%s8179_s22 + $0xd8] sm:$0xff] }
 0x11b   : > { %v1522_v43 = vpop.f32.mrf.mxu3  ;;  %576 = vst.msk [vmem:[#allocation2 + $0x159] sm:$0xff] %vm492_vm0, %v487_v33  ;;  %v1105_v33 = vld [vmem:[#allocation2 + $0x12a] sm:$0xff] }
 0x11c   : > { %v1243_v44 = vpop.f32.mrf.mxu2  ;;  %v8648_v47 = vadd.f32 %v1522_v43, %v1332_v42  ;;  %v1102_v42 = vld [vmem:[#allocation2 + $0x10a] sm:$0xff] }
 0x11d   : > { %v999_v7 = vpop.f32.mrf.mxu1  ;;  %v1333_v14 = vadd.f32 %v1243_v44, %v994_v62  ;;  %v486_v62 = vld [vmem:[%s8179_s22 + $0xd0] sm:$0xff] }
 0x11e   : > { %575 = vst.msk [vmem:[#allocation2 + $0x151] sm:$0xff] %vm492_vm0, %v486_v62 }
 0x11f   : > { %v790_v3 = vpop.f32.mrf.mxu0 }
 0x120   : > { %7169 = vmatmul.msk.f32.gmra.mxu3 %vm492_vm0, %v1381_v50  ;;  %7091 = vmatmul.msk.f32.gmra.mxu1 %vm492_vm0, %v1381_v50  ;;  %v1000_v43 = vadd.f32 %v999_v7, %v790_v3 }
 0x121   : > { %7130 = vmatmul.msk.f32.gmra.mxu2 %vm492_vm0, %v1100_v54  ;;  %v8675_v54 = vld [vmem:[#allocation2 + $0x111] sm:$0xff] }
 0x122   : > { %7059 = vmatmul.msk.f32.gmra.mxu0 %vm492_vm0, %v8650_v11 }
 0x123   : > { %v1525_v16 = vpop.f32.mrf.mxu3 }
 0x124   : > { %v1246_v18 = vpop.f32.mrf.mxu2  ;;  %v8659_v22 = vadd.f32 %v1525_v16, %v1333_v14  ;;  %v1384_v16 = vld [vmem:[#allocation2 + $0x120] sm:$0xff] }
 0x125   : > { %v1002_v31 = vpop.f32.mrf.mxu1  ;;  %v1334_v34 = vadd.f32 %v1246_v18, %v997_v28  ;;  %v1103_v18 = vld [vmem:[#allocation2 + $0x112] sm:$0xff]  ;;  %v8686_v28 = vld [vmem:[#allocation2 + $0x121] sm:$0xff] }
 0x127   : > { %v793_v29 = vpop.f32.mrf.mxu0 }
 0x128   : > { %7170 = vmatmul.msk.f32.gmra.mxu3 %vm492_vm0, %v1382_v25  ;;  %7092 = vmatmul.msk.f32.gmra.mxu1 %vm492_vm0, %v1382_v25  ;;  %v1003_v24 = vadd.f32 %v1002_v31, %v793_v29 }
 0x129   : > { %7131 = vmatmul.msk.f32.gmra.mxu2 %vm492_vm0, %v1101_v26 }
 0x12a   : > { %7060 = vmatmul.msk.f32.gmra.mxu0 %vm492_vm0, %v8664_v32 }
 0x12b   : > { %v1528_v37 = vpop.f32.mrf.mxu3 }
 0x12c   : > { %v1249_v35 = vpop.f32.mrf.mxu2  ;;  %v8673_v36 = vadd.f32 %v1528_v37, %v1334_v34 }
 0x12d   : > { %v1005_v50 = vpop.f32.mrf.mxu1  ;;  %v1335_v12 = vadd.f32 %v1249_v35, %v1000_v43  ;;  %v1385_v35 = vld [vmem:[#allocation2 + $0x128] sm:$0xff] }
 0x12f   : > { %v796_v44 = vpop.f32.mrf.mxu0 }
 0x130   : > { %7171 = vmatmul.msk.f32.gmra.mxu3 %vm492_vm0, %v1383_v40  ;;  %7093 = vmatmul.msk.f32.gmra.mxu1 %vm492_vm0, %v1383_v40  ;;  %v1104_v40 = vld [vmem:[#allocation2 + $0x122] sm:$0xff] }
 0x131   : > { %7132 = vmatmul.msk.f32.gmra.mxu2 %vm492_vm0, %v1102_v42  ;;  %v1006_v42 = vadd.f32 %v1005_v50, %v796_v44 }
 0x132   : > { %7061 = vmatmul.msk.f32.gmra.mxu0 %vm492_vm0, %v8675_v54 }
 0x133   : > { %v1531_v14 = vpop.f32.mrf.mxu3 }
 0x134   : > { %v1252_v3 = vpop.f32.mrf.mxu2  ;;  %v8684_v7 = vadd.f32 %v1531_v14, %v1335_v12  ;;  %v8697_v12 = vld [vmem:[#allocation2 + $0x129] sm:$0xff] }
 0x135   : > { %v1008_v26 = vpop.f32.mrf.mxu1  ;;  %v1336_v34 = vadd.f32 %v1252_v3, %v1003_v24  ;;  %10413 = vst [vmem:[#allocation25_spill] sm:$0xff] %v8697_v12  ;;  %v488_v14 = vld [vmem:[%s8179_s22 + $0xe0] sm:$0xff]  ;;  %v1386_v24 = vld [vmem:[#allocation2 + $0x138] sm:$0xff] }
 0x136   : > { %577 = vst.msk [vmem:[#allocation2 + $0x169] sm:$0xff] %vm492_vm0, %v488_v14 }
 0x137   : > { %v799_v25 = vpop.f32.mrf.mxu0 }
 0x138   : > { %7172 = vmatmul.msk.f32.gmra.mxu3 %vm492_vm0, %v1384_v16  ;;  %7094 = vmatmul.msk.f32.gmra.mxu1 %vm492_vm0, %v1384_v16 }
 0x139   : > { %7133 = vmatmul.msk.f32.gmra.mxu2 %vm492_vm0, %v1103_v18  ;;  %v7185_v18 = vld [vmem:[%s10381_s1 + $0x118] sm:$0xff] }
 0x13a   : > { %7062 = vmatmul.msk.f32.gmra.mxu0 %vm492_vm0, %v8686_v28 }
 0x13b   : > { %v1534_v37 = vpop.f32.mrf.mxu3  ;;  %1793 = vmatpush.msrb.mxu0 %v7185_v18 }
 0x13c   : > { %v1255_v29 = vpop.f32.mrf.mxu2  ;;  %v8695_v31 = vadd.f32 %v1534_v37, %v1336_v34  ;;  %v1009_v34 = vadd.f32 %v1008_v26, %v799_v25 }
 0x13d   : > { %v1011_v62 = vpop.f32.mrf.mxu1  ;;  %v1337_v3 = vadd.f32 %v1255_v29, %v1006_v42  ;;  %v489_v42 = vld [vmem:[%s8179_s22 + $0xe8] sm:$0xff] }
 0x13e   : > { %578 = vst.msk [vmem:[#allocation2 + $0x171] sm:$0xff] %vm492_vm0, %v489_v42  ;;  %v1388_v42 = vld [vmem:[#allocation2 + $0x150] sm:$0xff] }
 0x13f   : > { %v802_v43 = vpop.f32.mrf.mxu0 }
 0x140   : > { %7173 = vmatmul.msk.f32.gmra.mxu3 %vm492_vm0, %v1385_v35  ;;  %7095 = vmatmul.msk.f32.gmra.mxu1 %vm492_vm0, %v1385_v35  ;;  %v1012_v18 = vadd.f32 %v1011_v62, %v802_v43 }
 0x141   : > { %7134 = vmatmul.msk.f32.gmra.mxu2 %vm492_vm0, %v1104_v40  ;;  %v8711_v40 = vld [vmem:[#allocation2 + $0x139] sm:$0xff] }
 0x142   : > { %7063 = vmatmul.msk.f32.gmra.mxu0 %vm492_vm0, %v8697_v12  ;;  %10415 = vst [vmem:[#allocation27_spill] sm:$0xff] %v8711_v40 }
 0x143   : > { %v1537_v16 = vpop.f32.mrf.mxu3 }
 0x144   : > { %v1258_v44 = vpop.f32.mrf.mxu2  ;;  %v8706_v50 = vadd.f32 %v1537_v16, %v1337_v3  ;;  %v1387_v3 = vld [vmem:[#allocation2 + $0x140] sm:$0xff] }
 0x145   : > { %v1014_v29 = vpop.f32.mrf.mxu1  ;;  %v1338_v35 = vadd.f32 %v1258_v44, %v1009_v34  ;;  %v1106_v16 = vld [vmem:[#allocation2 + $0x13a] sm:$0xff] }
 0x146   : > { %10414 = vst [vmem:[#allocation26_spill] sm:$0xff] %v8706_v50  ;;  %v8722_v50 = vld [vmem:[#allocation2 + $0x141] sm:$0xff]  ;;  %v7269_v34 = vld [vmem:[%s10381_s1 + $0x1b8] sm:$0xff] }
 0x147   : > { %v805_v37 = vpop.f32.mrf.mxu0  ;;  %10417 = vst [vmem:[#allocation29_spill] sm:$0xff] %v8722_v50  ;;  %v490_v44 = vld [vmem:[%s8179_s22 + $0xf0] sm:$0xff]  ;;  %2354 = vmatpush.msrb.mxu2 %v7269_v34  ;;  %v7308_v34 = vld [vmem:[%s10381_s1 + $0x1f0] sm:$0xff] }
 0x148   : > { %7174 = vmatmul.msk.f32.gmra.mxu3 %vm492_vm0, %v1386_v24  ;;  %7096 = vmatmul.msk.f32.gmra.mxu1 %vm492_vm0, %v1386_v24  ;;  %579 = vst.msk [vmem:[#allocation2 + $0x181] sm:$0xff] %vm492_vm0, %v490_v44  ;;  %v491_v44 = vld [vmem:[%s8179_s22 + $0xf8] sm:$0xff]  ;;  %s7909_s22 = scalar_lea.hbm %s7908_s23, 1 }
 0x149   : > { %7135 = vmatmul.msk.f32.gmra.mxu2 %vm492_vm0, %v1105_v33  ;;  %580 = vst.msk [vmem:[#allocation2 + $0x189] sm:$0xff] %vm492_vm0, %v491_v44  ;;  %p7910_p1 = scmp.ne.s32.totalorder %s7908_s23, %s7909_s22  ;;  %p7915_p8 = scmp.lt.s32.totalorder %s7913_s28, %s7909_s22 }
 0x14a   : > { %7064 = vmatmul.msk.f32.gmra.mxu0 %vm492_vm0, %v8711_v40 }
 0x14b   : > { %v1540_v14 = vpop.f32.mrf.mxu3  ;;  %p7911_p3 = pnand %p7910_p1, %p8141_p13  ;;  %p7916_p7 = por %p7915_p8, %p7914_p12 }
 0x14c   : > { %v1261_v25 = vpop.f32.mrf.mxu2  ;;  %v8720_v26 = vadd.f32 %v1540_v14, %v1338_v35  ;;  %v1107_v35 = vld [vmem:[#allocation2 + $0x142] sm:$0xff]  ;;  %v1015_v14 = vadd.f32 %v1014_v29, %v805_v37  ;;  %v7268_v37 = vld [vmem:[%s10381_s1 + $0x1b0] sm:$0xff]  ;;  %v7309_v29 = vld [vmem:[%s10381_s1 + $0x1f8] sm:$0xff] }
 0x14d   : > { %v1017_v12 = vpop.f32.mrf.mxu1  ;;  %v1339_v33 = vadd.f32 %v1261_v25, %v1012_v18  ;;  %v8740_v18 = vld [vmem:[#allocation2 + $0x151] sm:$0xff]  ;;  %2355 = vmatpush.msrb.mxu2 %v7268_v37  ;;  %2636 = vmatpush.msrb.mxu3 %v7309_v29  ;;  %v7307_v37 = vld [vmem:[%s10381_s1 + $0x1e8] sm:$0xff]  ;;  %p7912_p4 = pneg %p7911_p3 }
 0x14e   : > { %10416 = vst [vmem:[#allocation28_spill] sm:$0xff] %v8720_v26  ;;  %v1108_v26 = vld [vmem:[#allocation2 + $0x152] sm:$0xff] }
 0x14f   : > { %v808_v0 = vpop.f32.mrf.mxu0  ;;  %10419 = vst [vmem:[#allocation31_spill] sm:$0xff] %v8740_v18  ;;  %2637 = vmatpush.msrb.mxu3 %v7308_v34  ;;  %v7184_v34 = vld [vmem:[%s10381_s1 + $0x110] sm:$0xff]  ;;  %p7917_p9 = pnand %p7916_p7, %p7912_p4 }
 0x150   : > { %7175 = vmatmul.msk.f32.gmra.mxu3 %vm492_vm0, %v1387_v3  ;;  %7097 = vmatmul.msk.f32.gmra.mxu1 %vm492_vm0, %v1387_v3  ;;  %v1018_v29 = vadd.f32 %v1017_v12, %v808_v0  ;;  %v7306_v12 = vld [vmem:[%s10381_s1 + $0x1e0] sm:$0xff] }
 0x151   : > { %7136 = vmatmul.msk.f32.gmra.mxu2 %vm492_vm0, %v1106_v16  ;;  %2638 = vmatpush.msrb.mxu3 %v7307_v37 }
 0x152   : > { %7065 = vmatmul.msk.f32.gmra.mxu0 %vm492_vm0, %v8722_v50 }
 0x153   : > { %v1543_v24 = vpop.f32.mrf.mxu3  ;;  %2639 = vmatpush.msrb.mxu3 %v7306_v12  ;;  %1794 = vmatpush.msrb.mxu0 %v7184_v34  ;;  %v7182_v12 = vld [vmem:[%s10381_s1 + $0x100] sm:$0xff]  ;;  %v1390_v34 = vld [vmem:[#allocation2 + $0x168] sm:$0xff] }
 0x154   : > { %v1264_v43 = vpop.f32.mrf.mxu2  ;;  %v8731_v62 = vadd.f32 %v1543_v24, %v1339_v33  ;;  %v7229_v33 = vld [vmem:[%s10381_s1 + $0x178] sm:$0xff]  ;;  %v7228_v24 = vld [vmem:[%s10381_s1 + $0x170] sm:$0xff] }
 0x155   : > { %v8738_v16 = vpop.f32.mrf.mxu1  ;;  %v1340_v3 = vadd.f32 %v1264_v43, %v1015_v14  ;;  %2071 = vmatpush.msrb.mxu1 %v7229_v33  ;;  %v7267_v43 = vld [vmem:[%s10381_s1 + $0x1a8] sm:$0xff]  ;;  %v7266_v33 = vld [vmem:[%s10381_s1 + $0x1a0] sm:$0xff] }
 0x156   : > { %10418 = vst [vmem:[#allocation30_spill] sm:$0xff] %v8731_v62  ;;  %2356 = vmatpush.msrb.mxu2 %v7267_v43  ;;  %v1389_v62 = vld [vmem:[#allocation2 + $0x158] sm:$0xff] }
 0x157   : > { %v8736_v25 = vpop.f32.mrf.mxu0  ;;  %2072 = vmatpush.msrb.mxu1 %v7228_v24  ;;  %v8782_v43 = vld [vmem:[#allocation2 + $0x159] sm:$0xff] }
 0x158   : > { %7176 = vmatmul.msk.f32.gmra.mxu3 %vm492_vm0, %v1388_v42  ;;  %7098 = vmatmul.msk.f32.gmra.mxu1 %vm492_vm0, %v1388_v42  ;;  %v7227_v42 = vld [vmem:[%s10381_s1 + $0x168] sm:$0xff]  ;;  %10421 = vst [vmem:[#allocation33_spill] sm:$0xff] %v8782_v43  ;;  %v1021_v50 = vadd.f32 %v8738_v16, %v8736_v25  ;;  %v7222_v16 = vld [vmem:[%s10381_s1 + $0x140] sm:$0xff] }
 0x159   : > { %7137 = vmatmul.msk.f32.gmra.mxu2 %vm492_vm0, %v1107_v35  ;;  %2073 = vmatpush.msrb.mxu1 %v7227_v42  ;;  %v7225_v42 = vld [vmem:[%s10381_s1 + $0x158] sm:$0xff]  ;;  %v7303_v25 = vld [vmem:[%s10381_s1 + $0x1c8] sm:$0xff] }
 0x15a   : > { %7066 = vmatmul.msk.f32.gmra.mxu0 %vm492_vm0, %v8740_v18  ;;  %2357 = vmatpush.msrb.mxu2 %v7266_v33  ;;  %v7183_v33 = vld [vmem:[%s10381_s1 + $0x108] sm:$0xff]  ;;  %v1109_v18 = vld [vmem:[#allocation2 + $0x15a] sm:$0xff] }
 0x15b   : > { %v1546_v35 = vpop.f32.mrf.mxu3  ;;  %1795 = vmatpush.msrb.mxu0 %v7183_v33 }
 0x15c   : > { %v1267_v14 = vpop.f32.mrf.mxu2  ;;  %v8767_v44 = vadd.f32 %v1546_v35, %v1340_v3  ;;  %v7226_v35 = vld [vmem:[%s10381_s1 + $0x160] sm:$0xff] }
 0x15d   : > { %v8780_v24 = vpop.f32.mrf.mxu1  ;;  %v1341_v0 = vadd.f32 %v1267_v14, %v1018_v29  ;;  %2074 = vmatpush.msrb.mxu1 %v7226_v35  ;;  %v7305_v14 = vld [vmem:[%s10381_s1 + $0x1d8] sm:$0xff]  ;;  %v7224_v29 = vld [vmem:[%s10381_s1 + $0x150] sm:$0xff]  ;;  %1796 = vmatpush.msrb.mxu0 %v7182_v12 }
 0x15e   : > { %10420 = vst [vmem:[#allocation32_spill] sm:$0xff] %v8767_v44  ;;  %v7265_v44 = vld [vmem:[%s10381_s1 + $0x198] sm:$0xff]  ;;  %2640 = vmatpush.msrb.mxu3 %v7305_v14 }
 0x15f   : > { %v8778_v3 = vpop.f32.mrf.mxu0  ;;  %2358 = vmatpush.msrb.mxu2 %v7265_v44  ;;  %v7263_v44 = vld [vmem:[%s10381_s1 + $0x188] sm:$0xff]  ;;  %2075 = vmatpush.msrb.mxu1 %v7225_v42 }
 0x160   : > { %7177 = vmatmul.msk.f32.gmra.mxu3 %vm492_vm0, %v1389_v62  ;;  %7099 = vmatmul.msk.f32.gmra.mxu1 %vm492_vm0, %v1389_v62  ;;  %v7223_v42 = vld [vmem:[%s10381_s1 + $0x148] sm:$0xff] }
 0x161   : > { %7138 = vmatmul.msk.f32.gmra.mxu2 %vm492_vm0, %v1108_v26  ;;  %v7264_v26 = vld [vmem:[%s10381_s1 + $0x190] sm:$0xff]  ;;  %2076 = vmatpush.msrb.mxu1 %v7224_v29 }
 0x162   : > { %7067 = vmatmul.msk.f32.gmra.mxu0 %vm492_vm0, %v8782_v43  ;;  %2359 = vmatpush.msrb.mxu2 %v7264_v26  ;;  %v7304_v43 = vld [vmem:[%s10381_s1 + $0x1d0] sm:$0xff]  ;;  %v7262_v26 = vld [vmem:[%s10381_s1 + $0x180] sm:$0xff] }
 0x163   : > { %v1549_v37 = vpop.f32.mrf.mxu3  ;;  %2641 = vmatpush.msrb.mxu3 %v7304_v43  ;;  %2077 = vmatpush.msrb.mxu1 %v7223_v42  ;;  %v1110_v29 = vld [vmem:[#allocation2 + $0x16a] sm:$0xff] }
 0x164   : > { %v1270_v62 = vpop.f32.mrf.mxu2  ;;  %v8819_v35 = vadd.f32 %v1549_v37, %v1341_v0  ;;  %v8829_v37 = vld [vmem:[#allocation2 + $0x169] sm:$0xff]  ;;  %2360 = vmatpush.msrb.mxu2 %v7263_v44  ;;  %v1024_v44 = vadd.f32 %v8780_v24, %v8778_v3  ;;  %v8855_v42 = vld [vmem:[#allocation2 + $0x171] sm:$0xff] }
 0x165   : > { %v1026_v0 = vpop.f32.mrf.mxu1  ;;  %v1342_v14 = vadd.f32 %v1270_v62, %v1021_v50  ;;  %v7302_v50 = vld [vmem:[%s10381_s1 + $0x1c0] sm:$0xff]  ;;  %2642 = vmatpush.msrb.mxu3 %v7303_v25  ;;  %2078 = vmatpush.msrb.mxu1 %v7222_v16  ;;  %v1391_v62 = vld [vmem:[#allocation2 + $0x170] sm:$0xff] }
 0x166   : > { %2361 = vmatpush.msrb.mxu2 %v7262_v26  ;;  %v8864_v3 = vld [vmem:[#allocation2 + $0x172] sm:$0xff] }
 0x167   : > { %v817_v40 = vpop.f32.mrf.mxu0  ;;  %2643 = vmatpush.msrb.mxu3 %v7302_v50  ;;  %v1392_v50 = vld [vmem:[#allocation2 + $0x180] sm:$0xff] }
 0x168   : > { %7178 = vmatmul.msk.f32.gmra.mxu3 %vm492_vm0, %v1390_v34  ;;  %7100 = vmatmul.msk.f32.gmra.mxu1 %vm492_vm0, %v1390_v34  ;;  %v1027_v24 = vadd.f32 %v1026_v0, %v817_v40 }
 0x169   : > { %7139 = vmatmul.msk.f32.gmra.mxu2 %vm492_vm0, %v1109_v18 }
 0x16a   : > { %7068 = vmatmul.msk.f32.gmra.mxu0 %vm492_vm0, %v8829_v37 }
 0x16b   : > { %v1552_v18 = vpop.f32.mrf.mxu3 }
 0x16c   : > { %v1273_v43 = vpop.f32.mrf.mxu2  ;;  %v8851_v33 = vadd.f32 %v1552_v18, %v1342_v14 }
 0x16d   : > { %v1029_v34 = vpop.f32.mrf.mxu1  ;;  %v1343_v26 = vadd.f32 %v1273_v43, %v1024_v44 }
 0x16e   : > { %10422 = vst [vmem:[#allocation34_spill] sm:$0xff] %v8851_v33 }
 0x16f   : > { %v820_v12 = vpop.f32.mrf.mxu0 }
 0x170   : > { %7179 = vmatmul.msk.f32.gmra.mxu3 %vm492_vm0, %v1391_v62  ;;  %7101 = vmatmul.msk.f32.gmra.mxu1 %vm492_vm0, %v1391_v62  ;;  %v1030_v40 = vadd.f32 %v1029_v34, %v820_v12 }
 0x171   : > { %7140 = vmatmul.msk.f32.gmra.mxu2 %vm492_vm0, %v1110_v29 }
 0x172   : > { %7069 = vmatmul.msk.f32.gmra.mxu0 %vm492_vm0, %v8855_v42 }
 0x173   : > { %v1555_v14 = vpop.f32.mrf.mxu3 }
 0x174   : > { %v1276_v25 = vpop.f32.mrf.mxu2  ;;  %v8862_v16 = vadd.f32 %v1555_v14, %v1343_v26  ;;  %v8875_v26 = vld [vmem:[#allocation2 + $0x188] sm:$0xff] }
 0x175   : > { %v1032_v33 = vpop.f32.mrf.mxu1  ;;  %v1344_v43 = vadd.f32 %v1276_v25, %v1027_v24 }
 0x177   : > { %v823_v18 = vpop.f32.mrf.mxu0 }
 0x178   : > { %7180 = vmatmul.msk.f32.gmra.mxu3 %vm492_vm0, %v1392_v50  ;;  %7230 = vmatmul.msk.f32.vlgmr.msrb.gmra.mxu1 %vm492_vm0, %v8429_v48  ;;  %v1033_v12 = vadd.f32 %v1032_v33, %v823_v18 }
 0x179   : > { %7141 = vmatmul.msk.f32.gmra.mxu2 %vm492_vm0, %v8864_v3 }
 0x17a   : > { %7190 = vmatmul.msk.f32.vlgmr.msrb.gmra.mxu0 %vm492_vm0, %v8407_v41 }
 0x17b   : > { %v1558_v62 = vpop.f32.mrf.mxu3 }
 0x17c   : > { %v1279_v29 = vpop.f32.mrf.mxu2  ;;  %v8873_v44 = vadd.f32 %v1558_v62, %v1344_v43 }
 0x17d   : > { %v1035_v14 = vpop.f32.mrf.mxu1  ;;  %v1345_v25 = vadd.f32 %v1279_v29, %v1030_v40 }
 0x17f   : > { %v826_v0 = vpop.f32.mrf.mxu0 }
 0x180   : > { %7181 = vmatmul.msk.f32.gmra.mxu3 %vm492_vm0, %v8875_v26  ;;  %7231 = vmatmul.msk.f32.gmra.mxu1 %vm492_vm0, %v8443_v52  ;;  %v1036_v33 = vadd.f32 %v1035_v14, %v826_v0 }
 0x181   : > { %7270 = vmatmul.msk.f32.vlgmr.msrb.gmra.mxu2 %vm492_vm0, %v8441_v51 }
 0x182   : > { %7191 = vmatmul.msk.f32.gmra.mxu0 %vm492_vm0, %v8431_v49 }
 0x183   : > { %v1561_v41 = vpop.f32.mrf.mxu3 }
 0x184   : > { %v1282_v48 = vpop.f32.mrf.mxu2  ;;  %v8885_v50 = vadd.f32 %v1561_v41, %v1345_v25 }
 0x185   : > { %v1038_v24 = vpop.f32.mrf.mxu1  ;;  %v1346_v43 = vadd.f32 %v1282_v48, %v1033_v12 }
 0x187   : > { %v829_v34 = vpop.f32.mrf.mxu0 }
 0x188   : > { %7310 = vmatmul.msk.f32.vlgmr.msrb.gmra.mxu3 %vm492_vm0, %v8445_v53  ;;  %7232 = vmatmul.msk.f32.gmra.mxu1 %vm492_vm0, %v8459_v56  ;;  %v1039_v40 = vadd.f32 %v1038_v24, %v829_v34 }
 0x189   : > { %7271 = vmatmul.msk.f32.gmra.mxu2 %vm492_vm0, %v8457_v55 }
 0x18a   : > { %7192 = vmatmul.msk.f32.gmra.mxu0 %vm492_vm0, %v8445_v53 }
 0x18b   : > { %v1564_v49 = vpop.f32.mrf.mxu3 }
 0x18c   : > { %v1285_v51 = vpop.f32.mrf.mxu2  ;;  %v8895_v52 = vadd.f32 %v1564_v49, %v1346_v43 }
 0x18d   : > { %v1041_v62 = vpop.f32.mrf.mxu1  ;;  %v1347_v29 = vadd.f32 %v1285_v51, %v1036_v33 }
 0x18f   : > { %v832_v18 = vpop.f32.mrf.mxu0 }
 0x190   : > { %7311 = vmatmul.msk.f32.gmra.mxu3 %vm492_vm0, %v8461_v57  ;;  %7233 = vmatmul.msk.f32.gmra.mxu1 %vm492_vm0, %v8475_v60  ;;  %v1042_v41 = vadd.f32 %v1041_v62, %v832_v18 }
 0x191   : > { %7272 = vmatmul.msk.f32.gmra.mxu2 %vm492_vm0, %v8473_v59 }
 0x192   : > { %7193 = vmatmul.msk.f32.gmra.mxu0 %vm492_vm0, %v8461_v57 }
 0x193   : > { %v1567_v53 = vpop.f32.mrf.mxu3 }
 0x194   : > { %v1288_v55 = vpop.f32.mrf.mxu2  ;;  %v8905_v56 = vadd.f32 %v1567_v53, %v1347_v29  ;;  %v1651_v29 = vld [vmem:[#allocation2 + $0x69] sm:$0xff] }
 0x195   : > { %v1044_v14 = vpop.f32.mrf.mxu1  ;;  %v1348_v25 = vadd.f32 %v1288_v55, %v1039_v40  ;;  %v8937_v53 = vld [vmem:[#allocation2 + $0x6a] sm:$0xff] }
 0x196   : > { %10423 = vst [vmem:[#allocation35_spill] sm:$0xff] %v8905_v56 }
 0x197   : > { %v835_v0 = vpop.f32.mrf.mxu0 }
 0x198   : > { %7312 = vmatmul.msk.f32.gmra.mxu3 %vm492_vm0, %v8477_v61  ;;  %7234 = vmatmul.msk.f32.gmra.mxu1 %vm492_vm0, %v8491_v1  ;;  %v1045_v24 = vadd.f32 %v1044_v14, %v835_v0 }
 0x199   : > { %7273 = vmatmul.msk.f32.gmra.mxu2 %vm492_vm0, %v8489_v63 }
 0x19a   : > { %7194 = vmatmul.msk.f32.gmra.mxu0 %vm492_vm0, %v8477_v61 }
 0x19b   : > { %v1570_v57 = vpop.f32.mrf.mxu3 }
 0x19c   : > { %v1291_v59 = vpop.f32.mrf.mxu2  ;;  %v8915_v60 = vadd.f32 %v1570_v57, %v1348_v25  ;;  %v1652_v25 = vld [vmem:[#allocation2 + $0x79] sm:$0xff] }
 0x19d   : > { %v1047_v12 = vpop.f32.mrf.mxu1  ;;  %v1349_v34 = vadd.f32 %v1291_v59, %v1042_v41  ;;  %v8948_v57 = vld [vmem:[#allocation2 + $0x7a] sm:$0xff] }
 0x19e   : > { %10424 = vst [vmem:[#allocation36_spill] sm:$0xff] %v8915_v60 }
 0x19f   : > { %v838_v48 = vpop.f32.mrf.mxu0 }
 0x1a0   : > { %7313 = vmatmul.msk.f32.gmra.mxu3 %vm492_vm0, %v8493_v2  ;;  %7235 = vmatmul.msk.f32.gmra.mxu1 %vm492_vm0, %v8507_v5  ;;  %v1048_v33 = vadd.f32 %v1047_v12, %v838_v48  ;;  %v2217_v48 = vld [vmem:[#allocation2 + $0x90] sm:$0xff] }
 0x1a1   : > { %7274 = vmatmul.msk.f32.gmra.mxu2 %vm492_vm0, %v8505_v4 }
 0x1a2   : > { %7195 = vmatmul.msk.f32.gmra.mxu0 %vm492_vm0, %v8493_v2 }
 0x1a3   : > { %v1573_v61 = vpop.f32.mrf.mxu3 }
 0x1a4   : > { %v1294_v63 = vpop.f32.mrf.mxu2  ;;  %v8925_v1 = vadd.f32 %v1573_v61, %v1349_v34 }
 0x1a5   : > { %v1050_v49 = vpop.f32.mrf.mxu1  ;;  %v1350_v51 = vadd.f32 %v1294_v63, %v1045_v24  ;;  %v1653_v63 = vld [vmem:[#allocation2 + $0x81] sm:$0xff] }
 0x1a6   : > { %10425 = vst [vmem:[#allocation37_spill] sm:$0xff] %v8925_v1  ;;  %v8959_v24 = vld [vmem:[#allocation2 + $0x82] sm:$0xff] }
 0x1a7   : > { %v841_v43 = vpop.f32.mrf.mxu0 }
 0x1a8   : > { %7314 = vmatmul.msk.f32.gmra.mxu3 %vm492_vm0, %v8509_v6  ;;  %7236 = vmatmul.msk.f32.gmra.mxu1 %vm492_vm0, %v8523_v9  ;;  %v1051_v40 = vadd.f32 %v1050_v49, %v841_v43 }
 0x1a9   : > { %7275 = vmatmul.msk.f32.gmra.mxu2 %vm492_vm0, %v8521_v8 }
 0x1aa   : > { %7196 = vmatmul.msk.f32.gmra.mxu0 %vm492_vm0, %v8509_v6 }
 0x1ab   : > { %v1576_v2 = vpop.f32.mrf.mxu3 }
 0x1ac   : > { %v1297_v4 = vpop.f32.mrf.mxu2  ;;  %v8935_v5 = vadd.f32 %v1576_v2, %v1350_v51  ;;  %v7349_v51 = vld [vmem:[%s10381_s1 + $0x238] sm:$0xff] }
 0x1ad   : > { %v1053_v62 = vpop.f32.mrf.mxu1  ;;  %v1351_v8 = vadd.f32 %v1297_v4, %v1048_v33  ;;  %v2218_v2 = vld [vmem:[#allocation2 + $0x98] sm:$0xff]  ;;  %2918 = vmatpush.msra.mxu0 %v7349_v51 }
 0x1ae   : > { %10426 = vst [vmem:[#allocation38_spill] sm:$0xff] %v8935_v5 }
 0x1af   : > { %v844_v18 = vpop.f32.mrf.mxu0 }
 0x1b0   : > { %7315 = vmatmul.msk.f32.gmra.mxu3 %vm492_vm0, %v8525_v10  ;;  %7237 = vmatmul.msk.f32.gmra.mxu1 %vm492_vm0, %v8937_v53  ;;  %v1054_v12 = vadd.f32 %v1053_v62, %v844_v18  ;;  %v1654_v18 = vld [vmem:[#allocation2 + $0x91] sm:$0xff] }
 0x1b1   : > { %7276 = vmatmul.msk.f32.gmra.mxu2 %vm492_vm0, %v8540_v13  ;;  %v8972_v62 = vld [vmem:[#allocation2 + $0x92] sm:$0xff] }
 0x1b2   : > { %7197 = vmatmul.msk.f32.gmra.mxu0 %vm492_vm0, %v1651_v29 }
 0x1b3   : > { %v1579_v6 = vpop.f32.mrf.mxu3 }
 0x1b4   : > { %v1300_v9 = vpop.f32.mrf.mxu2  ;;  %v8946_v55 = vadd.f32 %v1579_v6, %v1351_v8 }
 0x1b5   : > { %v1056_v14 = vpop.f32.mrf.mxu1  ;;  %v1352_v10 = vadd.f32 %v1300_v9, %v1051_v40  ;;  %v2219_v40 = vld [vmem:[#allocation2 + $0xa8] sm:$0xff] }
 0x1b6   : > { %10427 = vst [vmem:[#allocation39_spill] sm:$0xff] %v8946_v55 }
 0x1b7   : > { %v847_v0 = vpop.f32.mrf.mxu0 }
 0x1b8   : > { %7316 = vmatmul.msk.f32.gmra.mxu3 %vm492_vm0, %v8542_v15  ;;  %7238 = vmatmul.msk.f32.gmra.mxu1 %vm492_vm0, %v8948_v57  ;;  %v1057_v4 = vadd.f32 %v1056_v14, %v847_v0 }
 0x1b9   : > { %7277 = vmatmul.msk.f32.gmra.mxu2 %vm492_vm0, %v8553_v17 }
 0x1ba   : > { %7198 = vmatmul.msk.f32.gmra.mxu0 %vm492_vm0, %v1652_v25 }
 0x1bb   : > { %v1582_v13 = vpop.f32.mrf.mxu3 }
 0x1bc   : > { %v1303_v59 = vpop.f32.mrf.mxu2  ;;  %v8957_v41 = vadd.f32 %v1582_v13, %v1352_v10  ;;  %v1655_v10 = vld [vmem:[#allocation2 + $0x99] sm:$0xff] }
 0x1bd   : > { %v1059_v61 = vpop.f32.mrf.mxu1  ;;  %v1353_v15 = vadd.f32 %v1303_v59, %v1054_v12  ;;  %v8982_v13 = vld [vmem:[#allocation2 + $0x9a] sm:$0xff] }
 0x1be   : > { %10428 = vst [vmem:[#allocation40_spill] sm:$0xff] %v8957_v41 }
 0x1bf   : > { %v850_v34 = vpop.f32.mrf.mxu0 }
 0x1c0   : > { %7317 = vmatmul.msk.f32.gmra.mxu3 %vm492_vm0, %v8555_v19  ;;  %7239 = vmatmul.msk.f32.gmra.mxu1 %vm492_vm0, %v8959_v24  ;;  %v1060_v0 = vadd.f32 %v1059_v61, %v850_v34  ;;  %v2501_v34 = vld [vmem:[#allocation2 + $0xa9] sm:$0xff] }
 0x1c1   : > { %7278 = vmatmul.msk.f32.gmra.mxu2 %vm492_vm0, %v2217_v48  ;;  %v2220_v61 = vld [vmem:[#allocation2 + $0xb0] sm:$0xff] }
 0x1c2   : > { %7199 = vmatmul.msk.f32.gmra.mxu0 %vm492_vm0, %v1653_v63 }
 0x1c3   : > { %v1585_v17 = vpop.f32.mrf.mxu3 }
 0x1c4   : > { %v1306_v43 = vpop.f32.mrf.mxu2  ;;  %v8967_v49 = vadd.f32 %v1585_v17, %v1353_v15 }
 0x1c5   : > { %v1062_v33 = vpop.f32.mrf.mxu1  ;;  %v1354_v29 = vadd.f32 %v1306_v43, %v1057_v4  ;;  %v8992_v43 = vld [vmem:[#allocation2 + $0xaa] sm:$0xff] }
 0x1c6   : > { %10429 = vst [vmem:[#allocation41_spill] sm:$0xff] %v8967_v49 }
 0x1c7   : > { %v853_v19 = vpop.f32.mrf.mxu0 }
 0x1c8   : > { %7318 = vmatmul.msk.f32.gmra.mxu3 %vm492_vm0, %v8566_v23  ;;  %7240 = vmatmul.msk.f32.gmra.mxu1 %vm492_vm0, %v8972_v62  ;;  %v1063_v63 = vadd.f32 %v1062_v33, %v853_v19  ;;  %v2221_v19 = vld [vmem:[#allocation2 + $0xc0] sm:$0xff] }
 0x1c9   : > { %7279 = vmatmul.msk.f32.gmra.mxu2 %vm492_vm0, %v2218_v2 }
 0x1ca   : > { %7200 = vmatmul.msk.f32.gmra.mxu0 %vm492_vm0, %v1654_v18  ;;  %v2502_v18 = vld [vmem:[#allocation2 + $0xb1] sm:$0xff] }
 0x1cb   : > { %v1588_v8 = vpop.f32.mrf.mxu3 }
 0x1cc   : > { %v1309_v6 = vpop.f32.mrf.mxu2  ;;  %v8980_v9 = vadd.f32 %v1588_v8, %v1354_v29 }
 0x1cd   : > { %v1065_v25 = vpop.f32.mrf.mxu1  ;;  %v1355_v23 = vadd.f32 %v1309_v6, %v1060_v0  ;;  %v9001_v6 = vld [vmem:[#allocation2 + $0xb2] sm:$0xff] }
 0x1ce   : > { %10430 = vst [vmem:[#allocation42_spill] sm:$0xff] %v8980_v9 }
 0x1cf   : > { %v856_v14 = vpop.f32.mrf.mxu0 }
 0x1d0   : > { %7319 = vmatmul.msk.f32.gmra.mxu3 %vm492_vm0, %v8575_v27  ;;  %7241 = vmatmul.msk.f32.gmra.mxu1 %vm492_vm0, %v8982_v13  ;;  %v1066_v33 = vadd.f32 %v1065_v25, %v856_v14  ;;  %v7348_v14 = vld [vmem:[%s10381_s1 + $0x230] sm:$0xff]  ;;  %v2503_v25 = vld [vmem:[#allocation2 + $0xc1] sm:$0xff] }
 0x1d1   : > { %7280 = vmatmul.msk.f32.gmra.mxu2 %vm492_vm0, %v2219_v40  ;;  %2919 = vmatpush.msra.mxu0 %v7348_v14 }
 0x1d2   : > { %7201 = vmatmul.msk.f32.gmra.mxu0 %vm492_vm0, %v1655_v10 }
 0x1d3   : > { %v1591_v59 = vpop.f32.mrf.mxu3 }
 0x1d4   : > { %v1312_v48 = vpop.f32.mrf.mxu2  ;;  %v8990_v12 = vadd.f32 %v1591_v59, %v1355_v23  ;;  %v2222_v59 = vld [vmem:[#allocation2 + $0xc8] sm:$0xff] }
 0x1d5   : > { %v1068_v17 = vpop.f32.mrf.mxu1  ;;  %v1356_v27 = vadd.f32 %v1312_v48, %v1063_v63  ;;  %v9013_v63 = vld [vmem:[#allocation2 + $0xc2] sm:$0xff] }
 0x1d6   : > { %10431 = vst [vmem:[#allocation43_spill] sm:$0xff] %v8990_v12 }
 0x1d7   : > { %v859_v15 = vpop.f32.mrf.mxu0 }
 0x1d8   : > { %7320 = vmatmul.msk.f32.gmra.mxu3 %vm492_vm0, %v2501_v34  ;;  %7242 = vmatmul.msk.f32.gmra.mxu1 %vm492_vm0, %v8992_v43  ;;  %v1069_v48 = vadd.f32 %v1068_v17, %v859_v15  ;;  %v2223_v15 = vld [vmem:[#allocation2 + $0xd8] sm:$0xff] }
 0x1d9   : > { %7281 = vmatmul.msk.f32.gmra.mxu2 %vm492_vm0, %v2220_v61 }
 0x1da   : > { %7202 = vmatmul.msk.f32.gmra.mxu0 %vm492_vm0, %v2501_v34 }
 0x1db   : > { %v1594_v51 = vpop.f32.mrf.mxu3 }
 0x1dc   : > { %v1315_v2 = vpop.f32.mrf.mxu2  ;;  %v8999_v4 = vadd.f32 %v1594_v51, %v1356_v27 }
 0x1dd   : > { %v1071_v8 = vpop.f32.mrf.mxu1  ;;  %v1357_v40 = vadd.f32 %v1315_v2, %v1066_v33 }
 0x1de   : > { %10432 = vst [vmem:[#allocation44_spill] sm:$0xff] %v8999_v4  ;;  %v3874_v4 = vld [vmem:[#allocation9 + $0x8] sm:$0xff] }
 0x1df   : > { %v862_v29 = vpop.f32.mrf.mxu0 }
 0x1e0   : > { %7321 = vmatmul.msk.f32.gmra.mxu3 %vm492_vm0, %v2502_v18  ;;  %7243 = vmatmul.msk.f32.gmra.mxu1 %vm492_vm0, %v9001_v6  ;;  %v1072_v17 = vadd.f32 %v1071_v8, %v862_v29  ;;  %v2224_v29 = vld [vmem:[#allocation2 + $0xe0] sm:$0xff]  ;;  %v985_v8 = vadd.f32 %v8596_v38, %v8601_v39 }
 0x1e1   : > { %7282 = vmatmul.msk.f32.gmra.mxu2 %vm492_vm0, %v2221_v19  ;;  %v2504_v19 = vld [vmem:[#allocation2 + $0xc9] sm:$0xff] }
 0x1e2   : > { %7203 = vmatmul.msk.f32.gmra.mxu0 %vm492_vm0, %v2502_v18 }
 0x1e3   : > { %v1597_v0 = vpop.f32.mrf.mxu3 }
 0x1e4   : > { %v1318_v10 = vpop.f32.mrf.mxu2  ;;  %v9008_v23 = vadd.f32 %v1597_v0, %v1357_v40  ;;  %v9022_v0 = vld [vmem:[#allocation2 + $0xca] sm:$0xff] }
 0x1e5   : > { %v1074_v61 = vpop.f32.mrf.mxu1  ;;  %v1358_v27 = vadd.f32 %v1318_v10, %v1069_v48  ;;  %v2505_v48 = vld [vmem:[#allocation2 + $0xd9] sm:$0xff] }
 0x1e6   : > { %10433 = vst [vmem:[#allocation45_spill] sm:$0xff] %v9008_v23 }
 0x1e7   : > { %v865_v34 = vpop.f32.mrf.mxu0 }
 0x1e8   : > { %7322 = vmatmul.msk.f32.gmra.mxu3 %vm492_vm0, %v2503_v25  ;;  %7244 = vmatmul.msk.f32.gmra.mxu1 %vm492_vm0, %v9013_v63 }
 0x1e9   : > { %7283 = vmatmul.msk.f32.gmra.mxu2 %vm492_vm0, %v2222_v59 }
 0x1ea   : > { %7204 = vmatmul.msk.f32.gmra.mxu0 %vm492_vm0, %v2503_v25 }
 0x1eb   : > { %v1600_v51 = vpop.f32.mrf.mxu3 }
 0x1ec   : > { %v1321_v2 = vpop.f32.mrf.mxu2  ;;  %v9020_v18 = vadd.f32 %v1600_v51, %v1358_v27  ;;  %v1075_v27 = vadd.f32 %v1074_v61, %v865_v34 }
 0x1ed   : > { %v1077_v40 = vpop.f32.mrf.mxu1  ;;  %v1359_v10 = vadd.f32 %v1321_v2, %v1072_v17  ;;  %v9033_v2 = vld [vmem:[#allocation2 + $0xda] sm:$0xff] }
 0x1ee   : > { %10434 = vst [vmem:[#allocation46_spill] sm:$0xff] %v9020_v18 }
 0x1ef   : > { %v868_v33 = vpop.f32.mrf.mxu0 }
 0x1f0   : > { %7323 = vmatmul.msk.f32.gmra.mxu3 %vm492_vm0, %v2504_v19  ;;  %7245 = vmatmul.msk.f32.gmra.mxu1 %vm492_vm0, %v9022_v0 }
 0x1f1   : > { %7284 = vmatmul.msk.f32.gmra.mxu2 %vm492_vm0, %v2223_v15  ;;  %v1330_v15 = vadd.f32 %v8613_v58, %v985_v8  ;;  %v2225_v58 = vld [vmem:[#allocation2 + $0xf0] sm:$0xff] }
 0x1f2   : > { %7205 = vmatmul.msk.f32.gmra.mxu0 %vm492_vm0, %v2504_v19  ;;  %v988_v19 = vadd.f32 %v8609_v45, %v8611_v46  ;;  %v2506_v46 = vld [vmem:[#allocation2 + $0xe1] sm:$0xff] }
 0x1f3   : > { %v1603_v14 = vpop.f32.mrf.mxu3  ;;  %v1612_v34 = vadd.f32 %v8628_v20, %v1330_v15  ;;  %v7347_v15 = vld [vmem:[%s10381_s1 + $0x228] sm:$0xff] }
 0x1f4   : > { %v1324_v25 = vpop.f32.mrf.mxu2  ;;  %v9029_v59 = vadd.f32 %v1603_v14, %v1359_v10  ;;  %v1331_v10 = vadd.f32 %v8630_v21, %v988_v19  ;;  %v1078_v14 = vadd.f32 %v1077_v40, %v868_v33  ;;  %v9048_v21 = vld [vmem:[#allocation2 + $0xe2] sm:$0xff]  ;;  %2920 = vmatpush.msra.mxu0 %v7347_v15 }
 0x1f5   : > { %v2080_v18 = vpop.f32.mrf.mxu1  ;;  %v1360_v17 = vadd.f32 %v1324_v25, %v1075_v27 }
 0x1f6   : > { %10435 = vst [vmem:[#allocation47_spill] sm:$0xff] %v9029_v59  ;;  %v1613_v45 = vadd.f32 %v8640_v30, %v1331_v10  ;;  %v2226_v10 = vld [vmem:[#allocation2 + $0xf8] sm:$0xff] }
 0x1f7   : > { %v1798_v51 = vpop.f32.mrf.mxu0 }
 0x1f8   : > { %7324 = vmatmul.msk.f32.gmra.mxu3 %vm492_vm0, %v2505_v48  ;;  %7246 = vmatmul.msk.f32.gmra.mxu1 %vm492_vm0, %v9033_v2  ;;  %v1894_v25 = vadd.f32 %v1798_v51, %v1612_v34  ;;  %v9060_v34 = vld [vmem:[#allocation2 + $0xf2] sm:$0xff] }
 0x1f9   : > { %7285 = vmatmul.msk.f32.gmra.mxu2 %vm492_vm0, %v2224_v29 }
 0x1fa   : > { %7206 = vmatmul.msk.f32.gmra.mxu0 %vm492_vm0, %v2505_v48  ;;  %v2176_v20 = vadd.f32 %v2080_v18, %v1894_v25 }
 0x1fb   : > { %v1606_v38 = vpop.f32.mrf.mxu3 }
 0x1fc   : > { %v1327_v39 = vpop.f32.mrf.mxu2  ;;  %v9045_v61 = vadd.f32 %v1606_v38, %v1360_v17  ;;  %v2507_v17 = vld [vmem:[#allocation2 + $0xf1] sm:$0xff] }
 0x1fd   : > { %v2083_v8 = vpop.f32.mrf.mxu1  ;;  %v1361_v27 = vadd.f32 %v1327_v39, %v1078_v14 }
 0x1fe   : > { %10436 = vst [vmem:[#allocation48_spill] sm:$0xff] %v9045_v61 }
 0x1ff   : > { %v1801_v29 = vpop.f32.mrf.mxu0 }
 0x200   : > { %v1895_v48 = vadd.f32 %v1801_v29, %v1613_v45  ;;  %7325 = vmatmul.msk.f32.gmra.mxu3 %vm492_vm0, %v2506_v46  ;;  %7247 = vmatmul.msk.f32.gmra.mxu1 %vm492_vm0, %v9048_v21  ;;  %v2227_v29 = vld [vmem:[#allocation2 + $0x108] sm:$0xff] }
 0x201   : > { %7286 = vmatmul.msk.f32.gmra.mxu2 %vm492_vm0, %v2225_v58 }
 0x202   : > { %v2177_v19 = vadd.f32 %v2083_v8, %v1895_v48  ;;  %7207 = vmatmul.msk.f32.gmra.mxu0 %vm492_vm0, %v2506_v46 }
 0x203   : > { %v1609_v30 = vpop.f32.mrf.mxu3 }
 0x204   : > { %v2363_v33 = vpop.f32.mrf.mxu2  ;;  %v9055_v40 = vadd.f32 %v1609_v30, %v1361_v27  ;;  %v1663_v27 = vld [vmem:[#allocation2 + $0xf9] sm:$0xff] }
 0x205   : > { %v2459_v51 = vadd.f32 %v2363_v33, %v2176_v20  ;;  %v2086_v39 = vpop.f32.mrf.mxu1 }
 0x206   : > { %10437 = vst [vmem:[#allocation49_spill] sm:$0xff] %v9055_v40 }
 0x207   : > { %v1804_v38 = vpop.f32.mrf.mxu0 }
 0x208   : > { %v1896_v45 = vadd.f32 %v1804_v38, %v8648_v47  ;;  %7326 = vmatmul.msk.f32.gmra.mxu3 %vm492_vm0, %v2507_v17  ;;  %7248 = vmatmul.msk.f32.gmra.mxu1 %vm492_vm0, %v9060_v34  ;;  %v9070_v47 = vld [vmem:[#allocation2 + $0xfa] sm:$0xff] }
 0x209   : > { %7287 = vmatmul.msk.f32.gmra.mxu2 %vm492_vm0, %v2226_v10 }
 0x20a   : > { %v2178_v18 = vadd.f32 %v2086_v39, %v1896_v45  ;;  %7208 = vmatmul.msk.f32.gmra.mxu0 %vm492_vm0, %v2507_v17  ;;  %v2228_v17 = vld [vmem:[#allocation2 + $0x110] sm:$0xff] }
 0x20b   : > { %v2645_v46 = vpop.f32.mrf.mxu3  ;;  %v9081_v39 = vld [vmem:[#allocation2 + $0x10a] sm:$0xff] }
 0x20c   : > { %v2366_v58 = vpop.f32.mrf.mxu2  ;;  %v9068_v14 = vadd.f32 %v2645_v46, %v2459_v51 }
 0x20d   : > { %v2460_v25 = vadd.f32 %v2366_v58, %v2177_v19  ;;  %v2089_v48 = vpop.f32.mrf.mxu1 }
 0x20f   : > { %v1807_v8 = vpop.f32.mrf.mxu0 }
 0x210   : > { %v1897_v20 = vadd.f32 %v1807_v8, %v8659_v22  ;;  %7327 = vmatmul.msk.f32.gmra.mxu3 %vm492_vm0, %v8650_v11  ;;  %7249 = vmatmul.msk.f32.gmra.mxu1 %vm492_vm0, %v9070_v47  ;;  %v1664_v22 = vld [vmem:[#allocation2 + $0x109] sm:$0xff] }
 0x211   : > { %7288 = vmatmul.msk.f32.gmra.mxu2 %vm492_vm0, %v2227_v29  ;;  %v2229_v29 = vld [vmem:[#allocation2 + $0x120] sm:$0xff] }
 0x212   : > { %v2179_v30 = vadd.f32 %v2089_v48, %v1897_v20  ;;  %7209 = vmatmul.msk.f32.gmra.mxu0 %vm492_vm0, %v1663_v27  ;;  %v9092_v27 = vld [vmem:[#allocation2 + $0x112] sm:$0xff] }
 0x213   : > { %v2648_v19 = vpop.f32.mrf.mxu3 }
 0x214   : > { %v2369_v33 = vpop.f32.mrf.mxu2  ;;  %v9079_v51 = vadd.f32 %v2648_v19, %v2460_v25 }
 0x215   : > { %v2461_v15 = vadd.f32 %v2369_v33, %v2178_v18  ;;  %v2092_v38 = vpop.f32.mrf.mxu1 }
 0x217   : > { %v1810_v10 = vpop.f32.mrf.mxu0 }
 0x218   : > { %v1898_v11 = vadd.f32 %v1810_v10, %v8673_v36  ;;  %7328 = vmatmul.msk.f32.gmra.mxu3 %vm492_vm0, %v8664_v32  ;;  %7250 = vmatmul.msk.f32.gmra.mxu1 %vm492_vm0, %v9081_v39  ;;  %v1665_v36 = vld [vmem:[#allocation2 + $0x111] sm:$0xff] }
 0x219   : > { %7289 = vmatmul.msk.f32.gmra.mxu2 %vm492_vm0, %v2228_v17  ;;  %v2230_v17 = vld [vmem:[#allocation2 + $0x128] sm:$0xff] }
 0x21a   : > { %v2180_v45 = vadd.f32 %v2092_v38, %v1898_v11  ;;  %7210 = vmatmul.msk.f32.gmra.mxu0 %vm492_vm0, %v1664_v22  ;;  %v1666_v38 = vld [vmem:[#allocation2 + $0x121] sm:$0xff] }
 0x21b   : > { %v2651_v18 = vpop.f32.mrf.mxu3  ;;  %v9106_v22 = vld [vmem:[#allocation2 + $0x122] sm:$0xff] }
 0x21c   : > { %v2372_v46 = vpop.f32.mrf.mxu2  ;;  %v9090_v58 = vadd.f32 %v2651_v18, %v2461_v15 }
 0x21d   : > { %v2462_v25 = vadd.f32 %v2372_v46, %v2179_v30  ;;  %v2095_v48 = vpop.f32.mrf.mxu1 }
 0x21f   : > { %v1813_v8 = vpop.f32.mrf.mxu0 }
 0x220   : > { %v1899_v32 = vadd.f32 %v1813_v8, %v8684_v7  ;;  %7329 = vmatmul.msk.f32.gmra.mxu3 %vm492_vm0, %v8675_v54  ;;  %7251 = vmatmul.msk.f32.gmra.mxu1 %vm492_vm0, %v9092_v27  ;;  %v7346_v7 = vld [vmem:[%s10381_s1 + $0x220] sm:$0xff]  ;;  %v2231_v8 = vld [vmem:[#allocation2 + $0x138] sm:$0xff] }
 0x221   : > { %7290 = vmatmul.msk.f32.gmra.mxu2 %vm492_vm0, %v2229_v29  ;;  %2921 = vmatpush.msra.mxu0 %v7346_v7 }
 0x222   : > { %v2181_v20 = vadd.f32 %v2095_v48, %v1899_v32  ;;  %7211 = vmatmul.msk.f32.gmra.mxu0 %vm492_vm0, %v1665_v36  ;;  %v9117_v32 = vld [vmem:[#allocation2 + $0x12a] sm:$0xff] }
 0x223   : > { %v2654_v30 = vpop.f32.mrf.mxu3 }
 0x224   : > { %v2375_v19 = vpop.f32.mrf.mxu2  ;;  %v9101_v33 = vadd.f32 %v2654_v30, %v2462_v25 }
 0x225   : > { %v2463_v15 = vadd.f32 %v2375_v19, %v2180_v45  ;;  %v2098_v10 = vpop.f32.mrf.mxu1  ;;  %v10439_v19 = vld [vmem:[#allocation25_spill] sm:$0xff] }
 0x227   : > { %v1816_v54 = vpop.f32.mrf.mxu0 }
 0x228   : > { %v1900_v11 = vadd.f32 %v1816_v54, %v8695_v31  ;;  %7330 = vmatmul.msk.f32.gmra.mxu3 %vm492_vm0, %v8686_v28  ;;  %7252 = vmatmul.msk.f32.gmra.mxu1 %vm492_vm0, %v9106_v22  ;;  %v1667_v31 = vld [vmem:[#allocation2 + $0x129] sm:$0xff] }
 0x229   : > { %7291 = vmatmul.msk.f32.gmra.mxu2 %vm492_vm0, %v2230_v17  ;;  %v10438_v28 = vld [vmem:[#allocation26_spill] sm:$0xff] }
 0x22a   : > { %v2182_v18 = vadd.f32 %v2098_v10, %v1900_v11  ;;  %7212 = vmatmul.msk.f32.gmra.mxu0 %vm492_vm0, %v1666_v38  ;;  %v2232_v10 = vld [vmem:[#allocation2 + $0x140] sm:$0xff] }
 0x22b   : > { %v2657_v45 = vpop.f32.mrf.mxu3  ;;  %v1668_v11 = vld [vmem:[#allocation2 + $0x139] sm:$0xff] }
 0x22c   : > { %v2378_v46 = vpop.f32.mrf.mxu2  ;;  %v9115_v25 = vadd.f32 %v2657_v45, %v2463_v15  ;;  %v9130_v45 = vld [vmem:[#allocation2 + $0x13a] sm:$0xff] }
 0x22d   : > { %v2464_v29 = vadd.f32 %v2378_v46, %v2181_v20  ;;  %v2101_v36 = vpop.f32.mrf.mxu1  ;;  %v10440_v46 = vld [vmem:[#allocation27_spill] sm:$0xff] }
 0x22f   : > { %v1819_v48 = vpop.f32.mrf.mxu0 }
 0x230   : > { %v1901_v30 = vadd.f32 %v1819_v48, %v10438_v28  ;;  %7331 = vmatmul.msk.f32.gmra.mxu3 %vm492_vm0, %v10439_v19  ;;  %7253 = vmatmul.msk.f32.gmra.mxu1 %vm492_vm0, %v9117_v32  ;;  %v1669_v28 = vld [vmem:[#allocation2 + $0x141] sm:$0xff] }
 0x231   : > { %7292 = vmatmul.msk.f32.gmra.mxu2 %vm492_vm0, %v2231_v8  ;;  %v10441_v19 = vld [vmem:[#allocation29_spill] sm:$0xff] }
 0x232   : > { %v2183_v7 = vadd.f32 %v2101_v36, %v1901_v30  ;;  %7213 = vmatmul.msk.f32.gmra.mxu0 %vm492_vm0, %v1667_v31  ;;  %v2233_v36 = vld [vmem:[#allocation2 + $0x150] sm:$0xff]  ;;  %v1951_v30 = vld [vmem:[#allocation2 + $0x142] sm:$0xff] }
 0x233   : > { %v2660_v20 = vpop.f32.mrf.mxu3 }
 0x234   : > { %v2381_v15 = vpop.f32.mrf.mxu2  ;;  %v9126_v17 = vadd.f32 %v2660_v20, %v2464_v29 }
 0x235   : > { %v2465_v54 = vadd.f32 %v2381_v15, %v2182_v18 }
 0x237   : > { %v9128_v38 = vpop.f32.mrf.mxu0 }
 0x238   : > { %7332 = vmatmul.msk.f32.gmra.mxu3 %vm492_vm0, %v10440_v46  ;;  %7254 = vmatmul.msk.f32.gmra.mxu1 %vm492_vm0, %v9130_v45  ;;  %v1952_v46 = vld [vmem:[#allocation2 + $0x152] sm:$0xff] }
 0x239   : > { %7293 = vmatmul.msk.f32.gmra.mxu2 %vm492_vm0, %v2232_v10 }
 0x23a   : > { %7214 = vmatmul.msk.f32.gmra.mxu0 %vm492_vm0, %v1668_v11  ;;  %v1670_v11 = vld [vmem:[#allocation2 + $0x151] sm:$0xff] }
 0x23b   : > { %v2663_v8 = vpop.f32.mrf.mxu3 }
 0x23c   : > { %v2384_v29 = vpop.f32.mrf.mxu2  ;;  %v9138_v48 = vadd.f32 %v2663_v8, %v2465_v54  ;;  %v2234_v54 = vld [vmem:[#allocation2 + $0x158] sm:$0xff]  ;;  %v10442_v8 = vld [vmem:[#allocation31_spill] sm:$0xff] }
 0x23d   : > { %v2466_v18 = vadd.f32 %v2384_v29, %v2183_v7  ;;  %v7345_v7 = vld [vmem:[%s10381_s1 + $0x218] sm:$0xff]  ;;  %v2235_v29 = vld [vmem:[#allocation2 + $0x168] sm:$0xff] }
 0x23e   : > { %2922 = vmatpush.msra.mxu0 %v7345_v7  ;;  %v1672_v7 = vld [vmem:[#allocation2 + $0x169] sm:$0xff] }
 0x23f   : > { %v9140_v31 = vpop.f32.mrf.mxu0 }
 0x240   : > { %7333 = vmatmul.msk.f32.gmra.mxu3 %vm492_vm0, %v10441_v19  ;;  %7255 = vmatmul.msk.f32.gmra.mxu1 %vm492_vm0, %v1951_v30  ;;  %v10443_v30 = vld [vmem:[#allocation33_spill] sm:$0xff]  ;;  %v2236_v19 = vld [vmem:[#allocation2 + $0x170] sm:$0xff] }
 0x241   : > { %7294 = vmatmul.msk.f32.gmra.mxu2 %vm492_vm0, %v2233_v36  ;;  %v1671_v36 = vld [vmem:[#allocation2 + $0x159] sm:$0xff] }
 0x242   : > { %7215 = vmatmul.msk.f32.gmra.mxu0 %vm492_vm0, %v1669_v28  ;;  %v9161_v28 = vld [vmem:[#allocation2 + $0x15a] sm:$0xff] }
 0x243   : > { %v2666_v20 = vpop.f32.mrf.mxu3 }
 0x244   : > { %v9147_v15 = vadd.f32 %v2666_v20, %v2466_v18 }
 0x247   : > { %v9152_v10 = vpop.f32.mrf.mxu0 }
 0x248   : > { %7334 = vmatmul.msk.f32.gmra.mxu3 %vm492_vm0, %v10442_v8  ;;  %7256 = vmatmul.msk.f32.gmra.mxu1 %vm492_vm0, %v1952_v46  ;;  %v7344_v8 = vld [vmem:[%s10381_s1 + $0x210] sm:$0xff] }
 0x249   : > { %7295 = vmatmul.msk.f32.gmra.mxu2 %vm492_vm0, %v2234_v54  ;;  %v1954_v54 = vld [vmem:[#allocation2 + $0x16a] sm:$0xff]  ;;  %2923 = vmatpush.msra.mxu0 %v7344_v8  ;;  %v2240_v8 = vld [vmem:[#allocation2 + $0x1a0] sm:$0xff] }
 0x24a   : > { %7216 = vmatmul.msk.f32.gmra.mxu0 %vm492_vm0, %v1670_v11  ;;  %v2237_v11 = vld [vmem:[#allocation2 + $0x180] sm:$0xff] }
 0x24f   : > { %v9159_v18 = vpop.f32.mrf.mxu0 }
 0x250   : > { %7335 = vmatmul.msk.f32.gmra.mxu3 %vm492_vm0, %v10443_v30  ;;  %7257 = vmatmul.msk.f32.gmra.mxu1 %vm492_vm0, %v9161_v28 }
 0x251   : > { %7296 = vmatmul.msk.f32.gmra.mxu2 %vm492_vm0, %v2235_v29  ;;  %v7342_v29 = vld [vmem:[%s10381_s1 + $0x200] sm:$0xff] }
 0x252   : > { %7217 = vmatmul.msk.f32.gmra.mxu0 %vm492_vm0, %v1671_v36  ;;  %v2519_v36 = vld [vmem:[#allocation2 + $0x181] sm:$0xff] }
 0x257   : > { %v9169_v20 = vpop.f32.mrf.mxu0 }
 0x258   : > { %7336 = vmatmul.msk.f32.gmra.mxu3 %vm492_vm0, %v8829_v37  ;;  %7258 = vmatmul.msk.f32.gmra.mxu1 %vm492_vm0, %v1954_v54  ;;  %v7343_v37 = vld [vmem:[%s10381_s1 + $0x208] sm:$0xff] }
 0x259   : > { %7297 = vmatmul.msk.f32.gmra.mxu2 %vm492_vm0, %v2236_v19  ;;  %2924 = vmatpush.msra.mxu0 %v7343_v37  ;;  %v1956_v19 = vld [vmem:[#allocation2 + $0x182] sm:$0xff]  ;;  %v1957_v54 = vld [vmem:[#allocation2 + $0x18a] sm:$0xff]  ;;  %v2773_v37 = vld [vmem:[#allocation2 + $0x32] sm:$0xff] }
 0x25a   : > { %7218 = vmatmul.msk.f32.gmra.mxu0 %vm492_vm0, %v1672_v7 }
 0x25b   : > { %2925 = vmatpush.msra.mxu0 %v7342_v29  ;;  %v2522_v29 = vld [vmem:[#allocation2 + $0x1a1] sm:$0xff] }
 0x25f   : > { %v9176_v46 = vpop.f32.mrf.mxu0 }
 0x260   : > { %7337 = vmatmul.msk.f32.gmra.mxu3 %vm492_vm0, %v8855_v42  ;;  %7259 = vmatmul.msk.f32.gmra.mxu1 %vm492_vm0, %v8864_v3  ;;  %v2239_v3 = vld [vmem:[#allocation2 + $0x198] sm:$0xff] }
 0x261   : > { %7298 = vmatmul.msk.f32.gmra.mxu2 %vm492_vm0, %v2237_v11  ;;  %v2521_v11 = vld [vmem:[#allocation2 + $0x199] sm:$0xff] }
 0x262   : > { %7219 = vmatmul.msk.f32.gmra.mxu0 %vm492_vm0, %v8855_v42  ;;  %v2520_v42 = vld [vmem:[#allocation2 + $0x189] sm:$0xff] }
 0x267   : > { %v9194_v30 = vpop.f32.mrf.mxu0 }
 0x268   : > { %7338 = vmatmul.msk.f32.gmra.mxu3 %vm492_vm0, %v2519_v36  ;;  %7260 = vmatmul.msk.f32.gmra.mxu1 %vm492_vm0, %v1956_v19  ;;  %v2774_v19 = vld [vmem:[#allocation2 + $0x3a] sm:$0xff] }
 0x269   : > { %7299 = vmatmul.msk.f32.gmra.mxu2 %vm492_vm0, %v8875_v26 }
 0x26a   : > { %7220 = vmatmul.msk.f32.gmra.mxu0 %vm492_vm0, %v2519_v36 }
 0x26f   : > { %v9201_v7 = vpop.f32.mrf.mxu0 }
 0x270   : > { %7339 = vmatmul.msk.f32.gmra.mxu3 %vm492_vm0, %v2520_v42  ;;  %7261 = vmatmul.msk.f32.gmra.mxu1 %vm492_vm0, %v1957_v54 }
 0x271   : > { %7300 = vmatmul.msk.f32.gmra.mxu2 %vm492_vm0, %v2239_v3  ;;  %v2775_v3 = vld [vmem:[#allocation2 + $0x4a] sm:$0xff] }
 0x272   : > { %7221 = vmatmul.msk.f32.gmra.mxu0 %vm492_vm0, %v2520_v42 }
 0x277   : > { %v9207_v26 = vpop.f32.mrf.mxu0 }
 0x278   : > { %10444 = vst [vmem:[#allocation26_spill] sm:$0xff] %v9207_v26  ;;  %7340 = vmatmul.msk.f32.gmra.mxu3 %vm492_vm0, %v2521_v11  ;;  %v2776_v11 = vld [vmem:[#allocation2 + $0x52] sm:$0xff] }
 0x279   : > { %7301 = vmatmul.msk.f32.gmra.mxu2 %vm492_vm0, %v2240_v8 }
 0x27a   : > { %7350 = vmatmul.msk.f32.vlgmr.msra.gmra.mxu0 %vm492_vm0, %v2773_v37  ;;  %v2777_v37 = vld [vmem:[#allocation2 + $0x62] sm:$0xff] }
 0x27f   : > { %v9212_v36 = vpop.f32.mrf.mxu0 }
 0x280   : > { %10445 = vst [vmem:[#allocation25_spill] sm:$0xff] %v9212_v36  ;;  %7341 = vmatmul.msk.f32.gmra.mxu3 %vm492_vm0, %v2522_v29 }
 0x282   : > { %7351 = vmatmul.msk.f32.gmra.mxu0 %vm492_vm0, %v2774_v19 }
 0x287   : > { %v9216_v42 = vpop.f32.mrf.mxu0 }
 0x288   : > { %10446 = vst [vmem:[#allocation27_spill] sm:$0xff] %v9216_v42 }
 0x28a   : > { %7352 = vmatmul.msk.f32.gmra.mxu0 %vm492_vm0, %v2775_v3 }
 0x28f   : > { %v9219_v54 = vpop.f32.mrf.mxu0 }
 0x290   : > { %10447 = vst [vmem:[#allocation29_spill] sm:$0xff] %v9219_v54 }
 0x292   : > { %7353 = vmatmul.msk.f32.gmra.mxu0 %vm492_vm0, %v2776_v11 }
 0x297   : > { %v9222_v8 = vpop.f32.mrf.mxu0 }
 0x298   : > { %10448 = vst [vmem:[#allocation31_spill] sm:$0xff] %v9222_v8 }
 0x29a   : > { %7354 = vmatmul.msk.f32.gmra.mxu0 %vm492_vm0, %v2777_v37  ;;  %v10460_v37 = vmov 0.0  }
 0x29b   : > { %3702 = vst.msk [vmem:[#allocation3 + $0x8] sm:$0x3] %vm3251_vm2, %v10460_v37 }
 0x29c   : > { %3704 = vst.msk [vmem:[#allocation3 + $0x18] sm:$0x3] %vm3251_vm2, %v10460_v37 }
 0x29d   : > { %3706 = vst.msk [vmem:[#allocation3 + $0x28] sm:$0x3] %vm3251_vm2, %v10460_v37 }
 0x29e   : > { %3708 = vst.msk [vmem:[#allocation3 + $0x38] sm:$0x3] %vm3251_vm2, %v10460_v37 }
 0x29f   : > { %v9225_v40 = vpop.f32.mrf.mxu0  ;;  %3710 = vst.msk [vmem:[#allocation3 + $0x48] sm:$0x3] %vm3251_vm2, %v10460_v37 }
 0x2a0   : > { %10449 = vst [vmem:[#allocation33_spill] sm:$0xff] %v9225_v40 }
 0x2a1   : > { %3712 = vst.msk [vmem:[#allocation3 + $0x58] sm:$0x3] %vm3251_vm2, %v10460_v37 }
 0x2a2   : > { %7355 = vmatmul.msk.f32.gmra.mxu0 %vm492_vm0, %v8937_v53  ;;  %3714 = vst.msk [vmem:[#allocation3 + $0x68] sm:$0x3] %vm3251_vm2, %v10460_v37 }
 0x2a3   : > { %3716 = vst.msk [vmem:[#allocation3 + $0x78] sm:$0x3] %vm3251_vm2, %v10460_v37 }
 0x2a4   : > { %3718 = vst.msk [vmem:[#allocation3 + $0x88] sm:$0x3] %vm3251_vm2, %v10460_v37 }
 0x2a5   : > { %3720 = vst.msk [vmem:[#allocation3 + $0x98] sm:$0x3] %vm3251_vm2, %v10460_v37 }
 0x2a6   : > { %3703 = vst.msk [vmem:[#allocation3 + $0x10] sm:$0xff] %vm3700_vm3, %v10460_v37 }
 0x2a7   : > { %v9229_v29 = vpop.f32.mrf.mxu0  ;;  %3701 = vst.msk [vmem:[#allocation3] sm:$0xff] %vm3700_vm3, %v10460_v37 }
 0x2a8   : > { %10450 = vst [vmem:[#allocation50_spill] sm:$0xff] %v9229_v29 }
 0x2a9   : > { %3705 = vst.msk [vmem:[#allocation3 + $0x20] sm:$0xff] %vm3700_vm3, %v10460_v37 }
 0x2aa   : > { %7356 = vmatmul.msk.f32.gmra.mxu0 %vm492_vm0, %v8948_v57  ;;  %3707 = vst.msk [vmem:[#allocation3 + $0x30] sm:$0xff] %vm3700_vm3, %v10460_v37 }
 0x2ab   : > { %3709 = vst.msk [vmem:[#allocation3 + $0x40] sm:$0xff] %vm3700_vm3, %v10460_v37 }
 0x2ac   : > { %3711 = vst.msk [vmem:[#allocation3 + $0x50] sm:$0xff] %vm3700_vm3, %v10460_v37 }
 0x2ad   : > { %3713 = vst.msk [vmem:[#allocation3 + $0x60] sm:$0xff] %vm3700_vm3, %v10460_v37 }
 0x2ae   : > { %3715 = vst.msk [vmem:[#allocation3 + $0x70] sm:$0xff] %vm3700_vm3, %v10460_v37  ;;  %v3877_v55 = vld [vmem:[#allocation3 + $0x1] sm:$0xff] }
 0x2af   : > { %v9233_v19 = vpop.f32.mrf.mxu0  ;;  %3717 = vst.msk [vmem:[#allocation3 + $0x80] sm:$0xff] %vm3700_vm3, %v10460_v37  ;;  %v3865_v29 = vld [vmem:[#allocation3] sm:$0xff] }
 0x2b0   : > { %10451 = vst [vmem:[#allocation51_spill] sm:$0xff] %v9233_v19  ;;  %v3886_v19 = vld [vmem:[#allocation9 + $0x20] sm:$0xff] }
 0x2b1   : > { %3719 = vst.msk [vmem:[#allocation3 + $0x90] sm:$0xff] %vm3700_vm3, %v10460_v37  ;;  %v4020_v41 = vld [vmem:[#allocation3 + $0x2] sm:$0xff] }
 0x2b2   : > { %7357 = vmatmul.msk.f32.gmra.mxu0 %vm492_vm0, %v8959_v24 }
 0x2b7   : > { %v9237_v3 = vpop.f32.mrf.mxu0 }
 0x2b8   : > { %10452 = vst [vmem:[#allocation52_spill] sm:$0xff] %v9237_v3  ;;  %v4030_v3 = vld [vmem:[#allocation9 + $0x48] sm:$0xff] }
 0x2ba   : > { %7358 = vmatmul.msk.f32.gmra.mxu0 %vm492_vm0, %v8972_v62 }
 0x2bf   : > { %v9241_v11 = vpop.f32.mrf.mxu0 }
 0x2c0   : > { %10453 = vst [vmem:[#allocation53_spill] sm:$0xff] %v9241_v11 }
 0x2c2   : > { %7359 = vmatmul.msk.f32.gmra.mxu0 %vm492_vm0, %v8982_v13 }
 0x2c7   : > { %v9245_v53 = vpop.f32.mrf.mxu0 }
 0x2c8   : > { %10454 = vst [vmem:[#allocation54_spill] sm:$0xff] %v9245_v53 }
 0x2ca   : > { %7360 = vmatmul.msk.f32.gmra.mxu0 %vm492_vm0, %v8992_v43 }
 0x2cf   : > { %v9249_v57 = vpop.f32.mrf.mxu0 }
 0x2d0   : > { %10455 = vst [vmem:[#allocation55_spill] sm:$0xff] %v9249_v57  ;;  %v4031_v57 = vld [vmem:[#allocation9 + $0x50] sm:$0xff] }
 0x2d2   : > { %7361 = vmatmul.msk.f32.gmra.mxu0 %vm492_vm0, %v9001_v6 }
 0x2d7   : > { %v9253_v24 = vpop.f32.mrf.mxu0 }
 0x2d8   : > { %10456 = vst [vmem:[#allocation56_spill] sm:$0xff] %v9253_v24 }
 0x2da   : > { %7362 = vmatmul.msk.f32.gmra.mxu0 %vm492_vm0, %v9013_v63 }
 0x2df   : > { %v9257_v62 = vpop.f32.mrf.mxu0 }
 0x2e0   : > { %10457 = vst [vmem:[#allocation57_spill] sm:$0xff] %v9257_v62  ;;  %v9300_v62 = vpop.f32.mrf.mxu3 }
 0x2e2   : > { %7363 = vmatmul.msk.f32.gmra.mxu0 %vm492_vm0, %v9022_v0  ;;  %v9291_v0 = vpop.f32.mrf.mxu1 }
 0x2e7   : > { %v9261_v13 = vpop.f32.mrf.mxu0 }
 0x2e8   : > { %10458 = vst [vmem:[#allocation58_spill] sm:$0xff] %v9261_v13 }
 0x2ea   : > { %7364 = vmatmul.msk.f32.gmra.mxu0 %vm492_vm0, %v9033_v2  ;;  %v9293_v2 = vpop.f32.mrf.mxu2  ;;  %v9306_v61 = vpop.f32.mrf.mxu1 }
 0x2ef   : > { %v9265_v43 = vpop.f32.mrf.mxu0 }
 0x2f0   : > { %10459 = vst [vmem:[#allocation59_spill] sm:$0xff] %v9265_v43  ;;  %v9298_v43 = vld [vmem:[#allocation7] ss:$0 sm:$0xff] }
 0x2f2   : > { %7365 = vmatmul.msk.f32.gmra.mxu0 %vm492_vm0, %v9048_v21 }
 0x2f7   : > { %v2927_v6 = vpop.f32.mrf.mxu0 }
 0x2f8   : > { %v3023_v21 = vadd.f32 %v2927_v6, %v9068_v14  ;;  %v9315_v14 = vpop.f32.mrf.mxu2  ;;  %v4032_v6 = vld [vmem:[#allocation9 + $0x58] sm:$0xff] }
 0x2f9   : > { %4069 = vmatpush.msra.mxu3 %v4032_v6 }
 0x2fa   : > { %7366 = vmatmul.msk.f32.gmra.mxu0 %vm492_vm0, %v9060_v34  ;;  %v3059_v34 = vadd.f32 %v9298_v43, %v3023_v21  ;;  %v3889_v21 = vld [vmem:[#allocation9 + $0x38] sm:$0xff] }
 0x2fb   : > { %3926 = vmatpush.msra.mxu1 %v3889_v21  ;;  %4070 = vmatpush.msra.mxu3 %v4031_v57 }
 0x2fd   : > { %4071 = vmatpush.msra.mxu3 %v4030_v3 }
 0x2ff   : > { %v2930_v63 = vpop.f32.mrf.mxu0 }
 0x300   : > { %v3024_v23 = vadd.f32 %v2930_v63, %v9079_v51 }
 0x302   : > { %7367 = vmatmul.msk.f32.gmra.mxu0 %vm492_vm0, %v9070_v47 }
 0x307   : > { %v2933_v59 = vpop.f32.mrf.mxu0 }
 0x308   : > { %v3025_v13 = vadd.f32 %v2933_v59, %v9090_v58  ;;  %v3091_v59 = vmax.f32 %v3059_v34, 0.0  ;;  %v3876_v58 = vld [vmem:[#allocation9 + $0x18] sm:$0xff]  ;;  %v9326_v34 = vpop.f32.mrf.mxu3 }
 0x309   : > { %3991 = vmatpush.msra.mxu2 %v3876_v58 }
 0x30a   : > { %v3061_v24 = vadd.f32 %v9298_v43, %v3025_v13  ;;  %7368 = vmatmul.msk.f32.gmra.mxu0 %vm492_vm0, %v9081_v39  ;;  %v3888_v39 = vld [vmem:[#allocation9 + $0x30] sm:$0xff] }
 0x30b   : > { %v3875_v13 = vld [vmem:[#allocation9 + $0x10] sm:$0xff]  ;;  %3927 = vmatpush.msra.mxu1 %v3888_v39 }
 0x30c   : > { %v3093_v47 = vmax.f32 %v3061_v24, 0.0  ;;  %3992 = vmatpush.msra.mxu2 %v3875_v13 }
 0x30e   : > { %v3123_v11 = vmax.f32 %v3091_v59, %v3093_v47  ;;  %v3060_v59 = vadd.f32 %v9298_v43, %v3024_v23  ;;  %v9342_v23 = vpop.f32.mrf.mxu1  ;;  %3993 = vmatpush.msra.mxu2 %v3874_v4 }
 0x30f   : > { %v2936_v24 = vpop.f32.mrf.mxu0 }
 0x310   : > { %v3155_v58 = vrot.slane %v3123_v11, 2  ;;  %v3156_v6 = vrot.slane %v3123_v11, 4  ;;  %v3157_v12 = vrot.slane %v3123_v11, 6  ;;  %v3252_v53 = vsel %vm3251_vm2, %v3123_v11, -inf }
 0x311   : > { %v3253_v51 = vrot.slane %v3252_v53, 4  ;;  %v3026_v63 = vadd.f32 %v2936_v24, %v9101_v33  ;;  %v3887_v24 = vld [vmem:[#allocation9 + $0x28] sm:$0xff]  ;;  %v3092_v49 = vmax.f32 %v3060_v59, 0.0 }
 0x312   : > { %v3259_v57 = vsel %vm3251_vm2, %v3155_v58, -inf  ;;  %v3266_v47 = vsel %vm3251_vm2, %v3156_v6, -inf  ;;  %v3273_v21 = vsel %vm3251_vm2, %v3157_v12, -inf  ;;  %7369 = vmatmul.msk.f32.gmra.mxu0 %vm492_vm0, %v9092_v27  ;;  %3928 = vmatpush.msra.mxu1 %v3887_v24  ;;  %v3873_v27 = vld [vmem:[#allocation9] sm:$0xff] }
 0x313   : > { %v3254_v11 = vmax.f32 %v3252_v53, %v3253_v51  ;;  %v3260_v39 = vrot.slane %v3259_v57, 4  ;;  %v3267_v33 = vrot.slane %v3266_v47, 4  ;;  %v3274_v13 = vrot.slane %v3273_v21, 4  ;;  %v4029_v53 = vld [vmem:[#allocation9 + $0x40] sm:$0xff]  ;;  %v9345_v51 = vpop.f32.mrf.mxu2  ;;  %3994 = vmatpush.msra.mxu2 %v3873_v27 }
 0x314   : > { %v3062_v58 = vadd.f32 %v9298_v43, %v3026_v63  ;;  %3929 = vmatpush.msra.mxu1 %v3886_v19  ;;  %4072 = vmatpush.msra.mxu3 %v4029_v53  ;;  %v9350_v19 = vpop.f32.mrf.mxu3 }
 0x315   : > { %v3255_v12 = vrot.slane %v3254_v11, 2  ;;  %v3261_v6 = vmax.f32 %v3259_v57, %v3260_v39  ;;  %v3268_v9 = vmax.f32 %v3266_v47, %v3267_v33  ;;  %v3275_v37 = vmax.f32 %v3273_v21, %v3274_v13  ;;  %7382 = vmatmul.msk.f32.vlgmr.msra.gmra.mxu1 %vm3700_vm3, %v3877_v55  ;;  %7390 = vmatmul.msk.f32.vlgmr.msra.gmra.mxu2 %vm3700_vm3, %v3865_v29 }
 0x316   : > { %v3094_v40 = vmax.f32 %v3062_v58, 0.0  ;;  %7398 = vmatmul.msk.f32.vlgmr.msra.gmra.mxu3 %vm3700_vm3, %v4020_v41  ;;  %v9358_v27 = vpop.f32.mrf.mxu1 }
 0x317   : > { %v3256_v63 = vmax.f32 %v3254_v11, %v3255_v12  ;;  %v3262_v24 = vrot.slane %v3261_v6, 2  ;;  %v3269_v4 = vrot.slane %v3268_v9, 2  ;;  %v2939_v8 = vpop.f32.mrf.mxu0  ;;  %v3276_v47 = vrot.slane %v3275_v37, 2 }
 0x318   : > { %v3124_v3 = vmax.f32 %v3092_v49, %v3094_v40 }
 0x319   : > { %v3263_v57 = vmax.f32 %v3261_v6, %v3262_v24  ;;  %v3270_v59 = vmax.f32 %v3268_v9, %v3269_v4  ;;  %v3257_v13 = vrot.slane %v3256_v63, 1  ;;  %v3277_v12 = vmax.f32 %v3275_v37, %v3276_v47 }
 0x31a   : > { %v3158_v21 = vrot.slane %v3124_v3, 2  ;;  %v3159_v39 = vrot.slane %v3124_v3, 4  ;;  %v3160_v33 = vrot.slane %v3124_v3, 6  ;;  %v3280_v11 = vsel %vm3251_vm2, %v3124_v3, -inf  ;;  %7370 = vmatmul.msk.f32.gmra.mxu0 %vm492_vm0, %v9106_v22 }
 0x31b   : > { %v3264_v55 = vrot.slane %v3263_v57, 1  ;;  %v3271_v49 = vrot.slane %v3270_v59, 1  ;;  %v3281_v40 = vrot.slane %v3280_v11, 4  ;;  %v3258_v22 = vmax.f32 %v3256_v63, %v3257_v13  ;;  %v9360_v54 = vpop.f32.mrf.mxu2 }
 0x31c   : > { %v3287_v29 = vsel %vm3251_vm2, %v3158_v21, -inf  ;;  %v3294_v41 = vsel %vm3251_vm2, %v3159_v39, -inf  ;;  %v3301_v9 = vsel %vm3251_vm2, %v3160_v33, -inf  ;;  %v3278_v56 = vrot.slane %v3277_v12, 1  ;;  %v9366_v13 = vpop.f32.mrf.mxu3 }
 0x31d   : > { %v3265_v58 = vmax.f32 %v3263_v57, %v3264_v55  ;;  %v3288_v6 = vrot.slane %v3287_v29, 4  ;;  %v3282_v53 = vmax.f32 %v3280_v11, %v3281_v40  ;;  %v3295_v24 = vrot.slane %v3294_v41, 4 }
 0x31e   : > { %v3302_v4 = vrot.slane %v3301_v9, 4  ;;  %v3272_v1 = vmax.f32 %v3270_v59, %v3271_v49  ;;  %v3027_v11 = vadd.f32 %v2939_v8, %v9115_v25  ;;  %v9370_v8 = vpop.f32.mrf.mxu1 }
 0x31f   : > { %v3289_v3 = vmax.f32 %v3287_v29, %v3288_v6  ;;  %v2942_v5 = vpop.f32.mrf.mxu0  ;;  %v3283_v21 = vrot.slane %v3282_v53, 2  ;;  %v3296_v36 = vmax.f32 %v3294_v41, %v3295_v24  ;;  %v3786_v57 = vsel %vm3785_vm4, %v3265_v58, %v3258_v22 }
 0x320   : > { %v3303_v39 = vmax.f32 %v3301_v9, %v3302_v4  ;;  %v3788_v59 = vsel %vm3787_vm5, %v3272_v1, %v3786_v57  ;;  %v3279_v41 = vmax.f32 %v3277_v12, %v3278_v56 }
 0x321   : > { %v3290_v37 = vrot.slane %v3289_v3, 2  ;;  %v3284_v47 = vmax.f32 %v3282_v53, %v3283_v21  ;;  %v3297_v33 = vrot.slane %v3296_v36, 2 }
 0x322   : > { %v3304_v55 = vrot.slane %v3303_v39, 2  ;;  %7371 = vmatmul.msk.f32.gmra.mxu0 %vm492_vm0, %v9117_v32  ;;  %v3790_v32 = vsel %vm3789_vm6, %v3279_v41, %v3788_v59 }
 0x323   : > { %v3291_v63 = vmax.f32 %v3289_v3, %v3290_v37  ;;  %v3285_v49 = vrot.slane %v3284_v47, 1  ;;  %v3298_v40 = vmax.f32 %v3296_v36, %v3297_v33  ;;  %v3063_v36 = vadd.f32 %v9298_v43, %v3027_v11  ;;  %v9376_v3 = vpop.f32.mrf.mxu2  ;;  %v2796_v11 = vld [vmem:[#allocation2 + $0x142] sm:$0xff] }
 0x324   : > { %v3305_v29 = vmax.f32 %v3303_v39, %v3304_v55  ;;  %v9384_v33 = vpop.f32.mrf.mxu3 }
 0x325   : > { %v3292_v9 = vrot.slane %v3291_v63, 1  ;;  %v3286_v58 = vmax.f32 %v3284_v47, %v3285_v49  ;;  %v3299_v6 = vrot.slane %v3298_v40, 1  ;;  %v3095_v37 = vmax.f32 %v3063_v36, 0.0 }
 0x326   : > { %v3306_v53 = vrot.slane %v3305_v29, 1 }
 0x327   : > { %v3293_v24 = vmax.f32 %v3291_v63, %v3292_v9  ;;  %v2945_v25 = vpop.f32.mrf.mxu0  ;;  %v3300_v4 = vmax.f32 %v3298_v40, %v3299_v6  ;;  %v3792_v1 = vsel %vm3791_vm7, %v3286_v58, %v3790_v32  ;;  %v9389_v9 = vpop.f32.mrf.mxu1 }
 0x328   : > { %v3029_v56 = vadd.f32 %v2945_v25, %v9138_v48  ;;  %v3307_v12 = vmax.f32 %v3305_v29, %v3306_v53  ;;  %v3028_v48 = vadd.f32 %v2942_v5, %v9126_v17 }
 0x329   : > { %v3794_v22 = vsel %vm3793_vm8, %v3293_v24, %v3792_v1 }
 0x32a   : > { %v3796_v21 = vsel %vm3795_vm9, %v3300_v4, %v3794_v22  ;;  %v3065_v39 = vadd.f32 %v9298_v43, %v3029_v56  ;;  %7372 = vmatmul.msk.f32.gmra.mxu0 %vm492_vm0, %v9130_v45  ;;  %v3064_v58 = vadd.f32 %v9298_v43, %v3028_v48 }
 0x32b   : > { %v3798_v57 = vsel %vm3797_vm10, %v3307_v12, %v3796_v21  ;;  %v9398_v12 = vpop.f32.mrf.mxu2 }
 0x32c   : > { %3857 = vst.msk [vmem:[#allocation3 + $0x11] sm:$0xff] %vm3700_vm3, %v3798_v57  ;;  %v3097_v47 = vmax.f32 %v3065_v39, 0.0 }
 0x32e   : > { %v3125_v55 = vmax.f32 %v3095_v37, %v3097_v47  ;;  %v3096_v47 = vmax.f32 %v3064_v58, 0.0  ;;  %v10462_v58 = vld [vmem:[#allocation32_spill] sm:$0xff] }
 0x32f   : > { %v2948_v63 = vpop.f32.mrf.mxu0 }
 0x330   : > { %v3161_v59 = vrot.slane %v3125_v55, 2  ;;  %v3162_v49 = vrot.slane %v3125_v55, 4  ;;  %v3163_v40 = vrot.slane %v3125_v55, 6  ;;  %v3308_v29 = vsel %vm3251_vm2, %v3125_v55, -inf }
 0x331   : > { %v3309_v41 = vrot.slane %v3308_v29, 4  ;;  %v3030_v45 = vadd.f32 %v2948_v63, %v9147_v15  ;;  %v10461_v15 = vld [vmem:[#allocation28_spill] sm:$0xff] }
 0x332   : > { %v3315_v6 = vsel %vm3251_vm2, %v3161_v59, -inf  ;;  %v3322_v53 = vsel %vm3251_vm2, %v3162_v49, -inf  ;;  %v3329_v5 = vsel %vm3251_vm2, %v3163_v40, -inf  ;;  %7373 = vmatmul.msk.f32.gmra.mxu0 %vm492_vm0, %v2796_v11  ;;  %v1902_v56 = vadd.f32 %v9128_v38, %v10461_v15  ;;  %v2797_v59 = vld [vmem:[#allocation2 + $0x152] sm:$0xff]  ;;  %v9404_v49 = vpop.f32.mrf.mxu3 }
 0x333   : > { %v3310_v17 = vmax.f32 %v3308_v29, %v3309_v41  ;;  %v3316_v32 = vrot.slane %v3315_v6, 4  ;;  %v3323_v24 = vrot.slane %v3322_v53, 4  ;;  %v3330_v25 = vrot.slane %v3329_v5, 4  ;;  %v3878_v4 = vld [vmem:[#allocation3 + $0x11] sm:$0xff] }
 0x334   : > { %v3866_v1 = vld [vmem:[#allocation3 + $0x10] sm:$0xff]  ;;  %v3066_v22 = vadd.f32 %v9298_v43, %v3030_v45  ;;  %7383 = vmatmul.msk.f32.gmra.mxu1 %vm3700_vm3, %v3878_v4  ;;  %v2184_v29 = vadd.f32 %v9291_v0, %v1902_v56 }
 0x335   : > { %v4021_v36 = vld [vmem:[#allocation3 + $0x12] sm:$0xff]  ;;  %7391 = vmatmul.msk.f32.gmra.mxu2 %vm3700_vm3, %v3866_v1  ;;  %v3311_v21 = vrot.slane %v3310_v17, 2  ;;  %v3317_v39 = vmax.f32 %v3315_v6, %v3316_v32  ;;  %v3324_v57 = vmax.f32 %v3322_v53, %v3323_v24  ;;  %v3331_v37 = vmax.f32 %v3329_v5, %v3330_v25 }
 0x336   : > { %7399 = vmatmul.msk.f32.gmra.mxu3 %vm3700_vm3, %v4021_v36  ;;  %v3098_v48 = vmax.f32 %v3066_v22, 0.0  ;;  %v9411_v36 = vpop.f32.mrf.mxu1 }
 0x337   : > { %v3312_v55 = vmax.f32 %v3310_v17, %v3311_v21  ;;  %v3318_v63 = vrot.slane %v3317_v39, 2  ;;  %v3325_v11 = vrot.slane %v3324_v57, 2  ;;  %v2951_v38 = vpop.f32.mrf.mxu0  ;;  %v3332_v4 = vrot.slane %v3331_v37, 2 }
 0x338   : > { %v3126_v40 = vmax.f32 %v3096_v47, %v3098_v48  ;;  %v1904_v17 = vadd.f32 %v9152_v10, %v10462_v58  ;;  %v2467_v21 = vadd.f32 %v9293_v2, %v2184_v29  ;;  %v9417_v48 = vpop.f32.mrf.mxu2 }
 0x339   : > { %v3319_v41 = vmax.f32 %v3317_v39, %v3318_v63  ;;  %v3326_v45 = vmax.f32 %v3324_v57, %v3325_v11  ;;  %v3313_v24 = vrot.slane %v3312_v55, 1  ;;  %v3333_v57 = vmax.f32 %v3331_v37, %v3332_v4 }
 0x33a   : > { %v3164_v6 = vrot.slane %v3126_v40, 2  ;;  %v3165_v53 = vrot.slane %v3126_v40, 4  ;;  %v3166_v5 = vrot.slane %v3126_v40, 6  ;;  %v3336_v32 = vsel %vm3251_vm2, %v3126_v40, -inf  ;;  %7374 = vmatmul.msk.f32.gmra.mxu0 %vm492_vm0, %v2797_v59  ;;  %v10463_v59 = vld [vmem:[#allocation30_spill] sm:$0xff] }
 0x33b   : > { %v3320_v25 = vrot.slane %v3319_v41, 1  ;;  %v3327_v1 = vrot.slane %v3326_v45, 1  ;;  %v3337_v15 = vrot.slane %v3336_v32, 4  ;;  %v1903_v40 = vadd.f32 %v9140_v31, %v10463_v59 }
 0x33c   : > { %v3343_v0 = vsel %vm3251_vm2, %v3164_v6, -inf  ;;  %v3350_v56 = vsel %vm3251_vm2, %v3165_v53, -inf  ;;  %v3357_v22 = vsel %vm3251_vm2, %v3166_v5, -inf  ;;  %v2186_v58 = vadd.f32 %v9342_v23, %v1904_v17 }
 0x33d   : > { %v3321_v39 = vmax.f32 %v3319_v41, %v3320_v25  ;;  %v3344_v47 = vrot.slane %v3343_v0, 4  ;;  %v3338_v10 = vmax.f32 %v3336_v32, %v3337_v15  ;;  %v3351_v63 = vrot.slane %v3350_v56, 4  ;;  %v9425_v25 = vpop.f32.mrf.mxu3 }
 0x33e   : > { %v3358_v11 = vrot.slane %v3357_v22, 4  ;;  %v3314_v6 = vmax.f32 %v3312_v55, %v3313_v24  ;;  %v3328_v60 = vmax.f32 %v3326_v45, %v3327_v1  ;;  %v2749_v37 = vadd.f32 %v9300_v62, %v2467_v21 }
 0x33f   : > { %v3345_v42 = vmax.f32 %v3343_v0, %v3344_v47  ;;  %v2954_v53 = vpop.f32.mrf.mxu0  ;;  %v3339_v5 = vrot.slane %v3338_v10, 2  ;;  %v3352_v26 = vmax.f32 %v3350_v56, %v3351_v63  ;;  %v3334_v29 = vrot.slane %v3333_v57, 1  ;;  %v2799_v63 = vld [vmem:[#allocation2 + $0x16a] sm:$0xff] }
 0x340   : > { %v3359_v2 = vmax.f32 %v3357_v22, %v3358_v11  ;;  %v3799_v41 = vsel %vm3785_vm4, %v3321_v39, %v3314_v6  ;;  %v2469_v32 = vadd.f32 %v9345_v51, %v2186_v58  ;;  %v3031_v45 = vadd.f32 %v2951_v38, %v2749_v37  ;;  %v9434_v39 = vpop.f32.mrf.mxu1 }
 0x341   : > { %v3346_v4 = vrot.slane %v3345_v42, 2  ;;  %v3340_v31 = vmax.f32 %v3338_v10, %v3339_v5  ;;  %v3353_v15 = vrot.slane %v3352_v26, 2  ;;  %v3800_v17 = vsel %vm3787_vm5, %v3328_v60, %v3799_v41 }
 0x342   : > { %v3360_v23 = vrot.slane %v3359_v2, 2  ;;  %7375 = vmatmul.msk.f32.gmra.mxu0 %vm492_vm0, %v9161_v28  ;;  %v2185_v0 = vadd.f32 %v9306_v61, %v1903_v40  ;;  %v1905_v51 = vadd.f32 %v9159_v18, %v8819_v35  ;;  %v3335_v56 = vmax.f32 %v3333_v57, %v3334_v29  ;;  %v9438_v61 = vpop.f32.mrf.mxu2 }
 0x343   : > { %v3347_v55 = vmax.f32 %v3345_v42, %v3346_v4  ;;  %v3341_v24 = vrot.slane %v3340_v31, 1  ;;  %v3354_v62 = vmax.f32 %v3352_v26, %v3353_v15  ;;  %v2751_v21 = vadd.f32 %v9350_v19, %v2469_v32  ;;  %v2800_v15 = vld [vmem:[#allocation2 + $0x172] sm:$0xff] }
 0x344   : > { %v3361_v1 = vmax.f32 %v3359_v2, %v3360_v23  ;;  %v2468_v38 = vadd.f32 %v9315_v14, %v2185_v0  ;;  %v3801_v60 = vsel %vm3789_vm6, %v3335_v56, %v3800_v17  ;;  %v3067_v18 = vadd.f32 %v9298_v43, %v3031_v45 }
 0x345   : > { %v3348_v22 = vrot.slane %v3347_v55, 1  ;;  %v3342_v47 = vmax.f32 %v3340_v31, %v3341_v24  ;;  %v3355_v28 = vrot.slane %v3354_v62, 1  ;;  %v2187_v57 = vadd.f32 %v9358_v27, %v1905_v51  ;;  %v9450_v37 = vpop.f32.mrf.mxu3 }
 0x346   : > { %v3362_v42 = vrot.slane %v3361_v1, 1  ;;  %v2750_v2 = vadd.f32 %v9326_v34, %v2468_v38  ;;  %v3099_v27 = vmax.f32 %v3067_v18, 0.0  ;;  %v10464_v38 = vld [vmem:[#allocation34_spill] sm:$0xff] }
 0x347   : > { %v3349_v26 = vmax.f32 %v3347_v55, %v3348_v22  ;;  %v2957_v10 = vpop.f32.mrf.mxu0  ;;  %v3356_v11 = vmax.f32 %v3354_v62, %v3355_v28  ;;  %v3802_v35 = vsel %vm3791_vm7, %v3342_v47, %v3801_v60  ;;  %v2470_v6 = vadd.f32 %v9360_v54, %v2187_v57 }
 0x348   : > { %v3033_v19 = vadd.f32 %v2957_v10, %v2751_v21  ;;  %v3363_v59 = vmax.f32 %v3361_v1, %v3362_v42  ;;  %v3032_v41 = vadd.f32 %v2954_v53, %v2750_v2  ;;  %v9454_v23 = vpop.f32.mrf.mxu1  ;;  %v1906_v60 = vadd.f32 %v9169_v20, %v10464_v38 }
 0x349   : > { %v3803_v40 = vsel %vm3793_vm8, %v3349_v26, %v3802_v35  ;;  %v2752_v32 = vadd.f32 %v9366_v13, %v2470_v6 }
 0x34a   : > { %v3804_v14 = vsel %vm3795_vm9, %v3356_v11, %v3803_v40  ;;  %v3069_v58 = vadd.f32 %v9298_v43, %v3033_v19  ;;  %7376 = vmatmul.msk.f32.gmra.mxu0 %vm492_vm0, %v2799_v63  ;;  %v9457_v62 = vpop.f32.mrf.mxu2  ;;  %v3068_v1 = vadd.f32 %v9298_v43, %v3032_v41 }
 0x34b   : > { %v3805_v5 = vsel %vm3797_vm10, %v3363_v59, %v3804_v14 }
 0x34c   : > { %3858 = vst.msk [vmem:[#allocation3 + $0x21] sm:$0xff] %vm3700_vm3, %v3805_v5  ;;  %v3101_v29 = vmax.f32 %v3069_v58, 0.0  ;;  %v3100_v19 = vmax.f32 %v3068_v1, 0.0  ;;  %v2801_v58 = vld [vmem:[#allocation2 + $0x182] sm:$0xff]  ;;  %v2188_v5 = vadd.f32 %v9370_v8, %v1906_v60  ;;  %v2802_v60 = vld [vmem:[#allocation2 + $0x18a] sm:$0xff] }
 0x34d   : > { %v9470_v18 = vpop.f32.mrf.mxu3 }
 0x34e   : > { %v3127_v4 = vmax.f32 %v3099_v27, %v3101_v29 }
 0x34f   : > { %v2960_v31 = vpop.f32.mrf.mxu0 }
 0x350   : > { %v3167_v55 = vrot.slane %v3127_v4, 2  ;;  %v3168_v54 = vrot.slane %v3127_v4, 4  ;;  %v3169_v45 = vrot.slane %v3127_v4, 6  ;;  %v3364_v17 = vsel %vm3251_vm2, %v3127_v4, -inf  ;;  %v9473_v41 = vpop.f32.mrf.mxu1 }
 0x351   : > { %v3365_v34 = vrot.slane %v3364_v17, 4  ;;  %v3034_v24 = vadd.f32 %v2960_v31, %v2752_v32 }
 0x352   : > { %v3371_v53 = vsel %vm3251_vm2, %v3167_v55, -inf  ;;  %v3378_v0 = vsel %vm3251_vm2, %v3168_v54, -inf  ;;  %v3385_v13 = vsel %vm3251_vm2, %v3169_v45, -inf  ;;  %7377 = vmatmul.msk.f32.gmra.mxu0 %vm492_vm0, %v2800_v15  ;;  %v1908_v55 = vadd.f32 %v9194_v30, %v8873_v44 }
 0x353   : > { %v3366_v51 = vmax.f32 %v3364_v17, %v3365_v34  ;;  %v3372_v56 = vrot.slane %v3371_v53, 4  ;;  %v3379_v22 = vrot.slane %v3378_v0, 4  ;;  %v3386_v21 = vrot.slane %v3385_v13, 4  ;;  %v3879_v47 = vld [vmem:[#allocation3 + $0x21] sm:$0xff]  ;;  %v9479_v34 = vpop.f32.mrf.mxu2 }
 0x354   : > { %v3867_v28 = vld [vmem:[#allocation3 + $0x20] sm:$0xff]  ;;  %v3070_v26 = vadd.f32 %v9298_v43, %v3034_v24  ;;  %7384 = vmatmul.msk.f32.gmra.mxu1 %vm3700_vm3, %v3879_v47  ;;  %v1907_v30 = vadd.f32 %v9176_v46, %v8862_v16  ;;  %v2190_v47 = vadd.f32 %v9411_v36, %v1908_v55 }
 0x355   : > { %v4022_v42 = vld [vmem:[#allocation3 + $0x22] sm:$0xff]  ;;  %7392 = vmatmul.msk.f32.gmra.mxu2 %vm3700_vm3, %v3867_v28  ;;  %v3367_v10 = vrot.slane %v3366_v51, 2  ;;  %v3373_v63 = vmax.f32 %v3371_v53, %v3372_v56  ;;  %v3380_v11 = vmax.f32 %v3378_v0, %v3379_v22  ;;  %v3387_v35 = vmax.f32 %v3385_v13, %v3386_v21 }
 0x356   : > { %7400 = vmatmul.msk.f32.gmra.mxu3 %vm3700_vm3, %v4022_v42  ;;  %v3102_v57 = vmax.f32 %v3070_v26, 0.0  ;;  %v2471_v0 = vadd.f32 %v9376_v3, %v2188_v5  ;;  %v9488_v26 = vpop.f32.mrf.mxu3  ;;  %v2473_v16 = vadd.f32 %v9417_v48, %v2190_v47 }
 0x357   : > { %v3368_v59 = vmax.f32 %v3366_v51, %v3367_v10  ;;  %v3374_v40 = vrot.slane %v3373_v63, 2  ;;  %v3381_v14 = vrot.slane %v3380_v11, 2  ;;  %v2963_v20 = vpop.f32.mrf.mxu0  ;;  %v3388_v29 = vrot.slane %v3387_v35, 2 }
 0x358   : > { %v3128_v6 = vmax.f32 %v3100_v19, %v3102_v57 }
 0x359   : > { %v3375_v2 = vmax.f32 %v3373_v63, %v3374_v40  ;;  %v3382_v27 = vmax.f32 %v3380_v11, %v3381_v14  ;;  %v3369_v54 = vrot.slane %v3368_v59, 1  ;;  %v3389_v51 = vmax.f32 %v3387_v35, %v3388_v29 }
 0x35a   : > { %v3170_v4 = vrot.slane %v3128_v6, 2  ;;  %v3171_v32 = vrot.slane %v3128_v6, 4  ;;  %v3172_v31 = vrot.slane %v3128_v6, 6  ;;  %v3392_v15 = vsel %vm3251_vm2, %v3128_v6, -inf  ;;  %7378 = vmatmul.msk.f32.gmra.mxu0 %vm492_vm0, %v2801_v58  ;;  %v9494_v6 = vpop.f32.mrf.mxu1 }
 0x35b   : > { %v3376_v45 = vrot.slane %v3375_v2, 1  ;;  %v3383_v17 = vrot.slane %v3382_v27, 1  ;;  %v3393_v8 = vrot.slane %v3392_v15, 4  ;;  %v3370_v28 = vmax.f32 %v3368_v59, %v3369_v54 }
 0x35c   : > { %v3399_v24 = vsel %vm3251_vm2, %v3170_v4, -inf  ;;  %v3406_v1 = vsel %vm3251_vm2, %v3171_v32, -inf  ;;  %v3413_v53 = vsel %vm3251_vm2, %v3172_v31, -inf  ;;  %v2753_v35 = vadd.f32 %v9384_v33, %v2471_v0 }
 0x35d   : > { %v3377_v13 = vmax.f32 %v3375_v2, %v3376_v45  ;;  %v3400_v56 = vrot.slane %v3399_v24, 4  ;;  %v3394_v22 = vmax.f32 %v3392_v15, %v3393_v8  ;;  %v3407_v21 = vrot.slane %v3406_v1, 4  ;;  %v9501_v15 = vpop.f32.mrf.mxu2 }
 0x35e   : > { %v3414_v44 = vrot.slane %v3413_v53, 4  ;;  %v3384_v10 = vmax.f32 %v3382_v27, %v3383_v17  ;;  %v3390_v19 = vrot.slane %v3389_v51, 1  ;;  %v3035_v58 = vadd.f32 %v2963_v20, %v2753_v35 }
 0x35f   : > { %v3401_v42 = vmax.f32 %v3399_v24, %v3400_v56  ;;  %v2966_v38 = vpop.f32.mrf.mxu0  ;;  %v3395_v63 = vrot.slane %v3394_v22, 2  ;;  %v3408_v3 = vmax.f32 %v3406_v1, %v3407_v21  ;;  %v3806_v57 = vsel %vm3785_vm4, %v3377_v13, %v3370_v28  ;;  %v2803_v1 = vld [vmem:[#allocation2 + $0x19a] sm:$0xff] }
 0x360   : > { %v3415_v11 = vmax.f32 %v3413_v53, %v3414_v44  ;;  %v3807_v5 = vsel %vm3787_vm5, %v3384_v10, %v3806_v57  ;;  %v2189_v29 = vadd.f32 %v9389_v9, %v1907_v30  ;;  %v1909_v4 = vadd.f32 %v9201_v7, %v8885_v50 }
 0x361   : > { %v3402_v40 = vrot.slane %v3401_v42, 2  ;;  %v3396_v46 = vmax.f32 %v3394_v22, %v3395_v63  ;;  %v3409_v36 = vrot.slane %v3408_v3, 2  ;;  %v3391_v48 = vmax.f32 %v3389_v51, %v3390_v19  ;;  %v9509_v51 = vpop.f32.mrf.mxu3  ;;  %v2804_v63 = vld [vmem:[#allocation2 + $0x1a2] sm:$0xff] }
 0x362   : > { %v3416_v59 = vrot.slane %v3415_v11, 2  ;;  %7379 = vmatmul.msk.f32.gmra.mxu0 %vm492_vm0, %v2802_v60  ;;  %v2755_v31 = vadd.f32 %v9425_v25, %v2473_v16  ;;  %v2472_v45 = vadd.f32 %v9398_v12, %v2189_v29  ;;  %v3071_v50 = vadd.f32 %v9298_v43, %v3035_v58  ;;  %v9518_v47 = vpop.f32.mrf.mxu1 }
 0x363   : > { %v3403_v14 = vmax.f32 %v3401_v42, %v3402_v40  ;;  %v3397_v2 = vrot.slane %v3396_v46, 1  ;;  %v3410_v27 = vmax.f32 %v3408_v3, %v3409_v36  ;;  %v3808_v17 = vsel %vm3789_vm6, %v3391_v48, %v3807_v5 }
 0x364   : > { %v3417_v33 = vmax.f32 %v3415_v11, %v3416_v59  ;;  %v2191_v25 = vadd.f32 %v9434_v39, %v1909_v4  ;;  %v2754_v44 = vadd.f32 %v9404_v49, %v2472_v45  ;;  %v3103_v39 = vmax.f32 %v3071_v50, 0.0 }
 0x365   : > { %v3404_v32 = vrot.slane %v3403_v14, 1  ;;  %v3398_v55 = vmax.f32 %v3396_v46, %v3397_v2  ;;  %v3411_v20 = vrot.slane %v3410_v27, 1  ;;  %v9521_v3 = vpop.f32.mrf.mxu2 }
 0x366   : > { %v3418_v54 = vrot.slane %v3417_v33, 1  ;;  %v2474_v22 = vadd.f32 %v9438_v61, %v2191_v25  ;;  %v3036_v28 = vadd.f32 %v2966_v38, %v2754_v44 }
 0x367   : > { %v3405_v8 = vmax.f32 %v3403_v14, %v3404_v32  ;;  %v2969_v24 = vpop.f32.mrf.mxu0  ;;  %v3412_v9 = vmax.f32 %v3410_v27, %v3411_v20  ;;  %v3809_v53 = vsel %vm3791_vm7, %v3398_v55, %v3808_v17  ;;  %v10465_v27 = vld [vmem:[#allocation26_spill] sm:$0xff] }
 0x368   : > { %v3037_v7 = vadd.f32 %v2969_v24, %v2755_v31  ;;  %v3419_v0 = vmax.f32 %v3417_v33, %v3418_v54  ;;  %v2756_v60 = vadd.f32 %v9450_v37, %v2474_v22  ;;  %v3072_v40 = vadd.f32 %v9298_v43, %v3036_v28  ;;  %v10467_v22 = vld [vmem:[#allocation27_spill] sm:$0xff] }
 0x369   : > { %v3810_v13 = vsel %vm3793_vm8, %v3405_v8, %v3809_v53  ;;  %v1910_v33 = vadd.f32 %v10465_v27, %v8895_v52  ;;  %v9531_v29 = vpop.f32.mrf.mxu3 }
 0x36a   : > { %v3811_v12 = vsel %vm3795_vm9, %v3412_v9, %v3810_v13  ;;  %v3073_v56 = vadd.f32 %v9298_v43, %v3037_v7  ;;  %7380 = vmatmul.msk.f32.gmra.mxu0 %vm492_vm0, %v2803_v1  ;;  %v3104_v20 = vmax.f32 %v3072_v40, 0.0  ;;  %v9537_v24 = vpop.f32.mrf.mxu1  ;;  %v10468_v40 = vld [vmem:[#allocation35_spill] sm:$0xff] }
 0x36b   : > { %v3812_v21 = vsel %vm3797_vm10, %v3419_v0, %v3811_v12 }
 0x36c   : > { %3859 = vst.msk [vmem:[#allocation3 + $0x31] sm:$0xff] %vm3700_vm3, %v3812_v21  ;;  %v3105_v30 = vmax.f32 %v3073_v56, 0.0  ;;  %v10466_v56 = vld [vmem:[#allocation36_spill] sm:$0xff] }
 0x36d   : > { %v9540_v7 = vpop.f32.mrf.mxu2  ;;  %v1912_v21 = vadd.f32 %v10467_v22, %v10466_v56 }
 0x36e   : > { %v3129_v42 = vmax.f32 %v3103_v39, %v3105_v30 }
 0x36f   : > { %v2972_v10 = vpop.f32.mrf.mxu0 }
 0x370   : > { %v3173_v11 = vrot.slane %v3129_v42, 2  ;;  %v3174_v61 = vrot.slane %v3129_v42, 4  ;;  %v3175_v35 = vrot.slane %v3129_v42, 6  ;;  %v3420_v19 = vsel %vm3251_vm2, %v3129_v42, -inf }
 0x371   : > { %v3421_v49 = vrot.slane %v3420_v19, 4  ;;  %v3038_v57 = vadd.f32 %v2972_v10, %v2756_v60 }
 0x372   : > { %v3427_v16 = vsel %vm3251_vm2, %v3173_v11, -inf  ;;  %v3434_v38 = vsel %vm3251_vm2, %v3174_v61, -inf  ;;  %v3441_v46 = vsel %vm3251_vm2, %v3175_v35, -inf  ;;  %7381 = vmatmul.msk.f32.gmra.mxu0 %vm492_vm0, %v2804_v63  ;;  %v9549_v35 = vpop.f32.mrf.mxu3 }
 0x373   : > { %v3422_v37 = vmax.f32 %v3420_v19, %v3421_v49  ;;  %v3428_v36 = vrot.slane %v3427_v16, 4  ;;  %v3435_v59 = vrot.slane %v3434_v38, 4  ;;  %v3442_v14 = vrot.slane %v3441_v46, 4  ;;  %v3880_v58 = vld [vmem:[#allocation3 + $0x31] sm:$0xff] }
 0x374   : > { %v3868_v5 = vld [vmem:[#allocation3 + $0x30] sm:$0xff]  ;;  %v3074_v4 = vadd.f32 %v9298_v43, %v3038_v57  ;;  %7385 = vmatmul.msk.f32.gmra.mxu1 %vm3700_vm3, %v3880_v58  ;;  %v2192_v43 = vadd.f32 %v9454_v23, %v1910_v33 }
 0x375   : > { %v4023_v2 = vld [vmem:[#allocation3 + $0x32] sm:$0xff]  ;;  %7393 = vmatmul.msk.f32.gmra.mxu2 %vm3700_vm3, %v3868_v5  ;;  %v3423_v48 = vrot.slane %v3422_v37, 2  ;;  %v3429_v32 = vmax.f32 %v3427_v16, %v3428_v36  ;;  %v3436_v31 = vmax.f32 %v3434_v38, %v3435_v59  ;;  %v3443_v55 = vmax.f32 %v3441_v46, %v3442_v14 }
 0x376   : > { %7401 = vmatmul.msk.f32.gmra.mxu3 %vm3700_vm3, %v4023_v2  ;;  %v3106_v54 = vmax.f32 %v3074_v4, 0.0  ;;  %v2475_v10 = vadd.f32 %v9457_v62, %v2192_v43  ;;  %v10469_v16 = vld [vmem:[#allocation25_spill] sm:$0xff]  ;;  %v2194_v46 = vadd.f32 %v9494_v6, %v1912_v21 }
 0x377   : > { %v3424_v45 = vmax.f32 %v3422_v37, %v3423_v48  ;;  %v3430_v17 = vrot.slane %v3429_v32, 2  ;;  %v3437_v8 = vrot.slane %v3436_v31, 2  ;;  %v2975_v52 = vpop.f32.mrf.mxu0  ;;  %v3444_v50 = vrot.slane %v3443_v55, 2 }
 0x378   : > { %v3130_v1 = vmax.f32 %v3104_v20, %v3106_v54  ;;  %v1911_v38 = vadd.f32 %v10469_v16, %v10468_v40  ;;  %v2757_v2 = vadd.f32 %v9470_v18, %v2475_v10  ;;  %v2477_v48 = vadd.f32 %v9501_v15, %v2194_v46 }
 0x379   : > { %v3431_v9 = vmax.f32 %v3429_v32, %v3430_v17  ;;  %v3438_v53 = vmax.f32 %v3436_v31, %v3437_v8  ;;  %v3425_v44 = vrot.slane %v3424_v45, 1  ;;  %v3445_v11 = vmax.f32 %v3443_v55, %v3444_v50  ;;  %v9557_v32 = vpop.f32.mrf.mxu1 }
 0x37a   : > { %v3176_v25 = vrot.slane %v3130_v1, 2  ;;  %v3177_v0 = vrot.slane %v3130_v1, 4  ;;  %v3178_v13 = vrot.slane %v3130_v1, 6  ;;  %v3448_v12 = vsel %vm3251_vm2, %v3130_v1, -inf }
 0x37b   : > { %v3432_v39 = vrot.slane %v3431_v9, 1  ;;  %v3439_v30 = vrot.slane %v3438_v53, 1  ;;  %v3449_v28 = vrot.slane %v3448_v12, 4  ;;  %v3426_v37 = vmax.f32 %v3424_v45, %v3425_v44  ;;  %v9559_v45 = vpop.f32.mrf.mxu2 }
 0x37c   : > { %v3455_v42 = vsel %vm3251_vm2, %v3176_v25, -inf  ;;  %v3462_v23 = vsel %vm3251_vm2, %v3177_v0, -inf  ;;  %v3469_v60 = vsel %vm3251_vm2, %v3178_v13, -inf  ;;  %v3446_v27 = vrot.slane %v3445_v11, 1 }
 0x37d   : > { %v3433_v63 = vmax.f32 %v3431_v9, %v3432_v39  ;;  %v3456_v61 = vrot.slane %v3455_v42, 4  ;;  %v3450_v19 = vmax.f32 %v3448_v12, %v3449_v28  ;;  %v3463_v49 = vrot.slane %v3462_v23, 4  ;;  %v10470_v9 = vld [vmem:[#allocation37_spill] sm:$0xff]  ;;  %v9568_v39 = vpop.f32.mrf.mxu3  ;;  %v9571_v28 = vld [vmem:[#allocation7] ss:$0 sm:$0xff] }
 0x37e   : > { %v3470_v57 = vrot.slane %v3469_v60, 4  ;;  %v3440_v14 = vmax.f32 %v3438_v53, %v3439_v30  ;;  %v3039_v54 = vadd.f32 %v2975_v52, %v2757_v2  ;;  %v2193_v43 = vadd.f32 %v9473_v41, %v1911_v38  ;;  %v10471_v53 = vld [vmem:[#allocation29_spill] sm:$0xff] }
 0x37f   : > { %v3457_v36 = vmax.f32 %v3455_v42, %v3456_v61  ;;  %v2978_v59 = vpop.f32.mrf.mxu0  ;;  %v3451_v58 = vrot.slane %v3450_v19, 2  ;;  %v3464_v5 = vmax.f32 %v3462_v23, %v3463_v49  ;;  %v3813_v33 = vsel %vm3785_vm4, %v3433_v63, %v3426_v37 }
 0x380   : > { %v3471_v62 = vmax.f32 %v3469_v60, %v3470_v57  ;;  %v3814_v17 = vsel %vm3787_vm5, %v3440_v14, %v3813_v33  ;;  %v1913_v50 = vadd.f32 %v10471_v53, %v10470_v9  ;;  %v3447_v15 = vmax.f32 %v3445_v11, %v3446_v27 }
 0x381   : > { %v3458_v4 = vrot.slane %v3457_v36, 2  ;;  %v3452_v31 = vmax.f32 %v3450_v19, %v3451_v58  ;;  %v3465_v55 = vrot.slane %v3464_v5, 2  ;;  %v2759_v0 = vadd.f32 %v9509_v51, %v2477_v48  ;;  %v9581_v49 = vpop.f32.mrf.mxu1 }
 0x382   : > { %v3472_v6 = vrot.slane %v3471_v62, 2  ;;  %v2476_v52 = vadd.f32 %v9479_v34, %v2193_v43  ;;  %v3815_v22 = vsel %vm3789_vm6, %v3447_v15, %v3814_v17  ;;  %v3075_v42 = vadd.f32 %v9571_v28, %v3039_v54  ;;  %v10472_v54 = vld [vmem:[#allocation38_spill] sm:$0xff]  ;;  %v10473_v17 = vld [vmem:[#allocation31_spill] sm:$0xff] }
 0x383   : > { %v3459_v20 = vmax.f32 %v3457_v36, %v3458_v4  ;;  %v3453_v8 = vrot.slane %v3452_v31, 1  ;;  %v3466_v1 = vmax.f32 %v3464_v5, %v3465_v55  ;;  %v2195_v51 = vadd.f32 %v9518_v47, %v1913_v50  ;;  %v9584_v47 = vpop.f32.mrf.mxu2 }
 0x384   : > { %v3473_v18 = vmax.f32 %v3471_v62, %v3472_v6  ;;  %v2758_v19 = vadd.f32 %v9488_v26, %v2476_v52  ;;  %v3107_v57 = vmax.f32 %v3075_v42, 0.0 }
 0x385   : > { %v3460_v25 = vrot.slane %v3459_v20, 1  ;;  %v3454_v13 = vmax.f32 %v3452_v31, %v3453_v8  ;;  %v3467_v12 = vrot.slane %v3466_v1, 1  ;;  %v2478_v11 = vadd.f32 %v9521_v3, %v2195_v51  ;;  %v9588_v62 = vpop.f32.mrf.mxu3 }
 0x386   : > { %v3474_v56 = vrot.slane %v3473_v18, 1  ;;  %v3040_v16 = vadd.f32 %v2978_v59, %v2758_v19  ;;  %v1914_v8 = vadd.f32 %v10473_v17, %v10472_v54 }
 0x387   : > { %v3461_v21 = vmax.f32 %v3459_v20, %v3460_v25  ;;  %v2981_v44 = vpop.f32.mrf.mxu0  ;;  %v3468_v30 = vmax.f32 %v3466_v1, %v3467_v12  ;;  %v3816_v41 = vsel %vm3791_vm7, %v3454_v13, %v3815_v22  ;;  %v2760_v46 = vadd.f32 %v9531_v29, %v2478_v11 }
 0x388   : > { %v3041_v23 = vadd.f32 %v2981_v44, %v2759_v0  ;;  %v3475_v60 = vmax.f32 %v3473_v18, %v3474_v56  ;;  %v3076_v2 = vadd.f32 %v9571_v28, %v3040_v16 }
 0x389   : > { %v3817_v10 = vsel %vm3793_vm8, %v3461_v21, %v3816_v41  ;;  %v9609_v50 = vpop.f32.mrf.mxu1  ;;  %v2196_v21 = vadd.f32 %v9537_v24, %v1914_v8 }
 0x38a   : > { %v3818_v34 = vsel %vm3795_vm9, %v3468_v30, %v3817_v10  ;;  %v3077_v63 = vadd.f32 %v9571_v28, %v3041_v23  ;;  %v3108_v15 = vmax.f32 %v3076_v2, 0.0  ;;  %v10474_v10 = vld [vmem:[#allocation40_spill] sm:$0xff]  ;;  %v10477_v2 = vld [vmem:[#allocation33_spill] sm:$0xff] }
 0x38b   : > { %v3819_v61 = vsel %vm3797_vm10, %v3475_v60, %v3818_v34  ;;  %v9611_v52 = vpop.f32.mrf.mxu2  ;;  %v10475_v34 = vld [vmem:[#allocation50_spill] sm:$0xff] }
 0x38c   : > { %3860 = vst.msk [vmem:[#allocation3 + $0x41] sm:$0xff] %vm3700_vm3, %v3819_v61  ;;  %v3109_v40 = vmax.f32 %v3077_v63, 0.0  ;;  %v1916_v63 = vadd.f32 %v10475_v34, %v10474_v10 }
 0x38e   : > { %v3131_v38 = vmax.f32 %v3107_v57, %v3109_v40  ;;  %v9617_v57 = vpop.f32.mrf.mxu3 }
 0x38f   : > { %v2984_v37 = vpop.f32.mrf.mxu0 }
 0x390   : > { %v3179_v36 = vrot.slane %v3131_v38, 2  ;;  %v3180_v14 = vrot.slane %v3131_v38, 4  ;;  %v3181_v3 = vrot.slane %v3131_v38, 6  ;;  %v3476_v58 = vsel %vm3251_vm2, %v3131_v38, -inf }
 0x391   : > { %v3477_v5 = vrot.slane %v3476_v58, 4  ;;  %v3042_v26 = vadd.f32 %v2984_v37, %v2760_v46  ;;  %v2479_v46 = vadd.f32 %v9540_v7, %v2196_v21 }
 0x392   : > { %v3483_v27 = vsel %vm3251_vm2, %v3179_v36, -inf  ;;  %v3490_v33 = vsel %vm3251_vm2, %v3180_v14, -inf  ;;  %v3497_v59 = vsel %vm3251_vm2, %v3181_v3, -inf }
 0x393   : > { %v3478_v4 = vmax.f32 %v3476_v58, %v3477_v5  ;;  %v3484_v29 = vrot.slane %v3483_v27, 4  ;;  %v3491_v48 = vrot.slane %v3490_v33, 4  ;;  %v3498_v31 = vrot.slane %v3497_v59, 4  ;;  %v9594_v55 = vld [vmem:[#allocation3 + $0x41] sm:$0xff] }
 0x394   : > { %v9596_v6 = vld [vmem:[#allocation3 + $0x40] sm:$0xff]  ;;  %v3078_v1 = vadd.f32 %v9571_v28, %v3042_v26  ;;  %7386 = vmatmul.msk.f32.gmra.mxu1 %vm3700_vm3, %v9594_v55  ;;  %v2761_v8 = vadd.f32 %v9549_v35, %v2479_v46 }
 0x395   : > { %v9598_v20 = vld [vmem:[#allocation3 + $0x42] sm:$0xff]  ;;  %7394 = vmatmul.msk.f32.gmra.mxu2 %vm3700_vm3, %v9596_v6  ;;  %v3479_v18 = vrot.slane %v3478_v4, 2  ;;  %v3485_v43 = vmax.f32 %v3483_v27, %v3484_v29  ;;  %v3492_v9 = vmax.f32 %v3490_v33, %v3491_v48  ;;  %v3499_v53 = vmax.f32 %v3497_v59, %v3498_v31  ;;  %v9626_v48 = vpop.f32.mrf.mxu1 }
 0x396   : > { %7402 = vmatmul.msk.f32.gmra.mxu3 %vm3700_vm3, %v9598_v20  ;;  %v3110_v25 = vmax.f32 %v3078_v1, 0.0  ;;  %v10476_v26 = vld [vmem:[#allocation39_spill] sm:$0xff]  ;;  %v2198_v33 = vadd.f32 %v9581_v49, %v1916_v63 }
 0x397   : > { %v3480_v0 = vmax.f32 %v3478_v4, %v3479_v18  ;;  %v3486_v13 = vrot.slane %v3485_v43, 2  ;;  %v3493_v12 = vrot.slane %v3492_v9, 2  ;;  %v2987_v56 = vpop.f32.mrf.mxu0  ;;  %v3500_v41 = vrot.slane %v3499_v53, 2 }
 0x398   : > { %v3132_v22 = vmax.f32 %v3108_v15, %v3110_v25  ;;  %v1915_v27 = vadd.f32 %v10477_v2, %v10476_v26 }
 0x399   : > { %v3487_v44 = vmax.f32 %v3485_v43, %v3486_v13  ;;  %v3494_v30 = vmax.f32 %v3492_v9, %v3493_v12  ;;  %v3481_v11 = vrot.slane %v3480_v0, 1  ;;  %v3501_v36 = vmax.f32 %v3499_v53, %v3500_v41  ;;  %v9631_v53 = vpop.f32.mrf.mxu2  ;;  %v10479_v41 = vld [vmem:[#allocation51_spill] sm:$0xff] }
 0x39a   : > { %v3182_v42 = vrot.slane %v3132_v22, 2  ;;  %v3183_v23 = vrot.slane %v3132_v22, 4  ;;  %v3184_v51 = vrot.slane %v3132_v22, 6  ;;  %v3504_v60 = vsel %vm3251_vm2, %v3132_v22, -inf }
 0x39b   : > { %v3488_v61 = vrot.slane %v3487_v44, 1  ;;  %v3495_v19 = vrot.slane %v3494_v30, 1  ;;  %v3505_v40 = vrot.slane %v3504_v60, 4  ;;  %v3482_v59 = vmax.f32 %v3480_v0, %v3481_v11 }
 0x39c   : > { %v3511_v16 = vsel %vm3251_vm2, %v3182_v42, -inf  ;;  %v3518_v24 = vsel %vm3251_vm2, %v3183_v23, -inf  ;;  %v3525_v38 = vsel %vm3251_vm2, %v3184_v51, -inf  ;;  %v3502_v1 = vrot.slane %v3501_v36, 1 }
 0x39d   : > { %v3489_v37 = vmax.f32 %v3487_v44, %v3488_v61  ;;  %v3512_v14 = vrot.slane %v3511_v16, 4  ;;  %v3506_v3 = vmax.f32 %v3504_v60, %v3505_v40  ;;  %v3519_v58 = vrot.slane %v3518_v24, 4  ;;  %v9638_v60 = vpop.f32.mrf.mxu3 }
 0x39e   : > { %v3526_v5 = vrot.slane %v3525_v38, 4  ;;  %v3496_v31 = vmax.f32 %v3494_v30, %v3495_v19  ;;  %v2481_v9 = vadd.f32 %v9584_v47, %v2198_v33  ;;  %v3043_v13 = vadd.f32 %v2987_v56, %v2761_v8  ;;  %v10478_v30 = vld [vmem:[#allocation41_spill] sm:$0xff] }
 0x39f   : > { %v3513_v4 = vmax.f32 %v3511_v16, %v3512_v14  ;;  %v2990_v29 = vpop.f32.mrf.mxu0  ;;  %v3507_v54 = vrot.slane %v3506_v3, 2  ;;  %v3520_v17 = vmax.f32 %v3518_v24, %v3519_v58  ;;  %v3820_v18 = vsel %vm3785_vm4, %v3489_v37, %v3482_v59  ;;  %v9646_v37 = vpop.f32.mrf.mxu1 }
 0x3a0   : > { %v3527_v7 = vmax.f32 %v3525_v38, %v3526_v5  ;;  %v3821_v12 = vsel %vm3787_vm5, %v3496_v31, %v3820_v18  ;;  %v2197_v35 = vadd.f32 %v9557_v32, %v1915_v27  ;;  %v1917_v42 = vadd.f32 %v10479_v41, %v10478_v30 }
 0x3a1   : > { %v3514_v43 = vrot.slane %v3513_v4, 2  ;;  %v3508_v49 = vmax.f32 %v3506_v3, %v3507_v54  ;;  %v3521_v15 = vrot.slane %v3520_v17, 2  ;;  %v3503_v23 = vmax.f32 %v3501_v36, %v3502_v1  ;;  %v9653_v5 = vpop.f32.mrf.mxu2 }
 0x3a2   : > { %v3528_v25 = vrot.slane %v3527_v7, 2  ;;  %v2763_v47 = vadd.f32 %v9588_v62, %v2481_v9  ;;  %v2480_v56 = vadd.f32 %v9559_v45, %v2197_v35  ;;  %v3079_v16 = vadd.f32 %v9571_v28, %v3043_v13  ;;  %v10480_v13 = vld [vmem:[#allocation42_spill] sm:$0xff] }
 0x3a3   : > { %v3515_v0 = vmax.f32 %v3513_v4, %v3514_v43  ;;  %v3509_v22 = vrot.slane %v3508_v49, 1  ;;  %v3522_v21 = vmax.f32 %v3520_v17, %v3521_v15  ;;  %v3822_v11 = vsel %vm3789_vm6, %v3503_v23, %v3821_v12  ;;  %v10481_v12 = vld [vmem:[#allocation52_spill] sm:$0xff] }
 0x3a4   : > { %v3529_v44 = vmax.f32 %v3527_v7, %v3528_v25  ;;  %v2199_v38 = vadd.f32 %v9609_v50, %v1917_v42  ;;  %v2762_v58 = vadd.f32 %v9568_v39, %v2480_v56  ;;  %v3111_v50 = vmax.f32 %v3079_v16, 0.0 }
 0x3a5   : > { %v3516_v51 = vrot.slane %v3515_v0, 1  ;;  %v3510_v10 = vmax.f32 %v3508_v49, %v3509_v22  ;;  %v3523_v34 = vrot.slane %v3522_v21, 1  ;;  %v9657_v4 = vpop.f32.mrf.mxu3  ;;  %v1918_v22 = vadd.f32 %v10481_v12, %v10480_v13 }
 0x3a6   : > { %v3530_v63 = vrot.slane %v3529_v44, 1  ;;  %v2482_v14 = vadd.f32 %v9611_v52, %v2199_v38  ;;  %v3044_v2 = vadd.f32 %v2990_v29, %v2762_v58 }
 0x3a7   : > { %v3517_v61 = vmax.f32 %v3515_v0, %v3516_v51  ;;  %v2993_v19 = vpop.f32.mrf.mxu0  ;;  %v3524_v40 = vmax.f32 %v3522_v21, %v3523_v34  ;;  %v3823_v32 = vsel %vm3791_vm7, %v3510_v10, %v3822_v11  ;;  %v2158_v21 = vpop.f32.mrf.mxu1 }
 0x3a8   : > { %v3045_v24 = vadd.f32 %v2993_v19, %v2763_v47  ;;  %v3531_v62 = vmax.f32 %v3529_v44, %v3530_v63  ;;  %v2764_v33 = vadd.f32 %v9617_v57, %v2482_v14  ;;  %v3080_v8 = vadd.f32 %v9571_v28, %v3044_v2 }
 0x3a9   : > { %v3824_v46 = vsel %vm3793_vm8, %v3517_v61, %v3823_v32  ;;  %v2441_v23 = vpop.f32.mrf.mxu2  ;;  %v2200_v61 = vadd.f32 %v9626_v48, %v1918_v22 }
 0x3aa   : > { %v3825_v36 = vsel %vm3795_vm9, %v3524_v40, %v3824_v46  ;;  %v3081_v45 = vadd.f32 %v9571_v28, %v3045_v24  ;;  %v3112_v51 = vmax.f32 %v3080_v8, 0.0  ;;  %v10484_v8 = vld [vmem:[#allocation43_spill] sm:$0xff] }
 0x3ab   : > { %v3826_v3 = vsel %vm3797_vm10, %v3531_v62, %v3825_v36  ;;  %v10482_v36 = vld [vmem:[#allocation44_spill] sm:$0xff] }
 0x3ac   : > { %3861 = vst.msk [vmem:[#allocation3 + $0x51] sm:$0xff] %vm3700_vm3, %v3826_v3  ;;  %v3113_v26 = vmax.f32 %v3081_v45, 0.0  ;;  %v10483_v45 = vld [vmem:[#allocation54_spill] sm:$0xff] }
 0x3ad   : > { %v2723_v16 = vpop.f32.mrf.mxu3  ;;  %v1920_v14 = vadd.f32 %v10483_v45, %v10482_v36 }
 0x3ae   : > { %v3133_v27 = vmax.f32 %v3111_v50, %v3113_v26 }
 0x3af   : > { %v2996_v59 = vpop.f32.mrf.mxu0 }
 0x3b0   : > { %v3185_v31 = vrot.slane %v3133_v27, 2  ;;  %v3186_v54 = vrot.slane %v3133_v27, 4  ;;  %v3187_v52 = vrot.slane %v3133_v27, 6  ;;  %v3532_v17 = vsel %vm3251_vm2, %v3133_v27, -inf }
 0x3b1   : > { %v3533_v7 = vrot.slane %v3532_v17, 4  ;;  %v3046_v39 = vadd.f32 %v2996_v59, %v2764_v33  ;;  %v2483_v33 = vadd.f32 %v9631_v53, %v2200_v61 }
 0x3b2   : > { %v3539_v1 = vsel %vm3251_vm2, %v3185_v31, -inf  ;;  %v3546_v18 = vsel %vm3251_vm2, %v3186_v54, -inf  ;;  %v3553_v29 = vsel %vm3251_vm2, %v3187_v52, -inf  ;;  %v2161_v52 = vpop.f32.mrf.mxu1 }
 0x3b3   : > { %v3534_v43 = vmax.f32 %v3532_v17, %v3533_v7  ;;  %v3540_v57 = vrot.slane %v3539_v1, 4  ;;  %v3547_v9 = vrot.slane %v3546_v18, 4  ;;  %v3554_v49 = vrot.slane %v3553_v29, 4  ;;  %v9664_v15 = vld [vmem:[#allocation3 + $0x51] sm:$0xff] }
 0x3b4   : > { %v9666_v25 = vld [vmem:[#allocation3 + $0x50] sm:$0xff]  ;;  %v3082_v44 = vadd.f32 %v9571_v28, %v3046_v39  ;;  %7387 = vmatmul.msk.f32.gmra.mxu1 %vm3700_vm3, %v9664_v15  ;;  %v2765_v53 = vadd.f32 %v9638_v60, %v2483_v33  ;;  %v10487_v60 = vld [vmem:[#allocation55_spill] sm:$0xff] }
 0x3b5   : > { %v9668_v0 = vld [vmem:[#allocation3 + $0x52] sm:$0xff]  ;;  %7395 = vmatmul.msk.f32.gmra.mxu2 %vm3700_vm3, %v9666_v25  ;;  %v3535_v35 = vrot.slane %v3534_v43, 2  ;;  %v3541_v30 = vmax.f32 %v3539_v1, %v3540_v57  ;;  %v3548_v41 = vmax.f32 %v3546_v18, %v3547_v9  ;;  %v3555_v42 = vmax.f32 %v3553_v29, %v3554_v49  ;;  %v2444_v49 = vpop.f32.mrf.mxu2 }
 0x3b6   : > { %7403 = vmatmul.msk.f32.gmra.mxu3 %vm3700_vm3, %v9668_v0  ;;  %v3114_v47 = vmax.f32 %v3082_v44, 0.0  ;;  %v10485_v1 = vld [vmem:[#allocation53_spill] sm:$0xff]  ;;  %v2202_v29 = vadd.f32 %v2158_v21, %v1920_v14 }
 0x3b7   : > { %v3536_v10 = vmax.f32 %v3534_v43, %v3535_v35  ;;  %v3542_v34 = vrot.slane %v3541_v30, 2  ;;  %v3549_v63 = vrot.slane %v3548_v41, 2  ;;  %v2999_v56 = vpop.f32.mrf.mxu0  ;;  %v3556_v32 = vrot.slane %v3555_v42, 2 }
 0x3b8   : > { %v3134_v11 = vmax.f32 %v3112_v51, %v3114_v47  ;;  %v1919_v18 = vadd.f32 %v10485_v1, %v10484_v8  ;;  %v3047_v21 = vadd.f32 %v2999_v56, %v2765_v53 }
 0x3b9   : > { %v3543_v19 = vmax.f32 %v3541_v30, %v3542_v34  ;;  %v3550_v40 = vmax.f32 %v3548_v41, %v3549_v63  ;;  %v3537_v3 = vrot.slane %v3536_v10, 1  ;;  %v3557_v31 = vmax.f32 %v3555_v42, %v3556_v32 }
 0x3ba   : > { %v3188_v24 = vrot.slane %v3134_v11, 2  ;;  %v3189_v38 = vrot.slane %v3134_v11, 4  ;;  %v3190_v62 = vrot.slane %v3134_v11, 6  ;;  %v3560_v46 = vsel %vm3251_vm2, %v3134_v11, -inf }
 0x3bb   : > { %v3544_v58 = vrot.slane %v3543_v19, 1  ;;  %v3551_v50 = vrot.slane %v3550_v40, 1  ;;  %v3561_v26 = vrot.slane %v3560_v46, 4  ;;  %v3538_v43 = vmax.f32 %v3536_v10, %v3537_v3  ;;  %v2726_v10 = vpop.f32.mrf.mxu3 }
 0x3bc   : > { %v3567_v2 = vsel %vm3251_vm2, %v3188_v24, -inf  ;;  %v3574_v48 = vsel %vm3251_vm2, %v3189_v38, -inf  ;;  %v3581_v27 = vsel %vm3251_vm2, %v3190_v62, -inf  ;;  %v3558_v35 = vrot.slane %v3557_v31, 1  ;;  %v10486_v24 = vld [vmem:[#allocation45_spill] sm:$0xff] }
 0x3bd   : > { %v3545_v59 = vmax.f32 %v3543_v19, %v3544_v58  ;;  %v3568_v54 = vrot.slane %v3567_v2, 4  ;;  %v3562_v17 = vmax.f32 %v3560_v46, %v3561_v26  ;;  %v3575_v7 = vrot.slane %v3574_v48, 4  ;;  %v2164_v26 = vpop.f32.mrf.mxu1 }
 0x3be   : > { %v3582_v39 = vrot.slane %v3581_v27, 4  ;;  %v3552_v13 = vmax.f32 %v3550_v40, %v3551_v50  ;;  %v2485_v42 = vadd.f32 %v2441_v23, %v2202_v29  ;;  %v2201_v32 = vadd.f32 %v9646_v37, %v1919_v18 }
 0x3bf   : > { %v3569_v57 = vmax.f32 %v3567_v2, %v3568_v54  ;;  %v3002_v9 = vpop.f32.mrf.mxu0  ;;  %v3563_v12 = vrot.slane %v3562_v17, 2  ;;  %v3576_v22 = vmax.f32 %v3574_v48, %v3575_v7  ;;  %v3827_v30 = vsel %vm3785_vm4, %v3545_v59, %v3538_v43 }
 0x3c0   : > { %v3583_v44 = vmax.f32 %v3581_v27, %v3582_v39  ;;  %v3828_v11 = vsel %vm3787_vm5, %v3552_v13, %v3827_v30  ;;  %v1921_v38 = vadd.f32 %v10487_v60, %v10486_v24  ;;  %v3559_v62 = vmax.f32 %v3557_v31, %v3558_v35  ;;  %v9700_v31 = vpop.f32.mrf.mxu2 }
 0x3c1   : > { %v3570_v41 = vrot.slane %v3569_v57, 2  ;;  %v3564_v51 = vmax.f32 %v3562_v17, %v3563_v12  ;;  %v3577_v47 = vrot.slane %v3576_v22, 2  ;;  %v2767_v36 = vadd.f32 %v2723_v16, %v2485_v42 }
 0x3c2   : > { %v3584_v34 = vrot.slane %v3583_v44, 2  ;;  %v2484_v3 = vadd.f32 %v9653_v5, %v2201_v32  ;;  %v3829_v56 = vsel %vm3789_vm6, %v3559_v62, %v3828_v11  ;;  %v3083_v37 = vadd.f32 %v9571_v28, %v3047_v21  ;;  %v10488_v11 = vld [vmem:[#allocation46_spill] sm:$0xff] }
 0x3c3   : > { %v3571_v63 = vmax.f32 %v3569_v57, %v3570_v41  ;;  %v3565_v61 = vrot.slane %v3564_v51, 1  ;;  %v3578_v19 = vmax.f32 %v3576_v22, %v3577_v47  ;;  %v2203_v33 = vadd.f32 %v2161_v52, %v1921_v38  ;;  %v9707_v18 = vpop.f32.mrf.mxu3 }
 0x3c4   : > { %v3585_v40 = vmax.f32 %v3583_v44, %v3584_v34  ;;  %v2766_v39 = vadd.f32 %v9657_v4, %v2484_v3  ;;  %v3115_v8 = vmax.f32 %v3083_v37, 0.0 }
 0x3c5   : > { %v3572_v46 = vrot.slane %v3571_v63, 1  ;;  %v3566_v23 = vmax.f32 %v3564_v51, %v3565_v61  ;;  %v3579_v45 = vrot.slane %v3578_v19, 1  ;;  %v2486_v17 = vadd.f32 %v2444_v49, %v2203_v33  ;;  %v9710_v35 = vpop.f32.mrf.mxu1  ;;  %v10489_v61 = vld [vmem:[#allocation56_spill] sm:$0xff] }
 0x3c6   : > { %v3586_v14 = vrot.slane %v3585_v40, 1  ;;  %v3048_v52 = vadd.f32 %v3002_v9, %v2766_v39 }
 0x3c7   : > { %v3573_v58 = vmax.f32 %v3571_v63, %v3572_v46  ;;  %v3005_v50 = vpop.f32.mrf.mxu0  ;;  %v3580_v2 = vmax.f32 %v3578_v19, %v3579_v45  ;;  %v3830_v48 = vsel %vm3791_vm7, %v3566_v23, %v3829_v56  ;;  %v2768_v43 = vadd.f32 %v2726_v10, %v2486_v17 }
 0x3c8   : > { %v3049_v27 = vadd.f32 %v3005_v50, %v2767_v36  ;;  %v3587_v59 = vmax.f32 %v3585_v40, %v3586_v14  ;;  %v3084_v4 = vadd.f32 %v9571_v28, %v3048_v52  ;;  %v1922_v19 = vadd.f32 %v10489_v61, %v10488_v11  ;;  %v9724_v40 = vpop.f32.mrf.mxu2  ;;  %v4118_v11 = vld [vmem:[#allocation9 + $0x78] sm:$0xff] }
 0x3c9   : > { %v3831_v16 = vsel %vm3793_vm8, %v3573_v58, %v3830_v48  ;;  %v4204_v61 = vld [vmem:[#allocation9 + $0x98] sm:$0xff]  ;;  %4155 = vmatpush.msrb.mxu1 %v4118_v11 }
 0x3ca   : > { %v3832_v54 = vsel %vm3795_vm9, %v3580_v2, %v3831_v16  ;;  %v3085_v5 = vadd.f32 %v9571_v28, %v3049_v27  ;;  %v3116_v46 = vmax.f32 %v3084_v4, 0.0  ;;  %v2204_v50 = vadd.f32 %v2164_v26, %v1922_v19  ;;  %v4290_v19 = vld [vmem:[#allocation9 + $0xb8] sm:$0xff]  ;;  %4241 = vmatpush.msrb.mxu2 %v4204_v61 }
 0x3cb   : > { %v3833_v7 = vsel %vm3797_vm10, %v3587_v59, %v3832_v54  ;;  %v9733_v56 = vpop.f32.mrf.mxu3  ;;  %v10490_v54 = vld [vmem:[#allocation48_spill] sm:$0xff]  ;;  %4327 = vmatpush.msrb.mxu3 %v4290_v19 }
 0x3cc   : > { %3862 = vst.msk [vmem:[#allocation3 + $0x61] sm:$0xff] %vm3700_vm3, %v3833_v7  ;;  %v3117_v1 = vmax.f32 %v3085_v5, 0.0  ;;  %v10491_v5 = vld [vmem:[#allocation58_spill] sm:$0xff] }
 0x3cd   : > { %v1924_v17 = vadd.f32 %v10491_v5, %v10490_v54 }
 0x3ce   : > { %v3135_v29 = vmax.f32 %v3115_v8, %v3117_v1  ;;  %v2170_v1 = vpop.f32.mrf.mxu1 }
 0x3cf   : > { %v3008_v57 = vpop.f32.mrf.mxu0 }
 0x3d0   : > { %v3191_v13 = vrot.slane %v3135_v29, 2  ;;  %v3192_v12 = vrot.slane %v3135_v29, 4  ;;  %v3193_v22 = vrot.slane %v3135_v29, 6  ;;  %v3588_v44 = vsel %vm3251_vm2, %v3135_v29, -inf }
 0x3d1   : > { %v3589_v49 = vrot.slane %v3588_v44, 4  ;;  %v3050_v53 = vadd.f32 %v3008_v57, %v2768_v43  ;;  %v2487_v57 = vadd.f32 %v9700_v31, %v2204_v50 }
 0x3d2   : > { %v3595_v30 = vsel %vm3251_vm2, %v3191_v13, -inf  ;;  %v3602_v41 = vsel %vm3251_vm2, %v3192_v12, -inf  ;;  %v3609_v9 = vsel %vm3251_vm2, %v3193_v22, -inf }
 0x3d3   : > { %v3590_v42 = vmax.f32 %v3588_v44, %v3589_v49  ;;  %v3596_v51 = vrot.slane %v3595_v30, 4  ;;  %v3603_v47 = vrot.slane %v3602_v41, 4  ;;  %v3610_v34 = vrot.slane %v3609_v9, 4  ;;  %v9716_v63 = vld [vmem:[#allocation3 + $0x61] sm:$0xff]  ;;  %v2453_v44 = vpop.f32.mrf.mxu2  ;;  %v2735_v50 = vpop.f32.mrf.mxu3 }
 0x3d4   : > { %v9718_v21 = vld [vmem:[#allocation3 + $0x60] sm:$0xff]  ;;  %v3086_v32 = vadd.f32 %v9571_v28, %v3050_v53  ;;  %7388 = vmatmul.msk.f32.gmra.mxu1 %vm3700_vm3, %v9716_v63 }
 0x3d5   : > { %v9720_v10 = vld [vmem:[#allocation3 + $0x62] sm:$0xff]  ;;  %7396 = vmatmul.msk.f32.gmra.mxu2 %vm3700_vm3, %v9718_v21  ;;  %v3591_v24 = vrot.slane %v3590_v42, 2  ;;  %v3597_v60 = vmax.f32 %v3595_v30, %v3596_v51  ;;  %v3604_v38 = vmax.f32 %v3602_v41, %v3603_v47  ;;  %v3611_v62 = vmax.f32 %v3609_v9, %v3610_v34  ;;  %v10493_v41 = vld [vmem:[#allocation57_spill] sm:$0xff] }
 0x3d6   : > { %7404 = vmatmul.msk.f32.gmra.mxu3 %vm3700_vm3, %v9720_v10  ;;  %v3118_v36 = vmax.f32 %v3086_v32, 0.0  ;;  %v10492_v30 = vld [vmem:[#allocation47_spill] sm:$0xff] }
 0x3d7   : > { %v3592_v23 = vmax.f32 %v3590_v42, %v3591_v24  ;;  %v3598_v45 = vrot.slane %v3597_v60, 2  ;;  %v3605_v14 = vrot.slane %v3604_v38, 2  ;;  %v3011_v3 = vpop.f32.mrf.mxu0  ;;  %v3612_v37 = vrot.slane %v3611_v62, 2 }
 0x3d8   : > { %v3136_v58 = vmax.f32 %v3116_v46, %v3118_v36  ;;  %v1923_v9 = vadd.f32 %v10493_v41, %v10492_v30  ;;  %v2206_v42 = vadd.f32 %v2170_v1, %v1924_v17  ;;  %v10495_v1 = vld [vmem:[#allocation59_spill] sm:$0xff] }
 0x3d9   : > { %v3599_v2 = vmax.f32 %v3597_v60, %v3598_v45  ;;  %v3606_v48 = vmax.f32 %v3604_v38, %v3605_v14  ;;  %v3593_v7 = vrot.slane %v3592_v23, 1  ;;  %v3613_v12 = vmax.f32 %v3611_v62, %v3612_v37  ;;  %v4203_v45 = vld [vmem:[#allocation9 + $0x90] sm:$0xff] }
 0x3da   : > { %v3194_v27 = vrot.slane %v3136_v58, 2  ;;  %v3195_v33 = vrot.slane %v3136_v58, 4  ;;  %v3196_v59 = vrot.slane %v3136_v58, 6  ;;  %v3616_v16 = vsel %vm3251_vm2, %v3136_v58, -inf  ;;  %v4289_v14 = vld [vmem:[#allocation9 + $0xb0] sm:$0xff]  ;;  %4242 = vmatpush.msrb.mxu2 %v4203_v45 }
 0x3db   : > { %v3600_v39 = vrot.slane %v3599_v2, 1  ;;  %v3607_v8 = vrot.slane %v3606_v48, 1  ;;  %v3617_v52 = vrot.slane %v3616_v16, 4  ;;  %v3594_v51 = vmax.f32 %v3592_v23, %v3593_v7  ;;  %v4117_v23 = vld [vmem:[#allocation9 + $0x70] sm:$0xff]  ;;  %4328 = vmatpush.msrb.mxu3 %v4289_v14 }
 0x3dc   : > { %v3623_v29 = vsel %vm3251_vm2, %v3194_v27, -inf  ;;  %v3630_v26 = vsel %vm3251_vm2, %v3195_v33, -inf  ;;  %v3637_v43 = vsel %vm3251_vm2, %v3196_v59, -inf  ;;  %v2769_v38 = vadd.f32 %v9707_v18, %v2487_v57  ;;  %4156 = vmatpush.msrb.mxu1 %v4117_v23  ;;  %v4116_v59 = vld [vmem:[#allocation9 + $0x68] sm:$0xff]  ;;  %v4287_v57 = vld [vmem:[#allocation9 + $0xa0] sm:$0xff] }
 0x3dd   : > { %v3601_v13 = vmax.f32 %v3599_v2, %v3600_v39  ;;  %v3624_v22 = vrot.slane %v3623_v29, 4  ;;  %v3618_v49 = vmax.f32 %v3616_v16, %v3617_v52  ;;  %v3631_v53 = vrot.slane %v3630_v26, 4  ;;  %v4202_v18 = vld [vmem:[#allocation9 + $0x88] sm:$0xff] }
 0x3de   : > { %v3638_v4 = vrot.slane %v3637_v43, 4  ;;  %v3608_v32 = vmax.f32 %v3606_v48, %v3607_v8  ;;  %v3614_v62 = vrot.slane %v3613_v12, 1  ;;  %v2489_v58 = vadd.f32 %v2453_v44, %v2206_v42  ;;  %v4288_v16 = vld [vmem:[#allocation9 + $0xa8] sm:$0xff]  ;;  %4157 = vmatpush.msrb.mxu1 %v4116_v59  ;;  %4243 = vmatpush.msrb.mxu2 %v4202_v18 }
 0x3df   : > { %v3625_v47 = vmax.f32 %v3623_v29, %v3624_v22  ;;  %v9744_v34 = vpop.f32.mrf.mxu0  ;;  %v3619_v31 = vrot.slane %v3618_v49, 2  ;;  %v3632_v24 = vmax.f32 %v3630_v26, %v3631_v53  ;;  %v3834_v46 = vsel %vm3785_vm4, %v3601_v13, %v3594_v51  ;;  %v10494_v8 = vld [vmem:[#allocation49_spill] sm:$0xff]  ;;  %4329 = vmatpush.msrb.mxu3 %v4288_v16  ;;  %v2173_v22 = vpop.f32.mrf.mxu1 }
 0x3e0   : > { %v3639_v60 = vmax.f32 %v3637_v43, %v3638_v4  ;;  %v3051_v33 = vadd.f32 %v3011_v3, %v2769_v38  ;;  %v3835_v54 = vsel %vm3787_vm5, %v3608_v32, %v3834_v46  ;;  %v2205_v39 = vadd.f32 %v9710_v35, %v1923_v9  ;;  %v4115_v3 = vld [vmem:[#allocation9 + $0x60] sm:$0xff]  ;;  %v2738_v38 = vpop.f32.mrf.mxu3 }
 0x3e1   : > { %v3626_v36 = vrot.slane %v3625_v47, 2  ;;  %v3620_v2 = vmax.f32 %v3618_v49, %v3619_v31  ;;  %v3633_v37 = vrot.slane %v3632_v24, 2  ;;  %v1925_v52 = vadd.f32 %v10495_v1, %v10494_v8  ;;  %v4201_v43 = vld [vmem:[#allocation9 + $0x80] sm:$0xff]  ;;  %4158 = vmatpush.msrb.mxu1 %v4115_v3  ;;  %4330 = vmatpush.msrb.mxu3 %v4287_v57 }
 0x3e2   : > { %v3640_v48 = vrot.slane %v3639_v60, 2  ;;  %v3615_v29 = vmax.f32 %v3613_v12, %v3614_v62  ;;  %v2771_v13 = vadd.f32 %v2735_v50, %v2489_v58  ;;  %4244 = vmatpush.msrb.mxu2 %v4201_v43  ;;  %v2488_v4 = vadd.f32 %v9724_v40, %v2205_v39  ;;  %v2456_v12 = vpop.f32.mrf.mxu2 }
 0x3e3   : > { %v3627_v27 = vmax.f32 %v3625_v47, %v3626_v36  ;;  %v3621_v5 = vrot.slane %v3620_v2, 1  ;;  %v3634_v17 = vmax.f32 %v3632_v24, %v3633_v37  ;;  %v3087_v51 = vadd.f32 %v9571_v28, %v3051_v33 }
 0x3e4   : > { %v3641_v7 = vmax.f32 %v3639_v60, %v3640_v48  ;;  %v3836_v35 = vsel %vm3789_vm6, %v3615_v29, %v3835_v54  ;;  %v2207_v11 = vadd.f32 %v2173_v22, %v1925_v52  ;;  %v2770_v60 = vadd.f32 %v9733_v56, %v2488_v4 }
 0x3e5   : > { %v3628_v26 = vrot.slane %v3627_v27, 1  ;;  %v3622_v44 = vmax.f32 %v3620_v2, %v3621_v5  ;;  %v3635_v49 = vrot.slane %v3634_v17, 1  ;;  %v3119_v62 = vmax.f32 %v3087_v51, 0.0  ;;  %v4106_v51 = vld [vmem:[#allocation3 + $0x10] sm:$0xff] }
 0x3e6   : > { %v3642_v53 = vrot.slane %v3641_v7, 1  ;;  %v2490_v31 = vadd.f32 %v2456_v12, %v2207_v11  ;;  %v3052_v36 = vadd.f32 %v9744_v34, %v2770_v60 }
 0x3e7   : > { %v3629_v30 = vmax.f32 %v3627_v27, %v3628_v26  ;;  %v3017_v41 = vpop.f32.mrf.mxu0  ;;  %v3636_v9 = vmax.f32 %v3634_v17, %v3635_v49  ;;  %v3837_v42 = vsel %vm3791_vm7, %v3622_v44, %v3836_v35 }
 0x3e8   : > { %v3053_v47 = vadd.f32 %v3017_v41, %v2771_v13  ;;  %v3643_v61 = vmax.f32 %v3641_v7, %v3642_v53  ;;  %v2772_v45 = vadd.f32 %v2738_v38, %v2490_v31  ;;  %v3088_v33 = vadd.f32 %v9571_v28, %v3052_v36 }
 0x3e9   : > { %v3838_v19 = vsel %vm3793_vm8, %v3629_v30, %v3837_v42 }
 0x3ea   : > { %v3839_v32 = vsel %vm3795_vm9, %v3636_v9, %v3838_v19  ;;  %v3089_v40 = vadd.f32 %v9571_v28, %v3053_v47  ;;  %v3120_v3 = vmax.f32 %v3088_v33, 0.0  ;;  %v4192_v47 = vld [vmem:[#allocation3 + $0x11] sm:$0xff] }
 0x3eb   : > { %v3840_v24 = vsel %vm3797_vm10, %v3643_v61, %v3839_v32 }
 0x3ec   : > { %3863 = vst.msk [vmem:[#allocation3 + $0x71] sm:$0xff] %vm3700_vm3, %v3840_v24  ;;  %v3121_v46 = vmax.f32 %v3089_v40, 0.0  ;;  %v4278_v40 = vld [vmem:[#allocation3 + $0x12] sm:$0xff] }
 0x3ee   : > { %v3137_v23 = vmax.f32 %v3119_v62, %v3121_v46 }
 0x3ef   : > { %v3020_v14 = vpop.f32.mrf.mxu0 }
 0x3f0   : > { %v3197_v58 = vrot.slane %v3137_v23, 2  ;;  %v3198_v50 = vrot.slane %v3137_v23, 4  ;;  %v3199_v2 = vrot.slane %v3137_v23, 6  ;;  %v3644_v37 = vsel %vm3251_vm2, %v3137_v23, -inf }
 0x3f1   : > { %v3645_v48 = vrot.slane %v3644_v37, 4  ;;  %v3054_v27 = vadd.f32 %v3020_v14, %v2772_v45 }
 0x3f2   : > { %v3651_v56 = vsel %vm3251_vm2, %v3197_v58, -inf  ;;  %v3658_v59 = vsel %vm3251_vm2, %v3198_v50, -inf  ;;  %v3665_v18 = vsel %vm3251_vm2, %v3199_v2, -inf }
 0x3f3   : > { %v3646_v16 = vmax.f32 %v3644_v37, %v3645_v48  ;;  %v3652_v34 = vrot.slane %v3651_v56, 4  ;;  %v3659_v54 = vrot.slane %v3658_v59, 4  ;;  %v3666_v5 = vrot.slane %v3665_v18, 4  ;;  %v9768_v17 = vld [vmem:[#allocation3 + $0x71] sm:$0xff] }
 0x3f4   : > { %v9770_v7 = vld [vmem:[#allocation3 + $0x70] sm:$0xff]  ;;  %v3090_v8 = vadd.f32 %v9571_v28, %v3054_v27  ;;  %7389 = vmatmul.msk.f32.gmra.mxu1 %vm3700_vm3, %v9768_v17 }
 0x3f5   : > { %v9772_v39 = vld [vmem:[#allocation3 + $0x72] sm:$0xff]  ;;  %7397 = vmatmul.msk.f32.gmra.mxu2 %vm3700_vm3, %v9770_v7  ;;  %v3647_v1 = vrot.slane %v3646_v16, 2  ;;  %v3653_v52 = vmax.f32 %v3651_v56, %v3652_v34  ;;  %v3660_v29 = vmax.f32 %v3658_v59, %v3659_v54  ;;  %v3667_v26 = vmax.f32 %v3665_v18, %v3666_v5  ;;  %v9789_v18 = vld [vmem:[#allocation3 + $0x20] sm:$0xff] }
 0x3f6   : > { %7405 = vmatmul.msk.f32.gmra.mxu3 %vm3700_vm3, %v9772_v39  ;;  %v3122_v43 = vmax.f32 %v3090_v8, 0.0 }
 0x3f7   : > { %v3648_v57 = vmax.f32 %v3646_v16, %v3647_v1  ;;  %v3654_v13 = vrot.slane %v3653_v52, 2  ;;  %v3661_v22 = vrot.slane %v3660_v29, 2  ;;  %v3668_v53 = vrot.slane %v3667_v26, 2  ;;  %v9791_v16 = vld [vmem:[#allocation3 + $0x21] sm:$0xff] }
 0x3f8   : > { %v3138_v44 = vmax.f32 %v3120_v3, %v3122_v43  ;;  %v9798_v1 = vld [vmem:[#allocation3 + $0x22] sm:$0xff] }
 0x3f9   : > { %v3655_v28 = vmax.f32 %v3653_v52, %v3654_v13  ;;  %v3662_v49 = vmax.f32 %v3660_v29, %v3661_v22  ;;  %v3649_v12 = vrot.slane %v3648_v57, 1  ;;  %v3669_v24 = vmax.f32 %v3667_v26, %v3668_v53 }
 0x3fa   : > { %v3200_v4 = vrot.slane %v3138_v44, 2  ;;  %v3201_v35 = vrot.slane %v3138_v44, 4  ;;  %v3202_v30 = vrot.slane %v3138_v44, 6  ;;  %v3672_v41 = vsel %vm3251_vm2, %v3138_v44, -inf }
 0x3fb   : > { %v3656_v9 = vrot.slane %v3655_v28, 1  ;;  %v3663_v42 = vrot.slane %v3662_v49, 1  ;;  %v3673_v11 = vrot.slane %v3672_v41, 4  ;;  %v3650_v36 = vmax.f32 %v3648_v57, %v3649_v12  ;;  %v4377_v12 = vld [vmem:[#allocation9 + $0xd8] sm:$0xff] }
 0x3fc   : > { %v3679_v61 = vsel %vm3251_vm2, %v3200_v4, -inf  ;;  %v3686_v19 = vsel %vm3251_vm2, %v3201_v35, -inf  ;;  %v3693_v32 = vsel %vm3251_vm2, %v3202_v30, -inf  ;;  %7406 = vmatmul.msk.f32.vlgmr.msrb.gmra.mxu1 %vm3700_vm3, %v4106_v51  ;;  %v3670_v2 = vrot.slane %v3669_v24, 1  ;;  %v7646_v35 = vld [vmem:[#allocation3 + $0x30] sm:$0xff] }
 0x3fd   : > { %7414 = vmatmul.msk.f32.vlgmr.msrb.gmra.mxu2 %vm3700_vm3, %v4192_v47  ;;  %v3657_v31 = vmax.f32 %v3655_v28, %v3656_v9  ;;  %v3680_v60 = vrot.slane %v3679_v61, 4  ;;  %v3674_v38 = vmax.f32 %v3672_v41, %v3673_v11  ;;  %v3687_v62 = vrot.slane %v3686_v19, 4  ;;  %v7647_v30 = vld [vmem:[#allocation3 + $0x31] sm:$0xff]  ;;  %v4463_v9 = vld [vmem:[#allocation9 + $0xf8] sm:$0xff]  ;;  %4414 = vmatpush.msra.mxu1 %v4377_v12 }
 0x3fe   : > { %7422 = vmatmul.msk.f32.vlgmr.msrb.gmra.mxu3 %vm3700_vm3, %v4278_v40  ;;  %v3694_v46 = vrot.slane %v3693_v32, 4  ;;  %v3664_v45 = vmax.f32 %v3662_v49, %v3663_v42  ;;  %v3671_v52 = vmax.f32 %v3669_v24, %v3670_v2  ;;  %v7648_v41 = vld [vmem:[#allocation3 + $0x32] sm:$0xff]  ;;  %v4549_v42 = vld [vmem:[#allocation9 + $0x118] sm:$0xff]  ;;  %4500 = vmatpush.msra.mxu2 %v4463_v9 }
 0x3ff   : > { %v3681_v23 = vmax.f32 %v3679_v61, %v3680_v60  ;;  %v3675_v14 = vrot.slane %v3674_v38, 2  ;;  %v3688_v58 = vmax.f32 %v3686_v19, %v3687_v62  ;;  %v3841_v37 = vsel %vm3785_vm4, %v3657_v31, %v3650_v36  ;;  %4586 = vmatpush.msra.mxu3 %v4549_v42  ;;  %v4376_v51 = vld [vmem:[#allocation9 + $0xd0] sm:$0xff]  ;;  %v4375_v61 = vld [vmem:[#allocation9 + $0xc8] sm:$0xff]  ;;  %v9838_v60 = vpop.f32.mrf.mxu1  ;;  %v9848_v62 = vpop.f32.mrf.mxu3  ;;  %v7649_v2 = vld [vmem:[#allocation3 + $0x40] sm:$0xff] }
 0x400   : > { %v3695_v50 = vmax.f32 %v3693_v32, %v3694_v46  ;;  %v3842_v34 = vsel %vm3787_vm5, %v3664_v45, %v3841_v37  ;;  %v4462_v47 = vld [vmem:[#allocation9 + $0xf0] sm:$0xff]  ;;  %4415 = vmatpush.msra.mxu1 %v4376_v51  ;;  %v4461_v19 = vld [vmem:[#allocation9 + $0xe8] sm:$0xff]  ;;  %v4546_v32 = vld [vmem:[#allocation9 + $0x100] sm:$0xff] }
 0x401   : > { %v3682_v48 = vrot.slane %v3681_v23, 2  ;;  %v3676_v27 = vmax.f32 %v3674_v38, %v3675_v14  ;;  %v3689_v33 = vrot.slane %v3688_v58, 2  ;;  %v3843_v57 = vsel %vm3789_vm6, %v3671_v52, %v3842_v34  ;;  %4501 = vmatpush.msra.mxu2 %v4462_v47  ;;  %v4548_v11 = vld [vmem:[#allocation9 + $0x110] sm:$0xff]  ;;  %v9844_v38 = vpop.f32.mrf.mxu2  ;;  %v5167_v45 = vld [vmem:[#allocation12 + $0x3e0] sm:$0xff] }
 0x402   : > { %v3696_v56 = vrot.slane %v3695_v50, 2  ;;  %4416 = vmatpush.msra.mxu1 %v4375_v61  ;;  %4587 = vmatpush.msra.mxu3 %v4548_v11  ;;  %v4452_v36 = vld [vmem:[#allocation3 + $0x31] sm:$0xff]  ;;  %v7650_v37 = vld [vmem:[#allocation3 + $0x41] sm:$0xff] }
 0x403   : > { %v3683_v59 = vmax.f32 %v3681_v23, %v3682_v48  ;;  %v3677_v54 = vrot.slane %v3676_v27, 1  ;;  %v3690_v5 = vmax.f32 %v3688_v58, %v3689_v33  ;;  %4502 = vmatpush.msra.mxu2 %v4461_v19  ;;  %v4538_v23 = vld [vmem:[#allocation3 + $0x32] sm:$0xff]  ;;  %5182 = vmatpush.msrb.mxu0 %v5167_v45  ;;  %v7651_v48 = vld [vmem:[#allocation3 + $0x42] sm:$0xff]  ;;  %v3997_v45 = vadd.f32 %v9844_v38, %v9838_v60 }
 0x404   : > { %v3697_v8 = vmax.f32 %v3695_v50, %v3696_v56  ;;  %7407 = vmatmul.msk.f32.gmra.mxu1 %vm3700_vm3, %v9789_v18  ;;  %v5163_v34 = vld [vmem:[#allocation12 + $0x3c0] sm:$0xff]  ;;  %v4849_v51 = vld [vmem:[#allocation12 + $0x1e8] sm:$0xff]  ;;  %v4850_v47 = vld [vmem:[#allocation12 + $0x1f0] sm:$0xff] }
 0x405   : > { %7415 = vmatmul.msk.f32.gmra.mxu2 %vm3700_vm3, %v9791_v16  ;;  %v3684_v29 = vrot.slane %v3683_v59, 1  ;;  %v3678_v26 = vmax.f32 %v3676_v27, %v3677_v54  ;;  %v3691_v3 = vrot.slane %v3690_v5, 1  ;;  %5183 = vmatpush.msrb.mxu0 %v5163_v34  ;;  %v4848_v42 = vld [vmem:[#allocation12 + $0x1e0] sm:$0xff]  ;;  %v4845_v19 = vld [vmem:[#allocation12 + $0x1c8] sm:$0xff] }
 0x406   : > { %7423 = vmatmul.msk.f32.gmra.mxu3 %vm3700_vm3, %v9798_v1  ;;  %v3698_v43 = vrot.slane %v3697_v8, 1  ;;  %v4844_v61 = vld [vmem:[#allocation12 + $0x1c0] sm:$0xff] }
 0x407   : > { %v3685_v13 = vmax.f32 %v3683_v59, %v3684_v29  ;;  %v3692_v22 = vmax.f32 %v3690_v5, %v3691_v3  ;;  %v3844_v44 = vsel %vm3791_vm7, %v3678_v26, %v3843_v57  ;;  %v9850_v46 = vpop.f32.mrf.mxu1  ;;  %v9857_v58 = vpop.f32.mrf.mxu3  ;;  %v4458_v5 = vld [vmem:[#allocation3 + $0x91] sm:$0xff]  ;;  %v5155_v34 = vld [vmem:[#allocation12 + $0x380] sm:$0xff] }
 0x408   : > { %v3699_v28 = vmax.f32 %v3697_v8, %v3698_v43  ;;  %v4544_v8 = vld [vmem:[#allocation3 + $0x92] sm:$0xff]  ;;  %v4828_v38 = vld [vmem:[#allocation12 + $0x140] sm:$0xff] }
 0x409   : > { %v3845_v49 = vsel %vm3793_vm8, %v3685_v13, %v3844_v44  ;;  %v9855_v14 = vpop.f32.mrf.mxu2  ;;  %v5159_v44 = vld [vmem:[#allocation12 + $0x3a0] sm:$0xff] }
 0x40a   : > { %v3846_v53 = vsel %vm3795_vm9, %v3692_v22, %v3845_v49  ;;  %5184 = vmatpush.msrb.mxu0 %v5159_v44  ;;  %v4098_v44 = vadd.f32 %v9848_v62, %v3997_v45  ;;  %v5147_v62 = vld [vmem:[#allocation12 + $0x340] sm:$0xff]  ;;  %v4826_v45 = vld [vmem:[#allocation12 + $0x130] sm:$0xff] }
 0x40b   : > { %v3847_v4 = vsel %vm3797_vm10, %v3699_v28, %v3846_v53 }
 0x40c   : > { %3864 = vst.msk [vmem:[#allocation3 + $0x81] sm:$0xff] %vm3700_vm3, %v3847_v4  ;;  %7408 = vmatmul.msk.f32.gmra.mxu1 %vm3700_vm3, %v7646_v35  ;;  %5185 = vmatpush.msrb.mxu0 %v5155_v34  ;;  %v5139_v34 = vld [vmem:[#allocation12 + $0x300] sm:$0xff] }
 0x40d   : > { %7416 = vmatmul.msk.f32.gmra.mxu2 %vm3700_vm3, %v7647_v30 }
 0x40e   : > { %7424 = vmatmul.msk.f32.gmra.mxu3 %vm3700_vm3, %v7648_v41 }
 0x40f   : > { %v9859_v50 = vpop.f32.mrf.mxu1  ;;  %v9866_v33 = vpop.f32.mrf.mxu3 }
 0x411   : > { %v9864_v27 = vpop.f32.mrf.mxu2 }
 0x413   : > { %v4113_v40 = vld [vmem:[#allocation3 + $0x80] sm:$0xff] }
 0x414   : > { %7409 = vmatmul.msk.f32.gmra.mxu1 %vm3700_vm3, %v9596_v6  ;;  %v4547_v6 = vld [vmem:[#allocation9 + $0x108] sm:$0xff]  ;;  %v4199_v31 = vld [vmem:[#allocation3 + $0x81] sm:$0xff] }
 0x415   : > { %7417 = vmatmul.msk.f32.gmra.mxu2 %vm3700_vm3, %v9594_v55  ;;  %v4374_v55 = vld [vmem:[#allocation9 + $0xc0] sm:$0xff]  ;;  %4588 = vmatpush.msra.mxu3 %v4547_v6 }
 0x416   : > { %7425 = vmatmul.msk.f32.gmra.mxu3 %vm3700_vm3, %v9598_v20  ;;  %v4460_v20 = vld [vmem:[#allocation9 + $0xe0] sm:$0xff]  ;;  %4417 = vmatpush.msra.mxu1 %v4374_v55  ;;  %v4846_v55 = vld [vmem:[#allocation12 + $0x1d0] sm:$0xff] }
 0x417   : > { %4503 = vmatpush.msra.mxu2 %v4460_v20  ;;  %4589 = vmatpush.msra.mxu3 %v4546_v32  ;;  %v4285_v24 = vld [vmem:[#allocation3 + $0x82] sm:$0xff]  ;;  %v9868_v56 = vpop.f32.mrf.mxu1 }
 0x418   : > { %4863 = vmatpush.msrb.mxu1 %v4848_v42  ;;  %v5151_v42 = vld [vmem:[#allocation12 + $0x360] sm:$0xff] }
 0x419   : > { %v9876_v59 = vpop.f32.mrf.mxu2  ;;  %4883 = vmatpush.msrb.mxu2 %v4849_v51  ;;  %4903 = vmatpush.msrb.mxu3 %v4850_v47  ;;  %v4829_v51 = vld [vmem:[#allocation12 + $0x148] sm:$0xff]  ;;  %v4830_v47 = vld [vmem:[#allocation12 + $0x150] sm:$0xff] }
 0x41a   : > { %4864 = vmatpush.msrb.mxu1 %v4844_v61  ;;  %5186 = vmatpush.msrb.mxu0 %v5151_v42  ;;  %v4000_v61 = vadd.f32 %v9855_v14, %v9850_v46  ;;  %v4820_v46 = vld [vmem:[#allocation12 + $0x100] sm:$0xff]  ;;  %v4821_v14 = vld [vmem:[#allocation12 + $0x108] sm:$0xff] }
 0x41b   : > { %4884 = vmatpush.msrb.mxu2 %v4845_v19  ;;  %4904 = vmatpush.msrb.mxu3 %v4846_v55 }
 0x41c   : > { %7410 = vmatmul.msk.f32.gmra.mxu1 %vm3700_vm3, %v9666_v25  ;;  %5187 = vmatpush.msrb.mxu0 %v5147_v62  ;;  %v4807_v62 = vld [vmem:[#allocation12 + $0xa0] sm:$0xff] }
 0x41d   : > { %7418 = vmatmul.msk.f32.gmra.mxu2 %vm3700_vm3, %v9664_v15 }
 0x41e   : > { %7426 = vmatmul.msk.f32.gmra.mxu3 %vm3700_vm3, %v9668_v0 }
 0x424   : > { %7411 = vmatmul.msk.f32.gmra.mxu1 %vm3700_vm3, %v9718_v21 }
 0x425   : > { %7419 = vmatmul.msk.f32.gmra.mxu2 %vm3700_vm3, %v9716_v63 }
 0x426   : > { %7427 = vmatmul.msk.f32.gmra.mxu3 %vm3700_vm3, %v9720_v10 }
 0x42c   : > { %7412 = vmatmul.msk.f32.gmra.mxu1 %vm3700_vm3, %v9770_v7 }
 0x42d   : > { %7420 = vmatmul.msk.f32.gmra.mxu2 %vm3700_vm3, %v9768_v17 }
 0x42e   : > { %7428 = vmatmul.msk.f32.gmra.mxu3 %vm3700_vm3, %v9772_v39 }
 0x434   : > { %7413 = vmatmul.msk.f32.gmra.mxu1 %vm3700_vm3, %v4113_v40 }
 0x435   : > { %7421 = vmatmul.msk.f32.gmra.mxu2 %vm3700_vm3, %v4199_v31 }
 0x436   : > { %7429 = vmatmul.msk.f32.gmra.mxu3 %vm3700_vm3, %v4285_v24 }
 0x43c   : > { %7430 = vmatmul.msk.f32.vlgmr.msra.gmra.mxu1 %vm3700_vm3, %v9789_v18  ;;  %v9878_v18 = vpop.f32.mrf.mxu3 }
 0x43d   : > { %7438 = vmatmul.msk.f32.vlgmr.msra.gmra.mxu2 %vm3700_vm3, %v9791_v16  ;;  %v9880_v16 = vpop.f32.mrf.mxu1 }
 0x43e   : > { %7446 = vmatmul.msk.f32.vlgmr.msra.gmra.mxu3 %vm3700_vm3, %v9798_v1 }
 0x444   : > { %7431 = vmatmul.msk.f32.gmra.mxu1 %vm3700_vm3, %v7646_v35 }
 0x445   : > { %7439 = vmatmul.msk.f32.gmra.mxu2 %vm3700_vm3, %v4452_v36  ;;  %v4841_v36 = vld [vmem:[#allocation12 + $0x1a8] sm:$0xff] }
 0x446   : > { %7447 = vmatmul.msk.f32.gmra.mxu3 %vm3700_vm3, %v4538_v23  ;;  %v4842_v23 = vld [vmem:[#allocation12 + $0x1b0] sm:$0xff]  ;;  %4885 = vmatpush.msrb.mxu2 %v4841_v36  ;;  %v4824_v36 = vld [vmem:[#allocation12 + $0x120] sm:$0xff] }
 0x447   : > { %4905 = vmatpush.msrb.mxu3 %v4842_v23  ;;  %v4825_v23 = vld [vmem:[#allocation12 + $0x128] sm:$0xff] }
 0x44c   : > { %7432 = vmatmul.msk.f32.gmra.mxu1 %vm3700_vm3, %v7649_v2  ;;  %v4836_v2 = vld [vmem:[#allocation12 + $0x180] sm:$0xff] }
 0x44d   : > { %7440 = vmatmul.msk.f32.gmra.mxu2 %vm3700_vm3, %v7650_v37  ;;  %v4837_v37 = vld [vmem:[#allocation12 + $0x188] sm:$0xff] }
 0x44e   : > { %7448 = vmatmul.msk.f32.gmra.mxu3 %vm3700_vm3, %v7651_v48  ;;  %v4838_v48 = vld [vmem:[#allocation12 + $0x190] sm:$0xff]  ;;  %4886 = vmatpush.msrb.mxu2 %v4837_v37  ;;  %v5143_v37 = vld [vmem:[#allocation12 + $0x320] sm:$0xff] }
 0x44f   : > { %4906 = vmatpush.msrb.mxu3 %v4838_v48  ;;  %5188 = vmatpush.msrb.mxu0 %v5143_v37  ;;  %v4099_v48 = vadd.f32 %v9857_v58, %v4000_v61  ;;  %v4843_v61 = vld [vmem:[#allocation12 + $0x1b8] sm:$0xff]  ;;  %v4808_v37 = vld [vmem:[#allocation12 + $0xa8] sm:$0xff] }
 0x451   : > { %5189 = vmatpush.msrb.mxu0 %v5139_v34  ;;  %v4835_v34 = vld [vmem:[#allocation12 + $0x178] sm:$0xff] }
 0x454   : > { %7433 = vmatmul.msk.f32.gmra.mxu1 %vm3700_vm3, %v9666_v25  ;;  %v9888_v25 = vpop.f32.mrf.mxu2 }
 0x455   : > { %7441 = vmatmul.msk.f32.gmra.mxu2 %vm3700_vm3, %v9664_v15  ;;  %v9890_v15 = vpop.f32.mrf.mxu3 }
 0x456   : > { %7449 = vmatmul.msk.f32.gmra.mxu3 %vm3700_vm3, %v9668_v0  ;;  %v9892_v0 = vpop.f32.mrf.mxu1 }
 0x45c   : > { %7434 = vmatmul.msk.f32.gmra.mxu1 %vm3700_vm3, %v9718_v21  ;;  %v9900_v21 = vpop.f32.mrf.mxu2 }
 0x45d   : > { %7442 = vmatmul.msk.f32.gmra.mxu2 %vm3700_vm3, %v9716_v63  ;;  %v9902_v63 = vpop.f32.mrf.mxu3 }
 0x45e   : > { %7450 = vmatmul.msk.f32.gmra.mxu3 %vm3700_vm3, %v9720_v10  ;;  %v9904_v10 = vpop.f32.mrf.mxu1 }
 0x464   : > { %7435 = vmatmul.msk.f32.gmra.mxu1 %vm3700_vm3, %v9770_v7  ;;  %v9909_v7 = vpop.f32.mrf.mxu2 }
 0x465   : > { %7443 = vmatmul.msk.f32.gmra.mxu2 %vm3700_vm3, %v9768_v17  ;;  %v9911_v17 = vpop.f32.mrf.mxu3 }
 0x466   : > { %7451 = vmatmul.msk.f32.gmra.mxu3 %vm3700_vm3, %v9772_v39  ;;  %v4372_v39 = vld [vmem:[#allocation3 + $0x90] sm:$0xff] }
 0x46c   : > { %7436 = vmatmul.msk.f32.gmra.mxu1 %vm3700_vm3, %v4113_v40 }
 0x46d   : > { %7444 = vmatmul.msk.f32.gmra.mxu2 %vm3700_vm3, %v4199_v31 }
 0x46e   : > { %7452 = vmatmul.msk.f32.gmra.mxu3 %vm3700_vm3, %v4285_v24  ;;  %v4840_v24 = vld [vmem:[#allocation12 + $0x1a0] sm:$0xff] }
 0x46f   : > { %4865 = vmatpush.msrb.mxu1 %v4840_v24 }
 0x471   : > { %v9913_v54 = vpop.f32.mrf.mxu1  ;;  %4866 = vmatpush.msrb.mxu1 %v4836_v2 }
 0x474   : > { %7437 = vmatmul.msk.f32.gmra.mxu1 %vm3700_vm3, %v4372_v39  ;;  %v4832_v39 = vld [vmem:[#allocation12 + $0x160] sm:$0xff] }
 0x475   : > { %7445 = vmatmul.msk.f32.gmra.mxu2 %vm3700_vm3, %v4458_v5  ;;  %v4833_v5 = vld [vmem:[#allocation12 + $0x168] sm:$0xff]  ;;  %4867 = vmatpush.msrb.mxu1 %v4832_v39  ;;  %v4851_v39 = vld [vmem:[#allocation12 + $0x1f8] sm:$0xff] }
 0x476   : > { %7453 = vmatmul.msk.f32.gmra.mxu3 %vm3700_vm3, %v4544_v8  ;;  %v4834_v8 = vld [vmem:[#allocation12 + $0x170] sm:$0xff]  ;;  %4887 = vmatpush.msrb.mxu2 %v4833_v5  ;;  %v4815_v5 = vld [vmem:[#allocation12 + $0xe0] sm:$0xff] }
 0x477   : > { %4907 = vmatpush.msrb.mxu3 %v4834_v8  ;;  %4868 = vmatpush.msrb.mxu1 %v4828_v38  ;;  %v4816_v8 = vld [vmem:[#allocation12 + $0xe8] sm:$0xff] }
 0x478   : > { %v9918_v1 = vpop.f32.mrf.mxu2  ;;  %4888 = vmatpush.msrb.mxu2 %v4829_v51  ;;  %v4811_v51 = vld [vmem:[#allocation12 + $0xc0] sm:$0xff] }
 0x479   : > { %v9920_v52 = vpop.f32.mrf.mxu3  ;;  %v9922_v29 = vpop.f32.mrf.mxu1  ;;  %4908 = vmatpush.msrb.mxu3 %v4830_v47  ;;  %4869 = vmatpush.msrb.mxu1 %v4824_v36  ;;  %v4812_v47 = vld [vmem:[#allocation12 + $0xc8] sm:$0xff] }
 0x47a   : > { %v4184_v19 = vadd.f32 %v9922_v29, %v4098_v44  ;;  %4889 = vmatpush.msrb.mxu2 %v4825_v23  ;;  %v4822_v29 = vld [vmem:[#allocation12 + $0x110] sm:$0xff]  ;;  %v5287_v44 = vld [vmem:[#allocation12 + $0x4e0] sm:$0xff] }
 0x47b   : > { %4909 = vmatpush.msrb.mxu3 %v4826_v45  ;;  %4870 = vmatpush.msrb.mxu1 %v4820_v46 }
 0x47c   : > { %4890 = vmatpush.msrb.mxu2 %v4821_v14  ;;  %5302 = vmatpush.msra.mxu0 %v5287_v44  ;;  %v4839_v14 = vld [vmem:[#allocation12 + $0x198] sm:$0xff] }
 0x47d   : > { %4910 = vmatpush.msrb.mxu3 %v4822_v29  ;;  %4923 = vmatpush.msra.mxu1 %v4851_v39  ;;  %v4803_v29 = vld [vmem:[#allocation12 + $0x80] sm:$0xff] }
 0x47e   : > { %4946 = vmatpush.msra.mxu2 %v4815_v5  ;;  %v4799_v39 = vld [vmem:[#allocation12 + $0x60] sm:$0xff]  ;;  %v4800_v5 = vld [vmem:[#allocation12 + $0x68] sm:$0xff] }
 0x47f   : > { %4966 = vmatpush.msra.mxu3 %v4816_v8  ;;  %v9984_v8 = vld [vmem:[#allocation10] ss:$0 sm:$0xff] }
 0x480   : > { %v9924_v26 = vpop.f32.mrf.mxu2  ;;  %4947 = vmatpush.msra.mxu2 %v4811_v51  ;;  %v4796_v51 = vld [vmem:[#allocation12 + $0x48] sm:$0xff] }
 0x481   : > { %v9926_v3 = vpop.f32.mrf.mxu3  ;;  %v9928_v43 = vpop.f32.mrf.mxu1  ;;  %v4270_v2 = vadd.f32 %v9924_v26, %v4184_v19  ;;  %v4847_v26 = vld [vmem:[#allocation12 + $0x1d8] sm:$0xff]  ;;  %v5283_v19 = vld [vmem:[#allocation12 + $0x4c0] sm:$0xff]  ;;  %4967 = vmatpush.msra.mxu3 %v4812_v47 }
 0x482   : > { %v4185_v38 = vadd.f32 %v9928_v43, %v4099_v48  ;;  %4924 = vmatpush.msra.mxu1 %v4847_v26  ;;  %5303 = vmatpush.msra.mxu0 %v5283_v19  ;;  %v4003_v43 = vadd.f32 %v9864_v27, %v9859_v50  ;;  %v4804_v48 = vld [vmem:[#allocation12 + $0x88] sm:$0xff]  ;;  %v5271_v50 = vld [vmem:[#allocation12 + $0x460] sm:$0xff]  ;;  %v4006_v19 = vadd.f32 %v9876_v59, %v9868_v56  ;;  %v4823_v56 = vld [vmem:[#allocation12 + $0x118] sm:$0xff] }
 0x483   : > { %v4356_v42 = vadd.f32 %v9926_v3, %v4270_v2  ;;  %v5279_v3 = vld [vmem:[#allocation12 + $0x4a0] sm:$0xff]  ;;  %4948 = vmatpush.msra.mxu2 %v4807_v62  ;;  %4968 = vmatpush.msra.mxu3 %v4808_v37 }
 0x484   : > { %4925 = vmatpush.msra.mxu1 %v4843_v61  ;;  %5304 = vmatpush.msra.mxu0 %v5279_v3  ;;  %v4100_v27 = vadd.f32 %v9866_v33, %v4003_v43  ;;  %v5267_v47 = vld [vmem:[#allocation12 + $0x440] sm:$0xff]  ;;  %v4827_v33 = vld [vmem:[#allocation12 + $0x138] sm:$0xff] }
 0x485   : > { %4949 = vmatpush.msra.mxu2 %v4803_v29  ;;  %4969 = vmatpush.msra.mxu3 %v4804_v48  ;;  %v5263_v37 = vld [vmem:[#allocation12 + $0x420] sm:$0xff] }
 0x486   : > { %4926 = vmatpush.msra.mxu1 %v4839_v14  ;;  %v4787_v59 = vld [vmem:[#allocation12] sm:$0xff]  ;;  %v4101_v14 = vadd.f32 %v9878_v18, %v4006_v19 }
 0x487   : > { %4950 = vmatpush.msra.mxu2 %v4799_v39  ;;  %4970 = vmatpush.msra.mxu3 %v4800_v5 }
 0x488   : > { %v9930_v57 = vpop.f32.mrf.mxu2  ;;  %4927 = vmatpush.msra.mxu1 %v4835_v34 }
 0x489   : > { %v9932_v13 = vpop.f32.mrf.mxu3  ;;  %v9934_v22 = vpop.f32.mrf.mxu1  ;;  %v4271_v36 = vadd.f32 %v9930_v57, %v4185_v38  ;;  %v5275_v57 = vld [vmem:[#allocation12 + $0x480] sm:$0xff]  ;;  %4971 = vmatpush.msra.mxu3 %v4796_v51 }
 0x48a   : > { %5305 = vmatpush.msra.mxu0 %v5275_v57  ;;  %v4795_v38 = vld [vmem:[#allocation12 + $0x40] sm:$0xff] }
 0x48b   : > { %4951 = vmatpush.msra.mxu2 %v4795_v38 }
 0x48c   : > { %5306 = vmatpush.msra.mxu0 %v5271_v50 }
 0x48e   : > { %5307 = vmatpush.msra.mxu0 %v5267_v47 }
 0x490   : > { %v9936_v28 = vpop.f32.mrf.mxu2  ;;  %5308 = vmatpush.msra.mxu0 %v5263_v37 }
 0x491   : > { %v9938_v49 = vpop.f32.mrf.mxu3  ;;  %v9940_v53 = vpop.f32.mrf.mxu1 }
 0x492   : > { %v4187_v48 = vadd.f32 %v9940_v53, %v4101_v14 }
 0x498   : > { %v9942_v4 = vpop.f32.mrf.mxu2 }
 0x499   : > { %v9944_v35 = vpop.f32.mrf.mxu3  ;;  %v9946_v30 = vpop.f32.mrf.mxu1  ;;  %v4273_v39 = vadd.f32 %v9942_v4, %v4187_v48 }
 0x49b   : > { %v4359_v51 = vadd.f32 %v9944_v35, %v4273_v39 }
 0x4a0   : > { %v9948_v41 = vpop.f32.mrf.mxu2 }
 0x4a1   : > { %v9950_v12 = vpop.f32.mrf.mxu3  ;;  %v9952_v9 = vpop.f32.mrf.mxu1 }
 0x4a8   : > { %v9954_v11 = vpop.f32.mrf.mxu2 }
 0x4a9   : > { %v9956_v6 = vpop.f32.mrf.mxu3  ;;  %v9958_v20 = vpop.f32.mrf.mxu1 }
 0x4b0   : > { %v9960_v32 = vpop.f32.mrf.mxu2 }
 0x4b1   : > { %v9962_v40 = vpop.f32.mrf.mxu3  ;;  %v9964_v31 = vpop.f32.mrf.mxu1 }
 0x4b8   : > { %v9969_v60 = vpop.f32.mrf.mxu2 }
 0x4b9   : > { %v9974_v55 = vpop.f32.mrf.mxu3  ;;  %v4419_v24 = vpop.f32.mrf.mxu1 }
 0x4ba   : > { %v4443_v23 = vadd.f32 %v4419_v24, %v4356_v42  ;;  %v4357_v24 = vadd.f32 %v9932_v13, %v4271_v36  ;;  %v4831_v42 = vld [vmem:[#allocation12 + $0x158] sm:$0xff]  ;;  %v4791_v36 = vld [vmem:[#allocation12 + $0x20] sm:$0xff] }
 0x4bb   : > { %4928 = vmatpush.msra.mxu1 %v4831_v42  ;;  %4952 = vmatpush.msra.mxu2 %v4791_v36 }
 0x4bd   : > { %4929 = vmatpush.msra.mxu1 %v4827_v33  ;;  %4953 = vmatpush.msra.mxu2 %v4787_v59 }
 0x4bf   : > { %4930 = vmatpush.msra.mxu1 %v4823_v56 }
 0x4c0   : > { %v4505_v58 = vpop.f32.mrf.mxu2 }
 0x4c1   : > { %v4591_v45 = vpop.f32.mrf.mxu3  ;;  %v4422_v2 = vpop.f32.mrf.mxu1  ;;  %v4529_v46 = vadd.f32 %v4505_v58, %v4443_v23  ;;  %v4186_v58 = vadd.f32 %v9934_v22, %v4100_v27  ;;  %v4792_v23 = vld [vmem:[#allocation12 + $0x28] sm:$0xff] }
 0x4c2   : > { %v4444_v26 = vadd.f32 %v4422_v2, %v4357_v24  ;;  %v4788_v22 = vld [vmem:[#allocation12 + $0x8] sm:$0xff]  ;;  %4972 = vmatpush.msra.mxu3 %v4792_v23 }
 0x4c3   : > { %v4615_v44 = vadd.f32 %v4591_v45, %v4529_v46  ;;  %v4272_v3 = vadd.f32 %v9936_v28, %v4186_v58  ;;  %v5259_v46 = vld [vmem:[#allocation12 + $0x400] sm:$0xff] }
 0x4c4   : > { %4973 = vmatpush.msra.mxu3 %v4788_v22  ;;  %5309 = vmatpush.msra.mxu0 %v5259_v46 }
 0x4c5   : > { %v4627_v2 = vadd.f32 %v9984_v8, %v4615_v44  ;;  %v4358_v28 = vadd.f32 %v9938_v49, %v4272_v3 }
 0x4c7   : > { %v4635_v57 = vmax.f32 %v4627_v2, 0.0 }
 0x4c8   : > { %v4508_v13 = vpop.f32.mrf.mxu2 }
 0x4c9   : > { %v4530_v61 = vadd.f32 %v4508_v13, %v4444_v26  ;;  %v4594_v62 = vpop.f32.mrf.mxu3  ;;  %v4425_v45 = vpop.f32.mrf.mxu1 }
 0x4ca   : > { %v4445_v50 = vadd.f32 %v4425_v45, %v4358_v28 }
 0x4cb   : > { %v4616_v43 = vadd.f32 %v4594_v62, %v4530_v61 }
 0x4cd   : > { %v4628_v29 = vadd.f32 %v9984_v8, %v4616_v43 }
 0x4cf   : > { %v4636_v24 = vmax.f32 %v4628_v29, 0.0 }
 0x4d0   : > { %v4511_v34 = vpop.f32.mrf.mxu2 }
 0x4d1   : > { %v4643_v5 = vmax.f32 %v4635_v57, %v4636_v24  ;;  %v4597_v27 = vpop.f32.mrf.mxu3  ;;  %v4531_v42 = vadd.f32 %v4511_v34, %v4445_v50  ;;  %v4428_v38 = vpop.f32.mrf.mxu1  ;;  %v4817_v34 = vld [vmem:[#allocation12 + $0xf0] sm:$0xff]  ;;  %v4818_v50 = vld [vmem:[#allocation12 + $0xf8] sm:$0xff] }
 0x4d2   : > { %v4446_v4 = vadd.f32 %v4428_v38, %v4359_v51  ;;  %v5407_v51 = vld [vmem:[#allocation12 + $0x5e0] sm:$0xff] }
 0x4d3   : > { %v4651_v44 = vrot.slane %v4643_v5, 2  ;;  %v4653_v18 = vrot.slane %v4643_v5, 6  ;;  %v4675_v26 = vsel %vm495_vm1, %v4643_v5, -inf  ;;  %v4617_v58 = vadd.f32 %v4597_v27, %v4531_v42  ;;  %v5047_v27 = vld [vmem:[#allocation12 + $0x2e0] sm:$0xff] }
 0x4d4   : > { %v4676_v13 = vrot.slane %v4675_v26, 4  ;;  %v4652_v43 = vrot.slane %v4643_v5, 4 }
 0x4d5   : > { %v4682_v49 = vsel %vm495_vm1, %v4651_v44, -inf  ;;  %v4696_v53 = vsel %vm495_vm1, %v4653_v18, -inf  ;;  %v4629_v2 = vadd.f32 %v9984_v8, %v4617_v58  ;;  %v4813_v18 = vld [vmem:[#allocation12 + $0xd0] sm:$0xff]  ;;  %v4810_v58 = vld [vmem:[#allocation12 + $0xb8] sm:$0xff] }
 0x4d6   : > { %v4683_v47 = vrot.slane %v4682_v49, 4  ;;  %v4697_v19 = vrot.slane %v4696_v53, 4  ;;  %v4677_v23 = vmax.f32 %v4675_v26, %v4676_v13  ;;  %v4689_v57 = vsel %vm495_vm1, %v4652_v43, -inf  ;;  %v5043_v13 = vld [vmem:[#allocation12 + $0x2c0] sm:$0xff] }
 0x4d7   : > { %v4637_v28 = vmax.f32 %v4629_v2, 0.0  ;;  %v4690_v26 = vrot.slane %v4689_v57, 4  ;;  %v5035_v2 = vld [vmem:[#allocation12 + $0x280] sm:$0xff] }
 0x4d8   : > { %v4684_v61 = vmax.f32 %v4682_v49, %v4683_v47  ;;  %v4698_v62 = vmax.f32 %v4696_v53, %v4697_v19  ;;  %v4514_v33 = vpop.f32.mrf.mxu2  ;;  %v4678_v46 = vrot.slane %v4677_v23, 2  ;;  %v4814_v49 = vld [vmem:[#allocation12 + $0xd8] sm:$0xff]  ;;  %v4809_v47 = vld [vmem:[#allocation12 + $0xb0] sm:$0xff]  ;;  %v5403_v19 = vld [vmem:[#allocation12 + $0x5c0] sm:$0xff] }
 0x4d9   : > { %v4532_v36 = vadd.f32 %v4514_v33, %v4446_v4  ;;  %v4600_v3 = vpop.f32.mrf.mxu3  ;;  %v4805_v33 = vld [vmem:[#allocation12 + $0x90] sm:$0xff] }
 0x4da   : > { %v4685_v45 = vrot.slane %v4684_v61, 2  ;;  %v4699_v37 = vrot.slane %v4698_v62, 2  ;;  %v4679_v5 = vmax.f32 %v4677_v23, %v4678_v46 }
 0x4db   : > { %v4618_v35 = vadd.f32 %v4600_v3, %v4532_v36  ;;  %v4691_v36 = vmax.f32 %v4689_v57, %v4690_v26 }
 0x4dc   : > { %v4686_v56 = vmax.f32 %v4684_v61, %v4685_v45  ;;  %v4700_v59 = vmax.f32 %v4698_v62, %v4699_v37  ;;  %v4680_v4 = vrot.slane %v4679_v5, 1  ;;  %v5039_v62 = vld [vmem:[#allocation12 + $0x2a0] sm:$0xff]  ;;  %v4806_v37 = vld [vmem:[#allocation12 + $0x98] sm:$0xff] }
 0x4dd   : > { %v4630_v22 = vadd.f32 %v9984_v8, %v4618_v35  ;;  %v5399_v45 = vld [vmem:[#allocation12 + $0x5a0] sm:$0xff]  ;;  %v4692_v46 = vrot.slane %v4691_v36, 2 }
 0x4de   : > { %v4687_v14 = vrot.slane %v4686_v56, 1  ;;  %v4701_v29 = vrot.slane %v4700_v59, 1  ;;  %v5395_v35 = vld [vmem:[#allocation12 + $0x580] sm:$0xff] }
 0x4df   : > { %v4638_v48 = vmax.f32 %v4630_v22, 0.0  ;;  %v4801_v22 = vld [vmem:[#allocation12 + $0x70] sm:$0xff]  ;;  %v4693_v26 = vmax.f32 %v4691_v36, %v4692_v46 }
 0x4e0   : > { %v4688_v24 = vmax.f32 %v4686_v56, %v4687_v14  ;;  %v10006_v44 = vmax.f32 %v4700_v59, %v4701_v29  ;;  %v10017_v59 = vmax.f32 %v4679_v5, %v4680_v4  ;;  %v4802_v14 = vld [vmem:[#allocation12 + $0x78] sm:$0xff]  ;;  %v5031_v29 = vld [vmem:[#allocation12 + $0x260] sm:$0xff]  ;;  %v5049_v36 = vld [vmem:[#allocation12 + $0x2f0] sm:$0xff] }
 0x4e1   : > { %v10004_v39 = vmax.f32 %v4637_v28, %v4638_v48  ;;  %v5391_v28 = vld [vmem:[#allocation12 + $0x560] sm:$0xff]  ;;  %v4797_v48 = vld [vmem:[#allocation12 + $0x50] sm:$0xff] }
 0x4e2   : > { %7454 = vmatmul.msk.f32.vlgmr.msrb.gmra.mxu1 %vm492_vm0, %v4688_v24  ;;  %7455 = vmatmul.msk.f32.vlgmr.msrb.gmra.mxu2 %vm492_vm0, %v4688_v24 }
 0x4e3   : > { %v4654_v42 = vrot.slane %v10004_v39, 2  ;;  %v4703_v38 = vsel %vm495_vm1, %v10004_v39, -inf  ;;  %7456 = vmatmul.msk.f32.vlgmr.msrb.gmra.mxu3 %vm492_vm0, %v4688_v24  ;;  %4986 = vmatpush.msrb.mxu1 %v4817_v34  ;;  %v4798_v34 = vld [vmem:[#allocation12 + $0x58] sm:$0xff] }
 0x4e4   : > { %v4704_v53 = vrot.slane %v4703_v38, 4  ;;  %5006 = vmatpush.msrb.mxu2 %v4818_v50  ;;  %5062 = vmatpush.msrb.mxu3 %v5047_v27  ;;  %v5027_v50 = vld [vmem:[#allocation12 + $0x240] sm:$0xff]  ;;  %v4655_v27 = vrot.slane %v10004_v39, 4 }
 0x4e5   : > { %7466 = vmatmul.msk.f32.vlgmr.msrb.gmra.mxu0 %vm492_vm0, %v10006_v44  ;;  %4987 = vmatpush.msrb.mxu1 %v4813_v18  ;;  %v4710_v23 = vsel %vm495_vm1, %v4654_v42, -inf  ;;  %v4793_v18 = vld [vmem:[#allocation12 + $0x30] sm:$0xff]  ;;  %v4794_v42 = vld [vmem:[#allocation12 + $0x38] sm:$0xff] }
 0x4e6   : > { %v4705_v61 = vmax.f32 %v4703_v38, %v4704_v53  ;;  %5422 = vmatpush.msrb.mxu0 %v5407_v51  ;;  %5007 = vmatpush.msrb.mxu2 %v4814_v49  ;;  %v4711_v56 = vrot.slane %v4710_v23, 4  ;;  %v5023_v38 = vld [vmem:[#allocation12 + $0x220] sm:$0xff]  ;;  %v4789_v49 = vld [vmem:[#allocation12 + $0x10] sm:$0xff]  ;;  %v4790_v53 = vld [vmem:[#allocation12 + $0x18] sm:$0xff]  ;;  %v4717_v4 = vsel %vm495_vm1, %v4655_v27, -inf  ;;  %v10051_v27 = vpop.f32.mrf.mxu3 }
 0x4e7   : > { %5063 = vmatpush.msrb.mxu3 %v5043_v13  ;;  %4988 = vmatpush.msrb.mxu1 %v4809_v47  ;;  %v5383_v51 = vld [vmem:[#allocation12 + $0x520] sm:$0xff] }
 0x4e8   : > { %v4706_v3 = vrot.slane %v4705_v61, 2  ;;  %5423 = vmatpush.msrb.mxu0 %v5403_v19  ;;  %5008 = vmatpush.msrb.mxu2 %v4810_v58  ;;  %v4712_v5 = vmax.f32 %v4710_v23, %v4711_v56  ;;  %v5019_v13 = vld [vmem:[#allocation12 + $0x200] sm:$0xff]  ;;  %v4012_v19 = vadd.f32 %v9900_v21, %v9892_v0  ;;  %v4694_v23 = vrot.slane %v4693_v26, 1  ;;  %v5046_v56 = vld [vmem:[#allocation12 + $0x2d8] sm:$0xff] }
 0x4e9   : > { %5064 = vmatpush.msrb.mxu3 %v5039_v62  ;;  %4989 = vmatpush.msrb.mxu1 %v4805_v33  ;;  %v10030_v62 = vpop.f32.mrf.mxu1  ;;  %v5379_v33 = vld [vmem:[#allocation12 + $0x500] sm:$0xff]  ;;  %v4718_v21 = vrot.slane %v4717_v4, 4 }
 0x4ea   : > { %v4707_v43 = vmax.f32 %v4705_v61, %v4706_v3  ;;  %5424 = vmatpush.msrb.mxu0 %v5399_v45  ;;  %5009 = vmatpush.msrb.mxu2 %v4806_v37  ;;  %v4713_v58 = vrot.slane %v4712_v5, 2  ;;  %v5048_v61 = vld [vmem:[#allocation12 + $0x2e8] sm:$0xff]  ;;  %v4009_v45 = vadd.f32 %v9888_v25, %v9880_v16  ;;  %v5050_v37 = vld [vmem:[#allocation12 + $0x2f8] sm:$0xff]  ;;  %v5527_v0 = vld [vmem:[#allocation12 + $0x6e0] sm:$0xff]  ;;  %v10034_v3 = vpop.f32.mrf.mxu2  ;;  %v10039_v16 = vmax.f32 %v4693_v26, %v4694_v23 }
 0x4eb   : > { %5065 = vmatpush.msrb.mxu3 %v5035_v2  ;;  %7457 = vmatmul.msk.f32.vlgmr.msra.gmra.mxu1 %vm492_vm0, %v4688_v24  ;;  %v5387_v24 = vld [vmem:[#allocation12 + $0x540] sm:$0xff]  ;;  %v4103_v2 = vadd.f32 %v9902_v63, %v4012_v19  ;;  %v5045_v25 = vld [vmem:[#allocation12 + $0x2d0] sm:$0xff]  ;;  %v5032_v26 = vld [vmem:[#allocation12 + $0x268] sm:$0xff] }
 0x4ec   : > { %5425 = vmatpush.msrb.mxu0 %v5395_v35  ;;  %7458 = vmatmul.msk.f32.vlgmr.msra.gmra.mxu2 %vm492_vm0, %v10017_v59  ;;  %v4708_v57 = vrot.slane %v4707_v43, 1  ;;  %v4714_v35 = vmax.f32 %v4712_v5, %v4713_v58  ;;  %v5523_v63 = vld [vmem:[#allocation12 + $0x6c0] sm:$0xff]  ;;  %v5038_v5 = vld [vmem:[#allocation12 + $0x298] sm:$0xff]  ;;  %v5029_v19 = vld [vmem:[#allocation12 + $0x250] sm:$0xff] }
 0x4ed   : > { %7459 = vmatmul.msk.f32.vlgmr.msra.gmra.mxu3 %vm492_vm0, %v10017_v59  ;;  %4990 = vmatpush.msrb.mxu1 %v4801_v22  ;;  %v4102_v22 = vadd.f32 %v9890_v15, %v4009_v45  ;;  %v4189_v46 = vadd.f32 %v9952_v9, %v4103_v2  ;;  %v5519_v9 = vld [vmem:[#allocation12 + $0x6a0] sm:$0xff]  ;;  %v5024_v23 = vld [vmem:[#allocation12 + $0x228] sm:$0xff]  ;;  %v5025_v45 = vld [vmem:[#allocation12 + $0x230] sm:$0xff] }
 0x4ee   : > { %5010 = vmatpush.msrb.mxu2 %v4802_v14  ;;  %5066 = vmatpush.msrb.mxu3 %v5031_v29  ;;  %v10025_v47 = vmax.f32 %v4707_v43, %v4708_v57  ;;  %v5044_v43 = vld [vmem:[#allocation12 + $0x2c8] sm:$0xff]  ;;  %v4719_v29 = vmax.f32 %v4717_v4, %v4718_v21  ;;  %v4656_v4 = vrot.slane %v10004_v39, 6  ;;  %v5503_v21 = vld [vmem:[#allocation12 + $0x620] sm:$0xff]  ;;  %v5021_v2 = vld [vmem:[#allocation12 + $0x210] sm:$0xff] }
 0x4ef   : > { %5426 = vmatpush.msrb.mxu0 %v5391_v28  ;;  %4991 = vmatpush.msrb.mxu1 %v4797_v48  ;;  %v5040_v14 = vld [vmem:[#allocation12 + $0x2a8] sm:$0xff]  ;;  %v5041_v28 = vld [vmem:[#allocation12 + $0x2b0] sm:$0xff]  ;;  %v5042_v48 = vld [vmem:[#allocation12 + $0x2b8] sm:$0xff]  ;;  %v4188_v57 = vadd.f32 %v9946_v30, %v4102_v22  ;;  %v4275_v15 = vadd.f32 %v9954_v11, %v4189_v46  ;;  %v4606_v22 = vpop.f32.mrf.mxu3 }
 0x4f0   : > { %5011 = vmatpush.msrb.mxu2 %v4798_v34  ;;  %5067 = vmatpush.msrb.mxu3 %v5027_v50  ;;  %v5036_v34 = vld [vmem:[#allocation12 + $0x288] sm:$0xff]  ;;  %v4715_v50 = vrot.slane %v4714_v35, 1  ;;  %v4720_v30 = vrot.slane %v4719_v29, 2  ;;  %v5033_v11 = vld [vmem:[#allocation12 + $0x270] sm:$0xff] }
 0x4f1   : > { %5427 = vmatpush.msrb.mxu0 %v5387_v24  ;;  %4992 = vmatpush.msrb.mxu1 %v4793_v18  ;;  %v4274_v24 = vadd.f32 %v9948_v41, %v4188_v57  ;;  %v5515_v18 = vld [vmem:[#allocation12 + $0x680] sm:$0xff]  ;;  %v5028_v41 = vld [vmem:[#allocation12 + $0x248] sm:$0xff] }
 0x4f2   : > { %5012 = vmatpush.msrb.mxu2 %v4794_v42  ;;  %5068 = vmatpush.msrb.mxu3 %v5023_v38  ;;  %v4434_v42 = vpop.f32.mrf.mxu1  ;;  %v4361_v38 = vadd.f32 %v9956_v6, %v4275_v15  ;;  %v5030_v6 = vld [vmem:[#allocation12 + $0x258] sm:$0xff]  ;;  %v5020_v39 = vld [vmem:[#allocation12 + $0x208] sm:$0xff]  ;;  %v5647_v15 = vld [vmem:[#allocation12 + $0x7e0] sm:$0xff] }
 0x4f3   : > { %5428 = vmatpush.msrb.mxu0 %v5383_v51  ;;  %4993 = vmatpush.msrb.mxu1 %v4789_v49  ;;  %v10055_v51 = vmax.f32 %v4714_v35, %v4715_v50  ;;  %v5034_v49 = vld [vmem:[#allocation12 + $0x278] sm:$0xff]  ;;  %v4360_v58 = vadd.f32 %v9950_v12, %v4274_v24  ;;  %v4724_v35 = vsel %vm495_vm1, %v4656_v4, -inf  ;;  %v5161_v24 = vld [vmem:[#allocation12 + $0x3b0] sm:$0xff]  ;;  %v5631_v4 = vld [vmem:[#allocation12 + $0x760] sm:$0xff] }
 0x4f4   : > { %5013 = vmatpush.msrb.mxu2 %v4790_v53  ;;  %5069 = vmatpush.msrb.mxu3 %v5019_v13  ;;  %v5511_v53 = vld [vmem:[#allocation12 + $0x660] sm:$0xff]  ;;  %v4520_v13 = vpop.f32.mrf.mxu2  ;;  %v5026_v12 = vld [vmem:[#allocation12 + $0x238] sm:$0xff] }
 0x4f5   : > { %7470 = vmatmul.msk.f32.vlgmr.msra.gmra.mxu0 %vm492_vm0, %v10025_v47  ;;  %5082 = vmatpush.msra.mxu1 %v5048_v61  ;;  %v4448_v61 = vadd.f32 %v4434_v42, %v4361_v38  ;;  %v5166_v50 = vld [vmem:[#allocation12 + $0x3d8] sm:$0xff]  ;;  %v5157_v42 = vld [vmem:[#allocation12 + $0x390] sm:$0xff] }
 0x4f6   : > { %5429 = vmatpush.msrb.mxu0 %v5379_v33  ;;  %5102 = vmatpush.msra.mxu2 %v5049_v36  ;;  %v5507_v33 = vld [vmem:[#allocation12 + $0x640] sm:$0xff]  ;;  %v4721_v36 = vmax.f32 %v4719_v29, %v4720_v30  ;;  %v5169_v29 = vld [vmem:[#allocation12 + $0x3f0] sm:$0xff]  ;;  %v5158_v38 = vld [vmem:[#allocation12 + $0x398] sm:$0xff] }
 0x4f7   : > { %5122 = vmatpush.msra.mxu3 %v5050_v37  ;;  %7460 = vmatmul.msk.f32.vlgmr.msrb.gmra.mxu1 %vm492_vm0, %v10017_v59  ;;  %v4447_v37 = vadd.f32 %v10030_v62, %v4360_v58  ;;  %v5639_v30 = vld [vmem:[#allocation12 + $0x7a0] sm:$0xff]  ;;  %v5148_v58 = vld [vmem:[#allocation12 + $0x348] sm:$0xff] }
 0x4f8   : > { %5542 = vmatpush.msra.mxu0 %v5527_v0  ;;  %7461 = vmatmul.msk.f32.vlgmr.msrb.gmra.mxu2 %vm492_vm0, %v10017_v59  ;;  %v5037_v59 = vld [vmem:[#allocation12 + $0x290] sm:$0xff]  ;;  %v4534_v0 = vadd.f32 %v4520_v13, %v4448_v61  ;;  %v4722_v62 = vrot.slane %v4721_v36, 1  ;;  %v5635_v13 = vld [vmem:[#allocation12 + $0x780] sm:$0xff] }
 0x4f9   : > { %7462 = vmatmul.msk.f32.vlgmr.msrb.gmra.mxu3 %vm492_vm0, %v10039_v16  ;;  %5083 = vmatpush.msra.mxu1 %v5044_v43  ;;  %v4533_v43 = vadd.f32 %v10034_v3, %v4447_v37  ;;  %v5164_v3 = vld [vmem:[#allocation12 + $0x3c8] sm:$0xff]  ;;  %v5149_v61 = vld [vmem:[#allocation12 + $0x350] sm:$0xff] }
 0x4fa   : > { %5103 = vmatpush.msra.mxu2 %v5045_v25  ;;  %5123 = vmatpush.msra.mxu3 %v5046_v56  ;;  %v5022_v25 = vld [vmem:[#allocation12 + $0x218] sm:$0xff]  ;;  %v5499_v56 = vld [vmem:[#allocation12 + $0x600] sm:$0xff]  ;;  %v4620_v46 = vadd.f32 %v4606_v22, %v4534_v0  ;;  %v10071_v57 = vmax.f32 %v4721_v36, %v4722_v62  ;;  %v5144_v36 = vld [vmem:[#allocation12 + $0x328] sm:$0xff] }
 0x4fb   : > { %5543 = vmatpush.msra.mxu0 %v5523_v63  ;;  %5084 = vmatpush.msra.mxu1 %v5040_v14  ;;  %v5168_v63 = vld [vmem:[#allocation12 + $0x3e8] sm:$0xff]  ;;  %v4725_v14 = vrot.slane %v4724_v35, 4  ;;  %v5145_v37 = vld [vmem:[#allocation12 + $0x330] sm:$0xff]  ;;  %v5146_v0 = vld [vmem:[#allocation12 + $0x338] sm:$0xff] }
 0x4fc   : > { %5104 = vmatpush.msra.mxu2 %v5041_v28  ;;  %5124 = vmatpush.msra.mxu3 %v5042_v48  ;;  %v5170_v28 = vld [vmem:[#allocation12 + $0x3f8] sm:$0xff]  ;;  %v4619_v48 = vadd.f32 %v10051_v27, %v4533_v43  ;;  %v5160_v27 = vld [vmem:[#allocation12 + $0x3a8] sm:$0xff]  ;;  %v5619_v43 = vld [vmem:[#allocation12 + $0x700] sm:$0xff] }
 0x4fd   : > { %5544 = vmatpush.msra.mxu0 %v5519_v9  ;;  %5085 = vmatpush.msra.mxu1 %v5036_v34  ;;  %v5165_v9 = vld [vmem:[#allocation12 + $0x3d0] sm:$0xff]  ;;  %v4632_v34 = vadd.f32 %v9984_v8, %v4620_v46  ;;  %v5290_v46 = vld [vmem:[#allocation12 + $0x4f8] sm:$0xff] }
 0x4fe   : > { %5105 = vmatpush.msra.mxu2 %v5037_v59  ;;  %5125 = vmatpush.msra.mxu3 %v5038_v5  ;;  %v4726_v59 = vmax.f32 %v4724_v35, %v4725_v14  ;;  %v5643_v5 = vld [vmem:[#allocation12 + $0x7c0] sm:$0xff]  ;;  %v5142_v35 = vld [vmem:[#allocation12 + $0x318] sm:$0xff]  ;;  %v5289_v62 = vld [vmem:[#allocation12 + $0x4f0] sm:$0xff] }
 0x4ff   : > { %5545 = vmatpush.msra.mxu0 %v5515_v18  ;;  %5086 = vmatpush.msra.mxu1 %v5032_v26  ;;  %v5162_v18 = vld [vmem:[#allocation12 + $0x3b8] sm:$0xff]  ;;  %v5156_v26 = vld [vmem:[#allocation12 + $0x388] sm:$0xff] }
 0x500   : > { %7474 = vmatmul.msk.f32.vlgmr.msrb.gmra.mxu0 %vm492_vm0, %v10055_v51  ;;  %5106 = vmatpush.msra.mxu2 %v5033_v11  ;;  %v4640_v11 = vmax.f32 %v4632_v34, 0.0  ;;  %v5281_v34 = vld [vmem:[#allocation12 + $0x4b0] sm:$0xff] }
 0x501   : > { %5126 = vmatpush.msra.mxu3 %v5034_v49  ;;  %5546 = vmatpush.msra.mxu0 %v5511_v53  ;;  %v5152_v49 = vld [vmem:[#allocation12 + $0x368] sm:$0xff]  ;;  %v4727_v53 = vrot.slane %v4726_v59, 2 }
 0x502   : > { %5087 = vmatpush.msra.mxu1 %v5028_v41  ;;  %5107 = vmatpush.msra.mxu2 %v5029_v19  ;;  %v5153_v41 = vld [vmem:[#allocation12 + $0x370] sm:$0xff] }
 0x503   : > { %5127 = vmatpush.msra.mxu3 %v5030_v6  ;;  %5547 = vmatpush.msra.mxu0 %v5507_v33  ;;  %v5150_v33 = vld [vmem:[#allocation12 + $0x358] sm:$0xff] }
 0x504   : > { %5088 = vmatpush.msra.mxu1 %v5024_v23  ;;  %5108 = vmatpush.msra.mxu2 %v5025_v45  ;;  %v4728_v23 = vmax.f32 %v4726_v59, %v4727_v53  ;;  %v5627_v45 = vld [vmem:[#allocation12 + $0x740] sm:$0xff]  ;;  %v5277_v59 = vld [vmem:[#allocation12 + $0x490] sm:$0xff]  ;;  %v5270_v53 = vld [vmem:[#allocation12 + $0x458] sm:$0xff] }
 0x505   : > { %5128 = vmatpush.msra.mxu3 %v5026_v12  ;;  %5548 = vmatpush.msra.mxu0 %v5503_v21  ;;  %v5140_v12 = vld [vmem:[#allocation12 + $0x308] sm:$0xff]  ;;  %v5623_v21 = vld [vmem:[#allocation12 + $0x720] sm:$0xff] }
 0x506   : > { %5089 = vmatpush.msra.mxu1 %v5020_v39  ;;  %5109 = vmatpush.msra.mxu2 %v5021_v2  ;;  %v5141_v39 = vld [vmem:[#allocation12 + $0x310] sm:$0xff] }
 0x507   : > { %5129 = vmatpush.msra.mxu3 %v5022_v25  ;;  %5549 = vmatpush.msra.mxu0 %v5499_v56  ;;  %v4729_v25 = vrot.slane %v4728_v23, 1  ;;  %v5288_v56 = vld [vmem:[#allocation12 + $0x4e8] sm:$0xff] }
 0x508   : > { %7463 = vmatmul.msk.f32.vlgmr.msra.gmra.mxu1 %vm492_vm0, %v10039_v16  ;;  %7464 = vmatmul.msk.f32.vlgmr.msra.gmra.mxu2 %vm492_vm0, %v10039_v16 }
 0x509   : > { %7465 = vmatmul.msk.f32.vlgmr.msra.gmra.mxu3 %vm492_vm0, %v10039_v16  ;;  %5202 = vmatpush.msrb.mxu1 %v5168_v63  ;;  %v4631_v16 = vadd.f32 %v9984_v8, %v4619_v48  ;;  %v5154_v8 = vld [vmem:[#allocation12 + $0x378] sm:$0xff]  ;;  %v5284_v63 = vld [vmem:[#allocation12 + $0x4c8] sm:$0xff]  ;;  %v10087_v14 = vmax.f32 %v4728_v23, %v4729_v25  ;;  %v5405_v25 = vld [vmem:[#allocation12 + $0x5d0] sm:$0xff] }
 0x50a   : > { %5222 = vmatpush.msrb.mxu2 %v5169_v29  ;;  %5242 = vmatpush.msrb.mxu3 %v5170_v28  ;;  %v5767_v29 = vld [vmem:[#allocation12 + $0x8e0] sm:$0xff]  ;;  %v5285_v28 = vld [vmem:[#allocation12 + $0x4d0] sm:$0xff]  ;;  %v5286_v48 = vld [vmem:[#allocation12 + $0x4d8] sm:$0xff] }
 0x50b   : > { %7478 = vmatmul.msk.f32.vlgmr.msra.gmra.mxu0 %vm492_vm0, %v10071_v57  ;;  %5203 = vmatpush.msrb.mxu1 %v5164_v3  ;;  %v4639_v19 = vmax.f32 %v4631_v16, 0.0  ;;  %v5280_v3 = vld [vmem:[#allocation12 + $0x4a8] sm:$0xff]  ;;  %v5262_v23 = vld [vmem:[#allocation12 + $0x418] sm:$0xff] }
 0x50c   : > { %5662 = vmatpush.msrb.mxu0 %v5647_v15  ;;  %5223 = vmatpush.msrb.mxu2 %v5165_v9  ;;  %v5763_v9 = vld [vmem:[#allocation12 + $0x8c0] sm:$0xff] }
 0x50d   : > { %5243 = vmatpush.msrb.mxu3 %v5166_v50  ;;  %5204 = vmatpush.msrb.mxu1 %v5160_v27  ;;  %v10077_v6 = vmax.f32 %v4639_v19, %v4640_v11  ;;  %v5282_v50 = vld [vmem:[#allocation12 + $0x4b8] sm:$0xff]  ;;  %v5759_v27 = vld [vmem:[#allocation12 + $0x8a0] sm:$0xff] }
 0x50e   : > { %5663 = vmatpush.msrb.mxu0 %v5643_v5  ;;  %5224 = vmatpush.msrb.mxu2 %v5161_v24  ;;  %v5278_v5 = vld [vmem:[#allocation12 + $0x498] sm:$0xff]  ;;  %v5272_v24 = vld [vmem:[#allocation12 + $0x468] sm:$0xff]  ;;  %v5751_v11 = vld [vmem:[#allocation12 + $0x860] sm:$0xff] }
 0x50f   : > { %5244 = vmatpush.msrb.mxu3 %v5162_v18  ;;  %5205 = vmatpush.msrb.mxu1 %v5156_v26  ;;  %v4731_v2 = vsel %vm495_vm1, %v10077_v6, -inf  ;;  %v5755_v18 = vld [vmem:[#allocation12 + $0x880] sm:$0xff]  ;;  %v5273_v26 = vld [vmem:[#allocation12 + $0x470] sm:$0xff] }
 0x510   : > { %5664 = vmatpush.msrb.mxu0 %v5639_v30  ;;  %5225 = vmatpush.msrb.mxu2 %v5157_v42  ;;  %v4732_v22 = vrot.slane %v4731_v2, 4  ;;  %v5274_v30 = vld [vmem:[#allocation12 + $0x478] sm:$0xff]  ;;  %v5268_v42 = vld [vmem:[#allocation12 + $0x448] sm:$0xff]  ;;  %v5747_v19 = vld [vmem:[#allocation12 + $0x840] sm:$0xff] }
 0x511   : > { %5245 = vmatpush.msrb.mxu3 %v5158_v38  ;;  %5206 = vmatpush.msrb.mxu1 %v5152_v49  ;;  %v5269_v38 = vld [vmem:[#allocation12 + $0x450] sm:$0xff]  ;;  %v4657_v49 = vrot.slane %v10077_v6, 2 }
 0x512   : > { %5665 = vmatpush.msrb.mxu0 %v5635_v13  ;;  %5226 = vmatpush.msrb.mxu2 %v5153_v41  ;;  %v4733_v15 = vmax.f32 %v4731_v2, %v4732_v22  ;;  %v5264_v13 = vld [vmem:[#allocation12 + $0x428] sm:$0xff] }
 0x513   : > { %5246 = vmatpush.msrb.mxu3 %v5154_v8  ;;  %5207 = vmatpush.msrb.mxu1 %v5148_v58  ;;  %v5265_v8 = vld [vmem:[#allocation12 + $0x430] sm:$0xff]  ;;  %v5266_v58 = vld [vmem:[#allocation12 + $0x438] sm:$0xff]  ;;  %v5404_v2 = vld [vmem:[#allocation12 + $0x5c8] sm:$0xff] }
 0x514   : > { %5666 = vmatpush.msrb.mxu0 %v5631_v4  ;;  %5227 = vmatpush.msrb.mxu2 %v5149_v61  ;;  %v4734_v16 = vrot.slane %v4733_v15, 2  ;;  %v5260_v4 = vld [vmem:[#allocation12 + $0x408] sm:$0xff]  ;;  %v5743_v61 = vld [vmem:[#allocation12 + $0x820] sm:$0xff] }
 0x515   : > { %5247 = vmatpush.msrb.mxu3 %v5150_v33  ;;  %5208 = vmatpush.msrb.mxu1 %v5144_v36  ;;  %v5261_v33 = vld [vmem:[#allocation12 + $0x410] sm:$0xff]  ;;  %v4738_v36 = vsel %vm495_vm1, %v4657_v49, -inf  ;;  %v5400_v22 = vld [vmem:[#allocation12 + $0x5a8] sm:$0xff]  ;;  %v5863_v49 = vld [vmem:[#allocation12 + $0x920] sm:$0xff] }
 0x516   : > { %5667 = vmatpush.msrb.mxu0 %v5627_v45  ;;  %5228 = vmatpush.msrb.mxu2 %v5145_v37  ;;  %v4735_v41 = vmax.f32 %v4733_v15, %v4734_v16  ;;  %v5739_v37 = vld [vmem:[#allocation12 + $0x800] sm:$0xff]  ;;  %v5392_v15 = vld [vmem:[#allocation12 + $0x568] sm:$0xff]  ;;  %v5390_v16 = vld [vmem:[#allocation12 + $0x558] sm:$0xff] }
 0x517   : > { %5248 = vmatpush.msrb.mxu3 %v5146_v0  ;;  %5209 = vmatpush.msrb.mxu1 %v5140_v12  ;;  %v5408_v0 = vld [vmem:[#allocation12 + $0x5e8] sm:$0xff]  ;;  %v4739_v12 = vrot.slane %v4738_v36, 4 }
 0x518   : > { %5668 = vmatpush.msrb.mxu0 %v5623_v21  ;;  %5229 = vmatpush.msrb.mxu2 %v5141_v39  ;;  %v4736_v45 = vrot.slane %v4735_v41, 1  ;;  %v5409_v21 = vld [vmem:[#allocation12 + $0x5f0] sm:$0xff]  ;;  %v5410_v39 = vld [vmem:[#allocation12 + $0x5f8] sm:$0xff] }
 0x519   : > { %5249 = vmatpush.msrb.mxu3 %v5142_v35  ;;  %7467 = vmatmul.msk.f32.vlgmr.msrb.gmra.mxu1 %vm492_vm0, %v10006_v44 }
 0x51a   : > { %5669 = vmatpush.msrb.mxu0 %v5619_v43  ;;  %7468 = vmatmul.msk.f32.vlgmr.msrb.gmra.mxu2 %vm492_vm0, %v10006_v44  ;;  %v10099_v35 = vmax.f32 %v4735_v41, %v4736_v45  ;;  %v5887_v43 = vld [vmem:[#allocation12 + $0x9e0] sm:$0xff] }
 0x51b   : > { %7469 = vmatmul.msk.f32.vlgmr.msrb.gmra.mxu3 %vm492_vm0, %v10006_v44  ;;  %5322 = vmatpush.msra.mxu1 %v5288_v56  ;;  %v5276_v44 = vld [vmem:[#allocation12 + $0x488] sm:$0xff]  ;;  %v5406_v56 = vld [vmem:[#allocation12 + $0x5d8] sm:$0xff] }
 0x51c   : > { %5342 = vmatpush.msra.mxu2 %v5289_v62  ;;  %5362 = vmatpush.msra.mxu3 %v5290_v46  ;;  %v4740_v62 = vmax.f32 %v4738_v36, %v4739_v12  ;;  %v5883_v46 = vld [vmem:[#allocation12 + $0x9c0] sm:$0xff] }
 0x51d   : > { %7482 = vmatmul.msk.f32.vlgmr.msrb.gmra.mxu0 %vm492_vm0, %v10087_v14  ;;  %5323 = vmatpush.msra.mxu1 %v5284_v63  ;;  %v5401_v63 = vld [vmem:[#allocation12 + $0x5b0] sm:$0xff] }
 0x51e   : > { %5782 = vmatpush.msra.mxu0 %v5767_v29  ;;  %5343 = vmatpush.msra.mxu2 %v5285_v28  ;;  %v5402_v29 = vld [vmem:[#allocation12 + $0x5b8] sm:$0xff]  ;;  %v5879_v28 = vld [vmem:[#allocation12 + $0x9a0] sm:$0xff] }
 0x51f   : > { %5363 = vmatpush.msra.mxu3 %v5286_v48  ;;  %5324 = vmatpush.msra.mxu1 %v5280_v3  ;;  %v5397_v48 = vld [vmem:[#allocation12 + $0x590] sm:$0xff]  ;;  %v5398_v3 = vld [vmem:[#allocation12 + $0x598] sm:$0xff] }
 0x520   : > { %5783 = vmatpush.msra.mxu0 %v5763_v9  ;;  %5344 = vmatpush.msra.mxu2 %v5281_v34  ;;  %v4741_v9 = vrot.slane %v4740_v62, 2  ;;  %v5875_v34 = vld [vmem:[#allocation12 + $0x980] sm:$0xff] }
 0x521   : > { %5364 = vmatpush.msra.mxu3 %v5282_v50  ;;  %5325 = vmatpush.msra.mxu1 %v5276_v44  ;;  %v5393_v50 = vld [vmem:[#allocation12 + $0x570] sm:$0xff]  ;;  %v5394_v44 = vld [vmem:[#allocation12 + $0x578] sm:$0xff] }
 0x522   : > { %5784 = vmatpush.msra.mxu0 %v5759_v27  ;;  %5345 = vmatpush.msra.mxu2 %v5277_v59  ;;  %v5388_v27 = vld [vmem:[#allocation12 + $0x548] sm:$0xff]  ;;  %v5871_v59 = vld [vmem:[#allocation12 + $0x960] sm:$0xff] }
 0x523   : > { %5365 = vmatpush.msra.mxu3 %v5278_v5  ;;  %5326 = vmatpush.msra.mxu1 %v5272_v24  ;;  %v5389_v5 = vld [vmem:[#allocation12 + $0x550] sm:$0xff]  ;;  %v4658_v24 = vrot.slane %v10077_v6, 4 }
 0x524   : > { %5785 = vmatpush.msra.mxu0 %v5755_v18  ;;  %5346 = vmatpush.msra.mxu2 %v5273_v26  ;;  %v5384_v18 = vld [vmem:[#allocation12 + $0x528] sm:$0xff]  ;;  %v4742_v26 = vmax.f32 %v4740_v62, %v4741_v9  ;;  %v5999_v62 = vld [vmem:[#allocation12 + $0xaa0] sm:$0xff] }
 0x525   : > { %5366 = vmatpush.msra.mxu3 %v5274_v30  ;;  %5327 = vmatpush.msra.mxu1 %v5268_v42  ;;  %v5867_v30 = vld [vmem:[#allocation12 + $0x940] sm:$0xff]  ;;  %v5385_v42 = vld [vmem:[#allocation12 + $0x530] sm:$0xff]  ;;  %v4745_v41 = vsel %vm495_vm1, %v4658_v24, -inf  ;;  %v5508_v9 = vld [vmem:[#allocation12 + $0x648] sm:$0xff] }
 0x526   : > { %5786 = vmatpush.msra.mxu0 %v5751_v11  ;;  %5347 = vmatpush.msra.mxu2 %v5269_v38  ;;  %v5386_v11 = vld [vmem:[#allocation12 + $0x538] sm:$0xff]  ;;  %v5380_v38 = vld [vmem:[#allocation12 + $0x508] sm:$0xff]  ;;  %v4746_v36 = vrot.slane %v4745_v41, 4 }
 0x527   : > { %5367 = vmatpush.msra.mxu3 %v5270_v53  ;;  %5328 = vmatpush.msra.mxu1 %v5264_v13  ;;  %v5381_v53 = vld [vmem:[#allocation12 + $0x510] sm:$0xff]  ;;  %v4018_v13 = vadd.f32 %v9918_v1, %v9913_v54  ;;  %v5530_v1 = vld [vmem:[#allocation12 + $0x6f8] sm:$0xff]  ;;  %v5504_v24 = vld [vmem:[#allocation12 + $0x628] sm:$0xff] }
 0x528   : > { %5787 = vmatpush.msra.mxu0 %v5747_v19  ;;  %5348 = vmatpush.msra.mxu2 %v5265_v8  ;;  %v5382_v19 = vld [vmem:[#allocation12 + $0x518] sm:$0xff]  ;;  %v10107_v8 = vpop.f32.mrf.mxu1  ;;  %v5529_v54 = vld [vmem:[#allocation12 + $0x6f0] sm:$0xff] }
 0x529   : > { %5368 = vmatpush.msra.mxu3 %v5266_v58  ;;  %5329 = vmatpush.msra.mxu1 %v5260_v4  ;;  %v5859_v58 = vld [vmem:[#allocation12 + $0x900] sm:$0xff]  ;;  %v4743_v4 = vrot.slane %v4742_v26, 1  ;;  %v4105_v45 = vadd.f32 %v9920_v52, %v4018_v13  ;;  %v5526_v52 = vld [vmem:[#allocation12 + $0x6d8] sm:$0xff] }
 0x52a   : > { %5788 = vmatpush.msra.mxu0 %v5743_v61  ;;  %5349 = vmatpush.msra.mxu2 %v5261_v33  ;;  %v4015_v61 = vadd.f32 %v9909_v7, %v9904_v10  ;;  %v5528_v33 = vld [vmem:[#allocation12 + $0x6e8] sm:$0xff]  ;;  %v6007_v7 = vld [vmem:[#allocation12 + $0xae0] sm:$0xff]  ;;  %v5502_v13 = vld [vmem:[#allocation12 + $0x618] sm:$0xff] }
 0x52b   : > { %5369 = vmatpush.msra.mxu3 %v5262_v23  ;;  %7471 = vmatmul.msk.f32.vlgmr.msra.gmra.mxu1 %vm492_vm0, %v10025_v47  ;;  %v10111_v23 = vpop.f32.mrf.mxu2  ;;  %v10120_v10 = vmax.f32 %v4742_v26, %v4743_v4 }
 0x52c   : > { %5789 = vmatpush.msra.mxu0 %v5739_v37  ;;  %7472 = vmatmul.msk.f32.vlgmr.msra.gmra.mxu2 %vm492_vm0, %v10025_v47  ;;  %v5524_v37 = vld [vmem:[#allocation12 + $0x6c8] sm:$0xff]  ;;  %v4104_v12 = vadd.f32 %v9911_v17, %v4015_v61  ;;  %v5522_v17 = vld [vmem:[#allocation12 + $0x6b8] sm:$0xff]  ;;  %v5649_v61 = vld [vmem:[#allocation12 + $0x7f0] sm:$0xff] }
 0x52d   : > { %7473 = vmatmul.msk.f32.vlgmr.msra.gmra.mxu3 %vm492_vm0, %v10025_v47  ;;  %5442 = vmatpush.msrb.mxu1 %v5408_v0  ;;  %v5396_v47 = vld [vmem:[#allocation12 + $0x588] sm:$0xff]  ;;  %v5525_v0 = vld [vmem:[#allocation12 + $0x6d0] sm:$0xff] }
 0x52e   : > { %5462 = vmatpush.msrb.mxu2 %v5409_v21  ;;  %5482 = vmatpush.msrb.mxu3 %v5410_v39  ;;  %v4191_v21 = vadd.f32 %v9964_v31, %v4105_v45  ;;  %v5520_v39 = vld [vmem:[#allocation12 + $0x6a8] sm:$0xff]  ;;  %v10128_v31 = vpop.f32.mrf.mxu3  ;;  %v5645_v45 = vld [vmem:[#allocation12 + $0x7d0] sm:$0xff] }
 0x52f   : > { %7486 = vmatmul.msk.f32.vlgmr.msra.gmra.mxu0 %vm492_vm0, %v10099_v35  ;;  %5443 = vmatpush.msrb.mxu1 %v5404_v2  ;;  %v4747_v2 = vmax.f32 %v4745_v41, %v4746_v36  ;;  %v5979_v41 = vld [vmem:[#allocation12 + $0xa00] sm:$0xff] }
 0x530   : > { %5902 = vmatpush.msrb.mxu0 %v5887_v43  ;;  %5463 = vmatpush.msrb.mxu2 %v5405_v25  ;;  %v6003_v43 = vld [vmem:[#allocation12 + $0xac0] sm:$0xff]  ;;  %v4190_v25 = vadd.f32 %v9958_v20, %v4104_v12  ;;  %v4440_v20 = vpop.f32.mrf.mxu1  ;;  %v5640_v12 = vld [vmem:[#allocation12 + $0x7a8] sm:$0xff] }
 0x531   : > { %5483 = vmatpush.msrb.mxu3 %v5406_v56  ;;  %5444 = vmatpush.msrb.mxu1 %v5400_v22  ;;  %v4277_v56 = vadd.f32 %v9969_v60, %v4191_v21  ;;  %v5516_v22 = vld [vmem:[#allocation12 + $0x688] sm:$0xff]  ;;  %v5995_v60 = vld [vmem:[#allocation12 + $0xa80] sm:$0xff] }
 0x532   : > { %5903 = vmatpush.msrb.mxu0 %v5883_v46  ;;  %5464 = vmatpush.msrb.mxu2 %v5401_v63  ;;  %v5517_v46 = vld [vmem:[#allocation12 + $0x690] sm:$0xff]  ;;  %v4276_v63 = vadd.f32 %v9960_v32, %v4190_v25  ;;  %v5991_v32 = vld [vmem:[#allocation12 + $0xa60] sm:$0xff] }
 0x533   : > { %5484 = vmatpush.msrb.mxu3 %v5402_v29  ;;  %5445 = vmatpush.msrb.mxu1 %v5396_v47  ;;  %v5518_v29 = vld [vmem:[#allocation12 + $0x698] sm:$0xff]  ;;  %v5512_v47 = vld [vmem:[#allocation12 + $0x668] sm:$0xff]  ;;  %v5637_v25 = vld [vmem:[#allocation12 + $0x790] sm:$0xff] }
 0x534   : > { %5904 = vmatpush.msrb.mxu0 %v5879_v28  ;;  %5465 = vmatpush.msrb.mxu2 %v5397_v48  ;;  %v4748_v28 = vrot.slane %v4747_v2, 2  ;;  %v5513_v48 = vld [vmem:[#allocation12 + $0x670] sm:$0xff] }
 0x535   : > { %5485 = vmatpush.msrb.mxu3 %v5398_v3  ;;  %5446 = vmatpush.msrb.mxu1 %v5392_v15  ;;  %v4363_v3 = vadd.f32 %v9974_v55, %v4277_v56  ;;  %v5514_v15 = vld [vmem:[#allocation12 + $0x678] sm:$0xff]  ;;  %v5987_v55 = vld [vmem:[#allocation12 + $0xa40] sm:$0xff] }
 0x536   : > { %5905 = vmatpush.msrb.mxu0 %v5875_v34  ;;  %5466 = vmatpush.msrb.mxu2 %v5393_v50  ;;  %v4526_v34 = vpop.f32.mrf.mxu2  ;;  %v5509_v50 = vld [vmem:[#allocation12 + $0x650] sm:$0xff] }
 0x537   : > { %5486 = vmatpush.msrb.mxu3 %v5394_v44  ;;  %5447 = vmatpush.msrb.mxu1 %v5388_v27  ;;  %v4362_v44 = vadd.f32 %v9962_v40, %v4276_v63  ;;  %v4659_v27 = vrot.slane %v10077_v6, 6  ;;  %v4612_v40 = vpop.f32.mrf.mxu3  ;;  %v5983_v6 = vld [vmem:[#allocation12 + $0xa20] sm:$0xff] }
 0x538   : > { %5906 = vmatpush.msrb.mxu0 %v5871_v59  ;;  %5467 = vmatpush.msrb.mxu2 %v5389_v5  ;;  %v4450_v59 = vadd.f32 %v4440_v20, %v4363_v3  ;;  %v5510_v5 = vld [vmem:[#allocation12 + $0x658] sm:$0xff]  ;;  %v5629_v20 = vld [vmem:[#allocation12 + $0x750] sm:$0xff]  ;;  %v5624_v3 = vld [vmem:[#allocation12 + $0x728] sm:$0xff] }
 0x539   : > { %5487 = vmatpush.msrb.mxu3 %v5390_v16  ;;  %5448 = vmatpush.msrb.mxu1 %v5384_v18  ;;  %v4749_v16 = vmax.f32 %v4747_v2, %v4748_v28  ;;  %v5505_v18 = vld [vmem:[#allocation12 + $0x630] sm:$0xff]  ;;  %v4449_v26 = vadd.f32 %v10107_v8, %v4362_v44  ;;  %v6111_v28 = vld [vmem:[#allocation12 + $0xb60] sm:$0xff] }
 0x53a   : > { %5907 = vmatpush.msrb.mxu0 %v5867_v30  ;;  %5468 = vmatpush.msrb.mxu2 %v5385_v42  ;;  %v4536_v30 = vadd.f32 %v4526_v34, %v4450_v59  ;;  %v5506_v42 = vld [vmem:[#allocation12 + $0x638] sm:$0xff]  ;;  %v5625_v34 = vld [vmem:[#allocation12 + $0x730] sm:$0xff]  ;;  %v6103_v44 = vld [vmem:[#allocation12 + $0xb20] sm:$0xff] }
 0x53b   : > { %5488 = vmatpush.msrb.mxu3 %v5386_v11  ;;  %5449 = vmatpush.msrb.mxu1 %v5380_v38  ;;  %v5500_v11 = vld [vmem:[#allocation12 + $0x608] sm:$0xff]  ;;  %v5501_v38 = vld [vmem:[#allocation12 + $0x610] sm:$0xff] }
 0x53c   : > { %5908 = vmatpush.msrb.mxu0 %v5863_v49  ;;  %5469 = vmatpush.msrb.mxu2 %v5381_v53  ;;  %v4752_v49 = vsel %vm495_vm1, %v4659_v27, -inf  ;;  %v4535_v53 = vadd.f32 %v10111_v23, %v4449_v26  ;;  %v4622_v8 = vadd.f32 %v4612_v40, %v4536_v30  ;;  %v5644_v23 = vld [vmem:[#allocation12 + $0x7c8] sm:$0xff]  ;;  %v5621_v27 = vld [vmem:[#allocation12 + $0x710] sm:$0xff]  ;;  %v5770_v30 = vld [vmem:[#allocation12 + $0x8f8] sm:$0xff] }
 0x53d   : > { %5489 = vmatpush.msrb.mxu3 %v5382_v19  ;;  %7475 = vmatmul.msk.f32.vlgmr.msrb.gmra.mxu1 %vm492_vm0, %v10055_v51  ;;  %v4750_v19 = vrot.slane %v4749_v16, 1  ;;  %v4753_v4 = vrot.slane %v4752_v49, 4  ;;  %v5769_v26 = vld [vmem:[#allocation12 + $0x8f0] sm:$0xff] }
 0x53e   : > { %5909 = vmatpush.msrb.mxu0 %v5859_v58  ;;  %7476 = vmatmul.msk.f32.vlgmr.msrb.gmra.mxu2 %vm492_vm0, %v10055_v51  ;;  %v5648_v58 = vld [vmem:[#allocation12 + $0x7e8] sm:$0xff]  ;;  %v4621_v36 = vadd.f32 %v10128_v31, %v4535_v53 }
 0x53f   : > { %7477 = vmatmul.msk.f32.vlgmr.msrb.gmra.mxu3 %vm492_vm0, %v10055_v51  ;;  %5562 = vmatpush.msra.mxu1 %v5528_v33  ;;  %v5521_v51 = vld [vmem:[#allocation12 + $0x6b0] sm:$0xff]  ;;  %v5650_v33 = vld [vmem:[#allocation12 + $0x7f8] sm:$0xff]  ;;  %v4754_v21 = vmax.f32 %v4752_v49, %v4753_v4  ;;  %v5760_v53 = vld [vmem:[#allocation12 + $0x8a8] sm:$0xff] }
 0x540   : > { %5582 = vmatpush.msra.mxu2 %v5529_v54  ;;  %5602 = vmatpush.msra.mxu3 %v5530_v1  ;;  %v10144_v54 = vmax.f32 %v4749_v16, %v4750_v19  ;;  %v6127_v1 = vld [vmem:[#allocation12 + $0xbe0] sm:$0xff]  ;;  %v5766_v49 = vld [vmem:[#allocation12 + $0x8d8] sm:$0xff]  ;;  %v5761_v19 = vld [vmem:[#allocation12 + $0x8b0] sm:$0xff] }
 0x541   : > { %7490 = vmatmul.msk.f32.vlgmr.msrb.gmra.mxu0 %vm492_vm0, %v10120_v10  ;;  %5563 = vmatpush.msra.mxu1 %v5524_v37  ;;  %v7652_v37 = vld [vmem:[#allocation10] ss:$0 sm:$0xff]  ;;  %v4755_v31 = vrot.slane %v4754_v21, 2  ;;  %v6239_v4 = vld [vmem:[#allocation12 + $0xca0] sm:$0xff] }
 0x542   : > { %6022 = vmatpush.msra.mxu0 %v6007_v7  ;;  %5583 = vmatpush.msra.mxu2 %v5525_v0  ;;  %v4634_v7 = vadd.f32 %v7652_v37, %v4622_v8  ;;  %v5646_v0 = vld [vmem:[#allocation12 + $0x7d8] sm:$0xff]  ;;  %v4633_v2 = vadd.f32 %v7652_v37, %v4621_v36  ;;  %v5753_v37 = vld [vmem:[#allocation12 + $0x870] sm:$0xff] }
 0x543   : > { %5603 = vmatpush.msra.mxu3 %v5526_v52  ;;  %5564 = vmatpush.msra.mxu1 %v5520_v39  ;;  %v6123_v52 = vld [vmem:[#allocation12 + $0xbc0] sm:$0xff]  ;;  %v5641_v39 = vld [vmem:[#allocation12 + $0x7b0] sm:$0xff]  ;;  %v5762_v8 = vld [vmem:[#allocation12 + $0x8b8] sm:$0xff] }
 0x544   : > { %6023 = vmatpush.msra.mxu0 %v6003_v43  ;;  %5584 = vmatpush.msra.mxu2 %v5521_v51  ;;  %v5636_v43 = vld [vmem:[#allocation12 + $0x788] sm:$0xff]  ;;  %v6119_v51 = vld [vmem:[#allocation12 + $0xba0] sm:$0xff]  ;;  %v4642_v56 = vmax.f32 %v4634_v7, 0.0  ;;  %v4641_v63 = vmax.f32 %v4633_v2, 0.0  ;;  %v5758_v36 = vld [vmem:[#allocation12 + $0x898] sm:$0xff] }
 0x545   : > { %5604 = vmatpush.msra.mxu3 %v5522_v17  ;;  %5565 = vmatpush.msra.mxu1 %v5516_v22  ;;  %v5638_v17 = vld [vmem:[#allocation12 + $0x798] sm:$0xff]  ;;  %v5632_v22 = vld [vmem:[#allocation12 + $0x768] sm:$0xff] }
 0x546   : > { %6024 = vmatpush.msra.mxu0 %v5999_v62  ;;  %5585 = vmatpush.msra.mxu2 %v5517_v46  ;;  %v6115_v62 = vld [vmem:[#allocation12 + $0xb80] sm:$0xff]  ;;  %v5633_v46 = vld [vmem:[#allocation12 + $0x770] sm:$0xff]  ;;  %v5754_v7 = vld [vmem:[#allocation12 + $0x878] sm:$0xff] }
 0x547   : > { %5605 = vmatpush.msra.mxu3 %v5518_v29  ;;  %5566 = vmatpush.msra.mxu1 %v5512_v47  ;;  %v5634_v29 = vld [vmem:[#allocation12 + $0x778] sm:$0xff]  ;;  %v5628_v47 = vld [vmem:[#allocation12 + $0x748] sm:$0xff] }
 0x548   : > { %6025 = vmatpush.msra.mxu0 %v5995_v60  ;;  %5586 = vmatpush.msra.mxu2 %v5513_v48  ;;  %v10148_v60 = vmax.f32 %v4641_v63, %v4642_v56  ;;  %v5630_v48 = vld [vmem:[#allocation12 + $0x758] sm:$0xff] }
 0x549   : > { %5606 = vmatpush.msra.mxu3 %v5514_v15  ;;  %5567 = vmatpush.msra.mxu1 %v5508_v9  ;;  %v4756_v15 = vmax.f32 %v4754_v21, %v4755_v31  ;;  %v6107_v9 = vld [vmem:[#allocation12 + $0xb40] sm:$0xff]  ;;  %v5749_v21 = vld [vmem:[#allocation12 + $0x850] sm:$0xff]  ;;  %v5750_v2 = vld [vmem:[#allocation12 + $0x858] sm:$0xff] }
 0x54a   : > { %6026 = vmatpush.msra.mxu0 %v5991_v32  ;;  %5587 = vmatpush.msra.mxu2 %v5509_v50  ;;  %v5626_v32 = vld [vmem:[#allocation12 + $0x738] sm:$0xff]  ;;  %v5620_v50 = vld [vmem:[#allocation12 + $0x708] sm:$0xff]  ;;  %v4759_v59 = vsel %vm495_vm1, %v10148_v60, -inf  ;;  %v5741_v31 = vld [vmem:[#allocation12 + $0x810] sm:$0xff] }
 0x54b   : > { %5607 = vmatpush.msra.mxu3 %v5510_v5  ;;  %5568 = vmatpush.msra.mxu1 %v5504_v24  ;;  %v5622_v5 = vld [vmem:[#allocation12 + $0x718] sm:$0xff]  ;;  %v6099_v24 = vld [vmem:[#allocation12 + $0xb00] sm:$0xff]  ;;  %v4757_v16 = vrot.slane %v4756_v15, 1 }
 0x54c   : > { %6027 = vmatpush.msra.mxu0 %v5987_v55  ;;  %5588 = vmatpush.msra.mxu2 %v5505_v18  ;;  %v5768_v55 = vld [vmem:[#allocation12 + $0x8e8] sm:$0xff]  ;;  %v4760_v18 = vrot.slane %v4759_v59, 4  ;;  %v5746_v56 = vld [vmem:[#allocation12 + $0x838] sm:$0xff] }
 0x54d   : > { %5608 = vmatpush.msra.mxu3 %v5506_v42  ;;  %5569 = vmatpush.msra.mxu1 %v5500_v11  ;;  %v5764_v11 = vld [vmem:[#allocation12 + $0x8c8] sm:$0xff]  ;;  %v10160_v40 = vmax.f32 %v4756_v15, %v4757_v16  ;;  %v5889_v15 = vld [vmem:[#allocation12 + $0x9f0] sm:$0xff] }
 0x54e   : > { %6028 = vmatpush.msra.mxu0 %v5983_v6  ;;  %5589 = vmatpush.msra.mxu2 %v5501_v38  ;;  %v6247_v6 = vld [vmem:[#allocation12 + $0xce0] sm:$0xff]  ;;  %v5765_v38 = vld [vmem:[#allocation12 + $0x8d0] sm:$0xff] }
 0x54f   : > { %5609 = vmatpush.msra.mxu3 %v5502_v13  ;;  %7479 = vmatmul.msk.f32.vlgmr.msra.gmra.mxu1 %vm492_vm0, %v10071_v57  ;;  %v4761_v13 = vmax.f32 %v4759_v59, %v4760_v18  ;;  %v5886_v59 = vld [vmem:[#allocation12 + $0x9d8] sm:$0xff] }
 0x550   : > { %6029 = vmatpush.msra.mxu0 %v5979_v41  ;;  %7480 = vmatmul.msk.f32.vlgmr.msra.gmra.mxu2 %vm492_vm0, %v10071_v57  ;;  %v6243_v41 = vld [vmem:[#allocation12 + $0xcc0] sm:$0xff]  ;;  %v5882_v18 = vld [vmem:[#allocation12 + $0x9b8] sm:$0xff] }
 0x551   : > { %7481 = vmatmul.msk.f32.vlgmr.msra.gmra.mxu3 %vm492_vm0, %v10071_v57  ;;  %5682 = vmatpush.msrb.mxu1 %v5648_v58  ;;  %v5642_v57 = vld [vmem:[#allocation12 + $0x7b8] sm:$0xff] }
 0x552   : > { %5702 = vmatpush.msrb.mxu2 %v5649_v61  ;;  %5722 = vmatpush.msrb.mxu3 %v5650_v33  ;;  %v5757_v61 = vld [vmem:[#allocation12 + $0x890] sm:$0xff] }
 0x553   : > { %7494 = vmatmul.msk.f32.vlgmr.msra.gmra.mxu0 %vm492_vm0, %v10144_v54  ;;  %5683 = vmatpush.msrb.mxu1 %v5644_v23  ;;  %v5752_v23 = vld [vmem:[#allocation12 + $0x868] sm:$0xff] }
 0x554   : > { %6142 = vmatpush.msrb.mxu0 %v6127_v1  ;;  %5703 = vmatpush.msrb.mxu2 %v5645_v45  ;;  %v4762_v1 = vrot.slane %v4761_v13, 2  ;;  %v6235_v45 = vld [vmem:[#allocation12 + $0xc80] sm:$0xff] }
 0x555   : > { %5723 = vmatpush.msrb.mxu3 %v5646_v0  ;;  %5684 = vmatpush.msrb.mxu1 %v5640_v12  ;;  %v5748_v0 = vld [vmem:[#allocation12 + $0x848] sm:$0xff]  ;;  %v6231_v12 = vld [vmem:[#allocation12 + $0xc60] sm:$0xff] }
 0x556   : > { %6143 = vmatpush.msrb.mxu0 %v6123_v52  ;;  %5704 = vmatpush.msrb.mxu2 %v5641_v39  ;;  %v4660_v39 = vrot.slane %v10148_v60, 2 }
 0x557   : > { %5724 = vmatpush.msrb.mxu3 %v5642_v57  ;;  %5685 = vmatpush.msrb.mxu1 %v5636_v43  ;;  %v5744_v57 = vld [vmem:[#allocation12 + $0x828] sm:$0xff]  ;;  %v4763_v43 = vmax.f32 %v4761_v13, %v4762_v1  ;;  %v6355_v13 = vld [vmem:[#allocation12 + $0xd80] sm:$0xff]  ;;  %v4661_v1 = vrot.slane %v10148_v60, 4 }
 0x558   : > { %6144 = vmatpush.msrb.mxu0 %v6119_v51  ;;  %5705 = vmatpush.msrb.mxu2 %v5637_v25  ;;  %v6227_v51 = vld [vmem:[#allocation12 + $0xc40] sm:$0xff]  ;;  %v5745_v25 = vld [vmem:[#allocation12 + $0x830] sm:$0xff] }
 0x559   : > { %5725 = vmatpush.msrb.mxu3 %v5638_v17  ;;  %5686 = vmatpush.msrb.mxu1 %v5632_v22  ;;  %v5740_v17 = vld [vmem:[#allocation12 + $0x808] sm:$0xff]  ;;  %v6223_v22 = vld [vmem:[#allocation12 + $0xc20] sm:$0xff] }
 0x55a   : > { %6145 = vmatpush.msrb.mxu0 %v6115_v62  ;;  %5706 = vmatpush.msrb.mxu2 %v5633_v46  ;;  %v4766_v62 = vsel %vm495_vm1, %v4660_v39, -inf  ;;  %v5742_v46 = vld [vmem:[#allocation12 + $0x818] sm:$0xff] }
 0x55b   : > { %5726 = vmatpush.msrb.mxu3 %v5634_v29  ;;  %5687 = vmatpush.msrb.mxu1 %v5628_v47  ;;  %v4764_v29 = vrot.slane %v4763_v43, 1  ;;  %v6219_v47 = vld [vmem:[#allocation12 + $0xc00] sm:$0xff] }
 0x55c   : > { %6146 = vmatpush.msrb.mxu0 %v6111_v28  ;;  %5707 = vmatpush.msrb.mxu2 %v5629_v20 }
 0x55d   : > { %5727 = vmatpush.msrb.mxu3 %v5630_v48  ;;  %5688 = vmatpush.msrb.mxu1 %v5624_v3  ;;  %v5888_v48 = vld [vmem:[#allocation12 + $0x9e8] sm:$0xff]  ;;  %v4767_v3 = vrot.slane %v4766_v62, 4 }
 0x55e   : > { %6147 = vmatpush.msrb.mxu0 %v6107_v9  ;;  %5708 = vmatpush.msrb.mxu2 %v5625_v34  ;;  %v5890_v9 = vld [vmem:[#allocation12 + $0x9f8] sm:$0xff]  ;;  %v5884_v34 = vld [vmem:[#allocation12 + $0x9c8] sm:$0xff] }
 0x55f   : > { %5728 = vmatpush.msrb.mxu3 %v5626_v32  ;;  %5689 = vmatpush.msrb.mxu1 %v5620_v50  ;;  %v10154_v42 = vpop.f32.mrf.mxu1  ;;  %v10178_v32 = vmax.f32 %v4763_v43, %v4764_v29  ;;  %v6367_v50 = vld [vmem:[#allocation12 + $0xde0] sm:$0xff]  ;;  %v4768_v16 = vmax.f32 %v4766_v62, %v4767_v3  ;;  %v6009_v62 = vld [vmem:[#allocation12 + $0xaf0] sm:$0xff]  ;;  %v6004_v29 = vld [vmem:[#allocation12 + $0xac8] sm:$0xff] }
 0x560   : > { %6148 = vmatpush.msrb.mxu0 %v6103_v44  ;;  %5709 = vmatpush.msrb.mxu2 %v5621_v27  ;;  %v5885_v44 = vld [vmem:[#allocation12 + $0x9d0] sm:$0xff] }
 0x561   : > { %5729 = vmatpush.msrb.mxu3 %v5622_v5  ;;  %7483 = vmatmul.msk.f32.vlgmr.msrb.gmra.mxu1 %vm492_vm0, %v10087_v14  ;;  %v5880_v5 = vld [vmem:[#allocation12 + $0x9a8] sm:$0xff]  ;;  %v6005_v3 = vld [vmem:[#allocation12 + $0xad0] sm:$0xff] }
 0x562   : > { %6149 = vmatpush.msrb.mxu0 %v6099_v24  ;;  %7484 = vmatmul.msk.f32.vlgmr.msrb.gmra.mxu2 %vm492_vm0, %v10087_v14 }
 0x563   : > { %7485 = vmatmul.msk.f32.vlgmr.msrb.gmra.mxu3 %vm492_vm0, %v10087_v14  ;;  %5802 = vmatpush.msra.mxu1 %v5768_v55  ;;  %v5756_v14 = vld [vmem:[#allocation12 + $0x888] sm:$0xff]  ;;  %v6363_v55 = vld [vmem:[#allocation12 + $0xdc0] sm:$0xff] }
 0x564   : > { %5822 = vmatpush.msra.mxu2 %v5769_v26  ;;  %5842 = vmatpush.msra.mxu3 %v5770_v30  ;;  %v5191_v26 = vpop.f32.mrf.mxu0  ;;  %v5876_v30 = vld [vmem:[#allocation12 + $0x988] sm:$0xff] }
 0x565   : > { %7498 = vmatmul.msk.f32.vlgmr.msrb.gmra.mxu0 %vm492_vm0, %v10160_v40  ;;  %5803 = vmatpush.msra.mxu1 %v5764_v11  ;;  %v4892_v33 = vpop.f32.mrf.mxu2  ;;  %v6359_v11 = vld [vmem:[#allocation12 + $0xda0] sm:$0xff] }
 0x566   : > { %6262 = vmatpush.msra.mxu0 %v6247_v6  ;;  %5823 = vmatpush.msra.mxu2 %v5765_v38  ;;  %v10164_v58 = vpop.f32.mrf.mxu3  ;;  %v5877_v6 = vld [vmem:[#allocation12 + $0x990] sm:$0xff]  ;;  %v5878_v38 = vld [vmem:[#allocation12 + $0x998] sm:$0xff] }
 0x567   : > { %5843 = vmatpush.msra.mxu3 %v5766_v49  ;;  %5804 = vmatpush.msra.mxu1 %v5760_v53  ;;  %v5872_v49 = vld [vmem:[#allocation12 + $0x968] sm:$0xff]  ;;  %v4769_v53 = vrot.slane %v4768_v16, 2 }
 0x568   : > { %6263 = vmatpush.msra.mxu0 %v6243_v41  ;;  %5824 = vmatpush.msra.mxu2 %v5761_v19  ;;  %v10166_v52 = vpop.f32.mrf.mxu1  ;;  %v5873_v41 = vld [vmem:[#allocation12 + $0x970] sm:$0xff] }
 0x569   : > { %5844 = vmatpush.msra.mxu3 %v5762_v8  ;;  %5805 = vmatpush.msra.mxu1 %v5756_v14  ;;  %v5874_v14 = vld [vmem:[#allocation12 + $0x978] sm:$0xff] }
 0x56a   : > { %6264 = vmatpush.msra.mxu0 %v6239_v4  ;;  %5825 = vmatpush.msra.mxu2 %v5757_v61 }
 0x56b   : > { %5845 = vmatpush.msra.mxu3 %v5758_v36  ;;  %5806 = vmatpush.msra.mxu1 %v5752_v23  ;;  %v5869_v36 = vld [vmem:[#allocation12 + $0x950] sm:$0xff] }
 0x56c   : > { %6265 = vmatpush.msra.mxu0 %v6235_v45  ;;  %5826 = vmatpush.msra.mxu2 %v5753_v37  ;;  %v5870_v45 = vld [vmem:[#allocation12 + $0x958] sm:$0xff]  ;;  %v4770_v37 = vmax.f32 %v4768_v16, %v4769_v53  ;;  %v6471_v53 = vld [vmem:[#allocation12 + $0xe60] sm:$0xff] }
 0x56d   : > { %5846 = vmatpush.msra.mxu3 %v5754_v7  ;;  %5807 = vmatpush.msra.mxu1 %v5748_v0  ;;  %v6347_v7 = vld [vmem:[#allocation12 + $0xd40] sm:$0xff]  ;;  %v5865_v0 = vld [vmem:[#allocation12 + $0x930] sm:$0xff]  ;;  %v5998_v16 = vld [vmem:[#allocation12 + $0xa98] sm:$0xff] }
 0x56e   : > { %6266 = vmatpush.msra.mxu0 %v6231_v12  ;;  %5827 = vmatpush.msra.mxu2 %v5749_v21  ;;  %v5866_v21 = vld [vmem:[#allocation12 + $0x938] sm:$0xff] }
 0x56f   : > { %5847 = vmatpush.msra.mxu3 %v5750_v2  ;;  %5808 = vmatpush.msra.mxu1 %v5744_v57  ;;  %v4955_v28 = vpop.f32.mrf.mxu2  ;;  %v6343_v2 = vld [vmem:[#allocation12 + $0xd20] sm:$0xff]  ;;  %v5861_v57 = vld [vmem:[#allocation12 + $0x910] sm:$0xff] }
 0x570   : > { %6267 = vmatpush.msra.mxu0 %v6227_v51  ;;  %5828 = vmatpush.msra.mxu2 %v5745_v25  ;;  %v4975_v63 = vpop.f32.mrf.mxu3  ;;  %v4956_v19 = vadd.f32 %v4955_v28, %v10154_v42  ;;  %v5864_v42 = vld [vmem:[#allocation12 + $0x928] sm:$0xff]  ;;  %v4773_v51 = vsel %vm495_vm1, %v4661_v1, -inf  ;;  %v5862_v25 = vld [vmem:[#allocation12 + $0x918] sm:$0xff]  ;;  %v6459_v1 = vld [vmem:[#allocation12 + $0xe00] sm:$0xff] }
 0x571   : > { %5848 = vmatpush.msra.mxu3 %v5746_v56  ;;  %5809 = vmatpush.msra.mxu1 %v5740_v17  ;;  %v10170_v20 = vadd.f32 %v4975_v63, %v4892_v33  ;;  %v6351_v33 = vld [vmem:[#allocation12 + $0xd60] sm:$0xff]  ;;  %v4771_v17 = vrot.slane %v4770_v37, 1 }
 0x572   : > { %6268 = vmatpush.msra.mxu0 %v6223_v22  ;;  %5829 = vmatpush.msra.mxu2 %v5741_v31  ;;  %v5311_v39 = vpop.f32.mrf.mxu0  ;;  %v6339_v56 = vld [vmem:[#allocation12 + $0xd00] sm:$0xff]  ;;  %v6008_v22 = vld [vmem:[#allocation12 + $0xae8] sm:$0xff]  ;;  %v4774_v31 = vrot.slane %v4773_v51, 4 }
 0x573   : > { %5849 = vmatpush.msra.mxu3 %v5742_v46  ;;  %7487 = vmatmul.msk.f32.vlgmr.msra.gmra.mxu1 %vm492_vm0, %v10099_v35  ;;  %v6010_v46 = vld [vmem:[#allocation12 + $0xaf8] sm:$0xff]  ;;  %v10202_v28 = vmax.f32 %v4770_v37, %v4771_v17  ;;  %v6603_v17 = vld [vmem:[#allocation12 + $0xfc0] sm:$0xff] }
 0x574   : > { %6269 = vmatpush.msra.mxu0 %v6219_v47  ;;  %7488 = vmatmul.msk.f32.vlgmr.msra.gmra.mxu2 %vm492_vm0, %v10099_v35  ;;  %v4995_v27 = vpop.f32.mrf.mxu1 }
 0x575   : > { %7489 = vmatmul.msk.f32.vlgmr.msra.gmra.mxu3 %vm492_vm0, %v10099_v35  ;;  %5922 = vmatpush.msrb.mxu1 %v5888_v48  ;;  %v10181_v24 = vadd.f32 %v4995_v27, %v10164_v58  ;;  %v5881_v35 = vld [vmem:[#allocation12 + $0x9b0] sm:$0xff]  ;;  %v5868_v58 = vld [vmem:[#allocation12 + $0x948] sm:$0xff]  ;;  %v6487_v48 = vld [vmem:[#allocation12 + $0xee0] sm:$0xff] }
 0x576   : > { %5942 = vmatpush.msrb.mxu2 %v5889_v15  ;;  %5962 = vmatpush.msrb.mxu3 %v5890_v9  ;;  %v6006_v15 = vld [vmem:[#allocation12 + $0xad8] sm:$0xff]  ;;  %v6000_v9 = vld [vmem:[#allocation12 + $0xaa8] sm:$0xff]  ;;  %v6479_v27 = vld [vmem:[#allocation12 + $0xea0] sm:$0xff] }
 0x577   : > { %7502 = vmatmul.msk.f32.vlgmr.msra.gmra.mxu0 %vm492_vm0, %v10178_v32  ;;  %5923 = vmatpush.msrb.mxu1 %v5884_v34  ;;  %v4775_v34 = vmax.f32 %v4773_v51, %v4774_v31  ;;  %v6126_v51 = vld [vmem:[#allocation12 + $0xbd8] sm:$0xff] }
 0x578   : > { %6382 = vmatpush.msrb.mxu0 %v6367_v50  ;;  %5943 = vmatpush.msrb.mxu2 %v5885_v44  ;;  %v6483_v50 = vld [vmem:[#allocation12 + $0xec0] sm:$0xff]  ;;  %v6002_v44 = vld [vmem:[#allocation12 + $0xab8] sm:$0xff] }
 0x579   : > { %5963 = vmatpush.msrb.mxu3 %v5886_v59  ;;  %5924 = vmatpush.msrb.mxu1 %v5880_v5  ;;  %v5997_v59 = vld [vmem:[#allocation12 + $0xa90] sm:$0xff]  ;;  %v6122_v31 = vld [vmem:[#allocation12 + $0xbb8] sm:$0xff] }
 0x57a   : > { %6383 = vmatpush.msrb.mxu0 %v6363_v55  ;;  %5944 = vmatpush.msrb.mxu2 %v5881_v35  ;;  %v5992_v55 = vld [vmem:[#allocation12 + $0xa68] sm:$0xff] }
 0x57b   : > { %5964 = vmatpush.msrb.mxu3 %v5882_v18  ;;  %5925 = vmatpush.msrb.mxu1 %v5876_v30  ;;  %v5015_v8 = vpop.f32.mrf.mxu2  ;;  %v6475_v30 = vld [vmem:[#allocation12 + $0xe80] sm:$0xff] }
 0x57c   : > { %6384 = vmatpush.msrb.mxu0 %v6359_v11  ;;  %5945 = vmatpush.msrb.mxu2 %v5877_v6  ;;  %v10187_v4 = vadd.f32 %v5015_v8, %v10166_v52  ;;  %v5071_v61 = vpop.f32.mrf.mxu3  ;;  %v5860_v52 = vld [vmem:[#allocation12 + $0x908] sm:$0xff]  ;;  %v5993_v11 = vld [vmem:[#allocation12 + $0xa70] sm:$0xff] }
 0x57d   : > { %5965 = vmatpush.msrb.mxu3 %v5878_v38  ;;  %5926 = vmatpush.msrb.mxu1 %v5872_v49  ;;  %v5134_v23 = vadd.f32 %v5071_v61, %v4956_v19  ;;  %v5994_v38 = vld [vmem:[#allocation12 + $0xa78] sm:$0xff]  ;;  %v5988_v49 = vld [vmem:[#allocation12 + $0xa48] sm:$0xff] }
 0x57e   : > { %6385 = vmatpush.msrb.mxu0 %v6355_v13  ;;  %5946 = vmatpush.msrb.mxu2 %v5873_v41  ;;  %v5989_v13 = vld [vmem:[#allocation12 + $0xa50] sm:$0xff]  ;;  %v5990_v41 = vld [vmem:[#allocation12 + $0xa58] sm:$0xff]  ;;  %v5984_v19 = vld [vmem:[#allocation12 + $0xa28] sm:$0xff] }
 0x57f   : > { %5966 = vmatpush.msrb.mxu3 %v5874_v14  ;;  %5927 = vmatpush.msrb.mxu1 %v5868_v58  ;;  %v5254_v12 = vadd.f32 %v5191_v26, %v5134_v23  ;;  %v4776_v26 = vrot.slane %v4775_v34, 2  ;;  %v6467_v14 = vld [vmem:[#allocation12 + $0xe40] sm:$0xff]  ;;  %v5985_v58 = vld [vmem:[#allocation12 + $0xa30] sm:$0xff]  ;;  %v5980_v61 = vld [vmem:[#allocation12 + $0xa08] sm:$0xff] }
 0x580   : > { %6386 = vmatpush.msrb.mxu0 %v6351_v33  ;;  %5947 = vmatpush.msrb.mxu2 %v5869_v36  ;;  %v6463_v33 = vld [vmem:[#allocation12 + $0xe20] sm:$0xff]  ;;  %v5981_v36 = vld [vmem:[#allocation12 + $0xa10] sm:$0xff] }
 0x581   : > { %5967 = vmatpush.msrb.mxu3 %v5870_v45  ;;  %5928 = vmatpush.msrb.mxu1 %v5864_v42  ;;  %v10190_v43 = vadd.f32 %v5311_v39, %v5254_v12  ;;  %v4777_v8 = vmax.f32 %v4775_v34, %v4776_v26  ;;  %v6128_v42 = vld [vmem:[#allocation12 + $0xbe8] sm:$0xff]  ;;  %v6130_v12 = vld [vmem:[#allocation12 + $0xbf8] sm:$0xff]  ;;  %v6113_v34 = vld [vmem:[#allocation12 + $0xb70] sm:$0xff] }
 0x582   : > { %6387 = vmatpush.msrb.mxu0 %v6347_v7  ;;  %5948 = vmatpush.msrb.mxu2 %v5865_v0  ;;  %v6129_v0 = vld [vmem:[#allocation12 + $0xbf0] sm:$0xff]  ;;  %v6100_v26 = vld [vmem:[#allocation12 + $0xb08] sm:$0xff] }
 0x583   : > { %5968 = vmatpush.msrb.mxu3 %v5866_v21  ;;  %5929 = vmatpush.msrb.mxu1 %v5860_v52  ;;  %v4778_v45 = vrot.slane %v4777_v8, 1  ;;  %v6124_v52 = vld [vmem:[#allocation12 + $0xbc8] sm:$0xff] }
 0x584   : > { %6388 = vmatpush.msrb.mxu0 %v6343_v2  ;;  %5949 = vmatpush.msrb.mxu2 %v5861_v57  ;;  %v6607_v2 = vld [vmem:[#allocation12 + $0xfe0] sm:$0xff]  ;;  %v6125_v57 = vld [vmem:[#allocation12 + $0xbd0] sm:$0xff] }
 0x585   : > { %5969 = vmatpush.msrb.mxu3 %v5862_v25  ;;  %7491 = vmatmul.msk.f32.vlgmr.msrb.gmra.mxu1 %vm492_vm0, %v10120_v10  ;;  %v5091_v63 = vpop.f32.mrf.mxu1  ;;  %v10223_v39 = vmax.f32 %v4777_v8, %v4778_v45  ;;  %v6120_v25 = vld [vmem:[#allocation12 + $0xba8] sm:$0xff] }
 0x586   : > { %6389 = vmatpush.msrb.mxu0 %v6339_v56  ;;  %7492 = vmatmul.msk.f32.vlgmr.msrb.gmra.mxu2 %vm492_vm0, %v10120_v10  ;;  %v10198_v47 = vadd.f32 %v5091_v63, %v10170_v20  ;;  %v6001_v20 = vld [vmem:[#allocation12 + $0xab0] sm:$0xff]  ;;  %v6244_v8 = vld [vmem:[#allocation12 + $0xcc8] sm:$0xff] }
 0x587   : > { %7493 = vmatmul.msk.f32.vlgmr.msrb.gmra.mxu3 %vm492_vm0, %v10120_v10  ;;  %6042 = vmatpush.msra.mxu1 %v6008_v22  ;;  %v5996_v10 = vld [vmem:[#allocation12 + $0xa88] sm:$0xff]  ;;  %v6121_v22 = vld [vmem:[#allocation12 + $0xbb0] sm:$0xff] }
 0x588   : > { %6062 = vmatpush.msra.mxu2 %v6009_v62  ;;  %6082 = vmatpush.msra.mxu3 %v6010_v46  ;;  %v6599_v62 = vld [vmem:[#allocation12 + $0xfa0] sm:$0xff]  ;;  %v6117_v46 = vld [vmem:[#allocation12 + $0xb90] sm:$0xff]  ;;  %v6232_v45 = vld [vmem:[#allocation12 + $0xc68] sm:$0xff] }
 0x589   : > { %7506 = vmatmul.msk.f32.vlgmr.msrb.gmra.mxu0 %vm492_vm0, %v10202_v28  ;;  %6043 = vmatpush.msra.mxu1 %v6004_v29  ;;  %v6118_v29 = vld [vmem:[#allocation12 + $0xb98] sm:$0xff] }
 0x58a   : > { %6502 = vmatpush.msra.mxu0 %v6487_v48  ;;  %6063 = vmatpush.msra.mxu2 %v6005_v3 }
 0x58b   : > { %6083 = vmatpush.msra.mxu3 %v6006_v15  ;;  %6044 = vmatpush.msra.mxu1 %v6000_v9  ;;  %v5111_v5 = vpop.f32.mrf.mxu2  ;;  %v6595_v9 = vld [vmem:[#allocation12 + $0xf80] sm:$0xff] }
 0x58c   : > { %6503 = vmatpush.msra.mxu0 %v6483_v50  ;;  %6064 = vmatpush.msra.mxu2 %v6001_v20  ;;  %v10207_v35 = vadd.f32 %v5111_v5, %v10181_v24  ;;  %v5131_v18 = vpop.f32.mrf.mxu3  ;;  %v4662_v24 = vrot.slane %v10148_v60, 6  ;;  %v5982_v60 = vld [vmem:[#allocation12 + $0xa18] sm:$0xff]  ;;  %v6104_v5 = vld [vmem:[#allocation12 + $0xb28] sm:$0xff] }
 0x58d   : > { %6084 = vmatpush.msra.mxu3 %v6002_v44  ;;  %6045 = vmatpush.msra.mxu1 %v5996_v10  ;;  %v10210_v6 = vadd.f32 %v5131_v18, %v10187_v4  ;;  %v5986_v4 = vld [vmem:[#allocation12 + $0xa38] sm:$0xff]  ;;  %v6108_v44 = vld [vmem:[#allocation12 + $0xb48] sm:$0xff]  ;;  %v6591_v10 = vld [vmem:[#allocation12 + $0xf60] sm:$0xff] }
 0x58e   : > { %6504 = vmatpush.msra.mxu0 %v6479_v27  ;;  %6065 = vmatpush.msra.mxu2 %v5997_v59  ;;  %v4780_v23 = vsel %vm495_vm1, %v4662_v24, -inf  ;;  %v6114_v20 = vld [vmem:[#allocation12 + $0xb78] sm:$0xff]  ;;  %v6109_v27 = vld [vmem:[#allocation12 + $0xb50] sm:$0xff] }
 0x58f   : > { %6085 = vmatpush.msra.mxu3 %v5998_v16  ;;  %6046 = vmatpush.msra.mxu1 %v5992_v55  ;;  %v4781_v7 = vrot.slane %v4780_v23, 4  ;;  %v6110_v59 = vld [vmem:[#allocation12 + $0xb58] sm:$0xff]  ;;  %v6587_v55 = vld [vmem:[#allocation12 + $0xf40] sm:$0xff]  ;;  %v6249_v24 = vld [vmem:[#allocation12 + $0xcf0] sm:$0xff] }
 0x590   : > { %6505 = vmatpush.msra.mxu0 %v6475_v30  ;;  %6066 = vmatpush.msra.mxu2 %v5993_v11  ;;  %v6106_v18 = vld [vmem:[#allocation12 + $0xb38] sm:$0xff]  ;;  %v6583_v30 = vld [vmem:[#allocation12 + $0xf20] sm:$0xff]  ;;  %v6101_v11 = vld [vmem:[#allocation12 + $0xb10] sm:$0xff] }
 0x591   : > { %6086 = vmatpush.msra.mxu3 %v5994_v38  ;;  %6047 = vmatpush.msra.mxu1 %v5988_v49  ;;  %v4782_v56 = vmax.f32 %v4780_v23, %v4781_v7  ;;  %v6579_v38 = vld [vmem:[#allocation12 + $0xf00] sm:$0xff]  ;;  %v6236_v23 = vld [vmem:[#allocation12 + $0xc88] sm:$0xff]  ;;  %v6233_v7 = vld [vmem:[#allocation12 + $0xc70] sm:$0xff] }
 0x592   : > { %6506 = vmatpush.msra.mxu0 %v6471_v53  ;;  %6067 = vmatpush.msra.mxu2 %v5989_v13  ;;  %v6248_v53 = vld [vmem:[#allocation12 + $0xce8] sm:$0xff] }
 0x593   : > { %6087 = vmatpush.msra.mxu3 %v5990_v41  ;;  %6048 = vmatpush.msra.mxu1 %v5984_v19  ;;  %v4783_v15 = vrot.slane %v4782_v56, 2  ;;  %v6250_v41 = vld [vmem:[#allocation12 + $0xcf8] sm:$0xff] }
 0x594   : > { %6507 = vmatpush.msra.mxu0 %v6467_v14  ;;  %6068 = vmatpush.msra.mxu2 %v5985_v58  ;;  %v6245_v58 = vld [vmem:[#allocation12 + $0xcd0] sm:$0xff] }
 0x595   : > { %6088 = vmatpush.msra.mxu3 %v5986_v4  ;;  %6049 = vmatpush.msra.mxu1 %v5980_v61  ;;  %v4784_v16 = vmax.f32 %v4782_v56, %v4783_v15  ;;  %v6246_v4 = vld [vmem:[#allocation12 + $0xcd8] sm:$0xff]  ;;  %v6240_v61 = vld [vmem:[#allocation12 + $0xca8] sm:$0xff] }
 0x596   : > { %6508 = vmatpush.msra.mxu0 %v6463_v33  ;;  %6069 = vmatpush.msra.mxu2 %v5981_v36  ;;  %v5211_v37 = vpop.f32.mrf.mxu1  ;;  %v6241_v33 = vld [vmem:[#allocation12 + $0xcb0] sm:$0xff]  ;;  %v6242_v36 = vld [vmem:[#allocation12 + $0xcb8] sm:$0xff]  ;;  %v6220_v56 = vld [vmem:[#allocation12 + $0xc08] sm:$0xff] }
 0x597   : > { %6089 = vmatpush.msra.mxu3 %v5982_v60  ;;  %7495 = vmatmul.msk.f32.vlgmr.msra.gmra.mxu1 %vm492_vm0, %v10144_v54  ;;  %v10217_v21 = vadd.f32 %v5211_v37, %v10198_v47  ;;  %v6112_v47 = vld [vmem:[#allocation12 + $0xb68] sm:$0xff]  ;;  %v4785_v49 = vrot.slane %v4784_v16, 1  ;;  %v6237_v60 = vld [vmem:[#allocation12 + $0xc90] sm:$0xff] }
 0x598   : > { %6509 = vmatpush.msra.mxu0 %v6459_v1  ;;  %7496 = vmatmul.msk.f32.vlgmr.msra.gmra.mxu2 %vm492_vm0, %v10144_v54  ;;  %v6356_v15 = vld [vmem:[#allocation12 + $0xd88] sm:$0xff] }
 0x599   : > { %7497 = vmatmul.msk.f32.vlgmr.msra.gmra.mxu3 %vm492_vm0, %v10144_v54  ;;  %6162 = vmatpush.msrb.mxu1 %v6128_v42  ;;  %v6116_v54 = vld [vmem:[#allocation12 + $0xb88] sm:$0xff]  ;;  %v10242_v14 = vmax.f32 %v4784_v16, %v4785_v49  ;;  %v6346_v16 = vld [vmem:[#allocation12 + $0xd38] sm:$0xff] }
 0x59a   : > { %6182 = vmatpush.msrb.mxu2 %v6129_v0  ;;  %6202 = vmatpush.msrb.mxu3 %v6130_v12  ;;  %v6234_v0 = vld [vmem:[#allocation12 + $0xc78] sm:$0xff] }
 0x59b   : > { %7510 = vmatmul.msk.f32.vlgmr.msra.gmra.mxu0 %vm492_vm0, %v10223_v39  ;;  %6163 = vmatpush.msrb.mxu1 %v6124_v52  ;;  %v6229_v52 = vld [vmem:[#allocation12 + $0xc50] sm:$0xff]  ;;  %v6486_v49 = vld [vmem:[#allocation12 + $0xed8] sm:$0xff] }
 0x59c   : > { %6622 = vmatpush.msrb.mxu0 %v6607_v2  ;;  %6183 = vmatpush.msrb.mxu2 %v6125_v57  ;;  %v6230_v2 = vld [vmem:[#allocation12 + $0xc58] sm:$0xff]  ;;  %v6224_v57 = vld [vmem:[#allocation12 + $0xc28] sm:$0xff] }
 0x59d   : > { %6203 = vmatpush.msrb.mxu3 %v6126_v51  ;;  %6164 = vmatpush.msrb.mxu1 %v6120_v25  ;;  %v5231_v63 = vpop.f32.mrf.mxu2  ;;  %v6225_v51 = vld [vmem:[#allocation12 + $0xc30] sm:$0xff]  ;;  %v6226_v25 = vld [vmem:[#allocation12 + $0xc38] sm:$0xff] }
 0x59e   : > { %6623 = vmatpush.msrb.mxu0 %v6603_v17  ;;  %6184 = vmatpush.msrb.mxu2 %v6121_v22  ;;  %v10228_v48 = vadd.f32 %v5231_v63, %v10207_v35  ;;  %v5251_v3 = vpop.f32.mrf.mxu3  ;;  %v6105_v35 = vld [vmem:[#allocation12 + $0xb30] sm:$0xff]  ;;  %v6222_v22 = vld [vmem:[#allocation12 + $0xc18] sm:$0xff] }
 0x59f   : > { %6204 = vmatpush.msrb.mxu3 %v6122_v31  ;;  %6165 = vmatpush.msrb.mxu1 %v6116_v54  ;;  %v10231_v50 = vadd.f32 %v5251_v3, %v10210_v6  ;;  %v6102_v6 = vld [vmem:[#allocation12 + $0xb18] sm:$0xff]  ;;  %v6221_v17 = vld [vmem:[#allocation12 + $0xc10] sm:$0xff]  ;;  %v6368_v31 = vld [vmem:[#allocation12 + $0xde8] sm:$0xff] }
 0x5a0   : > { %6624 = vmatpush.msrb.mxu0 %v6599_v62  ;;  %6185 = vmatpush.msrb.mxu2 %v6117_v46  ;;  %v6369_v54 = vld [vmem:[#allocation12 + $0xdf0] sm:$0xff]  ;;  %v6370_v62 = vld [vmem:[#allocation12 + $0xdf8] sm:$0xff]  ;;  %v6364_v46 = vld [vmem:[#allocation12 + $0xdc8] sm:$0xff] }
 0x5a1   : > { %6205 = vmatpush.msrb.mxu3 %v6118_v29  ;;  %6166 = vmatpush.msrb.mxu1 %v6112_v47  ;;  %v6365_v63 = vld [vmem:[#allocation12 + $0xdd0] sm:$0xff]  ;;  %v6366_v29 = vld [vmem:[#allocation12 + $0xdd8] sm:$0xff]  ;;  %v6360_v47 = vld [vmem:[#allocation12 + $0xda8] sm:$0xff] }
 0x5a2   : > { %6625 = vmatpush.msrb.mxu0 %v6595_v9  ;;  %6186 = vmatpush.msrb.mxu2 %v6113_v34  ;;  %v6362_v3 = vld [vmem:[#allocation12 + $0xdb8] sm:$0xff]  ;;  %v6357_v9 = vld [vmem:[#allocation12 + $0xd90] sm:$0xff] }
 0x5a3   : > { %6206 = vmatpush.msrb.mxu3 %v6114_v20  ;;  %6167 = vmatpush.msrb.mxu1 %v6108_v44  ;;  %v6358_v34 = vld [vmem:[#allocation12 + $0xd98] sm:$0xff]  ;;  %v6348_v44 = vld [vmem:[#allocation12 + $0xd48] sm:$0xff] }
 0x5a4   : > { %6626 = vmatpush.msrb.mxu0 %v6591_v10  ;;  %6187 = vmatpush.msrb.mxu2 %v6109_v27  ;;  %v6354_v20 = vld [vmem:[#allocation12 + $0xd78] sm:$0xff]  ;;  %v6349_v10 = vld [vmem:[#allocation12 + $0xd50] sm:$0xff] }
 0x5a5   : > { %6207 = vmatpush.msrb.mxu3 %v6110_v59  ;;  %6168 = vmatpush.msrb.mxu1 %v6104_v5  ;;  %v6350_v27 = vld [vmem:[#allocation12 + $0xd58] sm:$0xff]  ;;  %v6344_v59 = vld [vmem:[#allocation12 + $0xd28] sm:$0xff]  ;;  %v6345_v5 = vld [vmem:[#allocation12 + $0xd30] sm:$0xff] }
 0x5a6   : > { %6627 = vmatpush.msrb.mxu0 %v6587_v55  ;;  %6188 = vmatpush.msrb.mxu2 %v6105_v35  ;;  %v6340_v55 = vld [vmem:[#allocation12 + $0xd08] sm:$0xff]  ;;  %v6341_v35 = vld [vmem:[#allocation12 + $0xd10] sm:$0xff] }
 0x5a7   : > { %6208 = vmatpush.msrb.mxu3 %v6106_v18  ;;  %6169 = vmatpush.msrb.mxu1 %v6100_v26  ;;  %v6342_v18 = vld [vmem:[#allocation12 + $0xd18] sm:$0xff]  ;;  %v6488_v26 = vld [vmem:[#allocation12 + $0xee8] sm:$0xff] }
 0x5a8   : > { %6628 = vmatpush.msrb.mxu0 %v6583_v30  ;;  %6189 = vmatpush.msrb.mxu2 %v6101_v11  ;;  %v5331_v13 = vpop.f32.mrf.mxu1  ;;  %v6489_v30 = vld [vmem:[#allocation12 + $0xef0] sm:$0xff]  ;;  %v6490_v11 = vld [vmem:[#allocation12 + $0xef8] sm:$0xff] }
 0x5a9   : > { %6209 = vmatpush.msrb.mxu3 %v6102_v6  ;;  %7499 = vmatmul.msk.f32.vlgmr.msrb.gmra.mxu1 %vm492_vm0, %v10160_v40  ;;  %v10236_v19 = vadd.f32 %v5331_v13, %v10217_v21  ;;  %v6228_v21 = vld [vmem:[#allocation12 + $0xc48] sm:$0xff]  ;;  %v6481_v13 = vld [vmem:[#allocation12 + $0xeb0] sm:$0xff] }
 0x5aa   : > { %6629 = vmatpush.msrb.mxu0 %v6579_v38  ;;  %7500 = vmatmul.msk.f32.vlgmr.msrb.gmra.mxu2 %vm492_vm0, %v10160_v40  ;;  %v6484_v6 = vld [vmem:[#allocation12 + $0xec8] sm:$0xff]  ;;  %v6485_v38 = vld [vmem:[#allocation12 + $0xed0] sm:$0xff] }
 0x5ab   : > { %7501 = vmatmul.msk.f32.vlgmr.msrb.gmra.mxu3 %vm492_vm0, %v10160_v40  ;;  %6282 = vmatpush.msra.mxu1 %v6248_v53  ;;  %v6238_v40 = vld [vmem:[#allocation12 + $0xc98] sm:$0xff]  ;;  %v6480_v53 = vld [vmem:[#allocation12 + $0xea8] sm:$0xff] }
 0x5ac   : > { %6302 = vmatpush.msra.mxu2 %v6249_v24  ;;  %6322 = vmatpush.msra.mxu3 %v6250_v41  ;;  %v6482_v24 = vld [vmem:[#allocation12 + $0xeb8] sm:$0xff]  ;;  %v6476_v41 = vld [vmem:[#allocation12 + $0xe88] sm:$0xff] }
 0x5ad   : > { %7514 = vmatmul.msk.f32.vlgmr.msrb.gmra.mxu0 %vm492_vm0, %v10242_v14  ;;  %6283 = vmatpush.msra.mxu1 %v6244_v8  ;;  %v6477_v8 = vld [vmem:[#allocation12 + $0xe90] sm:$0xff] }
 0x5ae   : > { %6303 = vmatpush.msra.mxu2 %v6245_v58  ;;  %6323 = vmatpush.msra.mxu3 %v6246_v4  ;;  %v6478_v58 = vld [vmem:[#allocation12 + $0xe98] sm:$0xff]  ;;  %v6472_v4 = vld [vmem:[#allocation12 + $0xe68] sm:$0xff] }
 0x5af   : > { %6284 = vmatpush.msra.mxu1 %v6240_v61  ;;  %v5351_v1 = vpop.f32.mrf.mxu2  ;;  %v6474_v61 = vld [vmem:[#allocation12 + $0xe78] sm:$0xff] }
 0x5b0   : > { %6304 = vmatpush.msra.mxu2 %v6241_v33  ;;  %6324 = vmatpush.msra.mxu3 %v6242_v36  ;;  %v10247_v42 = vadd.f32 %v5351_v1, %v10228_v48  ;;  %v5371_v37 = vpop.f32.mrf.mxu3  ;;  %v6361_v48 = vld [vmem:[#allocation12 + $0xdb0] sm:$0xff]  ;;  %v6468_v33 = vld [vmem:[#allocation12 + $0xe48] sm:$0xff]  ;;  %v6466_v1 = vld [vmem:[#allocation12 + $0xe38] sm:$0xff] }
 0x5b1   : > { %6285 = vmatpush.msra.mxu1 %v6236_v23  ;;  %v10250_v12 = vadd.f32 %v5371_v37, %v10231_v50  ;;  %v6352_v50 = vld [vmem:[#allocation12 + $0xd68] sm:$0xff]  ;;  %v6469_v36 = vld [vmem:[#allocation12 + $0xe50] sm:$0xff]  ;;  %v6470_v23 = vld [vmem:[#allocation12 + $0xe58] sm:$0xff] }
 0x5b2   : > { %6305 = vmatpush.msra.mxu2 %v6237_v60  ;;  %6325 = vmatpush.msra.mxu3 %v6238_v40  ;;  %v6464_v60 = vld [vmem:[#allocation12 + $0xe28] sm:$0xff]  ;;  %v6465_v40 = vld [vmem:[#allocation12 + $0xe30] sm:$0xff] }
 0x5b3   : > { %6286 = vmatpush.msra.mxu1 %v6232_v45  ;;  %v10264_v45 = vpop.f32.mrf.mxu0  ;;  %v6460_v37 = vld [vmem:[#allocation12 + $0xe08] sm:$0xff] }
 0x5b4   : > { %6306 = vmatpush.msra.mxu2 %v6233_v7  ;;  %6326 = vmatpush.msra.mxu3 %v6234_v0  ;;  %v6461_v7 = vld [vmem:[#allocation12 + $0xe10] sm:$0xff]  ;;  %v6462_v0 = vld [vmem:[#allocation12 + $0xe18] sm:$0xff] }
 0x5b5   : > { %6287 = vmatpush.msra.mxu1 %v6228_v21  ;;  %v6608_v21 = vld [vmem:[#allocation12 + $0xfe8] sm:$0xff] }
 0x5b6   : > { %6307 = vmatpush.msra.mxu2 %v6229_v52  ;;  %6327 = vmatpush.msra.mxu3 %v6230_v2  ;;  %v6609_v52 = vld [vmem:[#allocation12 + $0xff0] sm:$0xff]  ;;  %v6610_v2 = vld [vmem:[#allocation12 + $0xff8] sm:$0xff] }
 0x5b7   : > { %6288 = vmatpush.msra.mxu1 %v6224_v57  ;;  %v6604_v57 = vld [vmem:[#allocation12 + $0xfc8] sm:$0xff] }
 0x5b8   : > { %6308 = vmatpush.msra.mxu2 %v6225_v51  ;;  %6328 = vmatpush.msra.mxu3 %v6226_v25  ;;  %v6605_v51 = vld [vmem:[#allocation12 + $0xfd0] sm:$0xff]  ;;  %v6606_v25 = vld [vmem:[#allocation12 + $0xfd8] sm:$0xff] }
 0x5b9   : > { %6289 = vmatpush.msra.mxu1 %v6220_v56  ;;  %v6600_v56 = vld [vmem:[#allocation12 + $0xfa8] sm:$0xff] }
 0x5ba   : > { %6309 = vmatpush.msra.mxu2 %v6221_v17  ;;  %6329 = vmatpush.msra.mxu3 %v6222_v22  ;;  %v6601_v17 = vld [vmem:[#allocation12 + $0xfb0] sm:$0xff]  ;;  %v6602_v22 = vld [vmem:[#allocation12 + $0xfb8] sm:$0xff] }
 0x5bb   : > { %7503 = vmatmul.msk.f32.vlgmr.msra.gmra.mxu1 %vm492_vm0, %v10178_v32  ;;  %7504 = vmatmul.msk.f32.vlgmr.msra.gmra.mxu2 %vm492_vm0, %v10178_v32 }
 0x5bc   : > { %7505 = vmatmul.msk.f32.vlgmr.msra.gmra.mxu3 %vm492_vm0, %v10178_v32  ;;  %6402 = vmatpush.msrb.mxu1 %v6368_v31  ;;  %v6353_v32 = vld [vmem:[#allocation12 + $0xd70] sm:$0xff]  ;;  %v6596_v31 = vld [vmem:[#allocation12 + $0xf88] sm:$0xff] }
 0x5bd   : > { %6422 = vmatpush.msrb.mxu2 %v6369_v54  ;;  %6442 = vmatpush.msrb.mxu3 %v6370_v62  ;;  %v10272_v54 = vpop.f32.mrf.mxu0  ;;  %v6597_v62 = vld [vmem:[#allocation12 + $0xf90] sm:$0xff] }
 0x5be   : > { %6403 = vmatpush.msrb.mxu1 %v6364_v46  ;;  %v6598_v46 = vld [vmem:[#allocation12 + $0xf98] sm:$0xff] }
 0x5bf   : > { %6423 = vmatpush.msrb.mxu2 %v6365_v63  ;;  %6443 = vmatpush.msrb.mxu3 %v6366_v29  ;;  %v6593_v63 = vld [vmem:[#allocation12 + $0xf70] sm:$0xff]  ;;  %v6594_v29 = vld [vmem:[#allocation12 + $0xf78] sm:$0xff] }
 0x5c0   : > { %6404 = vmatpush.msrb.mxu1 %v6360_v47  ;;  %v6588_v47 = vld [vmem:[#allocation12 + $0xf48] sm:$0xff] }
 0x5c1   : > { %6424 = vmatpush.msrb.mxu2 %v6361_v48  ;;  %6444 = vmatpush.msrb.mxu3 %v6362_v3  ;;  %v6589_v48 = vld [vmem:[#allocation12 + $0xf50] sm:$0xff]  ;;  %v6590_v3 = vld [vmem:[#allocation12 + $0xf58] sm:$0xff] }
 0x5c2   : > { %6405 = vmatpush.msrb.mxu1 %v6356_v15  ;;  %v6584_v15 = vld [vmem:[#allocation12 + $0xf28] sm:$0xff] }
 0x5c3   : > { %6425 = vmatpush.msrb.mxu2 %v6357_v9  ;;  %6445 = vmatpush.msrb.mxu3 %v6358_v34  ;;  %v6585_v9 = vld [vmem:[#allocation12 + $0xf30] sm:$0xff]  ;;  %v6586_v34 = vld [vmem:[#allocation12 + $0xf38] sm:$0xff] }
 0x5c4   : > { %6406 = vmatpush.msrb.mxu1 %v6352_v50  ;;  %v6580_v50 = vld [vmem:[#allocation12 + $0xf08] sm:$0xff] }
 0x5c5   : > { %6426 = vmatpush.msrb.mxu2 %v6353_v32  ;;  %6446 = vmatpush.msrb.mxu3 %v6354_v20  ;;  %v5671_v32 = vpop.f32.mrf.mxu0  ;;  %v6581_v20 = vld [vmem:[#allocation12 + $0xf10] sm:$0xff] }
 0x5c6   : > { %6407 = vmatpush.msrb.mxu1 %v6348_v44  ;;  %v6582_v44 = vld [vmem:[#allocation12 + $0xf18] sm:$0xff] }
 0x5c7   : > { %6427 = vmatpush.msrb.mxu2 %v6349_v10  ;;  %6447 = vmatpush.msrb.mxu3 %v6350_v27  ;;  %v6731_v10 = vld [vmem:[#allocation15 + $0x78] sm:$0xff]  ;;  %v6730_v27 = vld [vmem:[#allocation15 + $0x70] sm:$0xff] }
 0x5c8   : > { %6408 = vmatpush.msrb.mxu1 %v6344_v59  ;;  %6781 = vmatpush.msra.mxu0 %v6731_v10  ;;  %v6729_v59 = vld [vmem:[#allocation15 + $0x68] sm:$0xff]  ;;  %v6742_v10 = vld [vmem:[#allocation15 + $0xd0] sm:$0xff] }
 0x5c9   : > { %6428 = vmatpush.msrb.mxu2 %v6345_v5  ;;  %6448 = vmatpush.msrb.mxu3 %v6346_v16  ;;  %v6728_v5 = vld [vmem:[#allocation15 + $0x60] sm:$0xff] }
 0x5ca   : > { %6409 = vmatpush.msrb.mxu1 %v6340_v55  ;;  %6782 = vmatpush.msra.mxu0 %v6730_v27  ;;  %v6727_v55 = vld [vmem:[#allocation15 + $0x58] sm:$0xff]  ;;  %v6761_v27 = vld [vmem:[#allocation15 + $0x168] sm:$0xff] }
 0x5cb   : > { %6429 = vmatpush.msrb.mxu2 %v6341_v35  ;;  %6449 = vmatpush.msrb.mxu3 %v6342_v18  ;;  %v6726_v35 = vld [vmem:[#allocation15 + $0x50] sm:$0xff]  ;;  %v6725_v18 = vld [vmem:[#allocation15 + $0x48] sm:$0xff] }
 0x5cc   : > { %7507 = vmatmul.msk.f32.vlgmr.msrb.gmra.mxu1 %vm492_vm0, %v10202_v28  ;;  %7508 = vmatmul.msk.f32.vlgmr.msrb.gmra.mxu2 %vm492_vm0, %v10202_v28 }
 0x5cd   : > { %7509 = vmatmul.msk.f32.vlgmr.msrb.gmra.mxu3 %vm492_vm0, %v10202_v28  ;;  %6522 = vmatpush.msra.mxu1 %v6488_v26  ;;  %v6473_v28 = vld [vmem:[#allocation12 + $0xe70] sm:$0xff]  ;;  %v5791_v16 = vpop.f32.mrf.mxu0 }
 0x5ce   : > { %6542 = vmatpush.msra.mxu2 %v6489_v30  ;;  %6562 = vmatpush.msra.mxu3 %v6490_v11  ;;  %v6724_v30 = vld [vmem:[#allocation15 + $0x40] sm:$0xff]  ;;  %v6723_v11 = vld [vmem:[#allocation15 + $0x38] sm:$0xff] }
 0x5cf   : > { %6523 = vmatpush.msra.mxu1 %v6484_v6  ;;  %6783 = vmatpush.msra.mxu0 %v6729_v59  ;;  %v6722_v6 = vld [vmem:[#allocation15 + $0x30] sm:$0xff]  ;;  %v6777_v59 = vld [vmem:[#allocation15 + $0x1e8] sm:$0xff] }
 0x5d0   : > { %6543 = vmatpush.msra.mxu2 %v6485_v38  ;;  %6563 = vmatpush.msra.mxu3 %v6486_v49  ;;  %v6721_v38 = vld [vmem:[#allocation15 + $0x28] sm:$0xff] }
 0x5d1   : > { %6524 = vmatpush.msra.mxu1 %v6480_v53  ;;  %6784 = vmatpush.msra.mxu0 %v6728_v5  ;;  %v6741_v5 = vld [vmem:[#allocation15 + $0xc8] sm:$0xff] }
 0x5d2   : > { %6544 = vmatpush.msra.mxu2 %v6481_v13  ;;  %6564 = vmatpush.msra.mxu3 %v6482_v24  ;;  %v6719_v13 = vld [vmem:[#allocation15 + $0x18] sm:$0xff]  ;;  %v6718_v24 = vld [vmem:[#allocation15 + $0x10] sm:$0xff] }
 0x5d3   : > { %6525 = vmatpush.msra.mxu1 %v6476_v41  ;;  %6785 = vmatpush.msra.mxu0 %v6727_v55  ;;  %v6717_v41 = vld [vmem:[#allocation15 + $0x8] sm:$0xff]  ;;  %v6776_v55 = vld [vmem:[#allocation15 + $0x1e0] sm:$0xff] }
 0x5d4   : > { %6545 = vmatpush.msra.mxu2 %v6477_v8  ;;  %6565 = vmatpush.msra.mxu3 %v6478_v58  ;;  %v6716_v58 = vld [vmem:[#allocation15] sm:$0xff] }
 0x5d5   : > { %6526 = vmatpush.msra.mxu1 %v6472_v4  ;;  %v5911_v26 = vpop.f32.mrf.mxu0  ;;  %6786 = vmatpush.msra.mxu0 %v6726_v35  ;;  %v5494_v4 = vadd.f32 %v10264_v45, %v10190_v43  ;;  %v10291_v43 = vld [vmem:[#allocation13] sm:$0xf]  ;;  %v6740_v35 = vld [vmem:[#allocation15 + $0xc0] sm:$0xff] }
 0x5d6   : > { %6546 = vmatpush.msra.mxu2 %v6473_v28  ;;  %6566 = vmatpush.msra.mxu3 %v6474_v61 }
 0x5d7   : > { %6527 = vmatpush.msra.mxu1 %v6468_v33  ;;  %6787 = vmatpush.msra.mxu0 %v6725_v18  ;;  %v5614_v28 = vadd.f32 %v10272_v54, %v5494_v4  ;;  %v6759_v18 = vld [vmem:[#allocation15 + $0x158] sm:$0xff]  ;;  %v6736_v4 = vld [vmem:[#allocation15 + $0xa0] sm:$0xff] }
 0x5d8   : > { %6547 = vmatpush.msra.mxu2 %v6469_v36  ;;  %6567 = vmatpush.msra.mxu3 %v6470_v23  ;;  %v10283_v36 = vpop.f32.mrf.mxu1 }
 0x5d9   : > { %6528 = vmatpush.msra.mxu1 %v6464_v60  ;;  %6788 = vmatpush.msra.mxu0 %v6724_v30  ;;  %v5734_v33 = vadd.f32 %v5671_v32, %v5614_v28  ;;  %v6755_v28 = vld [vmem:[#allocation15 + $0x138] sm:$0xff] }
 0x5da   : > { %6548 = vmatpush.msra.mxu2 %v6465_v40  ;;  %6568 = vmatpush.msra.mxu3 %v6466_v1  ;;  %v10285_v40 = vpop.f32.mrf.mxu2 }
 0x5db   : > { %6529 = vmatpush.msra.mxu1 %v6460_v37  ;;  %6789 = vmatpush.msra.mxu0 %v6723_v11  ;;  %v5854_v23 = vadd.f32 %v5791_v16, %v5734_v33  ;;  %v10287_v37 = vpop.f32.mrf.mxu3  ;;  %v6760_v16 = vld [vmem:[#allocation15 + $0x160] sm:$0xff] }
 0x5dc   : > { %6549 = vmatpush.msra.mxu2 %v6461_v7  ;;  %6569 = vmatpush.msra.mxu3 %v6462_v0 }
 0x5dd   : > { %7511 = vmatmul.msk.f32.vlgmr.msra.gmra.mxu1 %vm492_vm0, %v10223_v39  ;;  %7512 = vmatmul.msk.f32.vlgmr.msra.gmra.mxu2 %vm492_vm0, %v10223_v39  ;;  %v6031_v49 = vpop.f32.mrf.mxu0  ;;  %v5974_v60 = vadd.f32 %v5911_v26, %v5854_v23  ;;  %v6775_v26 = vld [vmem:[#allocation15 + $0x1d8] sm:$0xff] }
 0x5de   : > { %7513 = vmatmul.msk.f32.vlgmr.msra.gmra.mxu3 %vm492_vm0, %v10223_v39  ;;  %6642 = vmatpush.msrb.mxu1 %v6608_v21  ;;  %v6592_v39 = vld [vmem:[#allocation12 + $0xf68] sm:$0xff] }
 0x5df   : > { %6662 = vmatpush.msrb.mxu2 %v6609_v52  ;;  %6682 = vmatpush.msrb.mxu3 %v6610_v2  ;;  %v6094_v1 = vadd.f32 %v6031_v49, %v5974_v60  ;;  %v6774_v49 = vld [vmem:[#allocation15 + $0x1d0] sm:$0xff] }
 0x5e0   : > { %6643 = vmatpush.msrb.mxu1 %v6604_v57  ;;  %6790 = vmatpush.msra.mxu0 %v6722_v6  ;;  %v10289_v0 = vpop.f32.mrf.mxu1  ;;  %v6739_v6 = vld [vmem:[#allocation15 + $0xb8] sm:$0xff] }
 0x5e1   : > { %6663 = vmatpush.msrb.mxu2 %v6605_v51  ;;  %6683 = vmatpush.msrb.mxu3 %v6606_v25  ;;  %v6700_v51 = vperm.slane %v10291_v43, 0 }
 0x5e2   : > { %6644 = vmatpush.msrb.mxu1 %v6600_v56  ;;  %6791 = vmatpush.msra.mxu0 %v6721_v38  ;;  %v10293_v2 = vpop.f32.mrf.mxu2  ;;  %v6758_v38 = vld [vmem:[#allocation15 + $0x150] sm:$0xff] }
 0x5e3   : > { %6664 = vmatpush.msrb.mxu2 %v6601_v17  ;;  %6684 = vmatpush.msrb.mxu3 %v6602_v22  ;;  %v10296_v25 = vpop.f32.mrf.mxu3 }
 0x5e4   : > { %6645 = vmatpush.msrb.mxu1 %v6596_v31 }
 0x5e5   : > { %6665 = vmatpush.msrb.mxu2 %v6597_v62  ;;  %6685 = vmatpush.msrb.mxu3 %v6598_v46  ;;  %v6151_v53 = vpop.f32.mrf.mxu0  ;;  %v6747_v46 = vld [vmem:[#allocation15 + $0xf8] sm:$0xff] }
 0x5e6   : > { %6646 = vmatpush.msrb.mxu1 %v6592_v39  ;;  %v6214_v21 = vadd.f32 %v6151_v53, %v6094_v1  ;;  %v6746_v39 = vld [vmem:[#allocation15 + $0xf0] sm:$0xff]  ;;  %v6735_v1 = vld [vmem:[#allocation15 + $0x98] sm:$0xff] }
 0x5e7   : > { %6666 = vmatpush.msrb.mxu2 %v6593_v63  ;;  %6686 = vmatpush.msrb.mxu3 %v6594_v29  ;;  %v6763_v29 = vld [vmem:[#allocation15 + $0x178] sm:$0xff]  ;;  %v6738_v53 = vld [vmem:[#allocation15 + $0xb0] sm:$0xff] }
 0x5e8   : > { %6647 = vmatpush.msrb.mxu1 %v6588_v47  ;;  %v10298_v17 = vpop.f32.mrf.mxu1  ;;  %v6779_v47 = vld [vmem:[#allocation15 + $0x1f8] sm:$0xff] }
 0x5e9   : > { %6667 = vmatpush.msrb.mxu2 %v6589_v48  ;;  %6687 = vmatpush.msrb.mxu3 %v6590_v3  ;;  %v6745_v3 = vld [vmem:[#allocation15 + $0xe8] sm:$0xff] }
 0x5ea   : > { %6648 = vmatpush.msrb.mxu1 %v6584_v15  ;;  %v10300_v62 = vpop.f32.mrf.mxu2  ;;  %v6762_v15 = vld [vmem:[#allocation15 + $0x170] sm:$0xff] }
 0x5eb   : > { %6668 = vmatpush.msrb.mxu2 %v6585_v9  ;;  %6688 = vmatpush.msrb.mxu3 %v6586_v34  ;;  %v10302_v63 = vpop.f32.mrf.mxu3  ;;  %v6778_v9 = vld [vmem:[#allocation15 + $0x1f0] sm:$0xff]  ;;  %v6744_v34 = vld [vmem:[#allocation15 + $0xe0] sm:$0xff] }
 0x5ec   : > { %6649 = vmatpush.msrb.mxu1 %v6580_v50  ;;  %v6743_v50 = vld [vmem:[#allocation15 + $0xd8] sm:$0xff] }
 0x5ed   : > { %6669 = vmatpush.msrb.mxu2 %v6581_v20  ;;  %6689 = vmatpush.msrb.mxu3 %v6582_v44 }
 0x5ee   : > { %7515 = vmatmul.msk.f32.vlgmr.msrb.gmra.mxu1 %vm492_vm0, %v10242_v14  ;;  %7516 = vmatmul.msk.f32.vlgmr.msrb.gmra.mxu2 %vm492_vm0, %v10242_v14 }
 0x5ef   : > { %7517 = vmatmul.msk.f32.vlgmr.msrb.gmra.mxu3 %vm492_vm0, %v10242_v14  ;;  %v6720_v14 = vld [vmem:[#allocation15 + $0x20] sm:$0xff]  ;;  %6801 = vmatpush.msra.mxu1 %v6747_v46  ;;  %v6751_v46 = vld [vmem:[#allocation15 + $0x118] sm:$0xff] }
 0x5f0   : > { %6792 = vmatpush.msra.mxu0 %v6720_v14  ;;  %v10304_v48 = vpop.f32.mrf.mxu1  ;;  %6821 = vmatpush.msra.mxu2 %v6763_v29 }
 0x5f1   : > { %6841 = vmatpush.msra.mxu3 %v6779_v47  ;;  %6802 = vmatpush.msra.mxu1 %v6746_v39  ;;  %v6767_v39 = vld [vmem:[#allocation15 + $0x198] sm:$0xff] }
 0x5f2   : > { %6793 = vmatpush.msra.mxu0 %v6719_v13  ;;  %6822 = vmatpush.msra.mxu2 %v6762_v15  ;;  %v6757_v13 = vld [vmem:[#allocation15 + $0x148] sm:$0xff]  ;;  %v6766_v15 = vld [vmem:[#allocation15 + $0x190] sm:$0xff] }
 0x5f3   : > { %6842 = vmatpush.msra.mxu3 %v6778_v9  ;;  %6803 = vmatpush.msra.mxu1 %v6745_v3  ;;  %v6750_v3 = vld [vmem:[#allocation15 + $0x110] sm:$0xff]  ;;  %v6749_v9 = vld [vmem:[#allocation15 + $0x108] sm:$0xff] }
 0x5f4   : > { %v6271_v8 = vpop.f32.mrf.mxu0  ;;  %6794 = vmatpush.msra.mxu0 %v6718_v24  ;;  %6823 = vmatpush.msra.mxu2 %v6761_v27  ;;  %v6773_v24 = vld [vmem:[#allocation15 + $0x1c8] sm:$0xff]  ;;  %v5495_v27 = vadd.f32 %v10283_v36, %v10236_v19 }
 0x5f5   : > { %v6334_v52 = vadd.f32 %v6271_v8, %v6214_v21  ;;  %6804 = vmatpush.msra.mxu1 %v6744_v34  ;;  %6843 = vmatpush.msra.mxu3 %v6777_v59  ;;  %v6756_v8 = vld [vmem:[#allocation15 + $0x140] sm:$0xff]  ;;  %v6770_v21 = vld [vmem:[#allocation15 + $0x1b0] sm:$0xff]  ;;  %v6765_v34 = vld [vmem:[#allocation15 + $0x188] sm:$0xff] }
 0x5f6   : > { %6795 = vmatpush.msra.mxu0 %v6717_v41  ;;  %6824 = vmatpush.msra.mxu2 %v6760_v16  ;;  %v6737_v41 = vld [vmem:[#allocation15 + $0xa8] sm:$0xff] }
 0x5f7   : > { %v10306_v32 = vpop.f32.mrf.mxu2  ;;  %6805 = vmatpush.msra.mxu1 %v6743_v50  ;;  %6844 = vmatpush.msra.mxu3 %v6776_v55  ;;  %v6748_v50 = vld [vmem:[#allocation15 + $0x100] sm:$0xff] }
 0x5f8   : > { %6796 = vmatpush.msra.mxu0 %v6716_v58  ;;  %v10308_v20 = vpop.f32.mrf.mxu3  ;;  %6825 = vmatpush.msra.mxu2 %v6759_v18  ;;  %v6772_v58 = vld [vmem:[#allocation15 + $0x1c0] sm:$0xff]  ;;  %v5496_v18 = vadd.f32 %v10285_v40, %v10247_v42 }
 0x5f9   : > { %6806 = vmatpush.msra.mxu1 %v6742_v10  ;;  %6845 = vmatpush.msra.mxu3 %v6775_v26  ;;  %v6764_v10 = vld [vmem:[#allocation15 + $0x180] sm:$0xff] }
 0x5fa   : > { %6826 = vmatpush.msra.mxu2 %v6758_v38  ;;  %v5616_v38 = vadd.f32 %v10293_v2, %v5496_v18 }
 0x5fb   : > { %6807 = vmatpush.msra.mxu1 %v6741_v5  ;;  %6846 = vmatpush.msra.mxu3 %v6774_v49  ;;  %v5615_v5 = vadd.f32 %v10289_v0, %v5495_v27 }
 0x5fc   : > { %6827 = vmatpush.msra.mxu2 %v6757_v13  ;;  %v5736_v0 = vadd.f32 %v10300_v62, %v5616_v38 }
 0x5fd   : > { %6808 = vmatpush.msra.mxu1 %v6740_v35  ;;  %6847 = vmatpush.msra.mxu3 %v6773_v24  ;;  %v5735_v35 = vadd.f32 %v10298_v17, %v5615_v5 }
 0x5fe   : > { %6828 = vmatpush.msra.mxu2 %v6756_v8  ;;  %v5856_v40 = vadd.f32 %v10306_v32, %v5736_v0 }
 0x5ff   : > { %6809 = vmatpush.msra.mxu1 %v6739_v6  ;;  %6848 = vmatpush.msra.mxu3 %v6772_v58  ;;  %v5855_v26 = vadd.f32 %v10304_v48, %v5735_v35  ;;  %v5497_v6 = vadd.f32 %v10287_v37, %v10250_v12  ;;  %v6701_v58 = vperm.slane %v10291_v43, 1 }
 0x600   : > { %6829 = vmatpush.msra.mxu2 %v6755_v28 }
 0x601   : > { %6810 = vmatpush.msra.mxu1 %v6738_v53  ;;  %v5617_v36 = vadd.f32 %v10296_v25, %v5497_v6 }
 0x602   : > { %v10310_v44 = vpop.f32.mrf.mxu1 }
 0x603   : > { %6811 = vmatpush.msra.mxu1 %v6737_v41  ;;  %v5975_v19 = vadd.f32 %v10310_v44, %v5855_v26  ;;  %v5737_v13 = vadd.f32 %v10302_v63, %v5617_v36 }
 0x605   : > { %6812 = vmatpush.msra.mxu1 %v6736_v4  ;;  %v5857_v12 = vadd.f32 %v10308_v20, %v5737_v13 }
 0x606   : > { %v6391_v61 = vpop.f32.mrf.mxu0 }
 0x607   : > { %v6454_v45 = vadd.f32 %v6391_v61, %v6334_v52  ;;  %v6771_v61 = vld [vmem:[#allocation15 + $0x1b8] sm:$0xff]  ;;  %6813 = vmatpush.msra.mxu1 %v6735_v1  ;;  %v6734_v52 = vld [vmem:[#allocation15 + $0x90] sm:$0xff] }
 0x608   : > { %6849 = vmatpush.msra.mxu3 %v6771_v61 }
 0x609   : > { %v10312_v30 = vpop.f32.mrf.mxu2  ;;  %6814 = vmatpush.msra.mxu1 %v6734_v52  ;;  %v6703_v52 = vperm.slane %v10291_v43, 3 }
 0x60a   : > { %v10314_v11 = vpop.f32.mrf.mxu3  ;;  %6850 = vmatpush.msra.mxu3 %v6770_v21  ;;  %v5976_v37 = vadd.f32 %v10312_v30, %v5856_v40 }
 0x60b   : > { %v5977_v44 = vadd.f32 %v10314_v11, %v5857_v12 }
 0x614   : > { %v10316_v14 = vpop.f32.mrf.mxu1 }
 0x615   : > { %v6095_v53 = vadd.f32 %v10316_v14, %v5975_v19 }
 0x618   : > { %v6511_v7 = vpop.f32.mrf.mxu0 }
 0x619   : > { %v6574_v57 = vadd.f32 %v6511_v7, %v6454_v45  ;;  %v6754_v7 = vld [vmem:[#allocation15 + $0x130] sm:$0xff]  ;;  %v6753_v45 = vld [vmem:[#allocation15 + $0x128] sm:$0xff] }
 0x61a   : > { %6830 = vmatpush.msra.mxu2 %v6754_v7 }
 0x61b   : > { %v10318_v33 = vpop.f32.mrf.mxu2 }
 0x61c   : > { %v10320_v23 = vpop.f32.mrf.mxu3  ;;  %6831 = vmatpush.msra.mxu2 %v6753_v45  ;;  %v6096_v25 = vadd.f32 %v10318_v33, %v5976_v37  ;;  %v6702_v33 = vperm.slane %v10291_v43, 2 }
 0x61d   : > { %v6097_v62 = vadd.f32 %v10320_v23, %v5977_v44 }
 0x626   : > { %v6171_v60 = vpop.f32.mrf.mxu1 }
 0x627   : > { %v6215_v48 = vadd.f32 %v6171_v60, %v6095_v53 }
 0x62a   : > { %v6631_v56 = vpop.f32.mrf.mxu0 }
 0x62b   : > { %v6694_v22 = vadd.f32 %v6631_v56, %v6574_v57  ;;  %v6769_v57 = vld [vmem:[#allocation15 + $0x1a8] sm:$0xff]  ;;  %v6752_v56 = vld [vmem:[#allocation15 + $0x120] sm:$0xff] }
 0x62c   : > { %6851 = vmatpush.msra.mxu3 %v6769_v57  ;;  %6832 = vmatpush.msra.mxu2 %v6752_v56 }
 0x62d   : > { %v6708_v31 = vadd.f32 %v6700_v51, %v6694_v22  ;;  %v6733_v51 = vld [vmem:[#allocation15 + $0x88] sm:$0xff]  ;;  %v6768_v22 = vld [vmem:[#allocation15 + $0x1a0] sm:$0xff] }
 0x62e   : > { %6815 = vmatpush.msra.mxu1 %v6733_v51  ;;  %6852 = vmatpush.msra.mxu3 %v6768_v22  ;;  %v6211_v29 = vpop.f32.mrf.mxu3 }
 0x62f   : > { %v6712_v54 = vmax.f32 %v6708_v31, 0.0  ;;  %v6191_v31 = vpop.f32.mrf.mxu2  ;;  %6833 = vmatpush.msra.mxu2 %v6751_v46  ;;  %v6217_v32 = vadd.f32 %v6211_v29, %v6097_v62  ;;  %v6780_v46 = vld [vmem:[#allocation16] sm:$0x1] }
 0x630   : > { %6853 = vmatpush.msra.mxu3 %v6767_v39  ;;  %v6216_v41 = vadd.f32 %v6191_v31, %v6096_v25 }
 0x631   : > { %6797 = vmatmul.f32.vlgmr.msra.gmra.mxu0 %v6712_v54  ;;  %v6732_v54 = vld [vmem:[#allocation15 + $0x80] sm:$0xff]  ;;  %6834 = vmatpush.msra.mxu2 %v6750_v3 }
 0x632   : > { %6816 = vmatpush.msra.mxu1 %v6732_v54  ;;  %6854 = vmatpush.msra.mxu3 %v6766_v15 }
 0x633   : > { %6835 = vmatpush.msra.mxu2 %v6749_v9 }
 0x634   : > { %6855 = vmatpush.msra.mxu3 %v6765_v34 }
 0x635   : > { %6836 = vmatpush.msra.mxu2 %v6748_v50 }
 0x636   : > { %6856 = vmatpush.msra.mxu3 %v6764_v10 }
 0x638   : > { %v6291_v47 = vpop.f32.mrf.mxu1 }
 0x639   : > { %v6335_v2 = vadd.f32 %v6291_v47, %v6215_v48 }
 0x63e   : > { %v6311_v59 = vpop.f32.mrf.mxu2 }
 0x63f   : > { %v6331_v16 = vpop.f32.mrf.mxu3  ;;  %v6336_v28 = vadd.f32 %v6311_v59, %v6216_v41 }
 0x640   : > { %v6337_v61 = vadd.f32 %v6331_v16, %v6217_v32 }
 0x649   : > { %v6411_v55 = vpop.f32.mrf.mxu1 }
 0x64a   : > { %v6455_v24 = vadd.f32 %v6411_v55, %v6335_v2 }
 0x64f   : > { %v6431_v49 = vpop.f32.mrf.mxu2 }
 0x650   : > { %v6451_v17 = vpop.f32.mrf.mxu3  ;;  %v6456_v30 = vadd.f32 %v6431_v49, %v6336_v28 }
 0x651   : > { %v6457_v1 = vadd.f32 %v6451_v17, %v6337_v61 }
 0x65a   : > { %v6531_v42 = vpop.f32.mrf.mxu1 }
 0x65b   : > { %v6575_v8 = vadd.f32 %v6531_v42, %v6455_v24 }
 0x660   : > { %v6551_v14 = vpop.f32.mrf.mxu2 }
 0x661   : > { %v6571_v63 = vpop.f32.mrf.mxu3  ;;  %v6576_v11 = vadd.f32 %v6551_v14, %v6456_v30 }
 0x662   : > { %v6577_v21 = vadd.f32 %v6571_v63, %v6457_v1 }
 0x66b   : > { %v6651_v4 = vpop.f32.mrf.mxu1 }
 0x66c   : > { %v6695_v20 = vadd.f32 %v6651_v4, %v6575_v8 }
 0x66e   : > { %v6709_v60 = vadd.f32 %v6701_v58, %v6695_v20 }
 0x670   : > { %v6713_v7 = vmax.f32 %v6709_v60, 0.0 }
 0x671   : > { %v6671_v23 = vpop.f32.mrf.mxu2 }
 0x672   : > { %v6696_v45 = vadd.f32 %v6671_v23, %v6576_v11  ;;  %v6691_v57 = vpop.f32.mrf.mxu3  ;;  %6817 = vmatmul.f32.vlgmr.msra.gmra.mxu1 %v6713_v7 }
 0x673   : > { %v6697_v51 = vadd.f32 %v6691_v57, %v6577_v21 }
 0x674   : > { %v6710_v56 = vadd.f32 %v6702_v33, %v6696_v45 }
 0x675   : > { %v6711_v22 = vadd.f32 %v6703_v52, %v6697_v51 }
 0x676   : > { %v6714_v31 = vmax.f32 %v6710_v56, 0.0 }
 0x677   : > { %v6715_v54 = vmax.f32 %v6711_v22, 0.0 }
 0x678   : > { %6837 = vmatmul.f32.vlgmr.msra.gmra.mxu2 %v6714_v31 }
 0x679   : > { %6857 = vmatmul.f32.vlgmr.msra.gmra.mxu3 %v6715_v54 }
 0x6ae   : > { %v6798_v39 = vpop.f32.mrf.mxu0 }
 0x6af   : > { %v6799_v47 = vadd.f32 %v6798_v39, %v6780_v46 }
 0x6ef   : > { %v6818_v29 = vpop.f32.mrf.mxu1 }
 0x6f0   : > { %v6819_v43 = vadd.f32 %v6818_v29, %v6799_v47 }
 0x6fb   : > { %v6838_v3 = vpop.f32.mrf.mxu2 }
 0x6fc   : > { %v6839_v15 = vadd.f32 %v6838_v3, %v6819_v43  ;;  %v6858_v9 = vpop.f32.mrf.mxu3 }
 0x6fe   : > { %v6859_v34 = vadd.f32 %v6858_v9, %v6839_v15 }
 0x700   : > { %6861 = vst [vmem:[%s459_s4] sm:$0x1] %v6859_v34 }
 0x701   : > { %7920 = shalt.err (!%p7917_p9)
}
 0x702   : > { %7551 = dma.vmem_to_hbm [thread:$0]  (%p8141_p13), %s6874_s2, 16, %s6876_s17, %s6863_s27  }
 0x703 PF: > { %s6887_s25 = sand.u32 1, %s7963_s30   ;;  %p10496_p10 = scmp.ge.s32.totalorder %s7975_s12, 2 }
 0x704   : > { %s6888_s29 = scalar_lea.sflag [#allocation6], %s6887_s25 }
 0x705   : > { %p7580_p11 = pnand %p10496_p10, %p8146_p5 }
 0x707   : > { %p7581_p0 = pneg %p7580_p11 }
 0x709   : > { %7958 = dma.done.wait (%p7581_p0), %s6888_s29, 16  }
 0x70a   : > { %7960 = vsyncadd (%p7581_p0), %s6888_s29, 4294967280  ;;  %p26_p2 = scmp.ge.s32.totalorder %s8121_s13, 4   ;;  %s10497_s30 = smov %s7967_s10 }
 0x70b   : > { %s10498_s10 = smov %s7971_s11  ;;  %s10499_s11 = smov %s8133_s18 }
 0x70c   : > { %s10500_s12 = smov %s8121_s13  ;;  %28 = sbr.rel (!%p26_p2) target bundleno = 13 (0xd), region = 164 }
 0x711   :  { %6893 = vsyncpa [#allocation5], 1 }
 0x712   :  { %6895 = vsyncpa [#allocation5 + $0x1], 1 }
 0x713   :  { %6896 = vsyncpa [#allocation8], 1 }
 0x714   :  { %6897 = vsyncpa [#allocation11], 1 }
 0x715   :  { %6898 = vsyncpa [#allocation14], 1 }
 0x716   :  { %6899 = vsyncpa [#allocation17], 1 }
 0x717   :  { %6900 = vsyncpa [#allocation6], 1 }
 0x718   :  { %6902 = vsyncpa [#allocation6 + $0x1], 1 }

</bundles_post_ra>
